<compile_context>
chip_gen: v7x
topology: tpu7x:2x2x1
jax: 0.10.0
libtpu: 0.0.40
codegen_flags: <defaults>
</compile_context>

<pallas_src>
import jax
import jax.numpy as jnp
from jax.experimental import pallas as pl
from jax.experimental.pallas import tpu as pltpu


def autoencoder_kernel(x_ref, w1_ref, b1_ref, wmid_ref, bmid_ref,
                       w4_ref, b4_ref, out_ref):
    """relu(x@W1+b1) -> relu(.@Wmid+bmid) -> .@W4+b4  (bf16 MXU, f32 accum).

    x arrives as f32 and is cast to bf16 in-kernel (single HBM read of x).
    """
    x = x_ref[...].astype(jnp.bfloat16)                               # [TB, Din]
    h1 = jnp.dot(x, w1_ref[...], preferred_element_type=jnp.float32)  # [TB, Hh]
    h1 = jnp.maximum(h1 + b1_ref[...], 0.0)
    h2 = jnp.dot(h1.astype(jnp.bfloat16), wmid_ref[...],
                 preferred_element_type=jnp.float32)                  # [TB, Hh]
    h2 = jnp.maximum(h2 + bmid_ref[...], 0.0)
    y = jnp.dot(h2.astype(jnp.bfloat16), w4_ref[...],
                preferred_element_type=jnp.float32)                   # [TB, Dout]
    out_ref[...] = (y + b4_ref[...]).astype(out_ref.dtype)


def prepare_params(params):
    """One-time weight preparation (hoisted out of the forward pass).

    Folds Linear(Hh, L) . Linear(L, Hh) — no nonlinearity between them — into a
    single [Hh, Hh] matrix, and casts MXU operands to bf16. Call once at init /
    after each weight update, NOT per forward call.
    """
    w1, b1, w2, b2, w3, b3, w4, b4 = params
    wmid = jnp.dot(w2, w3)                       # [Hh, Hh]
    bmid = jnp.dot(b2, w3) + b3                  # [1, Hh]
    return (w1.astype(jnp.bfloat16), b1,
            wmid.astype(jnp.bfloat16), bmid,
            w4.astype(jnp.bfloat16), b4)


def _batch_tile(B):
    """Pick the per-grid-step batch tile.

    - B < 8: one block equal to the full batch (no padding needed).
    - mid-size: ~half the batch, sublane-aligned, so the parallel grid has at
      least 2 steps and both v7x TensorCores are used.
    - large: 256 rows/step to amortize per-step overhead (capped for VMEM).
    """
    if B < 8:
        return B
    if B >= 512:
        return 256
    half = -(-B // 2)
    return max(8, min(256, ((half + 7) // 8) * 8))


def _build_call(B, TB, Din, Hh, Dout, weight_mode):
    def wspec(shape):
        # Constant over the batch grid: fetched once.
        return pl.BlockSpec(shape, lambda i: (0,) * len(shape),
                            pipeline_mode=weight_mode)

    in_specs = [
        pl.BlockSpec((TB, Din), lambda i: (i, 0)),   # x (f32): tiled over batch
        wspec((Din, Hh)), wspec((1, Hh)),            # W1 (bf16), b1 (f32)
        wspec((Hh, Hh)), wspec((1, Hh)),             # Wmid (bf16), bmid (f32)
        wspec((Hh, Dout)), wspec((1, Dout)),         # W4 (bf16), b4 (f32)
    ]
    out_specs = pl.BlockSpec((TB, Dout), lambda i: (i, 0))

    flops = 2 * B * (Din * Hh + Hh * Hh + Hh * Dout)
    bytes_accessed = (B * Din * 4 + B * Dout * 4                 # activations
                      + (Din * Hh + Hh * Hh + Hh * Dout) * 2     # bf16 weights
                      + (2 * Hh + Dout) * 4)                     # f32 biases

    return pl.pallas_call(
        autoencoder_kernel,
        out_shape=jax.ShapeDtypeStruct((B, Dout), jnp.float32),
        grid=(pl.cdiv(B, TB),),
        in_specs=in_specs,
        out_specs=out_specs,
        compiler_params=pltpu.CompilerParams(
            dimension_semantics=("parallel",),
            vmem_limit_bytes=48 * 1024 * 1024),
        cost_estimate=pl.CostEstimate(
            flops=flops, transcendentals=0, bytes_accessed=bytes_accessed),
    )


def conv_autoencoder_forward(x_nchw, prepared):
    """x_nchw: [B, C, H, W] float32 -> reconstruction [B, 1, 128, 32] float32.

    `prepared` comes from prepare_params(params) (weights already folded / bf16).
    """
    w1b, b1, wmidb, bmid, w4b, b4 = prepared
    B = x_nchw.shape[0]
    Din, Hh = w1b.shape
    Dout = w4b.shape[1]

    # Flatten NCHW row-major (matches torch .view(B, -1)); stays f32 — the bf16
    # cast happens inside the kernel. No pad / slice round trips.
    x_flat = x_nchw.reshape(B, -1)
    TB = _batch_tile(B)
    args = (x_flat, w1b, b1, wmidb, bmid, w4b, b4)

    try:
        # Single-buffer the constant weight/bias blocks (saves ~4.3 MiB VMEM).
        y = _build_call(B, TB, Din, Hh, Dout, pl.Buffered(1))(*args)
    except Exception:
        # TODO(synk): pipeline_mode=pl.Buffered(1) unsupported on this jax/Mosaic
        # version — fall back to default double-buffered weight blocks.
        y = _build_call(B, TB, Din, Hh, Dout, None)(*args)

    # Mirrors the reference decoder's final `x.view(x.size(0), 1, 128, 32)`.
    return y.reshape(B, 1, 128, 32)


def init_params(key, in_features, hidden, latent):
    """PyTorch nn.Linear-style init: U(-1/sqrt(fan_in), 1/sqrt(fan_in)) for W and b.
    Weights stored as [in, out] so the kernel computes y = x @ W + b."""
    def linear(k, fan_in, fan_out):
        kw, kb = jax.random.split(k)
        s = 1.0 / jnp.sqrt(fan_in)
        w = jax.random.uniform(kw, (fan_in, fan_out), jnp.float32, -s, s)
        b = jax.random.uniform(kb, (1, fan_out), jnp.float32, -s, s)
        return w, b

    k1, k2, k3, k4 = jax.random.split(key, 4)
    w1, b1 = linear(k1, in_features, hidden)    # encoder layer 1
    w2, b2 = linear(k2, hidden, latent)         # encoder layer 2 -> latent
    w3, b3 = linear(k3, latent, hidden)         # decoder layer 1
    w4, b4 = linear(k4, hidden, in_features)    # decoder layer 2 -> image
    return (w1, b1, w2, b2, w3, b3, w4, b4)


if __name__ == "__main__":
    # Shapes implied by the module: the decoder reconstructs (B, 1, 128, 32),
    # so the autoencoder input is a (B, 1, 128, 32) image; latent = lantentSpaceSize.
    B, C, H, W = 2, 1, 128, 32
    hidden = 256
    latent = 32          # lantentSpaceSize

    key = jax.random.PRNGKey(0)
    kx, kp = jax.random.split(key)
    x = jax.random.normal(kx, (B, C, H, W), jnp.float32)
    params = init_params(kp, C * H * W, hidden, latent)

    # Hoisted weight preparation: done once, reused across forward calls.
    prepared = prepare_params(params)

    recon = conv_autoencoder_forward(x, prepared)
    jax.block_until_ready(recon)
    assert recon.shape == (B, 1, 128, 32)

    # (a) Ground truth: f32, unfused, unfolded math of the stand-in autoencoder.
    w1, b1, w2, b2, w3, b3, w4, b4 = params
    xf = x.reshape(B, -1)
    h1 = jnp.maximum(xf @ w1 + b1, 0.0)
    z = h1 @ w2 + b2                              # latent bottleneck
    h2 = jnp.maximum(z @ w3 + b3, 0.0)
    ref32 = (h2 @ w4 + b4).reshape(B, 1, 128, 32)
    err32 = float(jnp.max(jnp.abs(recon - ref32)))
    assert jnp.allclose(recon, ref32, atol=5e-2, rtol=5e-2), err32

    # (b) Parity: identical folded/bf16 math computed with plain XLA dots.
    w1b, b1p, wmidb, bmidp, w4b, b4p = prepared
    xb = xf.astype(jnp.bfloat16)
    r1 = jnp.maximum(jnp.dot(xb, w1b, preferred_element_type=jnp.float32) + b1p, 0.0)
    r2 = jnp.maximum(jnp.dot(r1.astype(jnp.bfloat16), wmidb,
                             preferred_element_type=jnp.float32) + bmidp, 0.0)
    refbf = (jnp.dot(r2.astype(jnp.bfloat16), w4b,
                     preferred_element_type=jnp.float32) + b4p).reshape(B, 1, 128, 32)
    errbf = float(jnp.max(jnp.abs(recon - refbf)))
    assert jnp.allclose(recon, refbf, atol=1e-2, rtol=1e-2), errbf

    print("KERNEL_OK")
</pallas_src>

<mosaic_0001>
module attributes {stable_mosaic.version = 11 : i64} {
  func.func @autoencoder_kernel(%arg0: i32, %arg1: memref<2x4096xf32, #tpu.memory_space<vmem>>, %arg2: memref<4096x256xbf16, #tpu.memory_space<vmem>>, %arg3: memref<1x256xf32, #tpu.memory_space<vmem>>, %arg4: memref<256x256xbf16, #tpu.memory_space<vmem>>, %arg5: memref<1x256xf32, #tpu.memory_space<vmem>>, %arg6: memref<256x4096xbf16, #tpu.memory_space<vmem>>, %arg7: memref<1x4096xf32, #tpu.memory_space<vmem>>, %arg8: memref<2x4096xf32, #tpu.memory_space<vmem>>) attributes {dimension_semantics = [#tpu.dimension_semantics<parallel>], iteration_bounds = array<i64: 1>, scalar_prefetch = 0 : i64, scratch_operands = 0 : i64, tpu.core_type = #tpu.core_type<tc>, window_params = [{transform_indices = @transform_0, window_bounds = array<i64: 2, 4096>}, {pipeline_mode = #tpu.pipeline_mode<synchronous>, transform_indices = @transform_1, window_bounds = array<i64: 4096, 256>}, {pipeline_mode = #tpu.pipeline_mode<synchronous>, transform_indices = @transform_2, window_bounds = array<i64: 1, 256>}, {pipeline_mode = #tpu.pipeline_mode<synchronous>, transform_indices = @transform_3, window_bounds = array<i64: 256, 256>}, {pipeline_mode = #tpu.pipeline_mode<synchronous>, transform_indices = @transform_4, window_bounds = array<i64: 1, 256>}, {pipeline_mode = #tpu.pipeline_mode<synchronous>, transform_indices = @transform_5, window_bounds = array<i64: 256, 4096>}, {pipeline_mode = #tpu.pipeline_mode<synchronous>, transform_indices = @transform_6, window_bounds = array<i64: 1, 4096>}, {transform_indices = @transform_7, window_bounds = array<i64: 2, 4096>}]} {
    %c0 = arith.constant 0 : index
    %c0_0 = arith.constant 0 : index
    %0 = vector.load %arg1[%c0, %c0_0] : memref<2x4096xf32, #tpu.memory_space<vmem>>, vector<2x4096xf32>
    %1 = arith.truncf %0 : vector<2x4096xf32> to vector<2x4096xbf16>
    %c0_1 = arith.constant 0 : index
    %c0_2 = arith.constant 0 : index
    %2 = vector.load %arg2[%c0_1, %c0_2] : memref<4096x256xbf16, #tpu.memory_space<vmem>>, vector<4096x256xbf16>
    %cst = arith.constant dense<0.000000e+00> : vector<2x256xf32>
    %3 = tpu.matmul %1, %2, %cst {dimension_numbers = #tpu.dot_dimension_numbers<[1], [0], [0], [1], [0, 0, 1, 1], [], []>} : vector<2x4096xbf16>, vector<4096x256xbf16>, vector<2x256xf32> -> vector<2x256xf32>
    %c0_3 = arith.constant 0 : index
    %c0_4 = arith.constant 0 : index
    %4 = vector.load %arg3[%c0_3, %c0_4] : memref<1x256xf32, #tpu.memory_space<vmem>>, vector<1x256xf32>
    %5 = vector.broadcast %4 : vector<1x256xf32> to vector<2x256xf32>
    %6 = arith.addf %3, %5 : vector<2x256xf32>
    %cst_5 = arith.constant 0.000000e+00 : f32
    %7 = vector.broadcast %cst_5 : f32 to vector<2x256xf32>
    %8 = arith.maximumf %6, %7 : vector<2x256xf32>
    %9 = arith.truncf %8 : vector<2x256xf32> to vector<2x256xbf16>
    %c0_6 = arith.constant 0 : index
    %c0_7 = arith.constant 0 : index
    %10 = vector.load %arg4[%c0_6, %c0_7] : memref<256x256xbf16, #tpu.memory_space<vmem>>, vector<256x256xbf16>
    %cst_8 = arith.constant dense<0.000000e+00> : vector<2x256xf32>
    %11 = tpu.matmul %9, %10, %cst_8 {dimension_numbers = #tpu.dot_dimension_numbers<[1], [0], [0], [1], [0, 0, 1, 1], [], []>} : vector<2x256xbf16>, vector<256x256xbf16>, vector<2x256xf32> -> vector<2x256xf32>
    %c0_9 = arith.constant 0 : index
    %c0_10 = arith.constant 0 : index
    %12 = vector.load %arg5[%c0_9, %c0_10] : memref<1x256xf32, #tpu.memory_space<vmem>>, vector<1x256xf32>
    %13 = vector.broadcast %12 : vector<1x256xf32> to vector<2x256xf32>
    %14 = arith.addf %11, %13 : vector<2x256xf32>
    %cst_11 = arith.constant 0.000000e+00 : f32
    %15 = vector.broadcast %cst_11 : f32 to vector<2x256xf32>
    %16 = arith.maximumf %14, %15 : vector<2x256xf32>
    %17 = arith.truncf %16 : vector<2x256xf32> to vector<2x256xbf16>
    %c0_12 = arith.constant 0 : index
    %c0_13 = arith.constant 0 : index
    %18 = vector.load %arg6[%c0_12, %c0_13] : memref<256x4096xbf16, #tpu.memory_space<vmem>>, vector<256x4096xbf16>
    %cst_14 = arith.constant dense<0.000000e+00> : vector<2x4096xf32>
    %19 = tpu.matmul %17, %18, %cst_14 {dimension_numbers = #tpu.dot_dimension_numbers<[1], [0], [0], [1], [0, 0, 1, 1], [], []>} : vector<2x256xbf16>, vector<256x4096xbf16>, vector<2x4096xf32> -> vector<2x4096xf32>
    %c0_15 = arith.constant 0 : index
    %c0_16 = arith.constant 0 : index
    %20 = vector.load %arg7[%c0_15, %c0_16] : memref<1x4096xf32, #tpu.memory_space<vmem>>, vector<1x4096xf32>
    %21 = vector.broadcast %20 : vector<1x4096xf32> to vector<2x4096xf32>
    %22 = arith.addf %19, %21 : vector<2x4096xf32>
    %c0_17 = arith.constant 0 : index
    %c0_18 = arith.constant 0 : index
    %23 = vector.load %arg8[%c0_17, %c0_18] : memref<2x4096xf32, #tpu.memory_space<vmem>>, vector<2x4096xf32>
    tpu.vector_store %arg8[%c0_17, %c0_18], %22 {strides = array<i32>} : memref<2x4096xf32, #tpu.memory_space<vmem>>, vector<2x4096xf32>,
    return
  }
  func.func @transform_0(%arg0: i32) -> (i32, i32) {
    %c0_i32 = arith.constant 0 : i32
    %c0_i32_0 = arith.constant 0 : i32
    return %arg0, %c0_i32 : i32, i32
  }
  func.func @transform_1(%arg0: i32) -> (i32, i32) {
    %c0_i32 = arith.constant 0 : i32
    %c0_i32_0 = arith.constant 0 : i32
    %c0_i32_1 = arith.constant 0 : i32
    return %c0_i32, %c0_i32_0 : i32, i32
  }
  func.func @transform_2(%arg0: i32) -> (i32, i32) {
    %c0_i32 = arith.constant 0 : i32
    %c0_i32_0 = arith.constant 0 : i32
    %c0_i32_1 = arith.constant 0 : i32
    return %c0_i32, %c0_i32_0 : i32, i32
  }
  func.func @transform_3(%arg0: i32) -> (i32, i32) {
    %c0_i32 = arith.constant 0 : i32
    %c0_i32_0 = arith.constant 0 : i32
    %c0_i32_1 = arith.constant 0 : i32
    return %c0_i32, %c0_i32_0 : i32, i32
  }
  func.func @transform_4(%arg0: i32) -> (i32, i32) {
    %c0_i32 = arith.constant 0 : i32
    %c0_i32_0 = arith.constant 0 : i32
    %c0_i32_1 = arith.constant 0 : i32
    return %c0_i32, %c0_i32_0 : i32, i32
  }
  func.func @transform_5(%arg0: i32) -> (i32, i32) {
    %c0_i32 = arith.constant 0 : i32
    %c0_i32_0 = arith.constant 0 : i32
    %c0_i32_1 = arith.constant 0 : i32
    return %c0_i32, %c0_i32_0 : i32, i32
  }
  func.func @transform_6(%arg0: i32) -> (i32, i32) {
    %c0_i32 = arith.constant 0 : i32
    %c0_i32_0 = arith.constant 0 : i32
    %c0_i32_1 = arith.constant 0 : i32
    return %c0_i32, %c0_i32_0 : i32, i32
  }
  func.func @transform_7(%arg0: i32) -> (i32, i32) {
    %c0_i32 = arith.constant 0 : i32
    %c0_i32_0 = arith.constant 0 : i32
    return %arg0, %c0_i32 : i32, i32
  }
}

module attributes {stable_mosaic.version = 11 : i64} {
  func.func @autoencoder_kernel(%arg0: i32, %arg1: memref<2x4096xf32, #tpu.memory_space<vmem>>, %arg2: memref<4096x256xbf16, #tpu.memory_space<vmem>>, %arg3: memref<1x256xf32, #tpu.memory_space<vmem>>, %arg4: memref<256x256xbf16, #tpu.memory_space<vmem>>, %arg5: memref<1x256xf32, #tpu.memory_space<vmem>>, %arg6: memref<256x4096xbf16, #tpu.memory_space<vmem>>, %arg7: memref<1x4096xf32, #tpu.memory_space<vmem>>, %arg8: memref<2x4096xf32, #tpu.memory_space<vmem>>) attributes {dimension_semantics = [#tpu.dimension_semantics<parallel>], iteration_bounds = array<i64: 1>, scalar_prefetch = 0 : i64, scratch_operands = 0 : i64, tpu.core_type = #tpu.core_type<tc>, window_params = [{transform_indices = @transform_0, window_bounds = array<i64: 2, 4096>}, {pipeline_mode = #tpu.pipeline_mode<synchronous>, transform_indices = @transform_1, window_bounds = array<i64: 4096, 256>}, {pipeline_mode = #tpu.pipeline_mode<synchronous>, transform_indices = @transform_2, window_bounds = array<i64: 1, 256>}, {pipeline_mode = #tpu.pipeline_mode<synchronous>, transform_indices = @transform_3, window_bounds = array<i64: 256, 256>}, {pipeline_mode = #tpu.pipeline_mode<synchronous>, transform_indices = @transform_4, window_bounds = array<i64: 1, 256>}, {pipeline_mode = #tpu.pipeline_mode<synchronous>, transform_indices = @transform_5, window_bounds = array<i64: 256, 4096>}, {pipeline_mode = #tpu.pipeline_mode<synchronous>, transform_indices = @transform_6, window_bounds = array<i64: 1, 4096>}, {transform_indices = @transform_7, window_bounds = array<i64: 2, 4096>}]} {
    %c0 = arith.constant 0 : index
    %c0_0 = arith.constant 0 : index
    %0 = vector.load %arg1[%c0, %c0_0] : memref<2x4096xf32, #tpu.memory_space<vmem>>, vector<2x4096xf32>
    %1 = arith.truncf %0 : vector<2x4096xf32> to vector<2x4096xbf16>
    %c0_1 = arith.constant 0 : index
    %c0_2 = arith.constant 0 : index
    %2 = vector.load %arg2[%c0_1, %c0_2] : memref<4096x256xbf16, #tpu.memory_space<vmem>>, vector<4096x256xbf16>
    %cst = arith.constant dense<0.000000e+00> : vector<2x256xf32>
    %3 = tpu.matmul %1, %2, %cst {dimension_numbers = #tpu.dot_dimension_numbers<[1], [0], [0], [1], [0, 0, 1, 1], [], []>} : vector<2x4096xbf16>, vector<4096x256xbf16>, vector<2x256xf32> -> vector<2x256xf32>
    %c0_3 = arith.constant 0 : index
    %c0_4 = arith.constant 0 : index
    %4 = vector.load %arg3[%c0_3, %c0_4] : memref<1x256xf32, #tpu.memory_space<vmem>>, vector<1x256xf32>
    %5 = vector.broadcast %4 : vector<1x256xf32> to vector<2x256xf32>
    %6 = arith.addf %3, %5 : vector<2x256xf32>
    %cst_5 = arith.constant 0.000000e+00 : f32
    %7 = vector.broadcast %cst_5 : f32 to vector<2x256xf32>
    %8 = arith.maximumf %6, %7 : vector<2x256xf32>
    %9 = arith.truncf %8 : vector<2x256xf32> to vector<2x256xbf16>
    %c0_6 = arith.constant 0 : index
    %c0_7 = arith.constant 0 : index
    %10 = vector.load %arg4[%c0_6, %c0_7] : memref<256x256xbf16, #tpu.memory_space<vmem>>, vector<256x256xbf16>
    %cst_8 = arith.constant dense<0.000000e+00> : vector<2x256xf32>
    %11 = tpu.matmul %9, %10, %cst_8 {dimension_numbers = #tpu.dot_dimension_numbers<[1], [0], [0], [1], [0, 0, 1, 1], [], []>} : vector<2x256xbf16>, vector<256x256xbf16>, vector<2x256xf32> -> vector<2x256xf32>
    %c0_9 = arith.constant 0 : index
    %c0_10 = arith.constant 0 : index
    %12 = vector.load %arg5[%c0_9, %c0_10] : memref<1x256xf32, #tpu.memory_space<vmem>>, vector<1x256xf32>
    %13 = vector.broadcast %12 : vector<1x256xf32> to vector<2x256xf32>
    %14 = arith.addf %11, %13 : vector<2x256xf32>
    %cst_11 = arith.constant 0.000000e+00 : f32
    %15 = vector.broadcast %cst_11 : f32 to vector<2x256xf32>
    %16 = arith.maximumf %14, %15 : vector<2x256xf32>
    %17 = arith.truncf %16 : vector<2x256xf32> to vector<2x256xbf16>
    %c0_12 = arith.constant 0 : index
    %c0_13 = arith.constant 0 : index
    %18 = vector.load %arg6[%c0_12, %c0_13] : memref<256x4096xbf16, #tpu.memory_space<vmem>>, vector<256x4096xbf16>
    %cst_14 = arith.constant dense<0.000000e+00> : vector<2x4096xf32>
    %19 = tpu.matmul %17, %18, %cst_14 {dimension_numbers = #tpu.dot_dimension_numbers<[1], [0], [0], [1], [0, 0, 1, 1], [], []>} : vector<2x256xbf16>, vector<256x4096xbf16>, vector<2x4096xf32> -> vector<2x4096xf32>
    %c0_15 = arith.constant 0 : index
    %c0_16 = arith.constant 0 : index
    %20 = vector.load %arg7[%c0_15, %c0_16] : memref<1x4096xf32, #tpu.memory_space<vmem>>, vector<1x4096xf32>
    %21 = vector.broadcast %20 : vector<1x4096xf32> to vector<2x4096xf32>
    %22 = arith.addf %19, %21 : vector<2x4096xf32>
    %c0_17 = arith.constant 0 : index
    %c0_18 = arith.constant 0 : index
    %23 = vector.load %arg8[%c0_17, %c0_18] : memref<2x4096xf32, #tpu.memory_space<vmem>>, vector<2x4096xf32>
    tpu.vector_store %arg8[%c0_17, %c0_18], %22 {strides = array<i32>} : memref<2x4096xf32, #tpu.memory_space<vmem>>, vector<2x4096xf32>,
    return
  }
  func.func @transform_0(%arg0: i32) -> (i32, i32) {
    %c0_i32 = arith.constant 0 : i32
    %c0_i32_0 = arith.constant 0 : i32
    return %arg0, %c0_i32 : i32, i32
  }
  func.func @transform_1(%arg0: i32) -> (i32, i32) {
    %c0_i32 = arith.constant 0 : i32
    %c0_i32_0 = arith.constant 0 : i32
    %c0_i32_1 = arith.constant 0 : i32
    return %c0_i32, %c0_i32_0 : i32, i32
  }
  func.func @transform_2(%arg0: i32) -> (i32, i32) {
    %c0_i32 = arith.constant 0 : i32
    %c0_i32_0 = arith.constant 0 : i32
    %c0_i32_1 = arith.constant 0 : i32
    return %c0_i32, %c0_i32_0 : i32, i32
  }
  func.func @transform_3(%arg0: i32) -> (i32, i32) {
    %c0_i32 = arith.constant 0 : i32
    %c0_i32_0 = arith.constant 0 : i32
    %c0_i32_1 = arith.constant 0 : i32
    return %c0_i32, %c0_i32_0 : i32, i32
  }
  func.func @transform_4(%arg0: i32) -> (i32, i32) {
    %c0_i32 = arith.constant 0 : i32
    %c0_i32_0 = arith.constant 0 : i32
    %c0_i32_1 = arith.constant 0 : i32
    return %c0_i32, %c0_i32_0 : i32, i32
  }
  func.func @transform_5(%arg0: i32) -> (i32, i32) {
    %c0_i32 = arith.constant 0 : i32
    %c0_i32_0 = arith.constant 0 : i32
    %c0_i32_1 = arith.constant 0 : i32
    return %c0_i32, %c0_i32_0 : i32, i32
  }
  func.func @transform_6(%arg0: i32) -> (i32, i32) {
    %c0_i32 = arith.constant 0 : i32
    %c0_i32_0 = arith.constant 0 : i32
    %c0_i32_1 = arith.constant 0 : i32
    return %c0_i32, %c0_i32_0 : i32, i32
  }
  func.func @transform_7(%arg0: i32) -> (i32, i32) {
    %c0_i32 = arith.constant 0 : i32
    %c0_i32_0 = arith.constant 0 : i32
    return %arg0, %c0_i32 : i32, i32
  }
}

</mosaic_0001>

<bundles_post_ra>
// kernel: tpu_custom_call.1
= control target key start
LH: loop header
LB: loop body
LE: loop exit
PB: predicated region body
PF: predicated region fallthrough
CT: control target
= control target key end

     0   :  { %12 = vsyncpa [#allocation3], 0  ;;  %s11077_s0 = inlined_call_operand.hbm [shape: f32[2,4096], index: 0, kind: input, shape index: {}]   ;;  %s11078_s1 = inlined_call_operand.hbm [shape: bf16[4096,256], index: 1, kind: input, shape index: {}]   ;;  %s11079_s2 = inlined_call_operand.hbm [shape: f32[1,256], index: 2, kind: input, shape index: {}]   ;;  %s11080_s3 = inlined_call_operand.hbm [shape: bf16[256,256], index: 3, kind: input, shape index: {}]   ;;  %s11081_s4 = inlined_call_operand.hbm [shape: f32[1,256], index: 4, kind: input, shape index: {}]   ;;  %s11082_s5 = inlined_call_operand.hbm [shape: bf16[256,4096], index: 5, kind: input, shape index: {}]   ;;  %s11083_s6 = inlined_call_operand.hbm [shape: f32[1,4096], index: 6, kind: input, shape index: {}]   ;;  %s11084_s7 = inlined_call_operand.hbm [shape: f32[2,4096], index: 7, kind: output, shape index: {}]  }
   0x1   :  { %13 = vsyncpa [#allocation6], 0 }
   0x2   :  { %14 = vsyncpa [#allocation9], 0 }
   0x3   :  { %15 = vsyncpa [#allocation12], 0 }
   0x4   :  { %16 = vsyncpa [#allocation4], 0  ;;  %s10562_s24 = smov [#allocation5]   ;;  %s10376_s28 = scalar_lea.hbm %s11078_s1, 65536 }
   0x5   :  { %s32_s25 = sshll.u32 %s10562_s24, 4  ;;  %p10377_p0 = scmp.ne.s32.totalorder %s11078_s1, %s10376_s28  ;;  %s33_s25 = int_to_ptr.vmem [resolvable:$true] %s32_s25 }
   0x6   :  { %p10380_p1 = scmp.lt.u32.totalorder %s10376_s28, %s11078_s1 }
   0x8   :  { %p10382_p2 = pnand %p10380_p1, %p10377_p0 }
   0xa   :  { %10385 = shalt.err (!%p10382_p2)
}
   0xb   :  { %s10386_s10 = scalar_lea.vmem %s33_s25, 65536  ;;  %p10391_p4 = scmp.lt.s32.totalorder %s33_s25, %s33_s25 }
   0xc   :  { %p10387_p3 = scmp.ne.s32.totalorder %s33_s25, %s10386_s10  ;;  %p10392_p5 = scmp.lt.s32.totalorder %s10386_s10, %s10386_s10 }
   0xe   :  { %p10393_p6 = por %p10392_p5, %p10391_p4 }
  0x10   :  { %p10394_p7 = pnand %p10393_p6, %p10387_p3 }
  0x12   :  { %10397 = shalt.err (!%p10394_p7)
}
  0x13   :  { %s10563_s11 = smov 128   ;;  %s10564_s12 = smov 8  }
  0x14   :  { %38 = dma.hbm_to_vmem [thread:$0]  %s11078_s1, 65536, %s33_s25, [#allocation6], %s10563_s11, %s10563_s11, %s10564_s12  }
  0x15   :  { %s10565_s15 = smov [#allocation8]   ;;  %s10566_s17 = smov [#allocation11]  }
  0x16   :  { %s54_s16 = sshll.u32 %s10565_s15, 4  ;;  %s76_s18 = sshll.u32 %s10566_s17, 4  ;;  %s55_s16 = int_to_ptr.vmem [resolvable:$true] %s54_s16  ;;  %s77_s18 = int_to_ptr.vmem [resolvable:$true] %s76_s18 }
  0x17   :  { %s10398_s21 = scalar_lea.hbm %s11080_s3, 4096 }
  0x18   :  { %p10399_p8 = scmp.ne.s32.totalorder %s11080_s3, %s10398_s21  ;;  %p10402_p9 = scmp.lt.u32.totalorder %s10398_s21, %s11080_s3 }
  0x1a   :  { %p10404_p10 = pnand %p10402_p9, %p10399_p8 }
  0x1c   :  { %10407 = shalt.err (!%p10404_p10)
}
  0x1d   :  { %s10408_s1 = scalar_lea.vmem %s55_s16, 4096  ;;  %p10413_p12 = scmp.lt.s32.totalorder %s55_s16, %s55_s16 }
  0x1e   :  { %p10409_p11 = scmp.ne.s32.totalorder %s55_s16, %s10408_s1  ;;  %p10414_p13 = scmp.lt.s32.totalorder %s10408_s1, %s10408_s1 }
  0x20   :  { %p10415_p0 = por %p10414_p13, %p10413_p12 }
  0x22   :  { %p10416_p1 = pnand %p10415_p0, %p10409_p11 }
  0x24   :  { %10419 = shalt.err (!%p10416_p1)
}
  0x25   :  { %60 = dma.hbm_to_vmem [thread:$0]  %s11080_s3, 4096, %s55_s16, [#allocation9], %s10563_s11, %s10563_s11, %s10564_s12  }
  0x26   :  { %s10420_s30 = scalar_lea.hbm %s11082_s5, 65536 }
  0x27   :  { %p10421_p2 = scmp.ne.s32.totalorder %s11082_s5, %s10420_s30  ;;  %p10424_p3 = scmp.lt.u32.totalorder %s10420_s30, %s11082_s5 }
  0x29   :  { %p10426_p4 = pnand %p10424_p3, %p10421_p2 }
  0x2b   :  { %10429 = shalt.err (!%p10426_p4)
}
  0x2c   :  { %s10430_s14 = scalar_lea.vmem %s77_s18, 65536  ;;  %p10435_p6 = scmp.lt.s32.totalorder %s77_s18, %s77_s18 }
  0x2d   :  { %p10431_p5 = scmp.ne.s32.totalorder %s77_s18, %s10430_s14  ;;  %p10436_p7 = scmp.lt.s32.totalorder %s10430_s14, %s10430_s14 }
  0x2f   :  { %p10437_p8 = por %p10436_p7, %p10435_p6 }
  0x31   :  { %p10438_p9 = pnand %p10437_p8, %p10431_p5 }
  0x33   :  { %10441 = shalt.err (!%p10438_p9)
}
  0x34   :  { %s10567_s3 = smov 2048   ;;  %s10568_s16 = smov [#allocation2]  }
  0x35   :  { %82 = dma.hbm_to_vmem [thread:$0]  %s11082_s5, 65536, %s77_s18, [#allocation12], %s10567_s3, %s10567_s3, %s10563_s11  }
  0x36   :  { %s23_s17 = sshll.u32 %s10568_s16, 4  ;;  %s10569_s19 = smov [#allocation7]   ;;  %s24_s17 = int_to_ptr.vmem [resolvable:$true] %s23_s17 }
  0x37   :  { %s45_s20 = sshll.u32 %s10569_s19, 4  ;;  %s10442_s23 = scalar_lea.hbm %s11077_s0, 1024  ;;  %s46_s20 = int_to_ptr.vmem [resolvable:$true] %s45_s20 }
  0x38   :  { %p10443_p10 = scmp.ne.s32.totalorder %s11077_s0, %s10442_s23  ;;  %p10446_p11 = scmp.lt.u32.totalorder %s10442_s23, %s11077_s0 }
  0x3a   :  { %p10448_p12 = pnand %p10446_p11, %p10443_p10 }
  0x3c   :  { %10451 = shalt.err (!%p10448_p12)
}
  0x3d   :  { %s10452_s5 = scalar_lea.vmem %s24_s17, 1024  ;;  %p10457_p0 = scmp.lt.s32.totalorder %s24_s17, %s24_s17 }
  0x3e   :  { %p10453_p13 = scmp.ne.s32.totalorder %s24_s17, %s10452_s5  ;;  %p10458_p1 = scmp.lt.s32.totalorder %s10452_s5, %s10452_s5 }
  0x40   :  { %p10459_p2 = por %p10458_p1, %p10457_p0 }
  0x42   :  { %p10460_p3 = pnand %p10459_p2, %p10453_p13 }
  0x44   :  { %10463 = shalt.err (!%p10460_p3)
}
  0x45   :  { %26 = dma.hbm_to_vmem [thread:$0]  %s11077_s0, 1024, %s24_s17, [#allocation3]  }
  0x46   :  { %s10464_s29 = scalar_lea.hbm %s11079_s2, 32 }
  0x47   :  { %p10465_p4 = scmp.ne.s32.totalorder %s11079_s2, %s10464_s29  ;;  %p10468_p5 = scmp.lt.u32.totalorder %s10464_s29, %s11079_s2 }
  0x49   :  { %p10470_p6 = pnand %p10468_p5, %p10465_p4 }
  0x4b   :  { %10473 = shalt.err (!%p10470_p6)
}
  0x4c   :  { %s10474_s13 = scalar_lea.vmem %s46_s20, 32  ;;  %p10479_p8 = scmp.lt.s32.totalorder %s46_s20, %s46_s20 }
  0x4d   :  { %p10475_p7 = scmp.ne.s32.totalorder %s46_s20, %s10474_s13  ;;  %p10480_p9 = scmp.lt.s32.totalorder %s10474_s13, %s10474_s13 }
  0x4f   :  { %p10481_p10 = por %p10480_p9, %p10479_p8 }
  0x51   :  { %p10482_p11 = pnand %p10481_p10, %p10475_p7 }
  0x53   :  { %10485 = shalt.err (!%p10482_p11)
}
  0x54   :  { %48 = dma.hbm_to_vmem [thread:$0]  %s11079_s2, 32, %s46_s20, [#allocation6]  }
  0x55   :  { %s10570_s3 = smov [#allocation10]   ;;  %s10571_s15 = smov [#allocation13]  }
  0x56   :  { %s67_s12 = sshll.u32 %s10570_s3, 4  ;;  %s89_s16 = sshll.u32 %s10571_s15, 4  ;;  %s68_s12 = int_to_ptr.vmem [resolvable:$true] %s67_s12  ;;  %s90_s16 = int_to_ptr.vmem [resolvable:$true] %s89_s16 }
  0x57   :  { %s10486_s21 = scalar_lea.hbm %s11081_s4, 32 }
  0x58   :  { %p10487_p12 = scmp.ne.s32.totalorder %s11081_s4, %s10486_s21  ;;  %p10490_p13 = scmp.lt.u32.totalorder %s10486_s21, %s11081_s4 }
  0x5a   :  { %p10492_p0 = pnand %p10490_p13, %p10487_p12 }
  0x5c   :  { %10495 = shalt.err (!%p10492_p0)
}
  0x5d   :  { %s10496_s2 = scalar_lea.vmem %s68_s12, 32  ;;  %p10501_p2 = scmp.lt.s32.totalorder %s68_s12, %s68_s12 }
  0x5e   :  { %p10497_p1 = scmp.ne.s32.totalorder %s68_s12, %s10496_s2  ;;  %p10502_p3 = scmp.lt.s32.totalorder %s10496_s2, %s10496_s2 }
  0x60   :  { %p10503_p4 = por %p10502_p3, %p10501_p2 }
  0x62   :  { %p10504_p5 = pnand %p10503_p4, %p10497_p1 }
  0x64   :  { %10507 = shalt.err (!%p10504_p5)
}
  0x65   :  { %70 = dma.hbm_to_vmem [thread:$0]  %s11081_s4, 32, %s68_s12, [#allocation9]  }
  0x66   :  { %s10508_s11 = scalar_lea.hbm %s11083_s6, 512 }
  0x67   :  { %p10509_p6 = scmp.ne.s32.totalorder %s11083_s6, %s10508_s11  ;;  %p10512_p7 = scmp.lt.u32.totalorder %s10508_s11, %s11083_s6 }
  0x69   :  { %p10514_p8 = pnand %p10512_p7, %p10509_p6 }
  0x6b   :  { %10517 = shalt.err (!%p10514_p8)
}
  0x6c   :  { %s10518_s30 = scalar_lea.vmem %s90_s16, 512  ;;  %p10523_p10 = scmp.lt.s32.totalorder %s90_s16, %s90_s16 }
  0x6d   :  { %p10519_p9 = scmp.ne.s32.totalorder %s90_s16, %s10518_s30  ;;  %p10524_p11 = scmp.lt.s32.totalorder %s10518_s30, %s10518_s30 }
  0x6f   :  { %p10525_p12 = por %p10524_p11, %p10523_p10 }
  0x71   :  { %p10526_p13 = pnand %p10525_p12, %p10519_p9 }
  0x73   :  { %10529 = shalt.err (!%p10526_p13)
}
  0x74   :  { %92 = dma.hbm_to_vmem [thread:$0]  %s11083_s6, 512, %s90_s16, [#allocation12]  }
  0x75   :  { %10552 = dma.done.wait [#allocation3], 1024  }
  0x76   :  { %10553 = vsyncadd [#allocation3], 4294966272 }
  0x77   :  { %10554 = dma.done.wait [#allocation6], 65568  }
  0x78   :  { %10555 = vsyncadd [#allocation6], 4294901728 }
  0x79   :  { %10556 = dma.done.wait [#allocation9], 4128  }
  0x7a   :  { %10557 = vsyncadd [#allocation9], 4294963168 }
  0x7b   :  { %10558 = dma.done.wait [#allocation12], 66048  }
  0x7c   :  { %10559 = vsyncadd [#allocation12], 4294901248  ;;  %v9551_v0 = vld [vmem:[#allocation5 + $0x4] ss:$8 sps:$4 sm:$0xff]   ;;  %v9553_v1 = vld [vmem:[#allocation5] ss:$8 sps:$4 sm:$0xff]   ;;  %v134_v9 = vlaneseq }
  0x7d   :  { %3414 = vmatprep.subr.bf16.mxu0 %v9551_v0  ;;  %v9554_v2 = vld [vmem:[#allocation5 + $0x14] ss:$8 sps:$4 sm:$0xff]   ;;  %v9556_v3 = vld [vmem:[#allocation5 + $0x10] ss:$8 sps:$4 sm:$0xff]   ;;  %v9557_v4 = vld [vmem:[#allocation5 + $0x24] ss:$8 sps:$4 sm:$0xff]  }
  0x7e   :  { %3415 = vmatpush1.bf16.msra.mxu0 %v9553_v1  ;;  %v9559_v5 = vld [vmem:[#allocation5 + $0x20] ss:$8 sps:$4 sm:$0xff]   ;;  %v9560_v6 = vld [vmem:[#allocation5 + $0x34] ss:$8 sps:$4 sm:$0xff]   ;;  %v10572_v7 = vmov 1983009808  }
  0x7f   :  { %3416 = vmatprep.subr.bf16.mxu0 %v9554_v2  ;;  %v132_v8 = vunpack.c.l.s4 %v10572_v7  ;;  %v9562_v10 = vld [vmem:[#allocation5 + $0x30] ss:$8 sps:$4 sm:$0xff]   ;;  %v9563_v11 = vld [vmem:[#allocation5 + $0x44] ss:$8 sps:$4 sm:$0xff]   ;;  %v10703_v13 = vshrl.u32 %v134_v9, 7  ;;  %s10573_s6 = smov [#allocation14]  }
  0x80   :  { %v9565_v14 = vld [vmem:[#allocation5 + $0x40] ss:$8 sps:$4 sm:$0xff]   ;;  %v9566_v15 = vld [vmem:[#allocation5 + $0x54] ss:$8 sps:$4 sm:$0xff]   ;;  %v9568_v17 = vld [vmem:[#allocation5 + $0x50] ss:$8 sps:$4 sm:$0xff]  }
  0x81   :  { %v133_v12 = vunpack.c.0.s8 %v132_v8  ;;  %v9569_v18 = vld [vmem:[#allocation5 + $0x64] ss:$8 sps:$4 sm:$0xff]   ;;  %v9571_v21 = vld [vmem:[#allocation5 + $0x60] ss:$8 sps:$4 sm:$0xff]   ;;  %v9572_v22 = vld [vmem:[#allocation5 + $0x74] ss:$8 sps:$4 sm:$0xff]  }
  0x82   :  { %3417 = vmatpush1.bf16.msra.mxu0 %v9556_v3  ;;  %v114_v19 = vld [vmem:[#allocation2] sm:$0xff]  ;;  %v9574_v25 = vld [vmem:[#allocation5 + $0x70] ss:$8 sps:$4 sm:$0xff]   ;;  %v9578_v28 = vld [vmem:[#allocation5 + $0x94] ss:$8 sps:$4 sm:$0xff]   ;;  %s8409_s9 = sshll.u32 %s10573_s6, 4  ;;  %s8410_s9 = int_to_ptr.vmem [resolvable:$true] %s8409_s9 }
  0x83   :  { %3418 = vmatprep.subr.bf16.mxu0 %v9557_v4  ;;  %v10706_v16 = vsub.s32 %v133_v12, %v10703_v13  ;;  %v9575_v26 = vld [vmem:[#allocation5 + $0x84] ss:$8 sps:$4 sm:$0xff]   ;;  %v9577_v27 = vld [vmem:[#allocation5 + $0x80] ss:$8 sps:$4 sm:$0xff]   ;;  %v9580_v29 = vld [vmem:[#allocation5 + $0x90] ss:$8 sps:$4 sm:$0xff]   ;;  %v130_v38 = vcombine.high %v114_v19, %v114_v19  ;;  %p10535_p1 = scmp.lt.s32.totalorder %s8410_s9, %s8410_s9 }
  0x84   :  { %v9581_v30 = vld [vmem:[#allocation5 + $0xa4] ss:$8 sps:$4 sm:$0xff]   ;;  %v9583_v31 = vld [vmem:[#allocation5 + $0xa0] ss:$8 sps:$4 sm:$0xff]   ;;  %v9584_v32 = vld [vmem:[#allocation5 + $0xb4] ss:$8 sps:$4 sm:$0xff]  }
  0x85   :  { %v137_v20 = vrot.slane %v114_v19, %v10706_v16  ;;  %v9586_v33 = vld [vmem:[#allocation5 + $0xb0] ss:$8 sps:$4 sm:$0xff]   ;;  %v9587_v34 = vld [vmem:[#allocation5 + $0xc4] ss:$8 sps:$4 sm:$0xff]   ;;  %v9589_v35 = vld [vmem:[#allocation5 + $0xc0] ss:$8 sps:$4 sm:$0xff]   ;;  %v10710_v41 = vrot.slane %v130_v38, %v10706_v16 }
  0x86   :  { %3419 = vmatpush1.bf16.msra.mxu0 %v9559_v5  ;;  %v9590_v36 = vld [vmem:[#allocation5 + $0xd4] ss:$8 sps:$4 sm:$0xff]   ;;  %v9592_v37 = vld [vmem:[#allocation5 + $0xd0] ss:$8 sps:$4 sm:$0xff]   ;;  %v9593_v39 = vld [vmem:[#allocation5 + $0xe4] ss:$8 sps:$4 sm:$0xff]  }
  0x87   :  { %3420 = vmatprep.subr.bf16.mxu0 %v9560_v6  ;;  %v145_v23 = vcombine.high %v137_v20, %v137_v20  ;;  %v9595_v40 = vld [vmem:[#allocation5 + $0xe0] ss:$8 sps:$4 sm:$0xff]   ;;  %v9596_v42 = vld [vmem:[#allocation5 + $0xf4] ss:$8 sps:$4 sm:$0xff]   ;;  %v9598_v43 = vld [vmem:[#allocation5 + $0xf0] ss:$8 sps:$4 sm:$0xff]   ;;  %v146_v44 = vcombine.high %v10710_v41, %v10710_v41  ;;  %v298_v46 = vpack.c.bf16 %v137_v20, %v137_v20 }
  0x88   :  { %v9602_v45 = vld [vmem:[#allocation5 + $0x104] ss:$8 sps:$4 sm:$0xff]   ;;  %v9600_v47 = vld [vmem:[#allocation5 + $0x100] ss:$8 sps:$4 sm:$0xff]   ;;  %v9605_v49 = vld [vmem:[#allocation5 + $0x114] ss:$8 sps:$4 sm:$0xff]  }
  0x89   :  { %v299_v24 = vpack.c.bf16 %v145_v23, %v145_v23  ;;  %v301_v48 = vpack.c.bf16 %v146_v44, %v146_v44  ;;  %v9603_v50 = vld [vmem:[#allocation5 + $0x110] ss:$8 sps:$4 sm:$0xff]   ;;  %v9608_v51 = vld [vmem:[#allocation5 + $0x124] ss:$8 sps:$4 sm:$0xff]   ;;  %v9606_v52 = vld [vmem:[#allocation5 + $0x120] ss:$8 sps:$4 sm:$0xff]  }
  0x8a   :  { %3421 = vmatpush1.bf16.msra.mxu0 %v9562_v10  ;;  %v9611_v53 = vld [vmem:[#allocation5 + $0x134] ss:$8 sps:$4 sm:$0xff]   ;;  %v9609_v54 = vld [vmem:[#allocation5 + $0x130] ss:$8 sps:$4 sm:$0xff]   ;;  %v9614_v55 = vld [vmem:[#allocation5 + $0x144] ss:$8 sps:$4 sm:$0xff]  }
  0x8b   :  { %3422 = vmatprep.subr.bf16.mxu0 %v9563_v11  ;;  %3446 = vmatprep.mubr.bf16.mxu0 %v299_v24  ;;  %v9612_v56 = vld [vmem:[#allocation5 + $0x140] ss:$8 sps:$4 sm:$0xff]   ;;  %v9617_v57 = vld [vmem:[#allocation5 + $0x154] ss:$8 sps:$4 sm:$0xff]   ;;  %v9615_v58 = vld [vmem:[#allocation5 + $0x150] ss:$8 sps:$4 sm:$0xff]  }
  0x8c   :  { %v9620_v59 = vld [vmem:[#allocation5 + $0x164] ss:$8 sps:$4 sm:$0xff]   ;;  %v9618_v60 = vld [vmem:[#allocation5 + $0x160] ss:$8 sps:$4 sm:$0xff]   ;;  %v9623_v61 = vld [vmem:[#allocation5 + $0x174] ss:$8 sps:$4 sm:$0xff]  }
  0x8d   :  { %v9621_v62 = vld [vmem:[#allocation5 + $0x170] ss:$8 sps:$4 sm:$0xff]   ;;  %v9626_v63 = vld [vmem:[#allocation5 + $0x184] ss:$8 sps:$4 sm:$0xff]   ;;  %v9624_v0 = vld [vmem:[#allocation5 + $0x180] ss:$8 sps:$4 sm:$0xff]  }
  0x8e   :  { %3423 = vmatpush1.bf16.msra.mxu0 %v9565_v14  ;;  %v9629_v1 = vld [vmem:[#allocation5 + $0x194] ss:$8 sps:$4 sm:$0xff]   ;;  %v9627_v2 = vld [vmem:[#allocation5 + $0x190] ss:$8 sps:$4 sm:$0xff]   ;;  %v9632_v3 = vld [vmem:[#allocation5 + $0x1a4] ss:$8 sps:$4 sm:$0xff]  }
  0x8f   :  { %3424 = vmatprep.subr.bf16.mxu0 %v9566_v15  ;;  %v9630_v4 = vld [vmem:[#allocation5 + $0x1a0] ss:$8 sps:$4 sm:$0xff]   ;;  %v9635_v5 = vld [vmem:[#allocation5 + $0x1b4] ss:$8 sps:$4 sm:$0xff]   ;;  %v9633_v6 = vld [vmem:[#allocation5 + $0x1b0] ss:$8 sps:$4 sm:$0xff]  }
  0x90   :  { %v9638_v7 = vld [vmem:[#allocation5 + $0x1c4] ss:$8 sps:$4 sm:$0xff]   ;;  %v9636_v8 = vld [vmem:[#allocation5 + $0x1c0] ss:$8 sps:$4 sm:$0xff]   ;;  %v9641_v9 = vld [vmem:[#allocation5 + $0x1d4] ss:$8 sps:$4 sm:$0xff]  }
  0x91   :  { %v9639_v10 = vld [vmem:[#allocation5 + $0x1d0] ss:$8 sps:$4 sm:$0xff]   ;;  %v9644_v11 = vld [vmem:[#allocation5 + $0x1e4] ss:$8 sps:$4 sm:$0xff]   ;;  %v9642_v14 = vld [vmem:[#allocation5 + $0x1e0] ss:$8 sps:$4 sm:$0xff]  }
  0x92   :  { %3425 = vmatpush1.bf16.msra.mxu0 %v9568_v17  ;;  %v10714_v12 = vld [vmem:[#allocation2 + $0x8] sm:$0xff]  ;;  %v9647_v15 = vld [vmem:[#allocation5 + $0x1f4] ss:$8 sps:$4 sm:$0xff]   ;;  %s10530_s10 = scalar_lea.vmem %s8410_s9, 1024 }
  0x93   :  { %3426 = vmatprep.subr.bf16.mxu0 %v9569_v18  ;;  %v10718_v17 = vrot.slane %v10714_v12, %v10706_v16  ;;  %v9645_v18 = vld [vmem:[#allocation5 + $0x1f0] ss:$8 sps:$4 sm:$0xff]   ;;  %v9650_v19 = vld [vmem:[#allocation5 + $0x204] ss:$8 sps:$4 sm:$0xff]   ;;  %v9653_v23 = vld [vmem:[#allocation5 + $0x214] ss:$8 sps:$4 sm:$0xff]   ;;  %p10531_p0 = scmp.ne.s32.totalorder %s8410_s9, %s10530_s10  ;;  %p10536_p2 = scmp.lt.s32.totalorder %s10530_s10, %s10530_s10 }
  0x94   :  { %v9674_v38 = vld [vmem:[#allocation5 + $0x284] ss:$8 sps:$4 sm:$0xff]   ;;  %v9683_v44 = vld [vmem:[#allocation5 + $0x2b4] ss:$8 sps:$4 sm:$0xff]  }
  0x95   :  { %v162_v20 = vcombine.high %v10718_v17, %v10718_v17  ;;  %p10537_p3 = por %p10536_p2, %p10535_p1 }
  0x96   :  { %3427 = vmatpush1.bf16.msra.mxu0 %v9571_v21  ;;  %v300_v21 = vpack.c.bf16 %v10710_v41, %v10710_v41  ;;  %v9675_v41 = vld [vmem:[#allocation5 + $0x290] ss:$8 sps:$4 sm:$0xff]  }
  0x97   :  { %3428 = vmatprep.subr.bf16.mxu0 %v9572_v22  ;;  %v9648_v22 = vld [vmem:[#allocation5 + $0x200] ss:$8 sps:$4 sm:$0xff]   ;;  %v303_v24 = vpack.c.bf16 %v162_v20, %v162_v20  ;;  %v9729_v20 = vld [vmem:[#allocation5 + $0x3b0] ss:$8 sps:$4 sm:$0xff]   ;;  %p10538_p4 = pnand %p10537_p3, %p10531_p0 }
  0x9a   :  { %3429 = vmatpush1.bf16.msra.mxu0 %v9574_v25  ;;  %v9651_v25 = vld [vmem:[#allocation5 + $0x210] ss:$8 sps:$4 sm:$0xff]  }
  0x9b   :  { %3430 = vmatprep.subr.bf16.mxu0 %v9575_v26  ;;  %v9656_v26 = vld [vmem:[#allocation5 + $0x224] ss:$8 sps:$4 sm:$0xff]  }
  0x9e   :  { %3431 = vmatpush1.bf16.msra.mxu0 %v9577_v27  ;;  %v9654_v27 = vld [vmem:[#allocation5 + $0x220] ss:$8 sps:$4 sm:$0xff]  }
  0x9f   :  { %3432 = vmatprep.subr.bf16.mxu0 %v9578_v28  ;;  %v9659_v28 = vld [vmem:[#allocation5 + $0x234] ss:$8 sps:$4 sm:$0xff]  }
  0xa2   :  { %3433 = vmatpush1.bf16.msra.mxu0 %v9580_v29  ;;  %v9657_v29 = vld [vmem:[#allocation5 + $0x230] ss:$8 sps:$4 sm:$0xff]  }
  0xa3   :  { %3434 = vmatprep.subr.bf16.mxu0 %v9581_v30  ;;  %v9662_v30 = vld [vmem:[#allocation5 + $0x244] ss:$8 sps:$4 sm:$0xff]  }
  0xa6   :  { %3435 = vmatpush1.bf16.msra.mxu0 %v9583_v31  ;;  %v9660_v31 = vld [vmem:[#allocation5 + $0x240] ss:$8 sps:$4 sm:$0xff]  }
  0xa7   :  { %3436 = vmatprep.subr.bf16.mxu0 %v9584_v32  ;;  %v9665_v32 = vld [vmem:[#allocation5 + $0x254] ss:$8 sps:$4 sm:$0xff]  }
  0xaa   :  { %3437 = vmatpush1.bf16.msra.mxu0 %v9586_v33  ;;  %v9663_v33 = vld [vmem:[#allocation5 + $0x250] ss:$8 sps:$4 sm:$0xff]  }
  0xab   :  { %3438 = vmatprep.subr.bf16.mxu0 %v9587_v34  ;;  %v9668_v34 = vld [vmem:[#allocation5 + $0x264] ss:$8 sps:$4 sm:$0xff]  }
  0xae   :  { %3439 = vmatpush1.bf16.msra.mxu0 %v9589_v35  ;;  %v9666_v35 = vld [vmem:[#allocation5 + $0x260] ss:$8 sps:$4 sm:$0xff]  }
  0xaf   :  { %3440 = vmatprep.subr.bf16.mxu0 %v9590_v36  ;;  %v9671_v36 = vld [vmem:[#allocation5 + $0x274] ss:$8 sps:$4 sm:$0xff]  }
  0xb2   :  { %3441 = vmatpush1.bf16.msra.mxu0 %v9592_v37  ;;  %v9669_v37 = vld [vmem:[#allocation5 + $0x270] ss:$8 sps:$4 sm:$0xff]  }
  0xb3   :  { %3442 = vmatprep.subr.bf16.mxu0 %v9593_v39  ;;  %v9672_v39 = vld [vmem:[#allocation5 + $0x280] ss:$8 sps:$4 sm:$0xff]  }
  0xb6   :  { %3443 = vmatpush1.bf16.msra.mxu0 %v9595_v40  ;;  %v9677_v40 = vld [vmem:[#allocation5 + $0x294] ss:$8 sps:$4 sm:$0xff]  }
  0xb7   :  { %3444 = vmatprep.subr.bf16.mxu0 %v9596_v42  ;;  %v9680_v42 = vld [vmem:[#allocation5 + $0x2a4] ss:$8 sps:$4 sm:$0xff]  }
  0xba   :  { %3445 = vmatpush1.bf16.msra.mxu0 %v9598_v43  ;;  %v9678_v43 = vld [vmem:[#allocation5 + $0x2a0] ss:$8 sps:$4 sm:$0xff]  }
  0xbb   :  { %3455 = vmatprep.subr.bf16.mxu0 %v9602_v45  ;;  %v9681_v45 = vld [vmem:[#allocation5 + $0x2b0] ss:$8 sps:$4 sm:$0xff]  }
  0xbd   :  { %3447 = vmatmul.mubr.bf16.vlgmr.msra.gmra.mrb[0].mxu0 %v298_v46  ;;  %v9686_v46 = vld [vmem:[#allocation5 + $0x2c4] ss:$8 sps:$4 sm:$0xff]  }
  0xbe   :  { %3456 = vmatpush1.bf16.msra.mxu0 %v9600_v47  ;;  %3487 = vmatprep.mubr.bf16.mxu0 %v301_v48  ;;  %v9684_v47 = vld [vmem:[#allocation5 + $0x2c0] ss:$8 sps:$4 sm:$0xff]   ;;  %v9689_v48 = vld [vmem:[#allocation5 + $0x2d4] ss:$8 sps:$4 sm:$0xff]  }
  0xbf   :  { %3457 = vmatprep.subr.bf16.mxu0 %v9605_v49  ;;  %v9687_v49 = vld [vmem:[#allocation5 + $0x2d0] ss:$8 sps:$4 sm:$0xff]  }
  0xc2   :  { %3458 = vmatpush1.bf16.msra.mxu0 %v9603_v50  ;;  %v9692_v50 = vld [vmem:[#allocation5 + $0x2e4] ss:$8 sps:$4 sm:$0xff]  }
  0xc3   :  { %3459 = vmatprep.subr.bf16.mxu0 %v9608_v51  ;;  %v147_v51 = vcombine.high %v10714_v12, %v10714_v12  ;;  %v9720_v12 = vld [vmem:[#allocation5 + $0x380] ss:$8 sps:$4 sm:$0xff]  }
  0xc6   :  { %3460 = vmatpush1.bf16.msra.mxu0 %v9606_v52  ;;  %v9690_v52 = vld [vmem:[#allocation5 + $0x2e0] ss:$8 sps:$4 sm:$0xff]  }
  0xc7   :  { %3461 = vmatprep.subr.bf16.mxu0 %v9611_v53  ;;  %v9695_v53 = vld [vmem:[#allocation5 + $0x2f4] ss:$8 sps:$4 sm:$0xff]  }
  0xca   :  { %3462 = vmatpush1.bf16.msra.mxu0 %v9609_v54  ;;  %v10727_v54 = vrot.slane %v147_v51, %v10706_v16  ;;  %v9769_v51 = vld [vmem:[#allocation5 + $0x480] ss:$8 sps:$4 sm:$0xff]  }
  0xcb   :  { %3463 = vmatprep.subr.bf16.mxu0 %v9614_v55  ;;  %v9693_v55 = vld [vmem:[#allocation5 + $0x2f0] ss:$8 sps:$4 sm:$0xff]  }
  0xce   :  { %3464 = vmatpush1.bf16.msra.mxu0 %v9612_v56  ;;  %v9698_v56 = vld [vmem:[#allocation5 + $0x304] ss:$8 sps:$4 sm:$0xff]  }
  0xcf   :  { %3465 = vmatprep.subr.bf16.mxu0 %v9617_v57  ;;  %v163_v57 = vcombine.high %v10727_v54, %v10727_v54 }
  0xd2   :  { %3466 = vmatpush1.bf16.msra.mxu0 %v9615_v58  ;;  %v302_v58 = vpack.c.bf16 %v10718_v17, %v10718_v17  ;;  %v9728_v17 = vld [vmem:[#allocation5 + $0x3a4] ss:$8 sps:$4 sm:$0xff]  }
  0xd3   :  { %3467 = vmatprep.subr.bf16.mxu0 %v9620_v59  ;;  %v9696_v59 = vld [vmem:[#allocation5 + $0x300] ss:$8 sps:$4 sm:$0xff]  }
  0xd6   :  { %3468 = vmatpush1.bf16.msra.mxu0 %v9618_v60  ;;  %v9701_v60 = vld [vmem:[#allocation5 + $0x314] ss:$8 sps:$4 sm:$0xff]  }
  0xd7   :  { %3469 = vmatprep.subr.bf16.mxu0 %v9623_v61  ;;  %v305_v61 = vpack.c.bf16 %v163_v57, %v163_v57  ;;  %v9778_v57 = vld [vmem:[#allocation5 + $0x4b0] ss:$8 sps:$4 sm:$0xff]  }
  0xda   :  { %3470 = vmatpush1.bf16.msra.mxu0 %v9621_v62  ;;  %v9699_v62 = vld [vmem:[#allocation5 + $0x310] ss:$8 sps:$4 sm:$0xff]  }
  0xdb   :  { %3471 = vmatprep.subr.bf16.mxu0 %v9626_v63  ;;  %v9704_v63 = vld [vmem:[#allocation5 + $0x324] ss:$8 sps:$4 sm:$0xff]  }
  0xde   :  { %3472 = vmatpush1.bf16.msra.mxu0 %v9624_v0  ;;  %v9702_v0 = vld [vmem:[#allocation5 + $0x320] ss:$8 sps:$4 sm:$0xff]  }
  0xdf   :  { %3473 = vmatprep.subr.bf16.mxu0 %v9629_v1  ;;  %v9707_v1 = vld [vmem:[#allocation5 + $0x334] ss:$8 sps:$4 sm:$0xff]  }
  0xe2   :  { %3474 = vmatpush1.bf16.msra.mxu0 %v9627_v2  ;;  %v9705_v2 = vld [vmem:[#allocation5 + $0x330] ss:$8 sps:$4 sm:$0xff]  }
  0xe3   :  { %3475 = vmatprep.subr.bf16.mxu0 %v9632_v3  ;;  %v9710_v3 = vld [vmem:[#allocation5 + $0x344] ss:$8 sps:$4 sm:$0xff]  }
  0xe6   :  { %3476 = vmatpush1.bf16.msra.mxu0 %v9630_v4  ;;  %v9708_v4 = vld [vmem:[#allocation5 + $0x340] ss:$8 sps:$4 sm:$0xff]  }
  0xe7   :  { %3477 = vmatprep.subr.bf16.mxu0 %v9635_v5  ;;  %v9713_v5 = vld [vmem:[#allocation5 + $0x354] ss:$8 sps:$4 sm:$0xff]  }
  0xea   :  { %3478 = vmatpush1.bf16.msra.mxu0 %v9633_v6  ;;  %v9711_v6 = vld [vmem:[#allocation5 + $0x350] ss:$8 sps:$4 sm:$0xff]  }
  0xeb   :  { %3479 = vmatprep.subr.bf16.mxu0 %v9638_v7  ;;  %v9716_v7 = vld [vmem:[#allocation5 + $0x364] ss:$8 sps:$4 sm:$0xff]  }
  0xee   :  { %3480 = vmatpush1.bf16.msra.mxu0 %v9636_v8  ;;  %v9714_v8 = vld [vmem:[#allocation5 + $0x360] ss:$8 sps:$4 sm:$0xff]  }
  0xef   :  { %3481 = vmatprep.subr.bf16.mxu0 %v9641_v9  ;;  %v9719_v9 = vld [vmem:[#allocation5 + $0x374] ss:$8 sps:$4 sm:$0xff]  }
  0xf2   :  { %3482 = vmatpush1.bf16.msra.mxu0 %v9639_v10  ;;  %v9717_v10 = vld [vmem:[#allocation5 + $0x370] ss:$8 sps:$4 sm:$0xff]  }
  0xf3   :  { %3483 = vmatprep.subr.bf16.mxu0 %v9644_v11  ;;  %v9722_v11 = vld [vmem:[#allocation5 + $0x384] ss:$8 sps:$4 sm:$0xff]  }
  0xf6   :  { %3484 = vmatpush1.bf16.msra.mxu0 %v9642_v14  ;;  %v9725_v14 = vld [vmem:[#allocation5 + $0x394] ss:$8 sps:$4 sm:$0xff]  }
  0xf7   :  { %3485 = vmatprep.subr.bf16.mxu0 %v9647_v15  ;;  %v9723_v15 = vld [vmem:[#allocation5 + $0x390] ss:$8 sps:$4 sm:$0xff]  }
  0xfa   :  { %3486 = vmatpush1.bf16.msra.mxu0 %v9645_v18  ;;  %v9726_v18 = vld [vmem:[#allocation5 + $0x3a0] ss:$8 sps:$4 sm:$0xff]  }
  0xfb   :  { %3496 = vmatprep.subr.bf16.mxu0 %v9650_v19  ;;  %v9731_v19 = vld [vmem:[#allocation5 + $0x3b4] ss:$8 sps:$4 sm:$0xff]  }
  0xfd   :  { %3488 = vmatmul.mubr.bf16.vlgmr.msra.gmra.mrb[0].mxu0 %v300_v21  ;;  %v9734_v21 = vld [vmem:[#allocation5 + $0x3c4] ss:$8 sps:$4 sm:$0xff]  }
  0xfe   :  { %3497 = vmatpush1.bf16.msra.mxu0 %v9648_v22  ;;  %3528 = vmatprep.mubr.bf16.mxu0 %v303_v24  ;;  %v9732_v22 = vld [vmem:[#allocation5 + $0x3c0] ss:$8 sps:$4 sm:$0xff]   ;;  %v9735_v24 = vld [vmem:[#allocation5 + $0x3d0] ss:$8 sps:$4 sm:$0xff]  }
  0xff   :  { %3498 = vmatprep.subr.bf16.mxu0 %v9653_v23  ;;  %v9737_v23 = vld [vmem:[#allocation5 + $0x3d4] ss:$8 sps:$4 sm:$0xff]  }
 0x102   :  { %3499 = vmatpush1.bf16.msra.mxu0 %v9651_v25  ;;  %v9740_v25 = vld [vmem:[#allocation5 + $0x3e4] ss:$8 sps:$4 sm:$0xff]  }
 0x103   :  { %3500 = vmatprep.subr.bf16.mxu0 %v9656_v26  ;;  %v10733_v26 = vld [vmem:[#allocation2 + $0x10] sm:$0xff] }
 0x106   :  { %3501 = vmatpush1.bf16.msra.mxu0 %v9654_v27  ;;  %v9738_v27 = vld [vmem:[#allocation5 + $0x3e0] ss:$8 sps:$4 sm:$0xff]  }
 0x107   :  { %3502 = vmatprep.subr.bf16.mxu0 %v9659_v28  ;;  %v10737_v28 = vrot.slane %v10733_v26, %v10706_v16 }
 0x10a   :  { %3503 = vmatpush1.bf16.msra.mxu0 %v9657_v29  ;;  %v9743_v29 = vld [vmem:[#allocation5 + $0x3f4] ss:$8 sps:$4 sm:$0xff]  }
 0x10b   :  { %3504 = vmatprep.subr.bf16.mxu0 %v9662_v30  ;;  %v9741_v30 = vld [vmem:[#allocation5 + $0x3f0] ss:$8 sps:$4 sm:$0xff]  }
 0x10e   :  { %3505 = vmatpush1.bf16.msra.mxu0 %v9660_v31  ;;  %v179_v31 = vcombine.high %v10737_v28, %v10737_v28 }
 0x10f   :  { %3506 = vmatprep.subr.bf16.mxu0 %v9665_v32  ;;  %v9747_v32 = vld [vmem:[#allocation5 + $0x404] ss:$8 sps:$4 sm:$0xff]  }
 0x112   :  { %3507 = vmatpush1.bf16.msra.mxu0 %v9663_v33  ;;  %v304_v33 = vpack.c.bf16 %v10727_v54, %v10727_v54  ;;  %v9777_v54 = vld [vmem:[#allocation5 + $0x4a4] ss:$8 sps:$4 sm:$0xff]  }
 0x113   :  { %3508 = vmatprep.subr.bf16.mxu0 %v9668_v34  ;;  %v9745_v34 = vld [vmem:[#allocation5 + $0x400] ss:$8 sps:$4 sm:$0xff]  }
 0x116   :  { %3509 = vmatpush1.bf16.msra.mxu0 %v9666_v35  ;;  %v307_v35 = vpack.c.bf16 %v179_v31, %v179_v31  ;;  %v9828_v31 = vld [vmem:[#allocation5 + $0x5b4] ss:$8 sps:$4 sm:$0xff]  }
 0x117   :  { %3510 = vmatprep.subr.bf16.mxu0 %v9671_v36  ;;  %v9750_v36 = vld [vmem:[#allocation5 + $0x414] ss:$8 sps:$4 sm:$0xff]  }
 0x11a   :  { %3511 = vmatpush1.bf16.msra.mxu0 %v9669_v37  ;;  %v9748_v37 = vld [vmem:[#allocation5 + $0x410] ss:$8 sps:$4 sm:$0xff]  }
 0x11b   :  { %3512 = vmatprep.subr.bf16.mxu0 %v9674_v38  ;;  %v9753_v38 = vld [vmem:[#allocation5 + $0x424] ss:$8 sps:$4 sm:$0xff]  }
 0x11e   :  { %3513 = vmatpush1.bf16.msra.mxu0 %v9672_v39  ;;  %v9751_v39 = vld [vmem:[#allocation5 + $0x420] ss:$8 sps:$4 sm:$0xff]  }
 0x11f   :  { %3514 = vmatprep.subr.bf16.mxu0 %v9677_v40  ;;  %v9756_v40 = vld [vmem:[#allocation5 + $0x434] ss:$8 sps:$4 sm:$0xff]  }
 0x122   :  { %3515 = vmatpush1.bf16.msra.mxu0 %v9675_v41  ;;  %v9754_v41 = vld [vmem:[#allocation5 + $0x430] ss:$8 sps:$4 sm:$0xff]  }
 0x123   :  { %3516 = vmatprep.subr.bf16.mxu0 %v9680_v42  ;;  %v9759_v42 = vld [vmem:[#allocation5 + $0x444] ss:$8 sps:$4 sm:$0xff]  }
 0x126   :  { %3517 = vmatpush1.bf16.msra.mxu0 %v9678_v43  ;;  %v9757_v43 = vld [vmem:[#allocation5 + $0x440] ss:$8 sps:$4 sm:$0xff]  }
 0x127   :  { %3518 = vmatprep.subr.bf16.mxu0 %v9683_v44  ;;  %v9762_v44 = vld [vmem:[#allocation5 + $0x454] ss:$8 sps:$4 sm:$0xff]  }
 0x12a   :  { %3519 = vmatpush1.bf16.msra.mxu0 %v9681_v45  ;;  %v9760_v45 = vld [vmem:[#allocation5 + $0x450] ss:$8 sps:$4 sm:$0xff]  }
 0x12b   :  { %3520 = vmatprep.subr.bf16.mxu0 %v9686_v46  ;;  %v9765_v46 = vld [vmem:[#allocation5 + $0x464] ss:$8 sps:$4 sm:$0xff]  }
 0x12e   :  { %3521 = vmatpush1.bf16.msra.mxu0 %v9684_v47  ;;  %v9763_v47 = vld [vmem:[#allocation5 + $0x460] ss:$8 sps:$4 sm:$0xff]  }
 0x12f   :  { %3522 = vmatprep.subr.bf16.mxu0 %v9689_v48  ;;  %v9768_v48 = vld [vmem:[#allocation5 + $0x474] ss:$8 sps:$4 sm:$0xff]  }
 0x132   :  { %3523 = vmatpush1.bf16.msra.mxu0 %v9687_v49  ;;  %v9766_v49 = vld [vmem:[#allocation5 + $0x470] ss:$8 sps:$4 sm:$0xff]  }
 0x133   :  { %3524 = vmatprep.subr.bf16.mxu0 %v9692_v50  ;;  %v9771_v50 = vld [vmem:[#allocation5 + $0x484] ss:$8 sps:$4 sm:$0xff]  }
 0x136   :  { %3525 = vmatpush1.bf16.msra.mxu0 %v9690_v52  ;;  %v9774_v52 = vld [vmem:[#allocation5 + $0x494] ss:$8 sps:$4 sm:$0xff]  }
 0x137   :  { %3526 = vmatprep.subr.bf16.mxu0 %v9695_v53  ;;  %v9772_v53 = vld [vmem:[#allocation5 + $0x490] ss:$8 sps:$4 sm:$0xff]  }
 0x13a   :  { %3527 = vmatpush1.bf16.msra.mxu0 %v9693_v55  ;;  %v9775_v55 = vld [vmem:[#allocation5 + $0x4a0] ss:$8 sps:$4 sm:$0xff]  }
 0x13b   :  { %3537 = vmatprep.subr.bf16.mxu0 %v9698_v56  ;;  %v9780_v56 = vld [vmem:[#allocation5 + $0x4b4] ss:$8 sps:$4 sm:$0xff]  }
 0x13d   :  { %3529 = vmatmul.mubr.bf16.vlgmr.msra.gmra.mrb[0].mxu0 %v302_v58  ;;  %v9783_v58 = vld [vmem:[#allocation5 + $0x4c4] ss:$8 sps:$4 sm:$0xff]  }
 0x13e   :  { %3538 = vmatpush1.bf16.msra.mxu0 %v9696_v59  ;;  %3569 = vmatprep.mubr.bf16.mxu0 %v305_v61  ;;  %v9781_v59 = vld [vmem:[#allocation5 + $0x4c0] ss:$8 sps:$4 sm:$0xff]   ;;  %v9784_v61 = vld [vmem:[#allocation5 + $0x4d0] ss:$8 sps:$4 sm:$0xff]  }
 0x13f   :  { %3539 = vmatprep.subr.bf16.mxu0 %v9701_v60  ;;  %v9786_v60 = vld [vmem:[#allocation5 + $0x4d4] ss:$8 sps:$4 sm:$0xff]  }
 0x142   :  { %3540 = vmatpush1.bf16.msra.mxu0 %v9699_v62  ;;  %v164_v62 = vcombine.high %v10733_v26, %v10733_v26  ;;  %v9817_v26 = vld [vmem:[#allocation5 + $0x580] ss:$8 sps:$4 sm:$0xff]  }
 0x143   :  { %3541 = vmatprep.subr.bf16.mxu0 %v9704_v63  ;;  %v9789_v63 = vld [vmem:[#allocation5 + $0x4e4] ss:$8 sps:$4 sm:$0xff]  }
 0x146   :  { %3542 = vmatpush1.bf16.msra.mxu0 %v9702_v0  ;;  %v9787_v0 = vld [vmem:[#allocation5 + $0x4e0] ss:$8 sps:$4 sm:$0xff]  }
 0x147   :  { %3543 = vmatprep.subr.bf16.mxu0 %v9707_v1  ;;  %v10746_v1 = vrot.slane %v164_v62, %v10706_v16  ;;  %v9868_v62 = vld [vmem:[#allocation5 + $0x684] ss:$8 sps:$4 sm:$0xff]  }
 0x14a   :  { %3544 = vmatpush1.bf16.msra.mxu0 %v9705_v2  ;;  %v9792_v2 = vld [vmem:[#allocation5 + $0x4f4] ss:$8 sps:$4 sm:$0xff]  }
 0x14b   :  { %3545 = vmatprep.subr.bf16.mxu0 %v9710_v3  ;;  %v9790_v3 = vld [vmem:[#allocation5 + $0x4f0] ss:$8 sps:$4 sm:$0xff]  }
 0x14e   :  { %3546 = vmatpush1.bf16.msra.mxu0 %v9708_v4  ;;  %v180_v4 = vcombine.high %v10746_v1, %v10746_v1 }
 0x14f   :  { %3547 = vmatprep.subr.bf16.mxu0 %v9713_v5  ;;  %v9795_v5 = vld [vmem:[#allocation5 + $0x504] ss:$8 sps:$4 sm:$0xff]  }
 0x152   :  { %3548 = vmatpush1.bf16.msra.mxu0 %v9711_v6  ;;  %v306_v6 = vpack.c.bf16 %v10737_v28, %v10737_v28  ;;  %v9820_v28 = vld [vmem:[#allocation5 + $0x590] ss:$8 sps:$4 sm:$0xff]  }
 0x153   :  { %3549 = vmatprep.subr.bf16.mxu0 %v9716_v7  ;;  %v9793_v7 = vld [vmem:[#allocation5 + $0x500] ss:$8 sps:$4 sm:$0xff]  }
 0x156   :  { %3550 = vmatpush1.bf16.msra.mxu0 %v9714_v8  ;;  %v309_v8 = vpack.c.bf16 %v180_v4, %v180_v4  ;;  %v9877_v4 = vld [vmem:[#allocation5 + $0x6b4] ss:$8 sps:$4 sm:$0xff]  }
 0x157   :  { %3551 = vmatprep.subr.bf16.mxu0 %v9719_v9  ;;  %v9798_v9 = vld [vmem:[#allocation5 + $0x514] ss:$8 sps:$4 sm:$0xff]  }
 0x15a   :  { %3552 = vmatpush1.bf16.msra.mxu0 %v9717_v10  ;;  %v9796_v10 = vld [vmem:[#allocation5 + $0x510] ss:$8 sps:$4 sm:$0xff]  }
 0x15b   :  { %3553 = vmatprep.subr.bf16.mxu0 %v9722_v11  ;;  %v9801_v11 = vld [vmem:[#allocation5 + $0x524] ss:$8 sps:$4 sm:$0xff]  }
 0x15e   :  { %3554 = vmatpush1.bf16.msra.mxu0 %v9720_v12  ;;  %v9799_v12 = vld [vmem:[#allocation5 + $0x520] ss:$8 sps:$4 sm:$0xff]  }
 0x15f   :  { %3555 = vmatprep.subr.bf16.mxu0 %v9725_v14  ;;  %v9804_v14 = vld [vmem:[#allocation5 + $0x534] ss:$8 sps:$4 sm:$0xff]  }
 0x162   :  { %3556 = vmatpush1.bf16.msra.mxu0 %v9723_v15  ;;  %v9802_v15 = vld [vmem:[#allocation5 + $0x530] ss:$8 sps:$4 sm:$0xff]  }
 0x163   :  { %3557 = vmatprep.subr.bf16.mxu0 %v9728_v17  ;;  %v9807_v17 = vld [vmem:[#allocation5 + $0x544] ss:$8 sps:$4 sm:$0xff]  }
 0x166   :  { %3558 = vmatpush1.bf16.msra.mxu0 %v9726_v18  ;;  %v9805_v18 = vld [vmem:[#allocation5 + $0x540] ss:$8 sps:$4 sm:$0xff]  }
 0x167   :  { %3559 = vmatprep.subr.bf16.mxu0 %v9731_v19  ;;  %v9810_v19 = vld [vmem:[#allocation5 + $0x554] ss:$8 sps:$4 sm:$0xff]  }
 0x16a   :  { %3560 = vmatpush1.bf16.msra.mxu0 %v9729_v20  ;;  %v9808_v20 = vld [vmem:[#allocation5 + $0x550] ss:$8 sps:$4 sm:$0xff]  }
 0x16b   :  { %3561 = vmatprep.subr.bf16.mxu0 %v9734_v21  ;;  %v9813_v21 = vld [vmem:[#allocation5 + $0x564] ss:$8 sps:$4 sm:$0xff]  }
 0x16e   :  { %3562 = vmatpush1.bf16.msra.mxu0 %v9732_v22  ;;  %v9811_v22 = vld [vmem:[#allocation5 + $0x560] ss:$8 sps:$4 sm:$0xff]  }
 0x16f   :  { %3563 = vmatprep.subr.bf16.mxu0 %v9737_v23  ;;  %v9816_v23 = vld [vmem:[#allocation5 + $0x574] ss:$8 sps:$4 sm:$0xff]  }
 0x172   :  { %3564 = vmatpush1.bf16.msra.mxu0 %v9735_v24  ;;  %v9814_v24 = vld [vmem:[#allocation5 + $0x570] ss:$8 sps:$4 sm:$0xff]  }
 0x173   :  { %3565 = vmatprep.subr.bf16.mxu0 %v9740_v25  ;;  %v9819_v25 = vld [vmem:[#allocation5 + $0x584] ss:$8 sps:$4 sm:$0xff]  }
 0x176   :  { %3566 = vmatpush1.bf16.msra.mxu0 %v9738_v27  ;;  %v9822_v27 = vld [vmem:[#allocation5 + $0x594] ss:$8 sps:$4 sm:$0xff]  }
 0x177   :  { %3567 = vmatprep.subr.bf16.mxu0 %v9743_v29  ;;  %v9825_v29 = vld [vmem:[#allocation5 + $0x5a4] ss:$8 sps:$4 sm:$0xff]  }
 0x17a   :  { %3568 = vmatpush1.bf16.msra.mxu0 %v9741_v30  ;;  %v9823_v30 = vld [vmem:[#allocation5 + $0x5a0] ss:$8 sps:$4 sm:$0xff]  }
 0x17b   :  { %3578 = vmatprep.subr.bf16.mxu0 %v9747_v32  ;;  %v9826_v32 = vld [vmem:[#allocation5 + $0x5b0] ss:$8 sps:$4 sm:$0xff]  }
 0x17d   :  { %3570 = vmatmul.mubr.bf16.vlgmr.msra.gmra.mrb[0].mxu0 %v304_v33  ;;  %v9831_v33 = vld [vmem:[#allocation5 + $0x5c4] ss:$8 sps:$4 sm:$0xff]  }
 0x17e   :  { %3579 = vmatpush1.bf16.msra.mxu0 %v9745_v34  ;;  %3610 = vmatprep.mubr.bf16.mxu0 %v307_v35  ;;  %v9829_v34 = vld [vmem:[#allocation5 + $0x5c0] ss:$8 sps:$4 sm:$0xff]   ;;  %v9834_v35 = vld [vmem:[#allocation5 + $0x5d4] ss:$8 sps:$4 sm:$0xff]  }
 0x17f   :  { %3580 = vmatprep.subr.bf16.mxu0 %v9750_v36  ;;  %v9832_v36 = vld [vmem:[#allocation5 + $0x5d0] ss:$8 sps:$4 sm:$0xff]  }
 0x182   :  { %3581 = vmatpush1.bf16.msra.mxu0 %v9748_v37  ;;  %v9837_v37 = vld [vmem:[#allocation5 + $0x5e4] ss:$8 sps:$4 sm:$0xff]  }
 0x183   :  { %3582 = vmatprep.subr.bf16.mxu0 %v9753_v38  ;;  %v10752_v38 = vld [vmem:[#allocation2 + $0x18] sm:$0xff] }
 0x186   :  { %3583 = vmatpush1.bf16.msra.mxu0 %v9751_v39  ;;  %v9835_v39 = vld [vmem:[#allocation5 + $0x5e0] ss:$8 sps:$4 sm:$0xff]  }
 0x187   :  { %3584 = vmatprep.subr.bf16.mxu0 %v9756_v40  ;;  %v10756_v40 = vrot.slane %v10752_v38, %v10706_v16 }
 0x18a   :  { %3585 = vmatpush1.bf16.msra.mxu0 %v9754_v41  ;;  %v9840_v41 = vld [vmem:[#allocation5 + $0x5f4] ss:$8 sps:$4 sm:$0xff]  }
 0x18b   :  { %3586 = vmatprep.subr.bf16.mxu0 %v9759_v42  ;;  %v9838_v42 = vld [vmem:[#allocation5 + $0x5f0] ss:$8 sps:$4 sm:$0xff]  }
 0x18e   :  { %3587 = vmatpush1.bf16.msra.mxu0 %v9757_v43  ;;  %v196_v43 = vcombine.high %v10756_v40, %v10756_v40 }
 0x18f   :  { %3588 = vmatprep.subr.bf16.mxu0 %v9762_v44  ;;  %v9844_v44 = vld [vmem:[#allocation5 + $0x604] ss:$8 sps:$4 sm:$0xff]  }
 0x192   :  { %3589 = vmatpush1.bf16.msra.mxu0 %v9760_v45  ;;  %v308_v45 = vpack.c.bf16 %v10746_v1, %v10746_v1  ;;  %v9869_v1 = vld [vmem:[#allocation5 + $0x690] ss:$8 sps:$4 sm:$0xff]  }
 0x193   :  { %3590 = vmatprep.subr.bf16.mxu0 %v9765_v46  ;;  %v9842_v46 = vld [vmem:[#allocation5 + $0x600] ss:$8 sps:$4 sm:$0xff]  }
 0x196   :  { %3591 = vmatpush1.bf16.msra.mxu0 %v9763_v47  ;;  %v311_v47 = vpack.c.bf16 %v196_v43, %v196_v43  ;;  %v9925_v43 = vld [vmem:[#allocation5 + $0x7b4] ss:$8 sps:$4 sm:$0xff]  }
 0x197   :  { %3592 = vmatprep.subr.bf16.mxu0 %v9768_v48  ;;  %v9847_v48 = vld [vmem:[#allocation5 + $0x614] ss:$8 sps:$4 sm:$0xff]  }
 0x19a   :  { %3593 = vmatpush1.bf16.msra.mxu0 %v9766_v49  ;;  %v9845_v49 = vld [vmem:[#allocation5 + $0x610] ss:$8 sps:$4 sm:$0xff]  }
 0x19b   :  { %3594 = vmatprep.subr.bf16.mxu0 %v9771_v50  ;;  %v9850_v50 = vld [vmem:[#allocation5 + $0x624] ss:$8 sps:$4 sm:$0xff]  }
 0x19e   :  { %3595 = vmatpush1.bf16.msra.mxu0 %v9769_v51  ;;  %v9848_v51 = vld [vmem:[#allocation5 + $0x620] ss:$8 sps:$4 sm:$0xff]  }
 0x19f   :  { %3596 = vmatprep.subr.bf16.mxu0 %v9774_v52  ;;  %v9853_v52 = vld [vmem:[#allocation5 + $0x634] ss:$8 sps:$4 sm:$0xff]  }
 0x1a2   :  { %3597 = vmatpush1.bf16.msra.mxu0 %v9772_v53  ;;  %v9851_v53 = vld [vmem:[#allocation5 + $0x630] ss:$8 sps:$4 sm:$0xff]  }
 0x1a3   :  { %3598 = vmatprep.subr.bf16.mxu0 %v9777_v54  ;;  %v9856_v54 = vld [vmem:[#allocation5 + $0x644] ss:$8 sps:$4 sm:$0xff]  }
 0x1a6   :  { %3599 = vmatpush1.bf16.msra.mxu0 %v9775_v55  ;;  %v9854_v55 = vld [vmem:[#allocation5 + $0x640] ss:$8 sps:$4 sm:$0xff]  }
 0x1a7   :  { %3600 = vmatprep.subr.bf16.mxu0 %v9780_v56  ;;  %v9859_v56 = vld [vmem:[#allocation5 + $0x654] ss:$8 sps:$4 sm:$0xff]  }
 0x1aa   :  { %3601 = vmatpush1.bf16.msra.mxu0 %v9778_v57  ;;  %v9857_v57 = vld [vmem:[#allocation5 + $0x650] ss:$8 sps:$4 sm:$0xff]  }
 0x1ab   :  { %3602 = vmatprep.subr.bf16.mxu0 %v9783_v58  ;;  %v9862_v58 = vld [vmem:[#allocation5 + $0x664] ss:$8 sps:$4 sm:$0xff]  }
 0x1ae   :  { %3603 = vmatpush1.bf16.msra.mxu0 %v9781_v59  ;;  %v9860_v59 = vld [vmem:[#allocation5 + $0x660] ss:$8 sps:$4 sm:$0xff]  }
 0x1af   :  { %3604 = vmatprep.subr.bf16.mxu0 %v9786_v60  ;;  %v9865_v60 = vld [vmem:[#allocation5 + $0x674] ss:$8 sps:$4 sm:$0xff]  }
 0x1b2   :  { %3605 = vmatpush1.bf16.msra.mxu0 %v9784_v61  ;;  %v9863_v61 = vld [vmem:[#allocation5 + $0x670] ss:$8 sps:$4 sm:$0xff]  }
 0x1b3   :  { %3606 = vmatprep.subr.bf16.mxu0 %v9789_v63  ;;  %v9866_v63 = vld [vmem:[#allocation5 + $0x680] ss:$8 sps:$4 sm:$0xff]  }
 0x1b6   :  { %3607 = vmatpush1.bf16.msra.mxu0 %v9787_v0  ;;  %v9871_v0 = vld [vmem:[#allocation5 + $0x694] ss:$8 sps:$4 sm:$0xff]  }
 0x1b7   :  { %3608 = vmatprep.subr.bf16.mxu0 %v9792_v2  ;;  %v9874_v2 = vld [vmem:[#allocation5 + $0x6a4] ss:$8 sps:$4 sm:$0xff]  }
 0x1ba   :  { %3609 = vmatpush1.bf16.msra.mxu0 %v9790_v3  ;;  %v9872_v3 = vld [vmem:[#allocation5 + $0x6a0] ss:$8 sps:$4 sm:$0xff]  }
 0x1bb   :  { %3619 = vmatprep.subr.bf16.mxu0 %v9795_v5  ;;  %v9875_v5 = vld [vmem:[#allocation5 + $0x6b0] ss:$8 sps:$4 sm:$0xff]  }
 0x1bd   :  { %3611 = vmatmul.mubr.bf16.vlgmr.msra.gmra.mrb[0].mxu0 %v306_v6  ;;  %v9880_v6 = vld [vmem:[#allocation5 + $0x6c4] ss:$8 sps:$4 sm:$0xff]  }
 0x1be   :  { %3620 = vmatpush1.bf16.msra.mxu0 %v9793_v7  ;;  %3651 = vmatprep.mubr.bf16.mxu0 %v309_v8  ;;  %v9878_v7 = vld [vmem:[#allocation5 + $0x6c0] ss:$8 sps:$4 sm:$0xff]   ;;  %v9883_v8 = vld [vmem:[#allocation5 + $0x6d4] ss:$8 sps:$4 sm:$0xff]  }
 0x1bf   :  { %3621 = vmatprep.subr.bf16.mxu0 %v9798_v9  ;;  %v9881_v9 = vld [vmem:[#allocation5 + $0x6d0] ss:$8 sps:$4 sm:$0xff]  }
 0x1c2   :  { %3622 = vmatpush1.bf16.msra.mxu0 %v9796_v10  ;;  %v181_v10 = vcombine.high %v10752_v38, %v10752_v38  ;;  %v9914_v38 = vld [vmem:[#allocation5 + $0x780] ss:$8 sps:$4 sm:$0xff]  }
 0x1c3   :  { %3623 = vmatprep.subr.bf16.mxu0 %v9801_v11  ;;  %v9886_v11 = vld [vmem:[#allocation5 + $0x6e4] ss:$8 sps:$4 sm:$0xff]  }
 0x1c6   :  { %3624 = vmatpush1.bf16.msra.mxu0 %v9799_v12  ;;  %v9884_v12 = vld [vmem:[#allocation5 + $0x6e0] ss:$8 sps:$4 sm:$0xff]  }
 0x1c7   :  { %3625 = vmatprep.subr.bf16.mxu0 %v9804_v14  ;;  %v10765_v14 = vrot.slane %v181_v10, %v10706_v16  ;;  %v9965_v10 = vld [vmem:[#allocation5 + $0x884] ss:$8 sps:$4 sm:$0xff]  }
 0x1ca   :  { %3626 = vmatpush1.bf16.msra.mxu0 %v9802_v15  ;;  %v9889_v15 = vld [vmem:[#allocation5 + $0x6f4] ss:$8 sps:$4 sm:$0xff]  }
 0x1cb   :  { %3627 = vmatprep.subr.bf16.mxu0 %v9807_v17  ;;  %v9887_v17 = vld [vmem:[#allocation5 + $0x6f0] ss:$8 sps:$4 sm:$0xff]  }
 0x1ce   :  { %3628 = vmatpush1.bf16.msra.mxu0 %v9805_v18  ;;  %v197_v18 = vcombine.high %v10765_v14, %v10765_v14 }
 0x1cf   :  { %3629 = vmatprep.subr.bf16.mxu0 %v9810_v19  ;;  %v9892_v19 = vld [vmem:[#allocation5 + $0x704] ss:$8 sps:$4 sm:$0xff]  }
 0x1d2   :  { %3630 = vmatpush1.bf16.msra.mxu0 %v9808_v20  ;;  %v310_v20 = vpack.c.bf16 %v10756_v40, %v10756_v40  ;;  %v9917_v40 = vld [vmem:[#allocation5 + $0x790] ss:$8 sps:$4 sm:$0xff]  }
 0x1d3   :  { %3631 = vmatprep.subr.bf16.mxu0 %v9813_v21  ;;  %v9890_v21 = vld [vmem:[#allocation5 + $0x700] ss:$8 sps:$4 sm:$0xff]  }
 0x1d6   :  { %3632 = vmatpush1.bf16.msra.mxu0 %v9811_v22  ;;  %v313_v22 = vpack.c.bf16 %v197_v18, %v197_v18  ;;  %v9974_v18 = vld [vmem:[#allocation5 + $0x8b4] ss:$8 sps:$4 sm:$0xff]  }
 0x1d7   :  { %3633 = vmatprep.subr.bf16.mxu0 %v9816_v23  ;;  %v9895_v23 = vld [vmem:[#allocation5 + $0x714] ss:$8 sps:$4 sm:$0xff]  }
 0x1da   :  { %3634 = vmatpush1.bf16.msra.mxu0 %v9814_v24  ;;  %v9893_v24 = vld [vmem:[#allocation5 + $0x710] ss:$8 sps:$4 sm:$0xff]  }
 0x1db   :  { %3635 = vmatprep.subr.bf16.mxu0 %v9819_v25  ;;  %v9898_v25 = vld [vmem:[#allocation5 + $0x724] ss:$8 sps:$4 sm:$0xff]  }
 0x1de   :  { %3636 = vmatpush1.bf16.msra.mxu0 %v9817_v26  ;;  %v9896_v26 = vld [vmem:[#allocation5 + $0x720] ss:$8 sps:$4 sm:$0xff]  }
 0x1df   :  { %3637 = vmatprep.subr.bf16.mxu0 %v9822_v27  ;;  %v9901_v27 = vld [vmem:[#allocation5 + $0x734] ss:$8 sps:$4 sm:$0xff]  }
 0x1e2   :  { %3638 = vmatpush1.bf16.msra.mxu0 %v9820_v28  ;;  %v9899_v28 = vld [vmem:[#allocation5 + $0x730] ss:$8 sps:$4 sm:$0xff]  }
 0x1e3   :  { %3639 = vmatprep.subr.bf16.mxu0 %v9825_v29  ;;  %v9904_v29 = vld [vmem:[#allocation5 + $0x744] ss:$8 sps:$4 sm:$0xff]  }
 0x1e6   :  { %3640 = vmatpush1.bf16.msra.mxu0 %v9823_v30  ;;  %v9902_v30 = vld [vmem:[#allocation5 + $0x740] ss:$8 sps:$4 sm:$0xff]  }
 0x1e7   :  { %3641 = vmatprep.subr.bf16.mxu0 %v9828_v31  ;;  %v9907_v31 = vld [vmem:[#allocation5 + $0x754] ss:$8 sps:$4 sm:$0xff]  }
 0x1ea   :  { %3642 = vmatpush1.bf16.msra.mxu0 %v9826_v32  ;;  %v9905_v32 = vld [vmem:[#allocation5 + $0x750] ss:$8 sps:$4 sm:$0xff]  }
 0x1eb   :  { %3643 = vmatprep.subr.bf16.mxu0 %v9831_v33  ;;  %v9910_v33 = vld [vmem:[#allocation5 + $0x764] ss:$8 sps:$4 sm:$0xff]  }
 0x1ee   :  { %3644 = vmatpush1.bf16.msra.mxu0 %v9829_v34  ;;  %v9908_v34 = vld [vmem:[#allocation5 + $0x760] ss:$8 sps:$4 sm:$0xff]  }
 0x1ef   :  { %3645 = vmatprep.subr.bf16.mxu0 %v9834_v35  ;;  %v9913_v35 = vld [vmem:[#allocation5 + $0x774] ss:$8 sps:$4 sm:$0xff]  }
 0x1f2   :  { %3646 = vmatpush1.bf16.msra.mxu0 %v9832_v36  ;;  %v9911_v36 = vld [vmem:[#allocation5 + $0x770] ss:$8 sps:$4 sm:$0xff]  }
 0x1f3   :  { %3647 = vmatprep.subr.bf16.mxu0 %v9837_v37  ;;  %v9916_v37 = vld [vmem:[#allocation5 + $0x784] ss:$8 sps:$4 sm:$0xff]  }
 0x1f6   :  { %3648 = vmatpush1.bf16.msra.mxu0 %v9835_v39  ;;  %v9919_v39 = vld [vmem:[#allocation5 + $0x794] ss:$8 sps:$4 sm:$0xff]  }
 0x1f7   :  { %3649 = vmatprep.subr.bf16.mxu0 %v9840_v41  ;;  %v9922_v41 = vld [vmem:[#allocation5 + $0x7a4] ss:$8 sps:$4 sm:$0xff]  }
 0x1fa   :  { %3650 = vmatpush1.bf16.msra.mxu0 %v9838_v42  ;;  %v9920_v42 = vld [vmem:[#allocation5 + $0x7a0] ss:$8 sps:$4 sm:$0xff]  }
 0x1fb   :  { %3660 = vmatprep.subr.bf16.mxu0 %v9844_v44  ;;  %v9923_v44 = vld [vmem:[#allocation5 + $0x7b0] ss:$8 sps:$4 sm:$0xff]  }
 0x1fd   :  { %3652 = vmatmul.mubr.bf16.vlgmr.msra.gmra.mrb[0].mxu0 %v308_v45  ;;  %v9928_v45 = vld [vmem:[#allocation5 + $0x7c4] ss:$8 sps:$4 sm:$0xff]  }
 0x1fe   :  { %3661 = vmatpush1.bf16.msra.mxu0 %v9842_v46  ;;  %3692 = vmatprep.mubr.bf16.mxu0 %v311_v47  ;;  %v9926_v46 = vld [vmem:[#allocation5 + $0x7c0] ss:$8 sps:$4 sm:$0xff]   ;;  %v9931_v47 = vld [vmem:[#allocation5 + $0x7d4] ss:$8 sps:$4 sm:$0xff]  }
 0x1ff   :  { %3662 = vmatprep.subr.bf16.mxu0 %v9847_v48  ;;  %v9929_v48 = vld [vmem:[#allocation5 + $0x7d0] ss:$8 sps:$4 sm:$0xff]  }
 0x202   :  { %3663 = vmatpush1.bf16.msra.mxu0 %v9845_v49  ;;  %v9934_v49 = vld [vmem:[#allocation5 + $0x7e4] ss:$8 sps:$4 sm:$0xff]  }
 0x203   :  { %3664 = vmatprep.subr.bf16.mxu0 %v9850_v50  ;;  %v10771_v50 = vld [vmem:[#allocation2 + $0x20] sm:$0xff] }
 0x206   :  { %3665 = vmatpush1.bf16.msra.mxu0 %v9848_v51  ;;  %v9932_v51 = vld [vmem:[#allocation5 + $0x7e0] ss:$8 sps:$4 sm:$0xff]  }
 0x207   :  { %3666 = vmatprep.subr.bf16.mxu0 %v9853_v52  ;;  %v10775_v52 = vrot.slane %v10771_v50, %v10706_v16 }
 0x20a   :  { %3667 = vmatpush1.bf16.msra.mxu0 %v9851_v53  ;;  %v9937_v53 = vld [vmem:[#allocation5 + $0x7f4] ss:$8 sps:$4 sm:$0xff]  }
 0x20b   :  { %3668 = vmatprep.subr.bf16.mxu0 %v9856_v54  ;;  %v9935_v54 = vld [vmem:[#allocation5 + $0x7f0] ss:$8 sps:$4 sm:$0xff]  }
 0x20e   :  { %3669 = vmatpush1.bf16.msra.mxu0 %v9854_v55  ;;  %v213_v55 = vcombine.high %v10775_v52, %v10775_v52 }
 0x20f   :  { %3670 = vmatprep.subr.bf16.mxu0 %v9859_v56  ;;  %v9941_v56 = vld [vmem:[#allocation5 + $0x804] ss:$8 sps:$4 sm:$0xff]  }
 0x212   :  { %3671 = vmatpush1.bf16.msra.mxu0 %v9857_v57  ;;  %v312_v57 = vpack.c.bf16 %v10765_v14, %v10765_v14  ;;  %v9966_v14 = vld [vmem:[#allocation5 + $0x890] ss:$8 sps:$4 sm:$0xff]  }
 0x213   :  { %3672 = vmatprep.subr.bf16.mxu0 %v9862_v58  ;;  %v9939_v58 = vld [vmem:[#allocation5 + $0x800] ss:$8 sps:$4 sm:$0xff]  }
 0x216   :  { %3673 = vmatpush1.bf16.msra.mxu0 %v9860_v59  ;;  %v315_v59 = vpack.c.bf16 %v213_v55, %v213_v55  ;;  %v10022_v55 = vld [vmem:[#allocation5 + $0x9b4] ss:$8 sps:$4 sm:$0xff]  }
 0x217   :  { %3674 = vmatprep.subr.bf16.mxu0 %v9865_v60  ;;  %v9944_v60 = vld [vmem:[#allocation5 + $0x814] ss:$8 sps:$4 sm:$0xff]  }
 0x21a   :  { %3675 = vmatpush1.bf16.msra.mxu0 %v9863_v61  ;;  %v9942_v61 = vld [vmem:[#allocation5 + $0x810] ss:$8 sps:$4 sm:$0xff]  }
 0x21b   :  { %3676 = vmatprep.subr.bf16.mxu0 %v9868_v62  ;;  %v9947_v62 = vld [vmem:[#allocation5 + $0x824] ss:$8 sps:$4 sm:$0xff]  }
 0x21e   :  { %3677 = vmatpush1.bf16.msra.mxu0 %v9866_v63  ;;  %v9945_v63 = vld [vmem:[#allocation5 + $0x820] ss:$8 sps:$4 sm:$0xff]  }
 0x21f   :  { %3678 = vmatprep.subr.bf16.mxu0 %v9871_v0  ;;  %v9950_v0 = vld [vmem:[#allocation5 + $0x834] ss:$8 sps:$4 sm:$0xff]  }
 0x222   :  { %3679 = vmatpush1.bf16.msra.mxu0 %v9869_v1  ;;  %v9948_v1 = vld [vmem:[#allocation5 + $0x830] ss:$8 sps:$4 sm:$0xff]  }
 0x223   :  { %3680 = vmatprep.subr.bf16.mxu0 %v9874_v2  ;;  %v9953_v2 = vld [vmem:[#allocation5 + $0x844] ss:$8 sps:$4 sm:$0xff]  }
 0x226   :  { %3681 = vmatpush1.bf16.msra.mxu0 %v9872_v3  ;;  %v9951_v3 = vld [vmem:[#allocation5 + $0x840] ss:$8 sps:$4 sm:$0xff]  }
 0x227   :  { %3682 = vmatprep.subr.bf16.mxu0 %v9877_v4  ;;  %v9956_v4 = vld [vmem:[#allocation5 + $0x854] ss:$8 sps:$4 sm:$0xff]  }
 0x22a   :  { %3683 = vmatpush1.bf16.msra.mxu0 %v9875_v5  ;;  %v9954_v5 = vld [vmem:[#allocation5 + $0x850] ss:$8 sps:$4 sm:$0xff]  }
 0x22b   :  { %3684 = vmatprep.subr.bf16.mxu0 %v9880_v6  ;;  %v9959_v6 = vld [vmem:[#allocation5 + $0x864] ss:$8 sps:$4 sm:$0xff]  }
 0x22e   :  { %3685 = vmatpush1.bf16.msra.mxu0 %v9878_v7  ;;  %v9957_v7 = vld [vmem:[#allocation5 + $0x860] ss:$8 sps:$4 sm:$0xff]  }
 0x22f   :  { %3686 = vmatprep.subr.bf16.mxu0 %v9883_v8  ;;  %v9962_v8 = vld [vmem:[#allocation5 + $0x874] ss:$8 sps:$4 sm:$0xff]  }
 0x232   :  { %3687 = vmatpush1.bf16.msra.mxu0 %v9881_v9  ;;  %v9960_v9 = vld [vmem:[#allocation5 + $0x870] ss:$8 sps:$4 sm:$0xff]  }
 0x233   :  { %3688 = vmatprep.subr.bf16.mxu0 %v9886_v11  ;;  %v9963_v11 = vld [vmem:[#allocation5 + $0x880] ss:$8 sps:$4 sm:$0xff]  }
 0x236   :  { %3689 = vmatpush1.bf16.msra.mxu0 %v9884_v12  ;;  %v9968_v12 = vld [vmem:[#allocation5 + $0x894] ss:$8 sps:$4 sm:$0xff]  }
 0x237   :  { %3690 = vmatprep.subr.bf16.mxu0 %v9889_v15  ;;  %v9971_v15 = vld [vmem:[#allocation5 + $0x8a4] ss:$8 sps:$4 sm:$0xff]  }
 0x23a   :  { %3691 = vmatpush1.bf16.msra.mxu0 %v9887_v17  ;;  %v9969_v17 = vld [vmem:[#allocation5 + $0x8a0] ss:$8 sps:$4 sm:$0xff]  }
 0x23b   :  { %3701 = vmatprep.subr.bf16.mxu0 %v9892_v19  ;;  %v9972_v19 = vld [vmem:[#allocation5 + $0x8b0] ss:$8 sps:$4 sm:$0xff]  }
 0x23d   :  { %3693 = vmatmul.mubr.bf16.vlgmr.msra.gmra.mrb[0].mxu0 %v310_v20  ;;  %v9977_v20 = vld [vmem:[#allocation5 + $0x8c4] ss:$8 sps:$4 sm:$0xff]  }
 0x23e   :  { %3702 = vmatpush1.bf16.msra.mxu0 %v9890_v21  ;;  %3733 = vmatprep.mubr.bf16.mxu0 %v313_v22  ;;  %v9975_v21 = vld [vmem:[#allocation5 + $0x8c0] ss:$8 sps:$4 sm:$0xff]   ;;  %v9980_v22 = vld [vmem:[#allocation5 + $0x8d4] ss:$8 sps:$4 sm:$0xff]  }
 0x23f   :  { %3703 = vmatprep.subr.bf16.mxu0 %v9895_v23  ;;  %v9978_v23 = vld [vmem:[#allocation5 + $0x8d0] ss:$8 sps:$4 sm:$0xff]  }
 0x242   :  { %3704 = vmatpush1.bf16.msra.mxu0 %v9893_v24  ;;  %v198_v24 = vcombine.high %v10771_v50, %v10771_v50  ;;  %v10011_v50 = vld [vmem:[#allocation5 + $0x980] ss:$8 sps:$4 sm:$0xff]  }
 0x243   :  { %3705 = vmatprep.subr.bf16.mxu0 %v9898_v25  ;;  %v9983_v25 = vld [vmem:[#allocation5 + $0x8e4] ss:$8 sps:$4 sm:$0xff]  }
 0x246   :  { %3706 = vmatpush1.bf16.msra.mxu0 %v9896_v26  ;;  %v9981_v26 = vld [vmem:[#allocation5 + $0x8e0] ss:$8 sps:$4 sm:$0xff]  }
 0x247   :  { %3707 = vmatprep.subr.bf16.mxu0 %v9901_v27  ;;  %v10784_v27 = vrot.slane %v198_v24, %v10706_v16  ;;  %v10062_v24 = vld [vmem:[#allocation5 + $0xa84] ss:$8 sps:$4 sm:$0xff]  }
 0x24a   :  { %3708 = vmatpush1.bf16.msra.mxu0 %v9899_v28  ;;  %v9986_v28 = vld [vmem:[#allocation5 + $0x8f4] ss:$8 sps:$4 sm:$0xff]  }
 0x24b   :  { %3709 = vmatprep.subr.bf16.mxu0 %v9904_v29  ;;  %v9984_v29 = vld [vmem:[#allocation5 + $0x8f0] ss:$8 sps:$4 sm:$0xff]  }
 0x24e   :  { %3710 = vmatpush1.bf16.msra.mxu0 %v9902_v30  ;;  %v214_v30 = vcombine.high %v10784_v27, %v10784_v27 }
 0x24f   :  { %3711 = vmatprep.subr.bf16.mxu0 %v9907_v31  ;;  %v9989_v31 = vld [vmem:[#allocation5 + $0x904] ss:$8 sps:$4 sm:$0xff]  }
 0x252   :  { %3712 = vmatpush1.bf16.msra.mxu0 %v9905_v32  ;;  %v314_v32 = vpack.c.bf16 %v10775_v52, %v10775_v52  ;;  %v10014_v52 = vld [vmem:[#allocation5 + $0x990] ss:$8 sps:$4 sm:$0xff]  }
 0x253   :  { %3713 = vmatprep.subr.bf16.mxu0 %v9910_v33  ;;  %v9987_v33 = vld [vmem:[#allocation5 + $0x900] ss:$8 sps:$4 sm:$0xff]  }
 0x256   :  { %3714 = vmatpush1.bf16.msra.mxu0 %v9908_v34  ;;  %v317_v34 = vpack.c.bf16 %v214_v30, %v214_v30  ;;  %v10071_v30 = vld [vmem:[#allocation5 + $0xab4] ss:$8 sps:$4 sm:$0xff]  }
 0x257   :  { %3715 = vmatprep.subr.bf16.mxu0 %v9913_v35  ;;  %v9992_v35 = vld [vmem:[#allocation5 + $0x914] ss:$8 sps:$4 sm:$0xff]  }
 0x25a   :  { %3716 = vmatpush1.bf16.msra.mxu0 %v9911_v36  ;;  %v9990_v36 = vld [vmem:[#allocation5 + $0x910] ss:$8 sps:$4 sm:$0xff]  }
 0x25b   :  { %3717 = vmatprep.subr.bf16.mxu0 %v9916_v37  ;;  %v9995_v37 = vld [vmem:[#allocation5 + $0x924] ss:$8 sps:$4 sm:$0xff]  }
 0x25e   :  { %3718 = vmatpush1.bf16.msra.mxu0 %v9914_v38  ;;  %v9993_v38 = vld [vmem:[#allocation5 + $0x920] ss:$8 sps:$4 sm:$0xff]  }
 0x25f   :  { %3719 = vmatprep.subr.bf16.mxu0 %v9919_v39  ;;  %v9998_v39 = vld [vmem:[#allocation5 + $0x934] ss:$8 sps:$4 sm:$0xff]  }
 0x262   :  { %3720 = vmatpush1.bf16.msra.mxu0 %v9917_v40  ;;  %v9996_v40 = vld [vmem:[#allocation5 + $0x930] ss:$8 sps:$4 sm:$0xff]  }
 0x263   :  { %3721 = vmatprep.subr.bf16.mxu0 %v9922_v41  ;;  %v10001_v41 = vld [vmem:[#allocation5 + $0x944] ss:$8 sps:$4 sm:$0xff]  }
 0x266   :  { %3722 = vmatpush1.bf16.msra.mxu0 %v9920_v42  ;;  %v9999_v42 = vld [vmem:[#allocation5 + $0x940] ss:$8 sps:$4 sm:$0xff]  }
 0x267   :  { %3723 = vmatprep.subr.bf16.mxu0 %v9925_v43  ;;  %v10004_v43 = vld [vmem:[#allocation5 + $0x954] ss:$8 sps:$4 sm:$0xff]  }
 0x26a   :  { %3724 = vmatpush1.bf16.msra.mxu0 %v9923_v44  ;;  %v10002_v44 = vld [vmem:[#allocation5 + $0x950] ss:$8 sps:$4 sm:$0xff]  }
 0x26b   :  { %3725 = vmatprep.subr.bf16.mxu0 %v9928_v45  ;;  %v10007_v45 = vld [vmem:[#allocation5 + $0x964] ss:$8 sps:$4 sm:$0xff]  }
 0x26e   :  { %3726 = vmatpush1.bf16.msra.mxu0 %v9926_v46  ;;  %v10005_v46 = vld [vmem:[#allocation5 + $0x960] ss:$8 sps:$4 sm:$0xff]  }
 0x26f   :  { %3727 = vmatprep.subr.bf16.mxu0 %v9931_v47  ;;  %v10010_v47 = vld [vmem:[#allocation5 + $0x974] ss:$8 sps:$4 sm:$0xff]  }
 0x272   :  { %3728 = vmatpush1.bf16.msra.mxu0 %v9929_v48  ;;  %v10008_v48 = vld [vmem:[#allocation5 + $0x970] ss:$8 sps:$4 sm:$0xff]  }
 0x273   :  { %3729 = vmatprep.subr.bf16.mxu0 %v9934_v49  ;;  %v10013_v49 = vld [vmem:[#allocation5 + $0x984] ss:$8 sps:$4 sm:$0xff]  }
 0x276   :  { %3730 = vmatpush1.bf16.msra.mxu0 %v9932_v51  ;;  %v10016_v51 = vld [vmem:[#allocation5 + $0x994] ss:$8 sps:$4 sm:$0xff]  }
 0x277   :  { %3731 = vmatprep.subr.bf16.mxu0 %v9937_v53  ;;  %v10019_v53 = vld [vmem:[#allocation5 + $0x9a4] ss:$8 sps:$4 sm:$0xff]  }
 0x27a   :  { %3732 = vmatpush1.bf16.msra.mxu0 %v9935_v54  ;;  %v10017_v54 = vld [vmem:[#allocation5 + $0x9a0] ss:$8 sps:$4 sm:$0xff]  }
 0x27b   :  { %3742 = vmatprep.subr.bf16.mxu0 %v9941_v56  ;;  %v10020_v56 = vld [vmem:[#allocation5 + $0x9b0] ss:$8 sps:$4 sm:$0xff]  }
 0x27d   :  { %3734 = vmatmul.mubr.bf16.vlgmr.msra.gmra.mrb[0].mxu0 %v312_v57  ;;  %v10025_v57 = vld [vmem:[#allocation5 + $0x9c4] ss:$8 sps:$4 sm:$0xff]  }
 0x27e   :  { %3743 = vmatpush1.bf16.msra.mxu0 %v9939_v58  ;;  %3774 = vmatprep.mubr.bf16.mxu0 %v315_v59  ;;  %v10023_v58 = vld [vmem:[#allocation5 + $0x9c0] ss:$8 sps:$4 sm:$0xff]   ;;  %v10028_v59 = vld [vmem:[#allocation5 + $0x9d4] ss:$8 sps:$4 sm:$0xff]  }
 0x27f   :  { %3744 = vmatprep.subr.bf16.mxu0 %v9944_v60  ;;  %v10026_v60 = vld [vmem:[#allocation5 + $0x9d0] ss:$8 sps:$4 sm:$0xff]  }
 0x282   :  { %3745 = vmatpush1.bf16.msra.mxu0 %v9942_v61  ;;  %v10031_v61 = vld [vmem:[#allocation5 + $0x9e4] ss:$8 sps:$4 sm:$0xff]  }
 0x283   :  { %3746 = vmatprep.subr.bf16.mxu0 %v9947_v62  ;;  %v10790_v62 = vld [vmem:[#allocation2 + $0x28] sm:$0xff] }
 0x286   :  { %3747 = vmatpush1.bf16.msra.mxu0 %v9945_v63  ;;  %v10029_v63 = vld [vmem:[#allocation5 + $0x9e0] ss:$8 sps:$4 sm:$0xff]  }
 0x287   :  { %3748 = vmatprep.subr.bf16.mxu0 %v9950_v0  ;;  %v10794_v0 = vrot.slane %v10790_v62, %v10706_v16 }
 0x28a   :  { %3749 = vmatpush1.bf16.msra.mxu0 %v9948_v1  ;;  %v10034_v1 = vld [vmem:[#allocation5 + $0x9f4] ss:$8 sps:$4 sm:$0xff]  }
 0x28b   :  { %3750 = vmatprep.subr.bf16.mxu0 %v9953_v2  ;;  %v10032_v2 = vld [vmem:[#allocation5 + $0x9f0] ss:$8 sps:$4 sm:$0xff]  }
 0x28e   :  { %3751 = vmatpush1.bf16.msra.mxu0 %v9951_v3  ;;  %v230_v3 = vcombine.high %v10794_v0, %v10794_v0 }
 0x28f   :  { %3752 = vmatprep.subr.bf16.mxu0 %v9956_v4  ;;  %v10038_v4 = vld [vmem:[#allocation5 + $0xa04] ss:$8 sps:$4 sm:$0xff]  }
 0x292   :  { %3753 = vmatpush1.bf16.msra.mxu0 %v9954_v5  ;;  %v316_v5 = vpack.c.bf16 %v10784_v27, %v10784_v27  ;;  %v10063_v27 = vld [vmem:[#allocation5 + $0xa90] ss:$8 sps:$4 sm:$0xff]  }
 0x293   :  { %3754 = vmatprep.subr.bf16.mxu0 %v9959_v6  ;;  %v10036_v6 = vld [vmem:[#allocation5 + $0xa00] ss:$8 sps:$4 sm:$0xff]  }
 0x296   :  { %3755 = vmatpush1.bf16.msra.mxu0 %v9957_v7  ;;  %v319_v7 = vpack.c.bf16 %v230_v3, %v230_v3  ;;  %v10119_v3 = vld [vmem:[#allocation5 + $0xbb4] ss:$8 sps:$4 sm:$0xff]  }
 0x297   :  { %3756 = vmatprep.subr.bf16.mxu0 %v9962_v8  ;;  %v10041_v8 = vld [vmem:[#allocation5 + $0xa14] ss:$8 sps:$4 sm:$0xff]  }
 0x29a   :  { %3757 = vmatpush1.bf16.msra.mxu0 %v9960_v9  ;;  %v10039_v9 = vld [vmem:[#allocation5 + $0xa10] ss:$8 sps:$4 sm:$0xff]  }
 0x29b   :  { %3758 = vmatprep.subr.bf16.mxu0 %v9965_v10  ;;  %v10044_v10 = vld [vmem:[#allocation5 + $0xa24] ss:$8 sps:$4 sm:$0xff]  }
 0x29e   :  { %3759 = vmatpush1.bf16.msra.mxu0 %v9963_v11  ;;  %v10042_v11 = vld [vmem:[#allocation5 + $0xa20] ss:$8 sps:$4 sm:$0xff]  }
 0x29f   :  { %3760 = vmatprep.subr.bf16.mxu0 %v9968_v12  ;;  %v10047_v12 = vld [vmem:[#allocation5 + $0xa34] ss:$8 sps:$4 sm:$0xff]  }
 0x2a2   :  { %3761 = vmatpush1.bf16.msra.mxu0 %v9966_v14  ;;  %v10045_v14 = vld [vmem:[#allocation5 + $0xa30] ss:$8 sps:$4 sm:$0xff]  }
 0x2a3   :  { %3762 = vmatprep.subr.bf16.mxu0 %v9971_v15  ;;  %v10050_v15 = vld [vmem:[#allocation5 + $0xa44] ss:$8 sps:$4 sm:$0xff]  }
 0x2a6   :  { %3763 = vmatpush1.bf16.msra.mxu0 %v9969_v17  ;;  %v10048_v17 = vld [vmem:[#allocation5 + $0xa40] ss:$8 sps:$4 sm:$0xff]  }
 0x2a7   :  { %3764 = vmatprep.subr.bf16.mxu0 %v9974_v18  ;;  %v10053_v18 = vld [vmem:[#allocation5 + $0xa54] ss:$8 sps:$4 sm:$0xff]  }
 0x2aa   :  { %3765 = vmatpush1.bf16.msra.mxu0 %v9972_v19  ;;  %v10051_v19 = vld [vmem:[#allocation5 + $0xa50] ss:$8 sps:$4 sm:$0xff]  }
 0x2ab   :  { %3766 = vmatprep.subr.bf16.mxu0 %v9977_v20  ;;  %v10056_v20 = vld [vmem:[#allocation5 + $0xa64] ss:$8 sps:$4 sm:$0xff]  }
 0x2ae   :  { %3767 = vmatpush1.bf16.msra.mxu0 %v9975_v21  ;;  %v10054_v21 = vld [vmem:[#allocation5 + $0xa60] ss:$8 sps:$4 sm:$0xff]  }
 0x2af   :  { %3768 = vmatprep.subr.bf16.mxu0 %v9980_v22  ;;  %v10059_v22 = vld [vmem:[#allocation5 + $0xa74] ss:$8 sps:$4 sm:$0xff]  }
 0x2b2   :  { %3769 = vmatpush1.bf16.msra.mxu0 %v9978_v23  ;;  %v10057_v23 = vld [vmem:[#allocation5 + $0xa70] ss:$8 sps:$4 sm:$0xff]  }
 0x2b3   :  { %3770 = vmatprep.subr.bf16.mxu0 %v9983_v25  ;;  %v10060_v25 = vld [vmem:[#allocation5 + $0xa80] ss:$8 sps:$4 sm:$0xff]  }
 0x2b6   :  { %3771 = vmatpush1.bf16.msra.mxu0 %v9981_v26  ;;  %v10065_v26 = vld [vmem:[#allocation5 + $0xa94] ss:$8 sps:$4 sm:$0xff]  }
 0x2b7   :  { %3772 = vmatprep.subr.bf16.mxu0 %v9986_v28  ;;  %v10068_v28 = vld [vmem:[#allocation5 + $0xaa4] ss:$8 sps:$4 sm:$0xff]  }
 0x2ba   :  { %3773 = vmatpush1.bf16.msra.mxu0 %v9984_v29  ;;  %v10066_v29 = vld [vmem:[#allocation5 + $0xaa0] ss:$8 sps:$4 sm:$0xff]  }
 0x2bb   :  { %3783 = vmatprep.subr.bf16.mxu0 %v9989_v31  ;;  %v10069_v31 = vld [vmem:[#allocation5 + $0xab0] ss:$8 sps:$4 sm:$0xff]  }
 0x2bd   :  { %3775 = vmatmul.mubr.bf16.vlgmr.msra.gmra.mrb[0].mxu0 %v314_v32  ;;  %v10074_v32 = vld [vmem:[#allocation5 + $0xac4] ss:$8 sps:$4 sm:$0xff]  }
 0x2be   :  { %3784 = vmatpush1.bf16.msra.mxu0 %v9987_v33  ;;  %3815 = vmatprep.mubr.bf16.mxu0 %v317_v34  ;;  %v10072_v33 = vld [vmem:[#allocation5 + $0xac0] ss:$8 sps:$4 sm:$0xff]   ;;  %v10077_v34 = vld [vmem:[#allocation5 + $0xad4] ss:$8 sps:$4 sm:$0xff]  }
 0x2bf   :  { %3785 = vmatprep.subr.bf16.mxu0 %v9992_v35  ;;  %v10075_v35 = vld [vmem:[#allocation5 + $0xad0] ss:$8 sps:$4 sm:$0xff]  }
 0x2c2   :  { %3786 = vmatpush1.bf16.msra.mxu0 %v9990_v36  ;;  %v215_v36 = vcombine.high %v10790_v62, %v10790_v62  ;;  %v10108_v62 = vld [vmem:[#allocation5 + $0xb80] ss:$8 sps:$4 sm:$0xff]  }
 0x2c3   :  { %3787 = vmatprep.subr.bf16.mxu0 %v9995_v37  ;;  %v10080_v37 = vld [vmem:[#allocation5 + $0xae4] ss:$8 sps:$4 sm:$0xff]  }
 0x2c6   :  { %3788 = vmatpush1.bf16.msra.mxu0 %v9993_v38  ;;  %v10078_v38 = vld [vmem:[#allocation5 + $0xae0] ss:$8 sps:$4 sm:$0xff]  }
 0x2c7   :  { %3789 = vmatprep.subr.bf16.mxu0 %v9998_v39  ;;  %v10803_v39 = vrot.slane %v215_v36, %v10706_v16  ;;  %v10159_v36 = vld [vmem:[#allocation5 + $0xc84] ss:$8 sps:$4 sm:$0xff]  }
 0x2ca   :  { %3790 = vmatpush1.bf16.msra.mxu0 %v9996_v40  ;;  %v10083_v40 = vld [vmem:[#allocation5 + $0xaf4] ss:$8 sps:$4 sm:$0xff]  }
 0x2cb   :  { %3791 = vmatprep.subr.bf16.mxu0 %v10001_v41  ;;  %v10081_v41 = vld [vmem:[#allocation5 + $0xaf0] ss:$8 sps:$4 sm:$0xff]  }
 0x2ce   :  { %3792 = vmatpush1.bf16.msra.mxu0 %v9999_v42  ;;  %v231_v42 = vcombine.high %v10803_v39, %v10803_v39 }
 0x2cf   :  { %3793 = vmatprep.subr.bf16.mxu0 %v10004_v43  ;;  %v10086_v43 = vld [vmem:[#allocation5 + $0xb04] ss:$8 sps:$4 sm:$0xff]  }
 0x2d2   :  { %3794 = vmatpush1.bf16.msra.mxu0 %v10002_v44  ;;  %v318_v44 = vpack.c.bf16 %v10794_v0, %v10794_v0  ;;  %v10111_v0 = vld [vmem:[#allocation5 + $0xb90] ss:$8 sps:$4 sm:$0xff]  }
 0x2d3   :  { %3795 = vmatprep.subr.bf16.mxu0 %v10007_v45  ;;  %v10084_v45 = vld [vmem:[#allocation5 + $0xb00] ss:$8 sps:$4 sm:$0xff]  }
 0x2d6   :  { %3796 = vmatpush1.bf16.msra.mxu0 %v10005_v46  ;;  %v321_v46 = vpack.c.bf16 %v231_v42, %v231_v42  ;;  %v10168_v42 = vld [vmem:[#allocation5 + $0xcb4] ss:$8 sps:$4 sm:$0xff]  }
 0x2d7   :  { %3797 = vmatprep.subr.bf16.mxu0 %v10010_v47  ;;  %v10089_v47 = vld [vmem:[#allocation5 + $0xb14] ss:$8 sps:$4 sm:$0xff]  }
 0x2da   :  { %3798 = vmatpush1.bf16.msra.mxu0 %v10008_v48  ;;  %v10087_v48 = vld [vmem:[#allocation5 + $0xb10] ss:$8 sps:$4 sm:$0xff]  }
 0x2db   :  { %3799 = vmatprep.subr.bf16.mxu0 %v10013_v49  ;;  %v10092_v49 = vld [vmem:[#allocation5 + $0xb24] ss:$8 sps:$4 sm:$0xff]  }
 0x2de   :  { %3800 = vmatpush1.bf16.msra.mxu0 %v10011_v50  ;;  %v10090_v50 = vld [vmem:[#allocation5 + $0xb20] ss:$8 sps:$4 sm:$0xff]  }
 0x2df   :  { %3801 = vmatprep.subr.bf16.mxu0 %v10016_v51  ;;  %v10095_v51 = vld [vmem:[#allocation5 + $0xb34] ss:$8 sps:$4 sm:$0xff]  }
 0x2e2   :  { %3802 = vmatpush1.bf16.msra.mxu0 %v10014_v52  ;;  %v10093_v52 = vld [vmem:[#allocation5 + $0xb30] ss:$8 sps:$4 sm:$0xff]  }
 0x2e3   :  { %3803 = vmatprep.subr.bf16.mxu0 %v10019_v53  ;;  %v10098_v53 = vld [vmem:[#allocation5 + $0xb44] ss:$8 sps:$4 sm:$0xff]  }
 0x2e6   :  { %3804 = vmatpush1.bf16.msra.mxu0 %v10017_v54  ;;  %v10096_v54 = vld [vmem:[#allocation5 + $0xb40] ss:$8 sps:$4 sm:$0xff]  }
 0x2e7   :  { %3805 = vmatprep.subr.bf16.mxu0 %v10022_v55  ;;  %v10101_v55 = vld [vmem:[#allocation5 + $0xb54] ss:$8 sps:$4 sm:$0xff]  }
 0x2ea   :  { %3806 = vmatpush1.bf16.msra.mxu0 %v10020_v56  ;;  %v10099_v56 = vld [vmem:[#allocation5 + $0xb50] ss:$8 sps:$4 sm:$0xff]  }
 0x2eb   :  { %3807 = vmatprep.subr.bf16.mxu0 %v10025_v57  ;;  %v10104_v57 = vld [vmem:[#allocation5 + $0xb64] ss:$8 sps:$4 sm:$0xff]  }
 0x2ee   :  { %3808 = vmatpush1.bf16.msra.mxu0 %v10023_v58  ;;  %v10102_v58 = vld [vmem:[#allocation5 + $0xb60] ss:$8 sps:$4 sm:$0xff]  }
 0x2ef   :  { %3809 = vmatprep.subr.bf16.mxu0 %v10028_v59  ;;  %v10107_v59 = vld [vmem:[#allocation5 + $0xb74] ss:$8 sps:$4 sm:$0xff]  }
 0x2f2   :  { %3810 = vmatpush1.bf16.msra.mxu0 %v10026_v60  ;;  %v10105_v60 = vld [vmem:[#allocation5 + $0xb70] ss:$8 sps:$4 sm:$0xff]  }
 0x2f3   :  { %3811 = vmatprep.subr.bf16.mxu0 %v10031_v61  ;;  %v10110_v61 = vld [vmem:[#allocation5 + $0xb84] ss:$8 sps:$4 sm:$0xff]  }
 0x2f6   :  { %3812 = vmatpush1.bf16.msra.mxu0 %v10029_v63  ;;  %v10113_v63 = vld [vmem:[#allocation5 + $0xb94] ss:$8 sps:$4 sm:$0xff]  }
 0x2f7   :  { %3813 = vmatprep.subr.bf16.mxu0 %v10034_v1  ;;  %v10116_v1 = vld [vmem:[#allocation5 + $0xba4] ss:$8 sps:$4 sm:$0xff]  }
 0x2fa   :  { %3814 = vmatpush1.bf16.msra.mxu0 %v10032_v2  ;;  %v10114_v2 = vld [vmem:[#allocation5 + $0xba0] ss:$8 sps:$4 sm:$0xff]  }
 0x2fb   :  { %3824 = vmatprep.subr.bf16.mxu0 %v10038_v4  ;;  %v10117_v4 = vld [vmem:[#allocation5 + $0xbb0] ss:$8 sps:$4 sm:$0xff]  }
 0x2fd   :  { %3816 = vmatmul.mubr.bf16.vlgmr.msra.gmra.mrb[0].mxu0 %v316_v5  ;;  %v10122_v5 = vld [vmem:[#allocation5 + $0xbc4] ss:$8 sps:$4 sm:$0xff]  }
 0x2fe   :  { %3825 = vmatpush1.bf16.msra.mxu0 %v10036_v6  ;;  %3856 = vmatprep.mubr.bf16.mxu0 %v319_v7  ;;  %v10120_v6 = vld [vmem:[#allocation5 + $0xbc0] ss:$8 sps:$4 sm:$0xff]   ;;  %v10125_v7 = vld [vmem:[#allocation5 + $0xbd4] ss:$8 sps:$4 sm:$0xff]  }
 0x2ff   :  { %3826 = vmatprep.subr.bf16.mxu0 %v10041_v8  ;;  %v10123_v8 = vld [vmem:[#allocation5 + $0xbd0] ss:$8 sps:$4 sm:$0xff]  }
 0x302   :  { %3827 = vmatpush1.bf16.msra.mxu0 %v10039_v9  ;;  %v10128_v9 = vld [vmem:[#allocation5 + $0xbe4] ss:$8 sps:$4 sm:$0xff]  }
 0x303   :  { %3828 = vmatprep.subr.bf16.mxu0 %v10044_v10  ;;  %v10809_v10 = vld [vmem:[#allocation2 + $0x30] sm:$0xff] }
 0x306   :  { %3829 = vmatpush1.bf16.msra.mxu0 %v10042_v11  ;;  %v10126_v11 = vld [vmem:[#allocation5 + $0xbe0] ss:$8 sps:$4 sm:$0xff]  }
 0x307   :  { %3830 = vmatprep.subr.bf16.mxu0 %v10047_v12  ;;  %v10813_v12 = vrot.slane %v10809_v10, %v10706_v16 }
 0x30a   :  { %3831 = vmatpush1.bf16.msra.mxu0 %v10045_v14  ;;  %v10131_v14 = vld [vmem:[#allocation5 + $0xbf4] ss:$8 sps:$4 sm:$0xff]  }
 0x30b   :  { %3832 = vmatprep.subr.bf16.mxu0 %v10050_v15  ;;  %v10129_v15 = vld [vmem:[#allocation5 + $0xbf0] ss:$8 sps:$4 sm:$0xff]  }
 0x30e   :  { %3833 = vmatpush1.bf16.msra.mxu0 %v10048_v17  ;;  %v247_v17 = vcombine.high %v10813_v12, %v10813_v12 }
 0x30f   :  { %3834 = vmatprep.subr.bf16.mxu0 %v10053_v18  ;;  %v10135_v18 = vld [vmem:[#allocation5 + $0xc04] ss:$8 sps:$4 sm:$0xff]  }
 0x312   :  { %3835 = vmatpush1.bf16.msra.mxu0 %v10051_v19  ;;  %v320_v19 = vpack.c.bf16 %v10803_v39, %v10803_v39  ;;  %v10160_v39 = vld [vmem:[#allocation5 + $0xc90] ss:$8 sps:$4 sm:$0xff]  }
 0x313   :  { %3836 = vmatprep.subr.bf16.mxu0 %v10056_v20  ;;  %v10133_v20 = vld [vmem:[#allocation5 + $0xc00] ss:$8 sps:$4 sm:$0xff]  }
 0x316   :  { %3837 = vmatpush1.bf16.msra.mxu0 %v10054_v21  ;;  %v323_v21 = vpack.c.bf16 %v247_v17, %v247_v17  ;;  %v10216_v17 = vld [vmem:[#allocation5 + $0xdb4] ss:$8 sps:$4 sm:$0xff]  }
 0x317   :  { %3838 = vmatprep.subr.bf16.mxu0 %v10059_v22  ;;  %v10138_v22 = vld [vmem:[#allocation5 + $0xc14] ss:$8 sps:$4 sm:$0xff]  }
 0x31a   :  { %3839 = vmatpush1.bf16.msra.mxu0 %v10057_v23  ;;  %v10136_v23 = vld [vmem:[#allocation5 + $0xc10] ss:$8 sps:$4 sm:$0xff]  }
 0x31b   :  { %3840 = vmatprep.subr.bf16.mxu0 %v10062_v24  ;;  %v10141_v24 = vld [vmem:[#allocation5 + $0xc24] ss:$8 sps:$4 sm:$0xff]  }
 0x31e   :  { %3841 = vmatpush1.bf16.msra.mxu0 %v10060_v25  ;;  %v10139_v25 = vld [vmem:[#allocation5 + $0xc20] ss:$8 sps:$4 sm:$0xff]  }
 0x31f   :  { %3842 = vmatprep.subr.bf16.mxu0 %v10065_v26  ;;  %v10144_v26 = vld [vmem:[#allocation5 + $0xc34] ss:$8 sps:$4 sm:$0xff]  }
 0x322   :  { %3843 = vmatpush1.bf16.msra.mxu0 %v10063_v27  ;;  %v10142_v27 = vld [vmem:[#allocation5 + $0xc30] ss:$8 sps:$4 sm:$0xff]  }
 0x323   :  { %3844 = vmatprep.subr.bf16.mxu0 %v10068_v28  ;;  %v10147_v28 = vld [vmem:[#allocation5 + $0xc44] ss:$8 sps:$4 sm:$0xff]  }
 0x326   :  { %3845 = vmatpush1.bf16.msra.mxu0 %v10066_v29  ;;  %v10145_v29 = vld [vmem:[#allocation5 + $0xc40] ss:$8 sps:$4 sm:$0xff]  }
 0x327   :  { %3846 = vmatprep.subr.bf16.mxu0 %v10071_v30  ;;  %v10150_v30 = vld [vmem:[#allocation5 + $0xc54] ss:$8 sps:$4 sm:$0xff]  }
 0x32a   :  { %3847 = vmatpush1.bf16.msra.mxu0 %v10069_v31  ;;  %v10148_v31 = vld [vmem:[#allocation5 + $0xc50] ss:$8 sps:$4 sm:$0xff]  }
 0x32b   :  { %3848 = vmatprep.subr.bf16.mxu0 %v10074_v32  ;;  %v10153_v32 = vld [vmem:[#allocation5 + $0xc64] ss:$8 sps:$4 sm:$0xff]  }
 0x32e   :  { %3849 = vmatpush1.bf16.msra.mxu0 %v10072_v33  ;;  %v10151_v33 = vld [vmem:[#allocation5 + $0xc60] ss:$8 sps:$4 sm:$0xff]  }
 0x32f   :  { %3850 = vmatprep.subr.bf16.mxu0 %v10077_v34  ;;  %v10156_v34 = vld [vmem:[#allocation5 + $0xc74] ss:$8 sps:$4 sm:$0xff]  }
 0x332   :  { %3851 = vmatpush1.bf16.msra.mxu0 %v10075_v35  ;;  %v10154_v35 = vld [vmem:[#allocation5 + $0xc70] ss:$8 sps:$4 sm:$0xff]  }
 0x333   :  { %3852 = vmatprep.subr.bf16.mxu0 %v10080_v37  ;;  %v10157_v37 = vld [vmem:[#allocation5 + $0xc80] ss:$8 sps:$4 sm:$0xff]  }
 0x336   :  { %3853 = vmatpush1.bf16.msra.mxu0 %v10078_v38  ;;  %v10162_v38 = vld [vmem:[#allocation5 + $0xc94] ss:$8 sps:$4 sm:$0xff]  }
 0x337   :  { %3854 = vmatprep.subr.bf16.mxu0 %v10083_v40  ;;  %v10165_v40 = vld [vmem:[#allocation5 + $0xca4] ss:$8 sps:$4 sm:$0xff]  }
 0x33a   :  { %3855 = vmatpush1.bf16.msra.mxu0 %v10081_v41  ;;  %v10163_v41 = vld [vmem:[#allocation5 + $0xca0] ss:$8 sps:$4 sm:$0xff]  }
 0x33b   :  { %3865 = vmatprep.subr.bf16.mxu0 %v10086_v43  ;;  %v10166_v43 = vld [vmem:[#allocation5 + $0xcb0] ss:$8 sps:$4 sm:$0xff]  }
 0x33d   :  { %3857 = vmatmul.mubr.bf16.vlgmr.msra.gmra.mrb[0].mxu0 %v318_v44  ;;  %v10171_v44 = vld [vmem:[#allocation5 + $0xcc4] ss:$8 sps:$4 sm:$0xff]  }
 0x33e   :  { %3866 = vmatpush1.bf16.msra.mxu0 %v10084_v45  ;;  %3897 = vmatprep.mubr.bf16.mxu0 %v321_v46  ;;  %v10169_v45 = vld [vmem:[#allocation5 + $0xcc0] ss:$8 sps:$4 sm:$0xff]   ;;  %v10174_v46 = vld [vmem:[#allocation5 + $0xcd4] ss:$8 sps:$4 sm:$0xff]  }
 0x33f   :  { %3867 = vmatprep.subr.bf16.mxu0 %v10089_v47  ;;  %v10172_v47 = vld [vmem:[#allocation5 + $0xcd0] ss:$8 sps:$4 sm:$0xff]  }
 0x342   :  { %3868 = vmatpush1.bf16.msra.mxu0 %v10087_v48  ;;  %v232_v48 = vcombine.high %v10809_v10, %v10809_v10  ;;  %v10205_v10 = vld [vmem:[#allocation5 + $0xd80] ss:$8 sps:$4 sm:$0xff]  }
 0x343   :  { %3869 = vmatprep.subr.bf16.mxu0 %v10092_v49  ;;  %v10177_v49 = vld [vmem:[#allocation5 + $0xce4] ss:$8 sps:$4 sm:$0xff]  }
 0x346   :  { %3870 = vmatpush1.bf16.msra.mxu0 %v10090_v50  ;;  %v10175_v50 = vld [vmem:[#allocation5 + $0xce0] ss:$8 sps:$4 sm:$0xff]  }
 0x347   :  { %3871 = vmatprep.subr.bf16.mxu0 %v10095_v51  ;;  %v10822_v51 = vrot.slane %v232_v48, %v10706_v16  ;;  %v10338_v48 = vld [vmem:[#allocation8 + $0x30] ss:$8 sps:$4 sm:$0xff]  }
 0x34a   :  { %3872 = vmatpush1.bf16.msra.mxu0 %v10093_v52  ;;  %v10180_v52 = vld [vmem:[#allocation5 + $0xcf4] ss:$8 sps:$4 sm:$0xff]  }
 0x34b   :  { %3873 = vmatprep.subr.bf16.mxu0 %v10098_v53  ;;  %v10178_v53 = vld [vmem:[#allocation5 + $0xcf0] ss:$8 sps:$4 sm:$0xff]  }
 0x34e   :  { %3874 = vmatpush1.bf16.msra.mxu0 %v10096_v54  ;;  %v248_v54 = vcombine.high %v10822_v51, %v10822_v51 }
 0x34f   :  { %3875 = vmatprep.subr.bf16.mxu0 %v10101_v55  ;;  %v10183_v55 = vld [vmem:[#allocation5 + $0xd04] ss:$8 sps:$4 sm:$0xff]  }
 0x352   :  { %3876 = vmatpush1.bf16.msra.mxu0 %v10099_v56  ;;  %v322_v56 = vpack.c.bf16 %v10813_v12, %v10813_v12  ;;  %v10208_v12 = vld [vmem:[#allocation5 + $0xd90] ss:$8 sps:$4 sm:$0xff]  }
 0x353   :  { %3877 = vmatprep.subr.bf16.mxu0 %v10104_v57  ;;  %v10181_v57 = vld [vmem:[#allocation5 + $0xd00] ss:$8 sps:$4 sm:$0xff]  }
 0x356   :  { %3878 = vmatpush1.bf16.msra.mxu0 %v10102_v58  ;;  %v325_v58 = vpack.c.bf16 %v248_v54, %v248_v54  ;;  %v10245_v54 = vld [vmem:[#allocation5 + $0xe50] ss:$8 sps:$4 sm:$0xff]  }
 0x357   :  { %3879 = vmatprep.subr.bf16.mxu0 %v10107_v59  ;;  %v10186_v59 = vld [vmem:[#allocation5 + $0xd14] ss:$8 sps:$4 sm:$0xff]  }
 0x35a   :  { %3880 = vmatpush1.bf16.msra.mxu0 %v10105_v60  ;;  %v10184_v60 = vld [vmem:[#allocation5 + $0xd10] ss:$8 sps:$4 sm:$0xff]  }
 0x35b   :  { %3881 = vmatprep.subr.bf16.mxu0 %v10110_v61  ;;  %v10189_v61 = vld [vmem:[#allocation5 + $0xd24] ss:$8 sps:$4 sm:$0xff]  }
 0x35e   :  { %3882 = vmatpush1.bf16.msra.mxu0 %v10108_v62  ;;  %v10187_v62 = vld [vmem:[#allocation5 + $0xd20] ss:$8 sps:$4 sm:$0xff]  }
 0x35f   :  { %3883 = vmatprep.subr.bf16.mxu0 %v10113_v63  ;;  %v10192_v63 = vld [vmem:[#allocation5 + $0xd34] ss:$8 sps:$4 sm:$0xff]  }
 0x362   :  { %3884 = vmatpush1.bf16.msra.mxu0 %v10111_v0  ;;  %v10190_v0 = vld [vmem:[#allocation5 + $0xd30] ss:$8 sps:$4 sm:$0xff]  }
 0x363   :  { %3885 = vmatprep.subr.bf16.mxu0 %v10116_v1  ;;  %v10195_v1 = vld [vmem:[#allocation5 + $0xd44] ss:$8 sps:$4 sm:$0xff]  }
 0x366   :  { %3886 = vmatpush1.bf16.msra.mxu0 %v10114_v2  ;;  %v10193_v2 = vld [vmem:[#allocation5 + $0xd40] ss:$8 sps:$4 sm:$0xff]  }
 0x367   :  { %3887 = vmatprep.subr.bf16.mxu0 %v10119_v3  ;;  %v10198_v3 = vld [vmem:[#allocation5 + $0xd54] ss:$8 sps:$4 sm:$0xff]  }
 0x36a   :  { %3888 = vmatpush1.bf16.msra.mxu0 %v10117_v4  ;;  %v10196_v4 = vld [vmem:[#allocation5 + $0xd50] ss:$8 sps:$4 sm:$0xff]  }
 0x36b   :  { %3889 = vmatprep.subr.bf16.mxu0 %v10122_v5  ;;  %v10201_v5 = vld [vmem:[#allocation5 + $0xd64] ss:$8 sps:$4 sm:$0xff]  }
 0x36e   :  { %3890 = vmatpush1.bf16.msra.mxu0 %v10120_v6  ;;  %v10199_v6 = vld [vmem:[#allocation5 + $0xd60] ss:$8 sps:$4 sm:$0xff]  }
 0x36f   :  { %3891 = vmatprep.subr.bf16.mxu0 %v10125_v7  ;;  %v10204_v7 = vld [vmem:[#allocation5 + $0xd74] ss:$8 sps:$4 sm:$0xff]  }
 0x372   :  { %3892 = vmatpush1.bf16.msra.mxu0 %v10123_v8  ;;  %v10202_v8 = vld [vmem:[#allocation5 + $0xd70] ss:$8 sps:$4 sm:$0xff]  }
 0x373   :  { %3893 = vmatprep.subr.bf16.mxu0 %v10128_v9  ;;  %v10207_v9 = vld [vmem:[#allocation5 + $0xd84] ss:$8 sps:$4 sm:$0xff]  }
 0x376   :  { %3894 = vmatpush1.bf16.msra.mxu0 %v10126_v11  ;;  %v10210_v11 = vld [vmem:[#allocation5 + $0xd94] ss:$8 sps:$4 sm:$0xff]  }
 0x377   :  { %3895 = vmatprep.subr.bf16.mxu0 %v10131_v14  ;;  %v10213_v14 = vld [vmem:[#allocation5 + $0xda4] ss:$8 sps:$4 sm:$0xff]  }
 0x37a   :  { %3896 = vmatpush1.bf16.msra.mxu0 %v10129_v15  ;;  %v10211_v15 = vld [vmem:[#allocation5 + $0xda0] ss:$8 sps:$4 sm:$0xff]  }
 0x37b   :  { %3906 = vmatprep.subr.bf16.mxu0 %v10135_v18  ;;  %v10214_v18 = vld [vmem:[#allocation5 + $0xdb0] ss:$8 sps:$4 sm:$0xff]  }
 0x37d   :  { %3898 = vmatmul.mubr.bf16.vlgmr.msra.gmra.mrb[0].mxu0 %v320_v19  ;;  %v10219_v19 = vld [vmem:[#allocation5 + $0xdc4] ss:$8 sps:$4 sm:$0xff]  }
 0x37e   :  { %3907 = vmatpush1.bf16.msra.mxu0 %v10133_v20  ;;  %3938 = vmatprep.mubr.bf16.mxu0 %v323_v21  ;;  %v10217_v20 = vld [vmem:[#allocation5 + $0xdc0] ss:$8 sps:$4 sm:$0xff]   ;;  %v10222_v21 = vld [vmem:[#allocation5 + $0xdd4] ss:$8 sps:$4 sm:$0xff]  }
 0x37f   :  { %3908 = vmatprep.subr.bf16.mxu0 %v10138_v22  ;;  %v10220_v22 = vld [vmem:[#allocation5 + $0xdd0] ss:$8 sps:$4 sm:$0xff]  }
 0x382   :  { %3909 = vmatpush1.bf16.msra.mxu0 %v10136_v23  ;;  %v10225_v23 = vld [vmem:[#allocation5 + $0xde4] ss:$8 sps:$4 sm:$0xff]  }
 0x383   :  { %3910 = vmatprep.subr.bf16.mxu0 %v10141_v24  ;;  %v10828_v24 = vld [vmem:[#allocation2 + $0x38] sm:$0xff] }
 0x386   :  { %3911 = vmatpush1.bf16.msra.mxu0 %v10139_v25  ;;  %v10223_v25 = vld [vmem:[#allocation5 + $0xde0] ss:$8 sps:$4 sm:$0xff]  }
 0x387   :  { %3912 = vmatprep.subr.bf16.mxu0 %v10144_v26  ;;  %v10832_v26 = vrot.slane %v10828_v24, %v10706_v16 }
 0x38a   :  { %3913 = vmatpush1.bf16.msra.mxu0 %v10142_v27  ;;  %v10228_v27 = vld [vmem:[#allocation5 + $0xdf4] ss:$8 sps:$4 sm:$0xff]  }
 0x38b   :  { %3914 = vmatprep.subr.bf16.mxu0 %v10147_v28  ;;  %v10226_v28 = vld [vmem:[#allocation5 + $0xdf0] ss:$8 sps:$4 sm:$0xff]  }
 0x38e   :  { %3915 = vmatpush1.bf16.msra.mxu0 %v10145_v29  ;;  %v264_v29 = vcombine.high %v10832_v26, %v10832_v26 }
 0x38f   :  { %3916 = vmatprep.subr.bf16.mxu0 %v10150_v30  ;;  %v10232_v30 = vld [vmem:[#allocation5 + $0xe04] ss:$8 sps:$4 sm:$0xff]  }
 0x392   :  { %3917 = vmatpush1.bf16.msra.mxu0 %v10148_v31  ;;  %v324_v31 = vpack.c.bf16 %v10822_v51, %v10822_v51  ;;  %v10247_v51 = vld [vmem:[#allocation5 + $0xe54] ss:$8 sps:$4 sm:$0xff]  }
 0x393   :  { %3918 = vmatprep.subr.bf16.mxu0 %v10153_v32  ;;  %v10230_v32 = vld [vmem:[#allocation5 + $0xe00] ss:$8 sps:$4 sm:$0xff]  }
 0x396   :  { %3919 = vmatpush1.bf16.msra.mxu0 %v10151_v33  ;;  %v327_v33 = vpack.c.bf16 %v264_v29, %v264_v29  ;;  %v10368_v29 = vld [vmem:[#allocation8 + $0xd0] ss:$8 sps:$4 sm:$0xff]  }
 0x397   :  { %3920 = vmatprep.subr.bf16.mxu0 %v10156_v34  ;;  %v10235_v34 = vld [vmem:[#allocation5 + $0xe14] ss:$8 sps:$4 sm:$0xff]  }
 0x39a   :  { %3921 = vmatpush1.bf16.msra.mxu0 %v10154_v35  ;;  %v10327_v35 = vld [vmem:[#allocation8 + $0x4] ss:$8 sps:$4 sm:$0xff]  }
 0x39b   :  { %3922 = vmatprep.subr.bf16.mxu0 %v10159_v36  ;;  %v10329_v36 = vld [vmem:[#allocation8] ss:$8 sps:$4 sm:$0xff]   ;;  %4278 = vmatprep.subr.bf16.mxu1 %v10327_v35  ;;  %v326_v35 = vpack.c.bf16 %v10832_v26, %v10832_v26 }
 0x39c   :  { %4279 = vmatpush1.bf16.msra.mxu1 %v10329_v36  ;;  %v10278_v36 = vld [vmem:[#allocation5 + $0xf00] ss:$8 sps:$4 sm:$0xff]  }
 0x39d   :  { %v10290_v26 = vld [vmem:[#allocation5 + $0xf40] ss:$8 sps:$4 sm:$0xff]  }
 0x39e   :  { %3923 = vmatpush1.bf16.msra.mxu0 %v10157_v37  ;;  %v10330_v37 = vld [vmem:[#allocation8 + $0x14] ss:$8 sps:$4 sm:$0xff]  }
 0x39f   :  { %3924 = vmatprep.subr.bf16.mxu0 %v10162_v38  ;;  %v10233_v38 = vld [vmem:[#allocation5 + $0xe10] ss:$8 sps:$4 sm:$0xff]   ;;  %4280 = vmatprep.subr.bf16.mxu1 %v10330_v37 }
 0x3a2   :  { %3925 = vmatpush1.bf16.msra.mxu0 %v10160_v39  ;;  %v10238_v39 = vld [vmem:[#allocation5 + $0xe24] ss:$8 sps:$4 sm:$0xff]  }
 0x3a3   :  { %3926 = vmatprep.subr.bf16.mxu0 %v10165_v40  ;;  %v10332_v40 = vld [vmem:[#allocation8 + $0x10] ss:$8 sps:$4 sm:$0xff]  }
 0x3a4   :  { %4281 = vmatpush1.bf16.msra.mxu1 %v10332_v40  ;;  %v10286_v40 = vld [vmem:[#allocation5 + $0xf24] ss:$8 sps:$4 sm:$0xff]  }
 0x3a6   :  { %3927 = vmatpush1.bf16.msra.mxu0 %v10163_v41  ;;  %v10333_v41 = vld [vmem:[#allocation8 + $0x24] ss:$8 sps:$4 sm:$0xff]  }
 0x3a7   :  { %3928 = vmatprep.subr.bf16.mxu0 %v10168_v42  ;;  %v10236_v42 = vld [vmem:[#allocation5 + $0xe20] ss:$8 sps:$4 sm:$0xff]   ;;  %4282 = vmatprep.subr.bf16.mxu1 %v10333_v41 }
 0x3a8   :  { %v10284_v41 = vld [vmem:[#allocation5 + $0xf20] ss:$8 sps:$4 sm:$0xff]  }
 0x3aa   :  { %3929 = vmatpush1.bf16.msra.mxu0 %v10166_v43  ;;  %v10241_v43 = vld [vmem:[#allocation5 + $0xe34] ss:$8 sps:$4 sm:$0xff]  }
 0x3ab   :  { %3930 = vmatprep.subr.bf16.mxu0 %v10171_v44  ;;  %v10335_v44 = vld [vmem:[#allocation8 + $0x20] ss:$8 sps:$4 sm:$0xff]  }
 0x3ac   :  { %4283 = vmatpush1.bf16.msra.mxu1 %v10335_v44  ;;  %v10292_v44 = vld [vmem:[#allocation5 + $0xf44] ss:$8 sps:$4 sm:$0xff]  }
 0x3ae   :  { %3931 = vmatpush1.bf16.msra.mxu0 %v10169_v45  ;;  %v10336_v45 = vld [vmem:[#allocation8 + $0x34] ss:$8 sps:$4 sm:$0xff]  }
 0x3af   :  { %3932 = vmatprep.subr.bf16.mxu0 %v10174_v46  ;;  %v10239_v46 = vld [vmem:[#allocation5 + $0xe30] ss:$8 sps:$4 sm:$0xff]   ;;  %4284 = vmatprep.subr.bf16.mxu1 %v10336_v45  ;;  %v10295_v45 = vld [vmem:[#allocation5 + $0xf54] ss:$8 sps:$4 sm:$0xff]  }
 0x3b0   :  { %4285 = vmatpush1.bf16.msra.mxu1 %v10338_v48  ;;  %v10296_v48 = vld [vmem:[#allocation5 + $0xf60] ss:$8 sps:$4 sm:$0xff]  }
 0x3b2   :  { %3933 = vmatpush1.bf16.msra.mxu0 %v10172_v47  ;;  %v10244_v47 = vld [vmem:[#allocation5 + $0xe44] ss:$8 sps:$4 sm:$0xff]  }
 0x3b3   :  { %3934 = vmatprep.subr.bf16.mxu0 %v10177_v49  ;;  %v10339_v49 = vld [vmem:[#allocation8 + $0x44] ss:$8 sps:$4 sm:$0xff]  }
 0x3b4   :  { %4286 = vmatprep.subr.bf16.mxu1 %v10339_v49  ;;  %v10301_v49 = vld [vmem:[#allocation5 + $0xf74] ss:$8 sps:$4 sm:$0xff]  }
 0x3b6   :  { %3935 = vmatpush1.bf16.msra.mxu0 %v10175_v50  ;;  %v10242_v50 = vld [vmem:[#allocation5 + $0xe40] ss:$8 sps:$4 sm:$0xff]  }
 0x3b7   :  { %3936 = vmatprep.subr.bf16.mxu0 %v10180_v52  ;;  %v10341_v52 = vld [vmem:[#allocation8 + $0x40] ss:$8 sps:$4 sm:$0xff]  }
 0x3b8   :  { %4287 = vmatpush1.bf16.msra.mxu1 %v10341_v52  ;;  %v10302_v52 = vld [vmem:[#allocation5 + $0xf80] ss:$8 sps:$4 sm:$0xff]  }
 0x3ba   :  { %3937 = vmatpush1.bf16.msra.mxu0 %v10178_v53  ;;  %v10342_v53 = vld [vmem:[#allocation8 + $0x54] ss:$8 sps:$4 sm:$0xff]  }
 0x3bb   :  { %3947 = vmatprep.subr.bf16.mxu0 %v10183_v55  ;;  %v10250_v55 = vld [vmem:[#allocation5 + $0xe64] ss:$8 sps:$4 sm:$0xff]   ;;  %4288 = vmatprep.subr.bf16.mxu1 %v10342_v53  ;;  %v10307_v53 = vld [vmem:[#allocation5 + $0xf94] ss:$8 sps:$4 sm:$0xff]  }
 0x3bd   :  { %3939 = vmatmul.mubr.bf16.vlgmr.msra.gmra.mrb[0].mxu0 %v322_v56  ;;  %v10344_v56 = vld [vmem:[#allocation8 + $0x50] ss:$8 sps:$4 sm:$0xff]  }
 0x3be   :  { %3948 = vmatpush1.bf16.msra.mxu0 %v10181_v57  ;;  %3979 = vmatprep.mubr.bf16.mxu0 %v325_v58  ;;  %v10345_v57 = vld [vmem:[#allocation8 + $0x64] ss:$8 sps:$4 sm:$0xff]  }
 0x3bf   :  { %3949 = vmatprep.subr.bf16.mxu0 %v10186_v59  ;;  %v10248_v58 = vld [vmem:[#allocation5 + $0xe60] ss:$8 sps:$4 sm:$0xff]   ;;  %v10253_v59 = vld [vmem:[#allocation5 + $0xe74] ss:$8 sps:$4 sm:$0xff]   ;;  %4289 = vmatpush1.bf16.msra.mxu1 %v10344_v56 }
 0x3c0   :  { %4290 = vmatprep.subr.bf16.mxu1 %v10345_v57  ;;  %v10308_v56 = vld [vmem:[#allocation5 + $0xfa0] ss:$8 sps:$4 sm:$0xff]   ;;  %v10313_v57 = vld [vmem:[#allocation5 + $0xfb4] ss:$8 sps:$4 sm:$0xff]  }
 0x3c2   :  { %3950 = vmatpush1.bf16.msra.mxu0 %v10184_v60  ;;  %v10347_v60 = vld [vmem:[#allocation8 + $0x60] ss:$8 sps:$4 sm:$0xff]  }
 0x3c3   :  { %3951 = vmatprep.subr.bf16.mxu0 %v10189_v61  ;;  %v10348_v61 = vld [vmem:[#allocation8 + $0x74] ss:$8 sps:$4 sm:$0xff]   ;;  %4291 = vmatpush1.bf16.msra.mxu1 %v10347_v60 }
 0x3c4   :  { %4292 = vmatprep.subr.bf16.mxu1 %v10348_v61  ;;  %v10314_v60 = vld [vmem:[#allocation5 + $0xfc0] ss:$8 sps:$4 sm:$0xff]   ;;  %v10319_v61 = vld [vmem:[#allocation5 + $0xfd4] ss:$8 sps:$4 sm:$0xff]  }
 0x3c6   :  { %3952 = vmatpush1.bf16.msra.mxu0 %v10187_v62  ;;  %v10251_v62 = vld [vmem:[#allocation5 + $0xe70] ss:$8 sps:$4 sm:$0xff]  }
 0x3c7   :  { %3953 = vmatprep.subr.bf16.mxu0 %v10192_v63  ;;  %v10256_v63 = vld [vmem:[#allocation5 + $0xe84] ss:$8 sps:$4 sm:$0xff]  }
 0x3ca   :  { %3954 = vmatpush1.bf16.msra.mxu0 %v10190_v0  ;;  %v10350_v0 = vld [vmem:[#allocation8 + $0x70] ss:$8 sps:$4 sm:$0xff]  }
 0x3cb   :  { %3955 = vmatprep.subr.bf16.mxu0 %v10195_v1  ;;  %v10351_v1 = vld [vmem:[#allocation8 + $0x84] ss:$8 sps:$4 sm:$0xff]   ;;  %4293 = vmatpush1.bf16.msra.mxu1 %v10350_v0 }
 0x3cc   :  { %4294 = vmatprep.subr.bf16.mxu1 %v10351_v1  ;;  %v10320_v0 = vld [vmem:[#allocation5 + $0xfe0] ss:$8 sps:$4 sm:$0xff]   ;;  %v10325_v1 = vld [vmem:[#allocation5 + $0xff4] ss:$8 sps:$4 sm:$0xff]  }
 0x3ce   :  { %3956 = vmatpush1.bf16.msra.mxu0 %v10193_v2  ;;  %v10254_v2 = vld [vmem:[#allocation5 + $0xe80] ss:$8 sps:$4 sm:$0xff]  }
 0x3cf   :  { %3957 = vmatprep.subr.bf16.mxu0 %v10198_v3  ;;  %v10259_v3 = vld [vmem:[#allocation5 + $0xe94] ss:$8 sps:$4 sm:$0xff]  }
 0x3d2   :  { %3958 = vmatpush1.bf16.msra.mxu0 %v10196_v4  ;;  %v10353_v4 = vld [vmem:[#allocation8 + $0x80] ss:$8 sps:$4 sm:$0xff]  }
 0x3d3   :  { %3959 = vmatprep.subr.bf16.mxu0 %v10201_v5  ;;  %v10354_v5 = vld [vmem:[#allocation8 + $0x94] ss:$8 sps:$4 sm:$0xff]   ;;  %4295 = vmatpush1.bf16.msra.mxu1 %v10353_v4  ;;  %v10369_v4 = vld [vmem:[#allocation8 + $0xe4] ss:$8 sps:$4 sm:$0xff]  }
 0x3d4   :  { %4296 = vmatprep.subr.bf16.mxu1 %v10354_v5  ;;  %v10371_v5 = vld [vmem:[#allocation8 + $0xe0] ss:$8 sps:$4 sm:$0xff]  }
 0x3d6   :  { %3960 = vmatpush1.bf16.msra.mxu0 %v10199_v6  ;;  %v10257_v6 = vld [vmem:[#allocation5 + $0xe90] ss:$8 sps:$4 sm:$0xff]  }
 0x3d7   :  { %3961 = vmatprep.subr.bf16.mxu0 %v10204_v7  ;;  %v10262_v7 = vld [vmem:[#allocation5 + $0xea4] ss:$8 sps:$4 sm:$0xff]  }
 0x3da   :  { %3962 = vmatpush1.bf16.msra.mxu0 %v10202_v8  ;;  %v10356_v8 = vld [vmem:[#allocation8 + $0x90] ss:$8 sps:$4 sm:$0xff]  }
 0x3db   :  { %3963 = vmatprep.subr.bf16.mxu0 %v10207_v9  ;;  %v10357_v9 = vld [vmem:[#allocation8 + $0xa4] ss:$8 sps:$4 sm:$0xff]   ;;  %4297 = vmatpush1.bf16.msra.mxu1 %v10356_v8 }
 0x3dc   :  { %4298 = vmatprep.subr.bf16.mxu1 %v10357_v9  ;;  %v10849_v8 = vld [vmem:[#allocation11] sm:$0xff] }
 0x3dd   :  { %v10851_v9 = vld [vmem:[#allocation11 + $0x80] sm:$0xff] }
 0x3de   :  { %3964 = vmatpush1.bf16.msra.mxu0 %v10205_v10  ;;  %v10260_v10 = vld [vmem:[#allocation5 + $0xea0] ss:$8 sps:$4 sm:$0xff]  }
 0x3df   :  { %3965 = vmatprep.subr.bf16.mxu0 %v10210_v11  ;;  %v10265_v11 = vld [vmem:[#allocation5 + $0xeb4] ss:$8 sps:$4 sm:$0xff]  }
 0x3e2   :  { %3966 = vmatpush1.bf16.msra.mxu0 %v10208_v12  ;;  %v10359_v12 = vld [vmem:[#allocation8 + $0xa0] ss:$8 sps:$4 sm:$0xff]  }
 0x3e3   :  { %3967 = vmatprep.subr.bf16.mxu0 %v10213_v14  ;;  %v10360_v14 = vld [vmem:[#allocation8 + $0xb4] ss:$8 sps:$4 sm:$0xff]   ;;  %4299 = vmatpush1.bf16.msra.mxu1 %v10359_v12 }
 0x3e4   :  { %4300 = vmatprep.subr.bf16.mxu1 %v10360_v14  ;;  %v4338_v12 = vld [vmem:[#allocation11 + $0x78] sm:$0xff] }
 0x3e5   :  { %v4354_v14 = vld [vmem:[#allocation11 + $0xf8] sm:$0xff] }
 0x3e6   :  { %3968 = vmatpush1.bf16.msra.mxu0 %v10211_v15  ;;  %v10263_v15 = vld [vmem:[#allocation5 + $0xeb0] ss:$8 sps:$4 sm:$0xff]  }
 0x3e7   :  { %3969 = vmatprep.subr.bf16.mxu0 %v10216_v17  ;;  %v10268_v17 = vld [vmem:[#allocation5 + $0xec4] ss:$8 sps:$4 sm:$0xff]  }
 0x3ea   :  { %3970 = vmatpush1.bf16.msra.mxu0 %v10214_v18  ;;  %v10362_v18 = vld [vmem:[#allocation8 + $0xb0] ss:$8 sps:$4 sm:$0xff]  }
 0x3eb   :  { %3971 = vmatprep.subr.bf16.mxu0 %v10219_v19  ;;  %v10363_v19 = vld [vmem:[#allocation8 + $0xc4] ss:$8 sps:$4 sm:$0xff]   ;;  %4301 = vmatpush1.bf16.msra.mxu1 %v10362_v18  ;;  %v4370_v18 = vld [vmem:[#allocation11 + $0x178] sm:$0xff] }
 0x3ec   :  { %4302 = vmatprep.subr.bf16.mxu1 %v10363_v19  ;;  %v4386_v19 = vld [vmem:[#allocation11 + $0x1f8] sm:$0xff] }
 0x3ee   :  { %3972 = vmatpush1.bf16.msra.mxu0 %v10217_v20  ;;  %v10266_v20 = vld [vmem:[#allocation5 + $0xec0] ss:$8 sps:$4 sm:$0xff]  }
 0x3ef   :  { %3973 = vmatprep.subr.bf16.mxu0 %v10222_v21  ;;  %v10271_v21 = vld [vmem:[#allocation5 + $0xed4] ss:$8 sps:$4 sm:$0xff]  }
 0x3f2   :  { %3974 = vmatpush1.bf16.msra.mxu0 %v10220_v22  ;;  %v10365_v22 = vld [vmem:[#allocation8 + $0xc0] ss:$8 sps:$4 sm:$0xff]  }
 0x3f3   :  { %3975 = vmatprep.subr.bf16.mxu0 %v10225_v23  ;;  %v10366_v23 = vld [vmem:[#allocation8 + $0xd4] ss:$8 sps:$4 sm:$0xff]   ;;  %4303 = vmatpush1.bf16.msra.mxu1 %v10365_v22 }
 0x3f4   :  { %4304 = vmatprep.subr.bf16.mxu1 %v10366_v23  ;;  %v4402_v22 = vld [vmem:[#allocation11 + $0x278] sm:$0xff] }
 0x3f5   :  { %v4418_v23 = vld [vmem:[#allocation11 + $0x2f8] sm:$0xff] }
 0x3f6   :  { %3976 = vmatpush1.bf16.msra.mxu0 %v10223_v25  ;;  %v10269_v25 = vld [vmem:[#allocation5 + $0xed0] ss:$8 sps:$4 sm:$0xff]  }
 0x3f7   :  { %3977 = vmatprep.subr.bf16.mxu0 %v10228_v27  ;;  %v249_v27 = vcombine.high %v10828_v24, %v10828_v24  ;;  %4305 = vmatpush1.bf16.msra.mxu1 %v10368_v29  ;;  %v10280_v24 = vld [vmem:[#allocation5 + $0xf04] ss:$8 sps:$4 sm:$0xff]   ;;  %v4450_v29 = vld [vmem:[#allocation11 + $0x3f8] sm:$0xff] }
 0x3f8   :  { %4306 = vmatprep.subr.bf16.mxu1 %v10369_v4 }
 0x3fa   :  { %3978 = vmatpush1.bf16.msra.mxu0 %v10226_v28  ;;  %v10274_v28 = vld [vmem:[#allocation5 + $0xee4] ss:$8 sps:$4 sm:$0xff]  }
 0x3fb   :  { %3988 = vmatprep.subr.bf16.mxu0 %v10232_v30  ;;  %v10272_v30 = vld [vmem:[#allocation5 + $0xee0] ss:$8 sps:$4 sm:$0xff]   ;;  %4307 = vmatpush1.bf16.msra.mxu1 %v10371_v5 }
 0x3fd   :  { %3980 = vmatmul.mubr.bf16.vlgmr.msra.gmra.mrb[0].mxu0 %v324_v31  ;;  %v10841_v31 = vrot.slane %v249_v27, %v10706_v16  ;;  %v9060_v27 = vcombine.high %v4402_v22, %v4418_v23 }
 0x3fe   :  { %3989 = vmatpush1.bf16.msra.mxu0 %v10230_v32  ;;  %4020 = vmatprep.mubr.bf16.mxu0 %v327_v33  ;;  %v10277_v32 = vld [vmem:[#allocation5 + $0xef4] ss:$8 sps:$4 sm:$0xff]   ;;  %v10275_v33 = vld [vmem:[#allocation5 + $0xef0] ss:$8 sps:$4 sm:$0xff]  }
 0x3ff   :  { %3990 = vmatprep.subr.bf16.mxu0 %v10235_v34  ;;  %v265_v34 = vcombine.high %v10841_v31, %v10841_v31 }
 0x401   :  { %v329_v37 = vpack.c.bf16 %v265_v34, %v265_v34 }
 0x402   :  { %3991 = vmatpush1.bf16.msra.mxu0 %v10233_v38  ;;  %v10283_v38 = vld [vmem:[#allocation5 + $0xf14] ss:$8 sps:$4 sm:$0xff]  }
 0x403   :  { %3992 = vmatprep.subr.bf16.mxu0 %v10238_v39  ;;  %v10281_v39 = vld [vmem:[#allocation5 + $0xf10] ss:$8 sps:$4 sm:$0xff]  }
 0x406   :  { %3993 = vmatpush1.bf16.msra.mxu0 %v10236_v42  ;;  %v10289_v42 = vld [vmem:[#allocation5 + $0xf34] ss:$8 sps:$4 sm:$0xff]  }
 0x407   :  { %3994 = vmatprep.subr.bf16.mxu0 %v10241_v43  ;;  %v10287_v43 = vld [vmem:[#allocation5 + $0xf30] ss:$8 sps:$4 sm:$0xff]  }
 0x40a   :  { %3995 = vmatpush1.bf16.msra.mxu0 %v10239_v46  ;;  %v10293_v46 = vld [vmem:[#allocation5 + $0xf50] ss:$8 sps:$4 sm:$0xff]  }
 0x40b   :  { %3996 = vmatprep.subr.bf16.mxu0 %v10244_v47  ;;  %v10298_v47 = vld [vmem:[#allocation5 + $0xf64] ss:$8 sps:$4 sm:$0xff]  }
 0x40e   :  { %3997 = vmatpush1.bf16.msra.mxu0 %v10242_v50  ;;  %v10299_v50 = vld [vmem:[#allocation5 + $0xf70] ss:$8 sps:$4 sm:$0xff]  }
 0x40f   :  { %3998 = vmatprep.subr.bf16.mxu0 %v10247_v51  ;;  %v10304_v51 = vld [vmem:[#allocation5 + $0xf84] ss:$8 sps:$4 sm:$0xff]  }
 0x412   :  { %3999 = vmatpush1.bf16.msra.mxu0 %v10245_v54  ;;  %v10305_v54 = vld [vmem:[#allocation5 + $0xf90] ss:$8 sps:$4 sm:$0xff]  }
 0x413   :  { %4000 = vmatprep.subr.bf16.mxu0 %v10250_v55  ;;  %v10310_v55 = vld [vmem:[#allocation5 + $0xfa4] ss:$8 sps:$4 sm:$0xff]  }
 0x416   :  { %4001 = vmatpush1.bf16.msra.mxu0 %v10248_v58  ;;  %v10311_v58 = vld [vmem:[#allocation5 + $0xfb0] ss:$8 sps:$4 sm:$0xff]  }
 0x417   :  { %4002 = vmatprep.subr.bf16.mxu0 %v10253_v59  ;;  %v10316_v59 = vld [vmem:[#allocation5 + $0xfc4] ss:$8 sps:$4 sm:$0xff]  }
 0x41a   :  { %4003 = vmatpush1.bf16.msra.mxu0 %v10251_v62  ;;  %v10317_v62 = vld [vmem:[#allocation5 + $0xfd0] ss:$8 sps:$4 sm:$0xff]  }
 0x41b   :  { %4004 = vmatprep.subr.bf16.mxu0 %v10256_v63  ;;  %v10322_v63 = vld [vmem:[#allocation5 + $0xfe4] ss:$8 sps:$4 sm:$0xff]  }
 0x41e   :  { %4005 = vmatpush1.bf16.msra.mxu0 %v10254_v2  ;;  %v10323_v2 = vld [vmem:[#allocation5 + $0xff0] ss:$8 sps:$4 sm:$0xff]  }
 0x41f   :  { %4006 = vmatprep.subr.bf16.mxu0 %v10259_v3  ;;  %v328_v3 = vpack.c.bf16 %v10841_v31, %v10841_v31 }
 0x422   :  { %4007 = vmatpush1.bf16.msra.mxu0 %v10257_v6  ;;  %v10372_v6 = vld [vmem:[#allocation8 + $0xf4] ss:$8 sps:$4 sm:$0xff]  }
 0x423   :  { %4008 = vmatprep.subr.bf16.mxu0 %v10262_v7  ;;  %v10374_v7 = vld [vmem:[#allocation8 + $0xf0] ss:$8 sps:$4 sm:$0xff]   ;;  %4308 = vmatprep.subr.bf16.mxu1 %v10372_v6  ;;  %v10858_v6 = vsub.s32 0, %v10703_v13 }
 0x424   :  { %4309 = vmatpush1.bf16.msra.mxu1 %v10374_v7  ;;  %v842_v7 = vld [vmem:[#allocation7] sm:$0x3] }
 0x426   :  { %4009 = vmatpush1.bf16.msra.mxu0 %v10260_v10  ;;  %v8965_v10 = vcombine.low %v10849_v8, %v10851_v9 }
 0x427   :  { %4010 = vmatprep.subr.bf16.mxu0 %v10265_v11  ;;  %v8966_v11 = vcombine.high %v10849_v8, %v10851_v9 }
 0x429   :  { %7563 = vmatprep.subr.bf16.mxu1 %v8966_v11  ;;  %v10861_v11 = vsub.s32 1, %v10703_v13 }
 0x42a   :  { %4011 = vmatpush1.bf16.msra.mxu0 %v10263_v15  ;;  %v8995_v15 = vcombine.low %v4338_v12, %v4354_v14 }
 0x42b   :  { %4012 = vmatprep.subr.bf16.mxu0 %v10268_v17  ;;  %v8996_v17 = vcombine.high %v4338_v12, %v4354_v14  ;;  %v847_v12 = vrot.slane %v842_v7, %v10858_v6  ;;  %v851_v14 = vrot.slane %v842_v7, %v10861_v11  ;;  %v4739_v7 = vld [vmem:[#allocation11 + $0xd00] sm:$0xff] }
 0x42e   :  { %4013 = vmatpush1.bf16.msra.mxu0 %v10266_v20  ;;  %v9027_v20 = vcombine.low %v4370_v18, %v4386_v19 }
 0x42f   :  { %4014 = vmatprep.subr.bf16.mxu0 %v10271_v21  ;;  %v9028_v21 = vcombine.high %v4370_v18, %v4386_v19 }
 0x432   :  { %4015 = vmatpush1.bf16.msra.mxu0 %v10269_v25  ;;  %v9059_v25 = vcombine.low %v4402_v22, %v4418_v23 }
 0x433   :  { %4016 = vmatprep.subr.bf16.mxu0 %v10274_v28  ;;  %v4434_v28 = vld [vmem:[#allocation11 + $0x378] sm:$0xff] }
 0x434   :  { %v9092_v31 = vcombine.high %v4434_v28, %v4450_v29 }
 0x436   :  { %4017 = vmatpush1.bf16.msra.mxu0 %v10272_v30  ;;  %v9091_v30 = vcombine.low %v4434_v28, %v4450_v29 }
 0x437   :  { %4018 = vmatprep.subr.bf16.mxu0 %v10277_v32  ;;  %v4466_v32 = vld [vmem:[#allocation11 + $0x478] sm:$0xff] }
 0x43a   :  { %4019 = vmatpush1.bf16.msra.mxu0 %v10275_v33  ;;  %v4482_v33 = vld [vmem:[#allocation11 + $0x4f8] sm:$0xff] }
 0x43b   :  { %4029 = vmatprep.subr.bf16.mxu0 %v10280_v24  ;;  %v9123_v34 = vcombine.low %v4466_v32, %v4482_v33  ;;  %v9124_v24 = vcombine.high %v4466_v32, %v4482_v33  ;;  %v4403_v32 = vld [vmem:[#allocation11 + $0x280] sm:$0xff] }
 0x43d   :  { %4021 = vmatmul.mubr.bf16.vlgmr.msra.gmra.mrb[0].mxu0 %v326_v35  ;;  %v4498_v35 = vld [vmem:[#allocation11 + $0x578] sm:$0xff] }
 0x43e   :  { %4030 = vmatpush1.bf16.msra.mxu0 %v10278_v36  ;;  %4061 = vmatprep.mubr.bf16.mxu0 %v329_v37  ;;  %v4514_v36 = vld [vmem:[#allocation11 + $0x5f8] sm:$0xff] }
 0x43f   :  { %4031 = vmatprep.subr.bf16.mxu0 %v10283_v38  ;;  %v9155_v37 = vcombine.low %v4498_v35, %v4514_v36  ;;  %v9156_v38 = vcombine.high %v4498_v35, %v4514_v36  ;;  %v4435_v35 = vld [vmem:[#allocation11 + $0x380] sm:$0xff] }
 0x442   :  { %4032 = vmatpush1.bf16.msra.mxu0 %v10281_v39  ;;  %v4530_v39 = vld [vmem:[#allocation11 + $0x678] sm:$0xff] }
 0x443   :  { %4033 = vmatprep.subr.bf16.mxu0 %v10286_v40  ;;  %v4546_v40 = vld [vmem:[#allocation11 + $0x6f8] sm:$0xff] }
 0x446   :  { %4034 = vmatpush1.bf16.msra.mxu0 %v10284_v41  ;;  %v9187_v41 = vcombine.low %v4530_v39, %v4546_v40 }
 0x447   :  { %4035 = vmatprep.subr.bf16.mxu0 %v10289_v42  ;;  %v9188_v42 = vcombine.high %v4530_v39, %v4546_v40  ;;  %v4467_v39 = vld [vmem:[#allocation11 + $0x480] sm:$0xff] }
 0x44a   :  { %4036 = vmatpush1.bf16.msra.mxu0 %v10287_v43  ;;  %v4562_v43 = vld [vmem:[#allocation11 + $0x778] sm:$0xff] }
 0x44b   :  { %4037 = vmatprep.subr.bf16.mxu0 %v10292_v44  ;;  %v4578_v44 = vld [vmem:[#allocation11 + $0x7f8] sm:$0xff] }
 0x44e   :  { %4038 = vmatpush1.bf16.msra.mxu0 %v10290_v26  ;;  %v9219_v26 = vcombine.low %v4562_v43, %v4578_v44 }
 0x44f   :  { %4039 = vmatprep.subr.bf16.mxu0 %v10295_v45  ;;  %v9220_v45 = vcombine.high %v4562_v43, %v4578_v44  ;;  %v4499_v43 = vld [vmem:[#allocation11 + $0x580] sm:$0xff] }
 0x450   :  { %v4531_v44 = vld [vmem:[#allocation11 + $0x680] sm:$0xff] }
 0x452   :  { %4040 = vmatpush1.bf16.msra.mxu0 %v10293_v46  ;;  %v4594_v46 = vld [vmem:[#allocation11 + $0x878] sm:$0xff] }
 0x453   :  { %4041 = vmatprep.subr.bf16.mxu0 %v10298_v47  ;;  %v4610_v47 = vld [vmem:[#allocation11 + $0x8f8] sm:$0xff] }
 0x456   :  { %4042 = vmatpush1.bf16.msra.mxu0 %v10296_v48  ;;  %v9251_v48 = vcombine.low %v4594_v46, %v4610_v47 }
 0x457   :  { %4043 = vmatprep.subr.bf16.mxu0 %v10301_v49  ;;  %v9252_v49 = vcombine.high %v4594_v46, %v4610_v47  ;;  %v4547_v46 = vld [vmem:[#allocation11 + $0x700] sm:$0xff] }
 0x458   :  { %v4563_v47 = vld [vmem:[#allocation11 + $0x780] sm:$0xff] }
 0x45a   :  { %4044 = vmatpush1.bf16.msra.mxu0 %v10299_v50  ;;  %v4626_v50 = vld [vmem:[#allocation11 + $0x978] sm:$0xff] }
 0x45b   :  { %4045 = vmatprep.subr.bf16.mxu0 %v10304_v51  ;;  %v4642_v51 = vld [vmem:[#allocation11 + $0x9f8] sm:$0xff] }
 0x45e   :  { %4046 = vmatpush1.bf16.msra.mxu0 %v10302_v52  ;;  %v9283_v52 = vcombine.low %v4626_v50, %v4642_v51 }
 0x45f   :  { %4047 = vmatprep.subr.bf16.mxu0 %v10307_v53  ;;  %v9284_v53 = vcombine.high %v4626_v50, %v4642_v51  ;;  %v4579_v50 = vld [vmem:[#allocation11 + $0x800] sm:$0xff] }
 0x460   :  { %v4595_v51 = vld [vmem:[#allocation11 + $0x880] sm:$0xff] }
 0x462   :  { %4048 = vmatpush1.bf16.msra.mxu0 %v10305_v54  ;;  %v4658_v54 = vld [vmem:[#allocation11 + $0xa78] sm:$0xff] }
 0x463   :  { %4049 = vmatprep.subr.bf16.mxu0 %v10310_v55  ;;  %v4674_v55 = vld [vmem:[#allocation11 + $0xaf8] sm:$0xff] }
 0x466   :  { %4050 = vmatpush1.bf16.msra.mxu0 %v10308_v56  ;;  %v9315_v56 = vcombine.low %v4658_v54, %v4674_v55 }
 0x467   :  { %4051 = vmatprep.subr.bf16.mxu0 %v10313_v57  ;;  %v9316_v57 = vcombine.high %v4658_v54, %v4674_v55  ;;  %v4611_v54 = vld [vmem:[#allocation11 + $0x900] sm:$0xff] }
 0x468   :  { %v4627_v55 = vld [vmem:[#allocation11 + $0x980] sm:$0xff] }
 0x46a   :  { %4052 = vmatpush1.bf16.msra.mxu0 %v10311_v58  ;;  %v4690_v58 = vld [vmem:[#allocation11 + $0xb78] sm:$0xff] }
 0x46b   :  { %4053 = vmatprep.subr.bf16.mxu0 %v10316_v59  ;;  %v4706_v59 = vld [vmem:[#allocation11 + $0xbf8] sm:$0xff] }
 0x46e   :  { %4054 = vmatpush1.bf16.msra.mxu0 %v10314_v60  ;;  %v9347_v60 = vcombine.low %v4690_v58, %v4706_v59 }
 0x46f   :  { %4055 = vmatprep.subr.bf16.mxu0 %v10319_v61  ;;  %v9348_v61 = vcombine.high %v4690_v58, %v4706_v59  ;;  %v4643_v58 = vld [vmem:[#allocation11 + $0xa00] sm:$0xff] }
 0x470   :  { %v4659_v59 = vld [vmem:[#allocation11 + $0xa80] sm:$0xff] }
 0x472   :  { %4056 = vmatpush1.bf16.msra.mxu0 %v10317_v62  ;;  %v4722_v62 = vld [vmem:[#allocation11 + $0xc78] sm:$0xff] }
 0x473   :  { %4057 = vmatprep.subr.bf16.mxu0 %v10322_v63  ;;  %v4738_v63 = vld [vmem:[#allocation11 + $0xcf8] sm:$0xff] }
 0x476   :  { %4058 = vmatpush1.bf16.msra.mxu0 %v10320_v0  ;;  %v9379_v0 = vcombine.low %v4722_v62, %v4738_v63 }
 0x477   :  { %4059 = vmatprep.subr.bf16.mxu0 %v10325_v1  ;;  %v9380_v1 = vcombine.high %v4722_v62, %v4738_v63  ;;  %v4675_v62 = vld [vmem:[#allocation11 + $0xb00] sm:$0xff] }
 0x478   :  { %v4691_v63 = vld [vmem:[#allocation11 + $0xb80] sm:$0xff] }
 0x47a   :  { %4060 = vmatpush1.bf16.msra.mxu0 %v10323_v2  ;;  %v4754_v2 = vld [vmem:[#allocation11 + $0xd78] sm:$0xff] }
 0x47b   :  { %8178 = vmatprep.subr.bf16.mxu0 %v8996_v17 }
 0x47d   :  { %4062 = vmatmul.mubr.bf16.vlgmr.msra.gmra.mrb[0].mxu0 %v328_v3  ;;  %v4770_v3 = vld [vmem:[#allocation11 + $0xdf8] sm:$0xff] }
 0x47e   :  { %8179 = vmatpush1.bf16.msra.mxu0 %v8995_v15  ;;  %v9411_v4 = vcombine.low %v4754_v2, %v4770_v3  ;;  %v9412_v5 = vcombine.high %v4754_v2, %v4770_v3  ;;  %v4707_v2 = vld [vmem:[#allocation11 + $0xc00] sm:$0xff] }
 0x47f   :  { %8180 = vmatprep.subr.bf16.mxu0 %v9028_v21  ;;  %v4723_v3 = vld [vmem:[#allocation11 + $0xc80] sm:$0xff] }
 0x482   :  { %8181 = vmatpush1.bf16.msra.mxu0 %v9027_v20 }
 0x483   :  { %8182 = vmatprep.subr.bf16.mxu0 %v9060_v27  ;;  %v4371_v27 = vld [vmem:[#allocation11 + $0x180] sm:$0xff] }
 0x486   :  { %8183 = vmatpush1.bf16.msra.mxu0 %v9059_v25  ;;  %v4355_v25 = vld [vmem:[#allocation11 + $0x100] sm:$0xff] }
 0x487   :  { %8184 = vmatprep.subr.bf16.mxu0 %v9092_v31  ;;  %v4387_v31 = vld [vmem:[#allocation11 + $0x200] sm:$0xff]  ;;  %v8997_v33 = vcombine.low %v4355_v25, %v4371_v27 }
 0x488   :  { %v9029_v36 = vcombine.low %v4387_v31, %v4403_v32 }
 0x48a   :  { %8185 = vmatpush1.bf16.msra.mxu0 %v9091_v30  ;;  %v8998_v30 = vcombine.high %v4355_v25, %v4371_v27 }
 0x48b   :  { %8186 = vmatprep.subr.bf16.mxu0 %v9124_v24  ;;  %v4419_v24 = vld [vmem:[#allocation11 + $0x300] sm:$0xff] }
 0x48c   :  { %v9061_v40 = vcombine.low %v4419_v24, %v4435_v35 }
 0x48e   :  { %8187 = vmatpush1.bf16.msra.mxu0 %v9123_v34  ;;  %v9030_v34 = vcombine.high %v4387_v31, %v4403_v32  ;;  %v4818_v31 = vld [vmem:[#allocation11 + $0xf78] sm:$0xff] }
 0x48f   :  { %8188 = vmatprep.subr.bf16.mxu0 %v9156_v38  ;;  %v4451_v38 = vld [vmem:[#allocation11 + $0x400] sm:$0xff]  ;;  %v4834_v32 = vld [vmem:[#allocation11 + $0xff8] sm:$0xff] }
 0x490   :  { %v9093_v8 = vcombine.low %v4451_v38, %v4467_v39 }
 0x492   :  { %8189 = vmatpush1.bf16.msra.mxu0 %v9155_v37  ;;  %v9062_v37 = vcombine.high %v4419_v24, %v4435_v35  ;;  %v9475_v24 = vcombine.low %v4818_v31, %v4834_v32  ;;  %v4324_v35 = vld [vmem:[#allocation11 + $0x8] sm:$0xff] }
 0x493   :  { %8190 = vmatprep.subr.bf16.mxu0 %v9188_v42  ;;  %v4483_v42 = vld [vmem:[#allocation11 + $0x500] sm:$0xff] }
 0x494   :  { %v9126_v9 = vcombine.high %v4483_v42, %v4499_v43 }
 0x496   :  { %8191 = vmatpush1.bf16.msra.mxu0 %v9187_v41  ;;  %v9094_v41 = vcombine.high %v4451_v38, %v4467_v39  ;;  %v4106_v39 = vld [vmem:[#allocation10] sm:$0x3] }
 0x497   :  { %8192 = vmatprep.subr.bf16.mxu0 %v9220_v45 }
 0x49a   :  { %8193 = vmatpush1.bf16.msra.mxu0 %v9219_v26  ;;  %v9125_v26 = vcombine.low %v4483_v42, %v4499_v43 }
 0x49b   :  { %8194 = vmatprep.subr.bf16.mxu0 %v9252_v49  ;;  %v9190_v49 = vcombine.high %v4547_v46, %v4563_v47 }
 0x49e   :  { %8195 = vmatpush1.bf16.msra.mxu0 %v9251_v48 }
 0x49f   :  { %8196 = vmatprep.subr.bf16.mxu0 %v9284_v53  ;;  %v9222_v53 = vcombine.high %v4579_v50, %v4595_v51 }
 0x4a2   :  { %8197 = vmatpush1.bf16.msra.mxu0 %v9283_v52  ;;  %v9189_v52 = vcombine.low %v4547_v46, %v4563_v47  ;;  %v4356_v46 = vld [vmem:[#allocation11 + $0x108] sm:$0xff] }
 0x4a3   :  { %8198 = vmatprep.subr.bf16.mxu0 %v9316_v57  ;;  %v9254_v57 = vcombine.high %v4611_v54, %v4627_v55  ;;  %v4372_v47 = vld [vmem:[#allocation11 + $0x188] sm:$0xff] }
 0x4a6   :  { %8199 = vmatpush1.bf16.msra.mxu0 %v9315_v56  ;;  %v9221_v56 = vcombine.low %v4579_v50, %v4595_v51  ;;  %v9000_v50 = vcombine.high %v4356_v46, %v4372_v47  ;;  %v4388_v51 = vld [vmem:[#allocation11 + $0x208] sm:$0xff] }
 0x4a7   :  { %8200 = vmatprep.subr.bf16.mxu0 %v9348_v61  ;;  %v9286_v61 = vcombine.high %v4643_v58, %v4659_v59 }
 0x4aa   :  { %8201 = vmatpush1.bf16.msra.mxu0 %v9347_v60  ;;  %v9253_v60 = vcombine.low %v4611_v54, %v4627_v55  ;;  %v4420_v55 = vld [vmem:[#allocation11 + $0x308] sm:$0xff] }
 0x4ab   :  { %8202 = vmatprep.subr.bf16.mxu0 %v9380_v1  ;;  %v9318_v1 = vcombine.high %v4675_v62, %v4691_v63 }
 0x4ae   :  { %8203 = vmatpush1.bf16.msra.mxu0 %v9379_v0  ;;  %v9285_v0 = vcombine.low %v4643_v58, %v4659_v59  ;;  %v4452_v59 = vld [vmem:[#allocation11 + $0x408] sm:$0xff] }
 0x4af   :  { %8204 = vmatprep.subr.bf16.mxu0 %v9412_v5  ;;  %v9350_v5 = vcombine.high %v4707_v2, %v4723_v3 }
 0x4b2   :  { %8205 = vmatpush1.bf16.msra.mxu0 %v9411_v4  ;;  %v9317_v4 = vcombine.low %v4675_v62, %v4691_v63  ;;  %v4484_v63 = vld [vmem:[#allocation11 + $0x508] sm:$0xff] }
 0x550   :  { %v4063_v15 = vpop.f32.mrb[0].mxu0 }
 0x551   :  { %v9477_v17 = vadd.f32 %v4063_v15, %v847_v12  ;;  %v4065_v18 = vpop.f32.mrb[1].mxu0  ;;  %v4755_v12 = vld [vmem:[#allocation11 + $0xd80] sm:$0xff] }
 0x552   :  { %v9478_v19 = vadd.f32 %v4065_v18, %v851_v14  ;;  %v4067_v20 = vpop.f32.mrb[2].mxu0  ;;  %v9349_v14 = vcombine.low %v4707_v2, %v4723_v3  ;;  %v9382_v15 = vcombine.high %v4739_v7, %v4755_v12  ;;  %v4771_v18 = vld [vmem:[#allocation11 + $0xe00] sm:$0xff]  ;;  %v4516_v3 = vld [vmem:[#allocation11 + $0x608] sm:$0xff] }
 0x553   :  { %v4070_v21 = vmax.f32 %v9477_v17, 0.0  ;;  %v4068_v22 = vpop.f32.mrb[3].mxu0  ;;  %v9381_v17 = vcombine.low %v4739_v7, %v4755_v12  ;;  %v4548_v12 = vld [vmem:[#allocation11 + $0x708] sm:$0xff] }
 0x554   :  { %v4071_v23 = vmax.f32 %v9478_v19, 0.0  ;;  %v4787_v19 = vld [vmem:[#allocation11 + $0xe80] sm:$0xff]  ;;  %v4802_v22 = vld [vmem:[#allocation11 + $0xef8] sm:$0xff] }
 0x555   :  { %v4072_v29 = vpack.c.bf16 %v4070_v21, %v4070_v21  ;;  %v9414_v20 = vcombine.high %v4771_v18, %v4787_v19  ;;  %v4786_v21 = vld [vmem:[#allocation11 + $0xe78] sm:$0xff] }
 0x556   :  { %v4073_v28 = vpack.c.bf16 %v4071_v23, %v4071_v23  ;;  %v9413_v23 = vcombine.low %v4771_v18, %v4787_v19  ;;  %v9444_v25 = vcombine.high %v4786_v21, %v4802_v22  ;;  %v9443_v27 = vcombine.low %v4786_v21, %v4802_v22  ;;  %v4580_v18 = vld [vmem:[#allocation11 + $0x808] sm:$0xff] }
 0x557   :  { %v4596_v19 = vld [vmem:[#allocation11 + $0x888] sm:$0xff] }
 0x558   :  { %4310 = vmatprep.mubr.bf16.mxu1 %v4073_v28  ;;  %8206 = vmatprep.subr.bf16.mxu0 %v9444_v25  ;;  %v4803_v28 = vld [vmem:[#allocation11 + $0xf00] sm:$0xff]  ;;  %v9224_v21 = vcombine.high %v4580_v18, %v4596_v19  ;;  %v4612_v22 = vld [vmem:[#allocation11 + $0x908] sm:$0xff]  ;;  %v9223_v25 = vcombine.low %v4580_v18, %v4596_v19 }
 0x559   :  { %4311 = vmatmul.mubr.bf16.vlgmr.msra.gmra.mrb[0].mxu1 %v4072_v29  ;;  %v4819_v29 = vld [vmem:[#allocation11 + $0xf80] sm:$0xff]  ;;  %8207 = vmatpush1.bf16.msra.mxu0 %v9443_v27 }
 0x55a   :  { %7564 = vmatpush1.bf16.msra.mxu1 %v8965_v10  ;;  %v4515_v10 = vld [vmem:[#allocation11 + $0x600] sm:$0xff] }
 0x55b   :  { %7565 = vmatprep.subr.bf16.mxu1 %v8998_v30  ;;  %v9158_v45 = vcombine.high %v4515_v10, %v4531_v44  ;;  %v9157_v48 = vcombine.low %v4515_v10, %v4531_v44  ;;  %v9446_v30 = vcombine.high %v4803_v28, %v4819_v29 }
 0x55e   :  { %7566 = vmatpush1.bf16.msra.mxu1 %v8997_v33  ;;  %v9445_v33 = vcombine.low %v4803_v28, %v4819_v29  ;;  %v4644_v28 = vld [vmem:[#allocation11 + $0xa08] sm:$0xff] }
 0x55f   :  { %7567 = vmatprep.subr.bf16.mxu1 %v9030_v34  ;;  %v9476_v34 = vcombine.high %v4818_v31, %v4834_v32  ;;  %v4660_v29 = vld [vmem:[#allocation11 + $0xa88] sm:$0xff] }
 0x560   :  { %v9288_v31 = vcombine.high %v4644_v28, %v4660_v29  ;;  %v4676_v32 = vld [vmem:[#allocation11 + $0xb08] sm:$0xff] }
 0x561   :  { %8208 = vmatprep.subr.bf16.mxu0 %v9476_v34  ;;  %v9287_v34 = vcombine.low %v4644_v28, %v4660_v29 }
 0x562   :  { %7568 = vmatpush1.bf16.msra.mxu1 %v9029_v36  ;;  %v4340_v36 = vld [vmem:[#allocation11 + $0x88] sm:$0xff]  ;;  %8209 = vmatpush1.bf16.msra.mxu0 %v9475_v24 }
 0x563   :  { %7569 = vmatprep.subr.bf16.mxu1 %v9062_v37  ;;  %v8968_v37 = vcombine.high %v4324_v35, %v4340_v36  ;;  %v8967_v38 = vcombine.low %v4324_v35, %v4340_v36  ;;  %v4708_v35 = vld [vmem:[#allocation11 + $0xc08] sm:$0xff] }
 0x564   :  { %v4724_v36 = vld [vmem:[#allocation11 + $0xc88] sm:$0xff] }
 0x566   :  { %7570 = vmatpush1.bf16.msra.mxu1 %v9061_v40  ;;  %v4111_v40 = vrot.slane %v4106_v39, %v10858_v6 }
 0x567   :  { %7571 = vmatprep.subr.bf16.mxu1 %v9094_v41  ;;  %v4115_v41 = vrot.slane %v4106_v39, %v10861_v11  ;;  %v4740_v39 = vld [vmem:[#allocation11 + $0xd08] sm:$0xff] }
 0x56a   :  { %7572 = vmatpush1.bf16.msra.mxu1 %v9093_v8 }
 0x56b   :  { %7573 = vmatprep.subr.bf16.mxu1 %v9126_v9 }
 0x56e   :  { %7574 = vmatpush1.bf16.msra.mxu1 %v9125_v26 }
 0x56f   :  { %7575 = vmatprep.subr.bf16.mxu1 %v9158_v45 }
 0x572   :  { %7576 = vmatpush1.bf16.msra.mxu1 %v9157_v48 }
 0x573   :  { %7577 = vmatprep.subr.bf16.mxu1 %v9190_v49 }
 0x576   :  { %7578 = vmatpush1.bf16.msra.mxu1 %v9189_v52  ;;  %v4404_v52 = vld [vmem:[#allocation11 + $0x288] sm:$0xff] }
 0x577   :  { %7579 = vmatprep.subr.bf16.mxu1 %v9222_v53  ;;  %v8999_v53 = vcombine.low %v4356_v46, %v4372_v47  ;;  %v9032_v54 = vcombine.high %v4388_v51, %v4404_v52  ;;  %v4325_v47 = vld [vmem:[#allocation11 + $0x10] sm:$0xff] }
 0x57a   :  { %7580 = vmatpush1.bf16.msra.mxu1 %v9221_v56  ;;  %v4436_v56 = vld [vmem:[#allocation11 + $0x388] sm:$0xff] }
 0x57b   :  { %7581 = vmatprep.subr.bf16.mxu1 %v9254_v57  ;;  %v9031_v57 = vcombine.low %v4388_v51, %v4404_v52  ;;  %v9064_v58 = vcombine.high %v4420_v55, %v4436_v56 }
 0x57e   :  { %7582 = vmatpush1.bf16.msra.mxu1 %v9253_v60  ;;  %v4468_v60 = vld [vmem:[#allocation11 + $0x488] sm:$0xff] }
 0x57f   :  { %7583 = vmatprep.subr.bf16.mxu1 %v9286_v61  ;;  %v9063_v61 = vcombine.low %v4420_v55, %v4436_v56  ;;  %v9096_v62 = vcombine.high %v4452_v59, %v4468_v60 }
 0x582   :  { %7584 = vmatpush1.bf16.msra.mxu1 %v9285_v0  ;;  %v4500_v0 = vld [vmem:[#allocation11 + $0x588] sm:$0xff] }
 0x583   :  { %7585 = vmatprep.subr.bf16.mxu1 %v9318_v1  ;;  %v9095_v1 = vcombine.low %v4452_v59, %v4468_v60  ;;  %v9128_v2 = vcombine.high %v4484_v63, %v4500_v0 }
 0x586   :  { %7586 = vmatpush1.bf16.msra.mxu1 %v9317_v4  ;;  %v4532_v4 = vld [vmem:[#allocation11 + $0x688] sm:$0xff] }
 0x587   :  { %7587 = vmatprep.subr.bf16.mxu1 %v9350_v5  ;;  %v9127_v5 = vcombine.low %v4484_v63, %v4500_v0  ;;  %v9160_v7 = vcombine.high %v4516_v3, %v4532_v4 }
 0x58a   :  { %7588 = vmatpush1.bf16.msra.mxu1 %v9349_v14  ;;  %v4564_v14 = vld [vmem:[#allocation11 + $0x788] sm:$0xff] }
 0x58b   :  { %7589 = vmatprep.subr.bf16.mxu1 %v9382_v15  ;;  %v9159_v15 = vcombine.low %v4516_v3, %v4532_v4 }
 0x58e   :  { %7590 = vmatpush1.bf16.msra.mxu1 %v9381_v17  ;;  %v9192_v17 = vcombine.high %v4548_v12, %v4564_v14 }
 0x58f   :  { %7591 = vmatprep.subr.bf16.mxu1 %v9414_v20  ;;  %v9191_v20 = vcombine.low %v4548_v12, %v4564_v14 }
 0x592   :  { %7592 = vmatpush1.bf16.msra.mxu1 %v9413_v23  ;;  %v4628_v23 = vld [vmem:[#allocation11 + $0x988] sm:$0xff] }
 0x593   :  { %7593 = vmatprep.subr.bf16.mxu1 %v9446_v30  ;;  %v9256_v27 = vcombine.high %v4612_v22, %v4628_v23  ;;  %v9255_v30 = vcombine.low %v4612_v22, %v4628_v23 }
 0x596   :  { %7594 = vmatpush1.bf16.msra.mxu1 %v9445_v33  ;;  %v4692_v33 = vld [vmem:[#allocation11 + $0xb88] sm:$0xff] }
 0x597   :  { %7604 = vmatprep.subr.bf16.mxu1 %v8968_v37  ;;  %v9320_v24 = vcombine.high %v4676_v32, %v4692_v33  ;;  %v9319_v37 = vcombine.low %v4676_v32, %v4692_v33 }
 0x62c   :  { %v4312_v42 = vpop.f32.mrb[0].mxu1 }
 0x62d   :  { %v4313_v43 = vadd.f32 %v4312_v42, %v4111_v40  ;;  %v4314_v8 = vpop.f32.mrb[1].mxu1  ;;  %v4756_v40 = vld [vmem:[#allocation11 + $0xd88] sm:$0xff] }
 0x62e   :  { %v4315_v9 = vadd.f32 %v4314_v8, %v4115_v41  ;;  %v4316_v10 = vpop.f32.mrb[2].mxu1  ;;  %v9351_v41 = vcombine.low %v4708_v35, %v4724_v36  ;;  %v9384_v42 = vcombine.high %v4740_v39, %v4756_v40  ;;  %v4788_v8 = vld [vmem:[#allocation11 + $0xe88] sm:$0xff] }
 0x62f   :  { %v4319_v44 = vmax.f32 %v4313_v43, 0.0  ;;  %v4317_v26 = vpop.f32.mrb[3].mxu1  ;;  %v4772_v43 = vld [vmem:[#allocation11 + $0xe08] sm:$0xff] }
 0x630   :  { %v4320_v45 = vmax.f32 %v4315_v9, 0.0  ;;  %v9383_v9 = vcombine.low %v4740_v39, %v4756_v40  ;;  %v9416_v10 = vcombine.high %v4772_v43, %v4788_v8  ;;  %v4820_v26 = vld [vmem:[#allocation11 + $0xf88] sm:$0xff] }
 0x631   :  { %v10872_v49 = vpack.c.bf16 %v4319_v44, %v4319_v44  ;;  %v4804_v44 = vld [vmem:[#allocation11 + $0xf08] sm:$0xff] }
 0x632   :  { %v10870_v48 = vpack.c.bf16 %v4320_v45, %v4320_v45  ;;  %v9415_v45 = vcombine.low %v4772_v43, %v4788_v8  ;;  %v9448_v46 = vcombine.high %v4804_v44, %v4820_v26  ;;  %v9447_v51 = vcombine.low %v4804_v44, %v4820_v26 }
 0x634   :  { %7595 = vmatprep.mubr.bf16.mxu1 %v10870_v48  ;;  %8210 = vmatprep.mubr.bf16.mxu0 %v10870_v48 }
 0x635   :  { %7596 = vmatmul.mubr.bf16.vlgmr.msra.gmra.mrb[4].mxu1 %v10872_v49  ;;  %8211 = vmatmul.mubr.bf16.vlgmr.msra.gmra.mrb[4].mxu0 %v10872_v49 }
 0x636   :  { %7605 = vmatpush1.bf16.msra.mxu1 %v8967_v38  ;;  %7636 = vmatprep.mubr.bf16.mxu1 %v10870_v48  ;;  %v9352_v38 = vcombine.high %v4708_v35, %v4724_v36 }
 0x637   :  { %7606 = vmatprep.subr.bf16.mxu1 %v9000_v50  ;;  %v4341_v50 = vld [vmem:[#allocation11 + $0x90] sm:$0xff] }
 0x638   :  { %v8970_v52 = vcombine.high %v4325_v47, %v4341_v50  ;;  %v8969_v55 = vcombine.low %v4325_v47, %v4341_v50 }
 0x63a   :  { %7607 = vmatpush1.bf16.msra.mxu1 %v8999_v53  ;;  %v4357_v53 = vld [vmem:[#allocation11 + $0x110] sm:$0xff] }
 0x63b   :  { %7608 = vmatprep.subr.bf16.mxu1 %v9032_v54  ;;  %v4373_v54 = vld [vmem:[#allocation11 + $0x190] sm:$0xff] }
 0x63c   :  { %v9002_v56 = vcombine.high %v4357_v53, %v4373_v54  ;;  %v9001_v59 = vcombine.low %v4357_v53, %v4373_v54 }
 0x63e   :  { %7609 = vmatpush1.bf16.msra.mxu1 %v9031_v57  ;;  %v4389_v57 = vld [vmem:[#allocation11 + $0x210] sm:$0xff] }
 0x63f   :  { %7610 = vmatprep.subr.bf16.mxu1 %v9064_v58  ;;  %v4405_v58 = vld [vmem:[#allocation11 + $0x290] sm:$0xff] }
 0x640   :  { %v9034_v60 = vcombine.high %v4389_v57, %v4405_v58  ;;  %v9033_v63 = vcombine.low %v4389_v57, %v4405_v58 }
 0x642   :  { %7611 = vmatpush1.bf16.msra.mxu1 %v9063_v61  ;;  %v4421_v61 = vld [vmem:[#allocation11 + $0x310] sm:$0xff] }
 0x643   :  { %7612 = vmatprep.subr.bf16.mxu1 %v9096_v62  ;;  %v4437_v62 = vld [vmem:[#allocation11 + $0x390] sm:$0xff] }
 0x644   :  { %v9066_v0 = vcombine.high %v4421_v61, %v4437_v62  ;;  %v9065_v3 = vcombine.low %v4421_v61, %v4437_v62 }
 0x646   :  { %7613 = vmatpush1.bf16.msra.mxu1 %v9095_v1  ;;  %v4453_v1 = vld [vmem:[#allocation11 + $0x410] sm:$0xff] }
 0x647   :  { %7614 = vmatprep.subr.bf16.mxu1 %v9128_v2  ;;  %v4469_v2 = vld [vmem:[#allocation11 + $0x490] sm:$0xff] }
 0x648   :  { %v9098_v4 = vcombine.high %v4453_v1, %v4469_v2  ;;  %v9097_v12 = vcombine.low %v4453_v1, %v4469_v2 }
 0x64a   :  { %7615 = vmatpush1.bf16.msra.mxu1 %v9127_v5  ;;  %v4485_v5 = vld [vmem:[#allocation11 + $0x510] sm:$0xff] }
 0x64b   :  { %7616 = vmatprep.subr.bf16.mxu1 %v9160_v7  ;;  %v4501_v7 = vld [vmem:[#allocation11 + $0x590] sm:$0xff] }
 0x64c   :  { %v9130_v14 = vcombine.high %v4485_v5, %v4501_v7  ;;  %v9129_v18 = vcombine.low %v4485_v5, %v4501_v7 }
 0x64e   :  { %7617 = vmatpush1.bf16.msra.mxu1 %v9159_v15  ;;  %v4517_v15 = vld [vmem:[#allocation11 + $0x610] sm:$0xff] }
 0x64f   :  { %7618 = vmatprep.subr.bf16.mxu1 %v9192_v17  ;;  %v4533_v17 = vld [vmem:[#allocation11 + $0x690] sm:$0xff] }
 0x650   :  { %v9162_v19 = vcombine.high %v4517_v15, %v4533_v17  ;;  %v9161_v22 = vcombine.low %v4517_v15, %v4533_v17 }
 0x652   :  { %7619 = vmatpush1.bf16.msra.mxu1 %v9191_v20  ;;  %v4549_v20 = vld [vmem:[#allocation11 + $0x710] sm:$0xff] }
 0x653   :  { %7620 = vmatprep.subr.bf16.mxu1 %v9224_v21  ;;  %v4565_v21 = vld [vmem:[#allocation11 + $0x790] sm:$0xff] }
 0x654   :  { %v9194_v23 = vcombine.high %v4549_v20, %v4565_v21  ;;  %v9193_v28 = vcombine.low %v4549_v20, %v4565_v21 }
 0x656   :  { %7621 = vmatpush1.bf16.msra.mxu1 %v9223_v25  ;;  %v4581_v25 = vld [vmem:[#allocation11 + $0x810] sm:$0xff] }
 0x657   :  { %7622 = vmatprep.subr.bf16.mxu1 %v9256_v27  ;;  %v4597_v27 = vld [vmem:[#allocation11 + $0x890] sm:$0xff] }
 0x658   :  { %v9226_v29 = vcombine.high %v4581_v25, %v4597_v27  ;;  %v9225_v32 = vcombine.low %v4581_v25, %v4597_v27 }
 0x65a   :  { %7623 = vmatpush1.bf16.msra.mxu1 %v9255_v30  ;;  %v4613_v30 = vld [vmem:[#allocation11 + $0x910] sm:$0xff] }
 0x65b   :  { %7624 = vmatprep.subr.bf16.mxu1 %v9288_v31  ;;  %v4629_v31 = vld [vmem:[#allocation11 + $0x990] sm:$0xff] }
 0x65c   :  { %v9258_v33 = vcombine.high %v4613_v30, %v4629_v31  ;;  %v9257_v35 = vcombine.low %v4613_v30, %v4629_v31 }
 0x65e   :  { %7625 = vmatpush1.bf16.msra.mxu1 %v9287_v34  ;;  %v4645_v34 = vld [vmem:[#allocation11 + $0xa10] sm:$0xff] }
 0x65f   :  { %7626 = vmatprep.subr.bf16.mxu1 %v9320_v24  ;;  %v4661_v24 = vld [vmem:[#allocation11 + $0xa90] sm:$0xff] }
 0x660   :  { %v9290_v36 = vcombine.high %v4645_v34, %v4661_v24  ;;  %v9289_v39 = vcombine.low %v4645_v34, %v4661_v24 }
 0x662   :  { %7627 = vmatpush1.bf16.msra.mxu1 %v9319_v37  ;;  %v4677_v37 = vld [vmem:[#allocation11 + $0xb10] sm:$0xff] }
 0x663   :  { %7628 = vmatprep.subr.bf16.mxu1 %v9352_v38  ;;  %v4693_v38 = vld [vmem:[#allocation11 + $0xb90] sm:$0xff] }
 0x664   :  { %v9322_v40 = vcombine.high %v4677_v37, %v4693_v38  ;;  %v9321_v43 = vcombine.low %v4677_v37, %v4693_v38 }
 0x666   :  { %7629 = vmatpush1.bf16.msra.mxu1 %v9351_v41  ;;  %v4709_v41 = vld [vmem:[#allocation11 + $0xc10] sm:$0xff] }
 0x667   :  { %7630 = vmatprep.subr.bf16.mxu1 %v9384_v42  ;;  %v4725_v42 = vld [vmem:[#allocation11 + $0xc90] sm:$0xff] }
 0x668   :  { %v9354_v8 = vcombine.high %v4709_v41, %v4725_v42  ;;  %v9353_v44 = vcombine.low %v4709_v41, %v4725_v42 }
 0x66a   :  { %7631 = vmatpush1.bf16.msra.mxu1 %v9383_v9  ;;  %v4741_v9 = vld [vmem:[#allocation11 + $0xd10] sm:$0xff] }
 0x66b   :  { %7632 = vmatprep.subr.bf16.mxu1 %v9416_v10  ;;  %v4757_v10 = vld [vmem:[#allocation11 + $0xd90] sm:$0xff] }
 0x66c   :  { %v9386_v26 = vcombine.high %v4741_v9, %v4757_v10  ;;  %v9385_v47 = vcombine.low %v4741_v9, %v4757_v10 }
 0x66e   :  { %7633 = vmatpush1.bf16.msra.mxu1 %v9415_v45  ;;  %v4773_v45 = vld [vmem:[#allocation11 + $0xe10] sm:$0xff] }
 0x66f   :  { %7634 = vmatprep.subr.bf16.mxu1 %v9448_v46  ;;  %v4789_v46 = vld [vmem:[#allocation11 + $0xe90] sm:$0xff] }
 0x670   :  { %v9418_v50 = vcombine.high %v4773_v45, %v4789_v46  ;;  %v9417_v53 = vcombine.low %v4773_v45, %v4789_v46 }
 0x672   :  { %7635 = vmatpush1.bf16.msra.mxu1 %v9447_v51  ;;  %v4805_v51 = vld [vmem:[#allocation11 + $0xf10] sm:$0xff] }
 0x673   :  { %7645 = vmatprep.subr.bf16.mxu1 %v8970_v52  ;;  %v4821_v52 = vld [vmem:[#allocation11 + $0xf90] sm:$0xff] }
 0x674   :  { %v9450_v54 = vcombine.high %v4805_v51, %v4821_v52  ;;  %v9449_v57 = vcombine.low %v4805_v51, %v4821_v52 }
 0x675   :  { %7637 = vmatmul.mubr.bf16.vlgmr.msra.gmra.mrb[8].mxu1 %v10872_v49 }
 0x676   :  { %7646 = vmatpush1.bf16.msra.mxu1 %v8969_v55  ;;  %7677 = vmatprep.mubr.bf16.mxu1 %v10870_v48  ;;  %v4326_v55 = vld [vmem:[#allocation11 + $0x18] sm:$0xff] }
 0x677   :  { %7647 = vmatprep.subr.bf16.mxu1 %v9002_v56  ;;  %v4342_v56 = vld [vmem:[#allocation11 + $0x98] sm:$0xff] }
 0x678   :  { %v8972_v58 = vcombine.high %v4326_v55, %v4342_v56  ;;  %v8971_v61 = vcombine.low %v4326_v55, %v4342_v56 }
 0x67a   :  { %7648 = vmatpush1.bf16.msra.mxu1 %v9001_v59  ;;  %v4358_v59 = vld [vmem:[#allocation11 + $0x118] sm:$0xff] }
 0x67b   :  { %7649 = vmatprep.subr.bf16.mxu1 %v9034_v60  ;;  %v4374_v60 = vld [vmem:[#allocation11 + $0x198] sm:$0xff] }
 0x67c   :  { %v9004_v62 = vcombine.high %v4358_v59, %v4374_v60  ;;  %v9003_v1 = vcombine.low %v4358_v59, %v4374_v60 }
 0x67e   :  { %7650 = vmatpush1.bf16.msra.mxu1 %v9033_v63  ;;  %v4390_v63 = vld [vmem:[#allocation11 + $0x218] sm:$0xff] }
 0x67f   :  { %7651 = vmatprep.subr.bf16.mxu1 %v9066_v0  ;;  %v4406_v0 = vld [vmem:[#allocation11 + $0x298] sm:$0xff] }
 0x680   :  { %v9036_v2 = vcombine.high %v4390_v63, %v4406_v0  ;;  %v9035_v5 = vcombine.low %v4390_v63, %v4406_v0 }
 0x682   :  { %7652 = vmatpush1.bf16.msra.mxu1 %v9065_v3  ;;  %v4422_v3 = vld [vmem:[#allocation11 + $0x318] sm:$0xff] }
 0x683   :  { %7653 = vmatprep.subr.bf16.mxu1 %v9098_v4  ;;  %v4438_v4 = vld [vmem:[#allocation11 + $0x398] sm:$0xff] }
 0x684   :  { %v9068_v7 = vcombine.high %v4422_v3, %v4438_v4  ;;  %v9067_v15 = vcombine.low %v4422_v3, %v4438_v4 }
 0x686   :  { %7654 = vmatpush1.bf16.msra.mxu1 %v9097_v12  ;;  %v4454_v12 = vld [vmem:[#allocation11 + $0x418] sm:$0xff] }
 0x687   :  { %7655 = vmatprep.subr.bf16.mxu1 %v9130_v14  ;;  %v4470_v14 = vld [vmem:[#allocation11 + $0x498] sm:$0xff] }
 0x688   :  { %v9100_v17 = vcombine.high %v4454_v12, %v4470_v14  ;;  %v9099_v20 = vcombine.low %v4454_v12, %v4470_v14 }
 0x68a   :  { %7656 = vmatpush1.bf16.msra.mxu1 %v9129_v18  ;;  %v4486_v18 = vld [vmem:[#allocation11 + $0x518] sm:$0xff] }
 0x68b   :  { %7657 = vmatprep.subr.bf16.mxu1 %v9162_v19  ;;  %v4502_v19 = vld [vmem:[#allocation11 + $0x598] sm:$0xff] }
 0x68c   :  { %v9132_v21 = vcombine.high %v4486_v18, %v4502_v19  ;;  %v9131_v25 = vcombine.low %v4486_v18, %v4502_v19 }
 0x68e   :  { %7658 = vmatpush1.bf16.msra.mxu1 %v9161_v22  ;;  %v4518_v22 = vld [vmem:[#allocation11 + $0x618] sm:$0xff] }
 0x68f   :  { %7659 = vmatprep.subr.bf16.mxu1 %v9194_v23  ;;  %v4534_v23 = vld [vmem:[#allocation11 + $0x698] sm:$0xff] }
 0x690   :  { %v9164_v27 = vcombine.high %v4518_v22, %v4534_v23  ;;  %v9163_v30 = vcombine.low %v4518_v22, %v4534_v23 }
 0x692   :  { %7660 = vmatpush1.bf16.msra.mxu1 %v9193_v28  ;;  %v4550_v28 = vld [vmem:[#allocation11 + $0x718] sm:$0xff] }
 0x693   :  { %7661 = vmatprep.subr.bf16.mxu1 %v9226_v29  ;;  %v4566_v29 = vld [vmem:[#allocation11 + $0x798] sm:$0xff] }
 0x694   :  { %v9196_v31 = vcombine.high %v4550_v28, %v4566_v29  ;;  %v9195_v34 = vcombine.low %v4550_v28, %v4566_v29  ;;  %v10886_v28 = vsub.s32 6, %v10703_v13 }
 0x696   :  { %7662 = vmatpush1.bf16.msra.mxu1 %v9225_v32  ;;  %v4582_v32 = vld [vmem:[#allocation11 + $0x818] sm:$0xff] }
 0x697   :  { %7663 = vmatprep.subr.bf16.mxu1 %v9258_v33  ;;  %v4598_v33 = vld [vmem:[#allocation11 + $0x898] sm:$0xff] }
 0x698   :  { %v9228_v24 = vcombine.high %v4582_v32, %v4598_v33  ;;  %v9227_v37 = vcombine.low %v4582_v32, %v4598_v33  ;;  %v10891_v32 = vsub.s32 7, %v10703_v13 }
 0x69a   :  { %7664 = vmatpush1.bf16.msra.mxu1 %v9257_v35  ;;  %v4614_v35 = vld [vmem:[#allocation11 + $0x918] sm:$0xff] }
 0x69b   :  { %7665 = vmatprep.subr.bf16.mxu1 %v9290_v36  ;;  %v4630_v36 = vld [vmem:[#allocation11 + $0x998] sm:$0xff] }
 0x69c   :  { %v9260_v38 = vcombine.high %v4614_v35, %v4630_v36  ;;  %v9259_v41 = vcombine.low %v4614_v35, %v4630_v36 }
 0x69e   :  { %7666 = vmatpush1.bf16.msra.mxu1 %v9289_v39  ;;  %v4646_v39 = vld [vmem:[#allocation11 + $0xa18] sm:$0xff] }
 0x69f   :  { %7667 = vmatprep.subr.bf16.mxu1 %v9322_v40  ;;  %v4662_v40 = vld [vmem:[#allocation11 + $0xa98] sm:$0xff] }
 0x6a0   :  { %v9292_v42 = vcombine.high %v4646_v39, %v4662_v40  ;;  %v9291_v9 = vcombine.low %v4646_v39, %v4662_v40 }
 0x6a2   :  { %7668 = vmatpush1.bf16.msra.mxu1 %v9321_v43  ;;  %v4678_v43 = vld [vmem:[#allocation11 + $0xb18] sm:$0xff] }
 0x6a3   :  { %7669 = vmatprep.subr.bf16.mxu1 %v9354_v8  ;;  %v4694_v8 = vld [vmem:[#allocation11 + $0xb98] sm:$0xff] }
 0x6a4   :  { %v9324_v10 = vcombine.high %v4678_v43, %v4694_v8  ;;  %v9323_v45 = vcombine.low %v4678_v43, %v4694_v8  ;;  %v4551_v43 = vld [vmem:[#allocation11 + $0x720] sm:$0xff] }
 0x6a5   :  { %v4567_v8 = vld [vmem:[#allocation11 + $0x7a0] sm:$0xff] }
 0x6a6   :  { %7670 = vmatpush1.bf16.msra.mxu1 %v9353_v44  ;;  %v4710_v44 = vld [vmem:[#allocation11 + $0xc18] sm:$0xff] }
 0x6a7   :  { %7671 = vmatprep.subr.bf16.mxu1 %v9386_v26  ;;  %v4726_v26 = vld [vmem:[#allocation11 + $0xc98] sm:$0xff] }
 0x6a8   :  { %v9356_v46 = vcombine.high %v4710_v44, %v4726_v26  ;;  %v9355_v51 = vcombine.low %v4710_v44, %v4726_v26 }
 0x6aa   :  { %7672 = vmatpush1.bf16.msra.mxu1 %v9385_v47  ;;  %v4742_v47 = vld [vmem:[#allocation11 + $0xd18] sm:$0xff] }
 0x6ab   :  { %7673 = vmatprep.subr.bf16.mxu1 %v9418_v50  ;;  %v4758_v50 = vld [vmem:[#allocation11 + $0xd98] sm:$0xff] }
 0x6ac   :  { %v9388_v52 = vcombine.high %v4742_v47, %v4758_v50  ;;  %v9387_v55 = vcombine.low %v4742_v47, %v4758_v50 }
 0x6ae   :  { %7674 = vmatpush1.bf16.msra.mxu1 %v9417_v53  ;;  %v4774_v53 = vld [vmem:[#allocation11 + $0xe18] sm:$0xff] }
 0x6af   :  { %7675 = vmatprep.subr.bf16.mxu1 %v9450_v54  ;;  %v4790_v54 = vld [vmem:[#allocation11 + $0xe98] sm:$0xff] }
 0x6b0   :  { %v9420_v56 = vcombine.high %v4774_v53, %v4790_v54  ;;  %v9419_v59 = vcombine.low %v4774_v53, %v4790_v54  ;;  %v9198_v54 = vcombine.high %v4551_v43, %v4567_v8 }
 0x6b2   :  { %7676 = vmatpush1.bf16.msra.mxu1 %v9449_v57  ;;  %v4806_v57 = vld [vmem:[#allocation11 + $0xf18] sm:$0xff] }
 0x6b3   :  { %7686 = vmatprep.subr.bf16.mxu1 %v8972_v58  ;;  %v4822_v58 = vld [vmem:[#allocation11 + $0xf98] sm:$0xff] }
 0x6b4   :  { %v9452_v60 = vcombine.high %v4806_v57, %v4822_v58  ;;  %v9451_v63 = vcombine.low %v4806_v57, %v4822_v58  ;;  %v4583_v57 = vld [vmem:[#allocation11 + $0x820] sm:$0xff] }
 0x6b5   :  { %7678 = vmatmul.mubr.bf16.vlgmr.msra.gmra.mrb[12].mxu1 %v10872_v49  ;;  %v4599_v58 = vld [vmem:[#allocation11 + $0x8a0] sm:$0xff] }
 0x6b6   :  { %7687 = vmatpush1.bf16.msra.mxu1 %v8971_v61  ;;  %7718 = vmatprep.mubr.bf16.mxu1 %v10870_v48  ;;  %v4327_v61 = vld [vmem:[#allocation11 + $0x20] sm:$0xff] }
 0x6b7   :  { %7688 = vmatprep.subr.bf16.mxu1 %v9004_v62  ;;  %v4343_v62 = vld [vmem:[#allocation11 + $0xa0] sm:$0xff] }
 0x6b8   :  { %v8974_v0 = vcombine.high %v4327_v61, %v4343_v62  ;;  %v8973_v3 = vcombine.low %v4327_v61, %v4343_v62  ;;  %v4615_v61 = vld [vmem:[#allocation11 + $0x920] sm:$0xff] }
 0x6b9   :  { %v4631_v62 = vld [vmem:[#allocation11 + $0x9a0] sm:$0xff] }
 0x6ba   :  { %7689 = vmatpush1.bf16.msra.mxu1 %v9003_v1  ;;  %v4359_v1 = vld [vmem:[#allocation11 + $0x120] sm:$0xff] }
 0x6bb   :  { %7690 = vmatprep.subr.bf16.mxu1 %v9036_v2  ;;  %v4375_v2 = vld [vmem:[#allocation11 + $0x1a0] sm:$0xff] }
 0x6bc   :  { %v9006_v4 = vcombine.high %v4359_v1, %v4375_v2  ;;  %v9005_v12 = vcombine.low %v4359_v1, %v4375_v2  ;;  %v4647_v1 = vld [vmem:[#allocation11 + $0xa20] sm:$0xff] }
 0x6bd   :  { %v4663_v2 = vld [vmem:[#allocation11 + $0xaa0] sm:$0xff] }
 0x6be   :  { %7691 = vmatpush1.bf16.msra.mxu1 %v9035_v5  ;;  %v4391_v5 = vld [vmem:[#allocation11 + $0x220] sm:$0xff] }
 0x6bf   :  { %7692 = vmatprep.subr.bf16.mxu1 %v9068_v7  ;;  %v4407_v7 = vld [vmem:[#allocation11 + $0x2a0] sm:$0xff] }
 0x6c0   :  { %v9038_v14 = vcombine.high %v4391_v5, %v4407_v7  ;;  %v9037_v18 = vcombine.low %v4391_v5, %v4407_v7  ;;  %v4679_v5 = vld [vmem:[#allocation11 + $0xb20] sm:$0xff] }
 0x6c1   :  { %v4695_v7 = vld [vmem:[#allocation11 + $0xba0] sm:$0xff] }
 0x6c2   :  { %7693 = vmatpush1.bf16.msra.mxu1 %v9067_v15  ;;  %v4423_v15 = vld [vmem:[#allocation11 + $0x320] sm:$0xff] }
 0x6c3   :  { %7694 = vmatprep.subr.bf16.mxu1 %v9100_v17  ;;  %v4439_v17 = vld [vmem:[#allocation11 + $0x3a0] sm:$0xff] }
 0x6c4   :  { %v9070_v19 = vcombine.high %v4423_v15, %v4439_v17  ;;  %v9069_v22 = vcombine.low %v4423_v15, %v4439_v17  ;;  %v4711_v15 = vld [vmem:[#allocation11 + $0xc20] sm:$0xff] }
 0x6c5   :  { %v4727_v17 = vld [vmem:[#allocation11 + $0xca0] sm:$0xff] }
 0x6c6   :  { %7695 = vmatpush1.bf16.msra.mxu1 %v9099_v20  ;;  %v4455_v20 = vld [vmem:[#allocation11 + $0x420] sm:$0xff] }
 0x6c7   :  { %7696 = vmatprep.subr.bf16.mxu1 %v9132_v21  ;;  %v4471_v21 = vld [vmem:[#allocation11 + $0x4a0] sm:$0xff] }
 0x6c8   :  { %v9102_v23 = vcombine.high %v4455_v20, %v4471_v21  ;;  %v9101_v29 = vcombine.low %v4455_v20, %v4471_v21  ;;  %v4743_v20 = vld [vmem:[#allocation11 + $0xd20] sm:$0xff] }
 0x6c9   :  { %v4759_v21 = vld [vmem:[#allocation11 + $0xda0] sm:$0xff] }
 0x6ca   :  { %7697 = vmatpush1.bf16.msra.mxu1 %v9131_v25  ;;  %v4487_v25 = vld [vmem:[#allocation11 + $0x520] sm:$0xff] }
 0x6cb   :  { %7698 = vmatprep.subr.bf16.mxu1 %v9164_v27  ;;  %v4503_v27 = vld [vmem:[#allocation11 + $0x5a0] sm:$0xff] }
 0x6cc   :  { %v9134_v33 = vcombine.high %v4487_v25, %v4503_v27 }
 0x6ce   :  { %7699 = vmatpush1.bf16.msra.mxu1 %v9163_v30  ;;  %v10888_v30 = vld [vmem:[#allocation13] sm:$0xff] }
 0x6cf   :  { %7700 = vmatprep.subr.bf16.mxu1 %v9196_v31  ;;  %v4838_v31 = vld [vmem:[#allocation13 + $0x18] sm:$0xff]  ;;  %v4846_v35 = vrot.slane %v10888_v30, %v10858_v6 }
 0x6d0   :  { %v4966_v36 = vrot.slane %v4838_v31, %v10886_v28  ;;  %v4970_v39 = vrot.slane %v4838_v31, %v10891_v32 }
 0x6d2   :  { %7701 = vmatpush1.bf16.msra.mxu1 %v9195_v34  ;;  %v4519_v34 = vld [vmem:[#allocation11 + $0x620] sm:$0xff] }
 0x6d3   :  { %7702 = vmatprep.subr.bf16.mxu1 %v9228_v24  ;;  %v4535_v24 = vld [vmem:[#allocation11 + $0x6a0] sm:$0xff] }
 0x6d4   :  { %v9166_v40 = vcombine.high %v4519_v34, %v4535_v24 }
 0x6d6   :  { %7703 = vmatpush1.bf16.msra.mxu1 %v9227_v37  ;;  %v9133_v37 = vcombine.low %v4487_v25, %v4503_v27  ;;  %v4775_v25 = vld [vmem:[#allocation11 + $0xe20] sm:$0xff] }
 0x6d7   :  { %7704 = vmatprep.subr.bf16.mxu1 %v9260_v38  ;;  %v4850_v38 = vrot.slane %v10888_v30, %v10861_v11  ;;  %v4791_v27 = vld [vmem:[#allocation11 + $0xea0] sm:$0xff] }
 0x6d8   :  { %v9422_v31 = vcombine.high %v4775_v25, %v4791_v27 }
 0x6da   :  { %7705 = vmatpush1.bf16.msra.mxu1 %v9259_v41 }
 0x6db   :  { %7706 = vmatprep.subr.bf16.mxu1 %v9292_v42 }
 0x6de   :  { %7707 = vmatpush1.bf16.msra.mxu1 %v9291_v9 }
 0x6df   :  { %7708 = vmatprep.subr.bf16.mxu1 %v9324_v10 }
 0x6e2   :  { %7709 = vmatpush1.bf16.msra.mxu1 %v9323_v45 }
 0x6e3   :  { %7710 = vmatprep.subr.bf16.mxu1 %v9356_v46 }
 0x6e6   :  { %7711 = vmatpush1.bf16.msra.mxu1 %v9355_v51  ;;  %v9165_v51 = vcombine.low %v4519_v34, %v4535_v24  ;;  %v4823_v34 = vld [vmem:[#allocation11 + $0xfa0] sm:$0xff]  ;;  %v9421_v24 = vcombine.low %v4775_v25, %v4791_v27 }
 0x6e7   :  { %7712 = vmatprep.subr.bf16.mxu1 %v9388_v52 }
 0x6ea   :  { %7713 = vmatpush1.bf16.msra.mxu1 %v9387_v55 }
 0x6eb   :  { %7714 = vmatprep.subr.bf16.mxu1 %v9420_v56 }
 0x6ee   :  { %7715 = vmatpush1.bf16.msra.mxu1 %v9419_v59  ;;  %v9197_v59 = vcombine.low %v4551_v43, %v4567_v8  ;;  %v4392_v8 = vld [vmem:[#allocation11 + $0x228] sm:$0xff] }
 0x6ef   :  { %7716 = vmatprep.subr.bf16.mxu1 %v9452_v60  ;;  %v9230_v60 = vcombine.high %v4583_v57, %v4599_v58 }
 0x6f2   :  { %7717 = vmatpush1.bf16.msra.mxu1 %v9451_v63  ;;  %v9229_v63 = vcombine.low %v4583_v57, %v4599_v58  ;;  %v4472_v57 = vld [vmem:[#allocation11 + $0x4a8] sm:$0xff] }
 0x6f3   :  { %7727 = vmatprep.subr.bf16.mxu1 %v8974_v0  ;;  %v9262_v0 = vcombine.high %v4615_v61, %v4631_v62 }
 0x6f5   :  { %7719 = vmatmul.mubr.bf16.vlgmr.msra.gmra.mrb[16].mxu1 %v10872_v49 }
 0x6f6   :  { %7728 = vmatpush1.bf16.msra.mxu1 %v8973_v3  ;;  %7759 = vmatprep.mubr.bf16.mxu1 %v10870_v48  ;;  %v9261_v3 = vcombine.low %v4615_v61, %v4631_v62  ;;  %v4504_v61 = vld [vmem:[#allocation11 + $0x5a8] sm:$0xff]  ;;  %v10914_v62 = vsub.s32 2, %v10703_v13 }
 0x6f7   :  { %7729 = vmatprep.subr.bf16.mxu1 %v9006_v4  ;;  %v9294_v4 = vcombine.high %v4647_v1, %v4663_v2 }
 0x6fa   :  { %7730 = vmatpush1.bf16.msra.mxu1 %v9005_v12  ;;  %v9293_v12 = vcombine.low %v4647_v1, %v4663_v2  ;;  %v4520_v2 = vld [vmem:[#allocation11 + $0x628] sm:$0xff] }
 0x6fb   :  { %7731 = vmatprep.subr.bf16.mxu1 %v9038_v14  ;;  %v9326_v14 = vcombine.high %v4679_v5, %v4695_v7 }
 0x6fe   :  { %7732 = vmatpush1.bf16.msra.mxu1 %v9037_v18  ;;  %v9325_v18 = vcombine.low %v4679_v5, %v4695_v7 }
 0x6ff   :  { %7733 = vmatprep.subr.bf16.mxu1 %v9070_v19  ;;  %v9358_v19 = vcombine.high %v4711_v15, %v4727_v17 }
 0x702   :  { %7734 = vmatpush1.bf16.msra.mxu1 %v9069_v22  ;;  %v9357_v22 = vcombine.low %v4711_v15, %v4727_v17  ;;  %v4552_v15 = vld [vmem:[#allocation11 + $0x728] sm:$0xff] }
 0x703   :  { %7735 = vmatprep.subr.bf16.mxu1 %v9102_v23  ;;  %v9390_v23 = vcombine.high %v4743_v20, %v4759_v21  ;;  %v4568_v17 = vld [vmem:[#allocation11 + $0x7a8] sm:$0xff] }
 0x704   :  { %v9200_v25 = vcombine.high %v4552_v15, %v4568_v17 }
 0x706   :  { %7736 = vmatpush1.bf16.msra.mxu1 %v9101_v29  ;;  %v9389_v29 = vcombine.low %v4743_v20, %v4759_v21 }
 0x707   :  { %7737 = vmatprep.subr.bf16.mxu1 %v9134_v33  ;;  %v4807_v33 = vld [vmem:[#allocation11 + $0xf20] sm:$0xff] }
 0x708   :  { %v7597_v41 = vpop.f32.mrb[4].mxu1  ;;  %v8212_v42 = vpop.f32.mrb[4].mxu0 }
 0x709   :  { %v10899_v9 = vadd.f32 %v7597_v41, %v4846_v35  ;;  %v10901_v10 = vadd.f32 %v8212_v42, %v4966_v36  ;;  %v7599_v44 = vpop.f32.mrb[5].mxu1  ;;  %v8214_v26 = vpop.f32.mrb[5].mxu0  ;;  %v9454_v35 = vcombine.high %v4807_v33, %v4823_v34  ;;  %v4328_v36 = vld [vmem:[#allocation11 + $0x28] sm:$0xff] }
 0x70a   :  { %v10903_v45 = vadd.f32 %v7599_v44, %v4850_v38  ;;  %7738 = vmatpush1.bf16.msra.mxu1 %v9133_v37  ;;  %v10905_v46 = vadd.f32 %v8214_v26, %v4970_v39  ;;  %v7601_v47 = vpop.f32.mrb[6].mxu1  ;;  %v8216_v50 = vpop.f32.mrb[6].mxu0  ;;  %v4344_v37 = vld [vmem:[#allocation11 + $0xa8] sm:$0xff]  ;;  %v9453_v38 = vcombine.low %v4807_v33, %v4823_v34 }
 0x70b   :  { %v7602_v52 = vpop.f32.mrb[7].mxu1  ;;  %v8217_v53 = vpop.f32.mrb[7].mxu0  ;;  %7739 = vmatprep.subr.bf16.mxu1 %v9166_v40  ;;  %v8976_v39 = vcombine.high %v4328_v36, %v4344_v37  ;;  %v4360_v40 = vld [vmem:[#allocation11 + $0x128] sm:$0xff]  ;;  %v8975_v42 = vcombine.low %v4328_v36, %v4344_v37 }
 0x70c   :  { %v8251_v55 = vcombine.low %v10899_v9, %v10903_v45  ;;  %v8371_v56 = vcombine.low %v10901_v10, %v10905_v46  ;;  %v4376_v41 = vld [vmem:[#allocation11 + $0x1a8] sm:$0xff] }
 0x70d   :  { %v9008_v43 = vcombine.high %v4360_v40, %v4376_v41  ;;  %v4408_v44 = vld [vmem:[#allocation11 + $0x2a8] sm:$0xff]  ;;  %v9007_v26 = vcombine.low %v4360_v40, %v4376_v41 }
 0x70e   :  { %7740 = vmatpush1.bf16.msra.mxu1 %v9165_v51  ;;  %v9040_v47 = vcombine.high %v4392_v8, %v4408_v44  ;;  %v4424_v50 = vld [vmem:[#allocation11 + $0x328] sm:$0xff]  ;;  %v9039_v52 = vcombine.low %v4392_v8, %v4408_v44  ;;  %v8259_v33 = vrot.slane %v8251_v55, %v10706_v16 }
 0x70f   :  { %7741 = vmatprep.subr.bf16.mxu1 %v9198_v54  ;;  %v4440_v51 = vld [vmem:[#allocation11 + $0x3a8] sm:$0xff] }
 0x710   :  { %v9072_v53 = vcombine.high %v4424_v50, %v4440_v51  ;;  %v4456_v54 = vld [vmem:[#allocation11 + $0x428] sm:$0xff]  ;;  %v9071_v58 = vcombine.low %v4424_v50, %v4440_v51 }
 0x711   :  { %v4616_v37 = vld [vmem:[#allocation11 + $0x928] sm:$0xff] }
 0x712   :  { %7742 = vmatpush1.bf16.msra.mxu1 %v9197_v59  ;;  %v9104_v59 = vcombine.high %v4456_v54, %v4472_v57  ;;  %v4648_v41 = vld [vmem:[#allocation11 + $0xa28] sm:$0xff] }
 0x713   :  { %7743 = vmatprep.subr.bf16.mxu1 %v9230_v60  ;;  %v4488_v60 = vld [vmem:[#allocation11 + $0x528] sm:$0xff] }
 0x714   :  { %v9136_v1 = vcombine.high %v4488_v60, %v4504_v61  ;;  %v9135_v7 = vcombine.low %v4488_v60, %v4504_v61  ;;  %v4680_v45 = vld [vmem:[#allocation11 + $0xb28] sm:$0xff] }
 0x715   :  { %v4696_v55 = vld [vmem:[#allocation11 + $0xba8] sm:$0xff] }
 0x716   :  { %7744 = vmatpush1.bf16.msra.mxu1 %v9229_v63  ;;  %v9103_v63 = vcombine.low %v4456_v54, %v4472_v57  ;;  %v9328_v44 = vcombine.high %v4680_v45, %v4696_v55  ;;  %v9327_v50 = vcombine.low %v4680_v45, %v4696_v55 }
 0x717   :  { %7745 = vmatprep.subr.bf16.mxu1 %v9262_v0  ;;  %v10917_v0 = vsub.s32 3, %v10703_v13 }
 0x719   :  { %v4858_v5 = vrot.slane %v10888_v30, %v10917_v0 }
 0x71a   :  { %7746 = vmatpush1.bf16.msra.mxu1 %v9261_v3  ;;  %v4536_v3 = vld [vmem:[#allocation11 + $0x6a8] sm:$0xff] }
 0x71b   :  { %7747 = vmatprep.subr.bf16.mxu1 %v9294_v4  ;;  %v4854_v4 = vrot.slane %v10888_v30, %v10914_v62 }
 0x71e   :  { %7748 = vmatpush1.bf16.msra.mxu1 %v9293_v12  ;;  %v9168_v12 = vcombine.high %v4520_v2, %v4536_v3 }
 0x71f   :  { %7749 = vmatprep.subr.bf16.mxu1 %v9326_v14 }
 0x722   :  { %7750 = vmatpush1.bf16.msra.mxu1 %v9325_v18 }
 0x723   :  { %7751 = vmatprep.subr.bf16.mxu1 %v9358_v19 }
 0x726   :  { %7752 = vmatpush1.bf16.msra.mxu1 %v9357_v22  ;;  %v9167_v22 = vcombine.low %v4520_v2, %v4536_v3 }
 0x727   :  { %7753 = vmatprep.subr.bf16.mxu1 %v9390_v23 }
 0x72a   :  { %7754 = vmatpush1.bf16.msra.mxu1 %v9389_v29  ;;  %v4584_v29 = vld [vmem:[#allocation11 + $0x828] sm:$0xff] }
 0x72b   :  { %7755 = vmatprep.subr.bf16.mxu1 %v9422_v31  ;;  %v4600_v31 = vld [vmem:[#allocation11 + $0x8a8] sm:$0xff] }
 0x72e   :  { %7756 = vmatpush1.bf16.msra.mxu1 %v9421_v24  ;;  %v9199_v24 = vcombine.low %v4552_v15, %v4568_v17  ;;  %v4377_v15 = vld [vmem:[#allocation11 + $0x1b0] sm:$0xff] }
 0x72f   :  { %7757 = vmatprep.subr.bf16.mxu1 %v9454_v35  ;;  %v9232_v35 = vcombine.high %v4584_v29, %v4600_v31 }
 0x732   :  { %7758 = vmatpush1.bf16.msra.mxu1 %v9453_v38  ;;  %v4632_v38 = vld [vmem:[#allocation11 + $0x9a8] sm:$0xff] }
 0x733   :  { %7768 = vmatprep.subr.bf16.mxu1 %v8976_v39  ;;  %v9231_v39 = vcombine.low %v4584_v29, %v4600_v31  ;;  %v9264_v40 = vcombine.high %v4616_v37, %v4632_v38  ;;  %v4457_v31 = vld [vmem:[#allocation11 + $0x430] sm:$0xff] }
 0x735   :  { %7760 = vmatmul.mubr.bf16.vlgmr.msra.gmra.mrb[20].mxu1 %v10872_v49 }
 0x736   :  { %7769 = vmatpush1.bf16.msra.mxu1 %v8975_v42  ;;  %7800 = vmatprep.mubr.bf16.mxu1 %v10870_v48  ;;  %v4664_v42 = vld [vmem:[#allocation11 + $0xaa8] sm:$0xff] }
 0x737   :  { %7770 = vmatprep.subr.bf16.mxu1 %v9008_v43  ;;  %v9263_v43 = vcombine.low %v4616_v37, %v4632_v38  ;;  %v9296_v9 = vcombine.high %v4648_v41, %v4664_v42  ;;  %v9295_v8 = vcombine.low %v4648_v41, %v4664_v42  ;;  %v10931_v37 = vsub.s32 4, %v10703_v13  ;;  %v4521_v41 = vld [vmem:[#allocation11 + $0x630] sm:$0xff] }
 0x738   :  { %v4537_v42 = vld [vmem:[#allocation11 + $0x6b0] sm:$0xff] }
 0x739   :  { %v9170_v55 = vcombine.high %v4521_v41, %v4537_v42 }
 0x73a   :  { %7771 = vmatpush1.bf16.msra.mxu1 %v9007_v26  ;;  %v4712_v26 = vld [vmem:[#allocation11 + $0xc28] sm:$0xff] }
 0x73b   :  { %7772 = vmatprep.subr.bf16.mxu1 %v9040_v47  ;;  %v4728_v47 = vld [vmem:[#allocation11 + $0xca8] sm:$0xff] }
 0x73c   :  { %v9360_v51 = vcombine.high %v4712_v26, %v4728_v47  ;;  %v9359_v54 = vcombine.low %v4712_v26, %v4728_v47  ;;  %v4569_v26 = vld [vmem:[#allocation11 + $0x7b0] sm:$0xff] }
 0x73e   :  { %7773 = vmatpush1.bf16.msra.mxu1 %v9039_v52  ;;  %v4744_v52 = vld [vmem:[#allocation11 + $0xd28] sm:$0xff] }
 0x73f   :  { %7774 = vmatprep.subr.bf16.mxu1 %v9072_v53  ;;  %v4760_v53 = vld [vmem:[#allocation11 + $0xda8] sm:$0xff] }
 0x740   :  { %v9392_v57 = vcombine.high %v4744_v52, %v4760_v53  ;;  %v9391_v60 = vcombine.low %v4744_v52, %v4760_v53  ;;  %v9169_v52 = vcombine.low %v4521_v41, %v4537_v42  ;;  %v4330_v41 = vld [vmem:[#allocation11 + $0x38] sm:$0xff] }
 0x741   :  { %v4346_v42 = vld [vmem:[#allocation11 + $0xb8] sm:$0xff] }
 0x742   :  { %7775 = vmatpush1.bf16.msra.mxu1 %v9071_v58  ;;  %v4776_v58 = vld [vmem:[#allocation11 + $0xe28] sm:$0xff] }
 0x743   :  { %7776 = vmatprep.subr.bf16.mxu1 %v9104_v59  ;;  %v4792_v59 = vld [vmem:[#allocation11 + $0xea8] sm:$0xff] }
 0x744   :  { %v9424_v61 = vcombine.high %v4776_v58, %v4792_v59  ;;  %v9423_v2 = vcombine.low %v4776_v58, %v4792_v59  ;;  %v4585_v58 = vld [vmem:[#allocation11 + $0x830] sm:$0xff] }
 0x745   :  { %v4601_v59 = vld [vmem:[#allocation11 + $0x8b0] sm:$0xff] }
 0x746   :  { %7777 = vmatpush1.bf16.msra.mxu1 %v9103_v63  ;;  %v4808_v63 = vld [vmem:[#allocation11 + $0xf28] sm:$0xff] }
 0x747   :  { %7778 = vmatprep.subr.bf16.mxu1 %v9136_v1  ;;  %v4824_v1 = vld [vmem:[#allocation11 + $0xfa8] sm:$0xff] }
 0x748   :  { %v7638_v14 = vpop.f32.mrb[8].mxu1  ;;  %v9456_v3 = vcombine.high %v4808_v63, %v4824_v1 }
 0x749   :  { %v7639_v18 = vadd.f32 %v7638_v14, %v4854_v4  ;;  %v7640_v19 = vpop.f32.mrb[9].mxu1  ;;  %v4329_v4 = vld [vmem:[#allocation11 + $0x30] sm:$0xff] }
 0x74a   :  { %v7641_v20 = vadd.f32 %v7640_v19, %v4858_v5  ;;  %v7642_v21 = vpop.f32.mrb[10].mxu1  ;;  %7779 = vmatpush1.bf16.msra.mxu1 %v9135_v7  ;;  %v4345_v5 = vld [vmem:[#allocation11 + $0xb0] sm:$0xff]  ;;  %v9455_v7 = vcombine.low %v4808_v63, %v4824_v1 }
 0x74b   :  { %v7643_v23 = vpop.f32.mrb[11].mxu1  ;;  %7780 = vmatprep.subr.bf16.mxu1 %v9168_v12  ;;  %v8978_v12 = vcombine.high %v4329_v4, %v4345_v5  ;;  %v4361_v14 = vld [vmem:[#allocation11 + $0x130] sm:$0xff]  ;;  %v8977_v17 = vcombine.low %v4329_v4, %v4345_v5 }
 0x74c   :  { %v8252_v27 = vcombine.low %v7639_v18, %v7641_v20  ;;  %v9010_v18 = vcombine.high %v4361_v14, %v4377_v15  ;;  %v4393_v19 = vld [vmem:[#allocation11 + $0x230] sm:$0xff]  ;;  %v9009_v21 = vcombine.low %v4361_v14, %v4377_v15 }
 0x74d   :  { %v4409_v20 = vld [vmem:[#allocation11 + $0x2b0] sm:$0xff] }
 0x74e   :  { %v8266_v34 = vrot.slane %v8252_v27, %v10706_v16  ;;  %7781 = vmatpush1.bf16.msra.mxu1 %v9167_v22  ;;  %v9042_v22 = vcombine.high %v4393_v19, %v4409_v20  ;;  %v4425_v23 = vld [vmem:[#allocation11 + $0x330] sm:$0xff]  ;;  %v9041_v27 = vcombine.low %v4393_v19, %v4409_v20 }
 0x74f   :  { %7782 = vmatprep.subr.bf16.mxu1 %v9200_v25  ;;  %v4441_v25 = vld [vmem:[#allocation11 + $0x3b0] sm:$0xff] }
 0x750   :  { %v8267_v36 = vcombine.low %v8259_v33, %v8266_v34  ;;  %v9074_v29 = vcombine.high %v4425_v23, %v4441_v25  ;;  %v4473_v33 = vld [vmem:[#allocation11 + $0x4b0] sm:$0xff]  ;;  %v9073_v34 = vcombine.low %v4425_v23, %v4441_v25 }
 0x751   :  { %v9105_v38 = vcombine.low %v4457_v31, %v4473_v33  ;;  %v4617_v63 = vld [vmem:[#allocation11 + $0x930] sm:$0xff] }
 0x752   :  { %8395 = vst [vmem:[#allocation14] sm:$0xff] %v8267_v36  ;;  %7783 = vmatpush1.bf16.msra.mxu1 %v9199_v24  ;;  %v9106_v24 = vcombine.high %v4457_v31, %v4473_v33  ;;  %v4505_v36 = vld [vmem:[#allocation11 + $0x5b0] sm:$0xff] }
 0x753   :  { %7784 = vmatprep.subr.bf16.mxu1 %v9232_v35  ;;  %v4489_v35 = vld [vmem:[#allocation11 + $0x530] sm:$0xff] }
 0x754   :  { %v9137_v45 = vcombine.low %v4489_v35, %v4505_v36  ;;  %v4633_v1 = vld [vmem:[#allocation11 + $0x9b0] sm:$0xff] }
 0x755   :  { %v4649_v4 = vld [vmem:[#allocation11 + $0xa30] sm:$0xff] }
 0x756   :  { %7785 = vmatpush1.bf16.msra.mxu1 %v9231_v39  ;;  %v10934_v39 = vsub.s32 5, %v10703_v13  ;;  %v4665_v5 = vld [vmem:[#allocation11 + $0xab0] sm:$0xff] }
 0x757   :  { %7786 = vmatprep.subr.bf16.mxu1 %v9264_v40  ;;  %v9138_v40 = vcombine.high %v4489_v35, %v4505_v36  ;;  %v4681_v14 = vld [vmem:[#allocation11 + $0xb30] sm:$0xff] }
 0x758   :  { %v4697_v15 = vld [vmem:[#allocation11 + $0xbb0] sm:$0xff] }
 0x759   :  { %v4713_v19 = vld [vmem:[#allocation11 + $0xc30] sm:$0xff] }
 0x75a   :  { %7787 = vmatpush1.bf16.msra.mxu1 %v9263_v43  ;;  %v4862_v43 = vrot.slane %v10888_v30, %v10931_v37  ;;  %v4729_v20 = vld [vmem:[#allocation11 + $0xcb0] sm:$0xff] }
 0x75b   :  { %7788 = vmatprep.subr.bf16.mxu1 %v9296_v9  ;;  %v4866_v9 = vrot.slane %v10888_v30, %v10934_v39  ;;  %v4745_v23 = vld [vmem:[#allocation11 + $0xd30] sm:$0xff] }
 0x75c   :  { %v4761_v25 = vld [vmem:[#allocation11 + $0xdb0] sm:$0xff] }
 0x75d   :  { %v4777_v31 = vld [vmem:[#allocation11 + $0xe30] sm:$0xff] }
 0x75e   :  { %7789 = vmatpush1.bf16.msra.mxu1 %v9295_v8  ;;  %v4793_v33 = vld [vmem:[#allocation11 + $0xeb0] sm:$0xff] }
 0x75f   :  { %7790 = vmatprep.subr.bf16.mxu1 %v9328_v44  ;;  %v4553_v44 = vld [vmem:[#allocation11 + $0x730] sm:$0xff] }
 0x760   :  { %v4809_v35 = vld [vmem:[#allocation11 + $0xf30] sm:$0xff] }
 0x761   :  { %v4825_v36 = vld [vmem:[#allocation11 + $0xfb0] sm:$0xff] }
 0x762   :  { %7791 = vmatpush1.bf16.msra.mxu1 %v9327_v50 }
 0x763   :  { %7792 = vmatprep.subr.bf16.mxu1 %v9360_v51 }
 0x766   :  { %7793 = vmatpush1.bf16.msra.mxu1 %v9359_v54  ;;  %v9202_v54 = vcombine.high %v4553_v44, %v4569_v26 }
 0x767   :  { %7794 = vmatprep.subr.bf16.mxu1 %v9392_v57 }
 0x76a   :  { %7795 = vmatpush1.bf16.msra.mxu1 %v9391_v60  ;;  %v9201_v60 = vcombine.low %v4553_v44, %v4569_v26  ;;  %v4394_v26 = vld [vmem:[#allocation11 + $0x238] sm:$0xff] }
 0x76b   :  { %7796 = vmatprep.subr.bf16.mxu1 %v9424_v61  ;;  %v9234_v61 = vcombine.high %v4585_v58, %v4601_v59 }
 0x76e   :  { %7797 = vmatpush1.bf16.msra.mxu1 %v9423_v2  ;;  %v9233_v2 = vcombine.low %v4585_v58, %v4601_v59 }
 0x76f   :  { %7798 = vmatprep.subr.bf16.mxu1 %v9456_v3  ;;  %v9266_v3 = vcombine.high %v4617_v63, %v4633_v1 }
 0x772   :  { %7799 = vmatpush1.bf16.msra.mxu1 %v9455_v7  ;;  %v9265_v7 = vcombine.low %v4617_v63, %v4633_v1 }
 0x773   :  { %7809 = vmatprep.subr.bf16.mxu1 %v8978_v12  ;;  %v9298_v12 = vcombine.high %v4649_v4, %v4665_v5 }
 0x775   :  { %7801 = vmatmul.mubr.bf16.vlgmr.msra.gmra.mrb[24].mxu1 %v10872_v49 }
 0x776   :  { %7810 = vmatpush1.bf16.msra.mxu1 %v8977_v17  ;;  %7841 = vmatprep.mubr.bf16.mxu1 %v10870_v48  ;;  %v9297_v17 = vcombine.low %v4649_v4, %v4665_v5 }
 0x777   :  { %7811 = vmatprep.subr.bf16.mxu1 %v9010_v18  ;;  %v9330_v18 = vcombine.high %v4681_v14, %v4697_v15 }
 0x77a   :  { %7812 = vmatpush1.bf16.msra.mxu1 %v9009_v21  ;;  %v9329_v21 = vcombine.low %v4681_v14, %v4697_v15  ;;  %v4870_v14 = vrot.slane %v10888_v30, %v10886_v28  ;;  %v4874_v15 = vrot.slane %v10888_v30, %v10891_v32 }
 0x77b   :  { %7813 = vmatprep.subr.bf16.mxu1 %v9042_v22  ;;  %v9362_v22 = vcombine.high %v4713_v19, %v4729_v20 }
 0x77e   :  { %7814 = vmatpush1.bf16.msra.mxu1 %v9041_v27  ;;  %v9361_v27 = vcombine.low %v4713_v19, %v4729_v20  ;;  %v4554_v20 = vld [vmem:[#allocation11 + $0x738] sm:$0xff] }
 0x77f   :  { %7815 = vmatprep.subr.bf16.mxu1 %v9074_v29  ;;  %v9394_v29 = vcombine.high %v4745_v23, %v4761_v25 }
 0x782   :  { %7816 = vmatpush1.bf16.msra.mxu1 %v9073_v34  ;;  %v9393_v34 = vcombine.low %v4745_v23, %v4761_v25 }
 0x783   :  { %7817 = vmatprep.subr.bf16.mxu1 %v9106_v24  ;;  %v9426_v24 = vcombine.high %v4777_v31, %v4793_v33 }
 0x786   :  { %7818 = vmatpush1.bf16.msra.mxu1 %v9105_v38  ;;  %v9425_v38 = vcombine.low %v4777_v31, %v4793_v33 }
 0x787   :  { %7819 = vmatprep.subr.bf16.mxu1 %v9138_v40  ;;  %v9458_v40 = vcombine.high %v4809_v35, %v4825_v36 }
 0x788   :  { %v7679_v8 = vpop.f32.mrb[12].mxu1 }
 0x789   :  { %v10940_v47 = vadd.f32 %v7679_v8, %v4862_v43  ;;  %v7681_v13 = vpop.f32.mrb[13].mxu1  ;;  %v9457_v43 = vcombine.low %v4809_v35, %v4825_v36  ;;  %v8979_v8 = vcombine.low %v4330_v41, %v4346_v42  ;;  %v4602_v35 = vld [vmem:[#allocation11 + $0x8b8] sm:$0xff] }
 0x78a   :  { %v10942_v50 = vadd.f32 %v7681_v13, %v4866_v9  ;;  %v7683_v51 = vpop.f32.mrb[14].mxu1  ;;  %7820 = vmatpush1.bf16.msra.mxu1 %v9137_v45  ;;  %v8980_v9 = vcombine.high %v4330_v41, %v4346_v42  ;;  %v4362_v45 = vld [vmem:[#allocation11 + $0x138] sm:$0xff] }
 0x78b   :  { %v7684_v53 = vpop.f32.mrb[15].mxu1  ;;  %7821 = vmatprep.subr.bf16.mxu1 %v9170_v55  ;;  %v4378_v55 = vld [vmem:[#allocation11 + $0x1b8] sm:$0xff] }
 0x78c   :  { %v8268_v57 = vcombine.low %v10940_v47, %v10942_v50  ;;  %v9012_v44 = vcombine.high %v4362_v45, %v4378_v55  ;;  %v4410_v13 = vld [vmem:[#allocation11 + $0x2b8] sm:$0xff]  ;;  %v9011_v51 = vcombine.low %v4362_v45, %v4378_v55 }
 0x78d   :  { %v4426_v53 = vld [vmem:[#allocation11 + $0x338] sm:$0xff]  ;;  %v9043_v58 = vcombine.low %v4394_v26, %v4410_v13 }
 0x78e   :  { %7822 = vmatpush1.bf16.msra.mxu1 %v9169_v52  ;;  %v9044_v52 = vcombine.high %v4394_v26, %v4410_v13  ;;  %v8276_v30 = vrot.slane %v8268_v57, %v10706_v16  ;;  %v4618_v42 = vld [vmem:[#allocation11 + $0x938] sm:$0xff] }
 0x78f   :  { %7823 = vmatprep.subr.bf16.mxu1 %v9202_v54  ;;  %v4442_v54 = vld [vmem:[#allocation11 + $0x3b8] sm:$0xff] }
 0x790   :  { %v9076_v59 = vcombine.high %v4426_v53, %v4442_v54  ;;  %v9075_v63 = vcombine.low %v4426_v53, %v4442_v54  ;;  %v4650_v55 = vld [vmem:[#allocation11 + $0xa38] sm:$0xff] }
 0x791   :  { %v4682_v50 = vld [vmem:[#allocation11 + $0xb38] sm:$0xff] }
 0x792   :  { %7824 = vmatpush1.bf16.msra.mxu1 %v9201_v60  ;;  %v4458_v60 = vld [vmem:[#allocation11 + $0x438] sm:$0xff] }
 0x793   :  { %7825 = vmatprep.subr.bf16.mxu1 %v9234_v61  ;;  %v4474_v61 = vld [vmem:[#allocation11 + $0x4b8] sm:$0xff] }
 0x794   :  { %v9108_v1 = vcombine.high %v4458_v60, %v4474_v61  ;;  %v9107_v4 = vcombine.low %v4458_v60, %v4474_v61  ;;  %v4698_v57 = vld [vmem:[#allocation11 + $0xbb8] sm:$0xff] }
 0x795   :  { %v9332_v13 = vcombine.high %v4682_v50, %v4698_v57  ;;  %v9331_v53 = vcombine.low %v4682_v50, %v4698_v57 }
 0x796   :  { %7826 = vmatpush1.bf16.msra.mxu1 %v9233_v2  ;;  %v4490_v2 = vld [vmem:[#allocation11 + $0x538] sm:$0xff] }
 0x797   :  { %7827 = vmatprep.subr.bf16.mxu1 %v9266_v3  ;;  %v4506_v3 = vld [vmem:[#allocation11 + $0x5b8] sm:$0xff] }
 0x798   :  { %v9140_v5 = vcombine.high %v4490_v2, %v4506_v3 }
 0x79a   :  { %7828 = vmatpush1.bf16.msra.mxu1 %v9265_v7  ;;  %v4522_v7 = vld [vmem:[#allocation11 + $0x638] sm:$0xff] }
 0x79b   :  { %7829 = vmatprep.subr.bf16.mxu1 %v9298_v12  ;;  %v4538_v12 = vld [vmem:[#allocation11 + $0x6b8] sm:$0xff] }
 0x79e   :  { %7830 = vmatpush1.bf16.msra.mxu1 %v9297_v17  ;;  %v9139_v17 = vcombine.low %v4490_v2, %v4506_v3 }
 0x79f   :  { %7831 = vmatprep.subr.bf16.mxu1 %v9330_v18  ;;  %v9172_v18 = vcombine.high %v4522_v7, %v4538_v12 }
 0x7a2   :  { %7832 = vmatpush1.bf16.msra.mxu1 %v9329_v21  ;;  %v4570_v21 = vld [vmem:[#allocation11 + $0x7b8] sm:$0xff] }
 0x7a3   :  { %7833 = vmatprep.subr.bf16.mxu1 %v9362_v22  ;;  %v9204_v33 = vcombine.high %v4554_v20, %v4570_v21 }
 0x7a6   :  { %7834 = vmatpush1.bf16.msra.mxu1 %v9361_v27 }
 0x7a7   :  { %7835 = vmatprep.subr.bf16.mxu1 %v9394_v29  ;;  %v9171_v29 = vcombine.low %v4522_v7, %v4538_v12 }
 0x7aa   :  { %7836 = vmatpush1.bf16.msra.mxu1 %v9393_v34 }
 0x7ab   :  { %7837 = vmatprep.subr.bf16.mxu1 %v9426_v24  ;;  %v4586_v24 = vld [vmem:[#allocation11 + $0x838] sm:$0xff] }
 0x7ae   :  { %7838 = vmatpush1.bf16.msra.mxu1 %v9425_v38  ;;  %v9203_v38 = vcombine.low %v4554_v20, %v4570_v21  ;;  %v4379_v20 = vld [vmem:[#allocation11 + $0x1c0] sm:$0xff] }
 0x7af   :  { %7839 = vmatprep.subr.bf16.mxu1 %v9458_v40  ;;  %v9236_v40 = vcombine.high %v4586_v24, %v4602_v35 }
 0x7b2   :  { %7840 = vmatpush1.bf16.msra.mxu1 %v9457_v43  ;;  %v4634_v43 = vld [vmem:[#allocation11 + $0x9b8] sm:$0xff] }
 0x7b3   :  { %7850 = vmatprep.subr.bf16.mxu1 %v8980_v9  ;;  %v9235_v9 = vcombine.low %v4586_v24, %v4602_v35  ;;  %v9268_v45 = vcombine.high %v4618_v42, %v4634_v43  ;;  %v4459_v35 = vld [vmem:[#allocation11 + $0x440] sm:$0xff] }
 0x7b5   :  { %7842 = vmatmul.mubr.bf16.vlgmr.msra.gmra.mrb[28].mxu1 %v10872_v49 }
 0x7b6   :  { %7851 = vmatpush1.bf16.msra.mxu1 %v8979_v8  ;;  %7882 = vmatprep.mubr.bf16.mxu1 %v10870_v48  ;;  %v4666_v8 = vld [vmem:[#allocation11 + $0xab8] sm:$0xff] }
 0x7b7   :  { %7852 = vmatprep.subr.bf16.mxu1 %v9012_v44  ;;  %v9267_v44 = vcombine.low %v4618_v42, %v4634_v43  ;;  %v9300_v47 = vcombine.high %v4650_v55, %v4666_v8  ;;  %v9299_v26 = vcombine.low %v4650_v55, %v4666_v8  ;;  %v10959_v43 = vld [vmem:[#allocation13 + $0x8] sm:$0xff]  ;;  %v4539_v55 = vld [vmem:[#allocation11 + $0x6c0] sm:$0xff] }
 0x7b8   :  { %v4878_v8 = vrot.slane %v10959_v43, %v10858_v6 }
 0x7ba   :  { %7853 = vmatpush1.bf16.msra.mxu1 %v9011_v51  ;;  %v4714_v51 = vld [vmem:[#allocation11 + $0xc38] sm:$0xff] }
 0x7bb   :  { %7854 = vmatprep.subr.bf16.mxu1 %v9044_v52  ;;  %v4730_v52 = vld [vmem:[#allocation11 + $0xcb8] sm:$0xff] }
 0x7bc   :  { %v9364_v54 = vcombine.high %v4714_v51, %v4730_v52  ;;  %v9363_v60 = vcombine.low %v4714_v51, %v4730_v52 }
 0x7be   :  { %7855 = vmatpush1.bf16.msra.mxu1 %v9043_v58  ;;  %v4746_v58 = vld [vmem:[#allocation11 + $0xd38] sm:$0xff] }
 0x7bf   :  { %7856 = vmatprep.subr.bf16.mxu1 %v9076_v59  ;;  %v4762_v59 = vld [vmem:[#allocation11 + $0xdb8] sm:$0xff] }
 0x7c0   :  { %v9396_v61 = vcombine.high %v4746_v58, %v4762_v59  ;;  %v9395_v2 = vcombine.low %v4746_v58, %v4762_v59 }
 0x7c2   :  { %7857 = vmatpush1.bf16.msra.mxu1 %v9075_v63  ;;  %v4778_v63 = vld [vmem:[#allocation11 + $0xe38] sm:$0xff] }
 0x7c3   :  { %7858 = vmatprep.subr.bf16.mxu1 %v9108_v1  ;;  %v4794_v1 = vld [vmem:[#allocation11 + $0xeb8] sm:$0xff] }
 0x7c4   :  { %v9428_v3 = vcombine.high %v4778_v63, %v4794_v1  ;;  %v9427_v7 = vcombine.low %v4778_v63, %v4794_v1  ;;  %v4587_v63 = vld [vmem:[#allocation11 + $0x840] sm:$0xff] }
 0x7c5   :  { %v4603_v1 = vld [vmem:[#allocation11 + $0x8c0] sm:$0xff] }
 0x7c6   :  { %7859 = vmatpush1.bf16.msra.mxu1 %v9107_v4  ;;  %v4810_v4 = vld [vmem:[#allocation11 + $0xf38] sm:$0xff] }
 0x7c7   :  { %7860 = vmatprep.subr.bf16.mxu1 %v9140_v5  ;;  %v4826_v5 = vld [vmem:[#allocation11 + $0xfb8] sm:$0xff] }
 0x7c8   :  { %v7720_v19 = vpop.f32.mrb[16].mxu1  ;;  %v9460_v12 = vcombine.high %v4810_v4, %v4826_v5 }
 0x7c9   :  { %v7721_v22 = vadd.f32 %v7720_v19, %v4870_v14  ;;  %v7722_v23 = vpop.f32.mrb[17].mxu1  ;;  %v4331_v14 = vld [vmem:[#allocation11 + $0x40] sm:$0xff] }
 0x7ca   :  { %v7723_v25 = vadd.f32 %v7722_v23, %v4874_v15  ;;  %v7724_v27 = vpop.f32.mrb[18].mxu1  ;;  %7861 = vmatpush1.bf16.msra.mxu1 %v9139_v17  ;;  %v4347_v15 = vld [vmem:[#allocation11 + $0xc0] sm:$0xff]  ;;  %v9459_v17 = vcombine.low %v4810_v4, %v4826_v5 }
 0x7cb   :  { %v7725_v31 = vpop.f32.mrb[19].mxu1  ;;  %7862 = vmatprep.subr.bf16.mxu1 %v9172_v18  ;;  %v8982_v18 = vcombine.high %v4331_v14, %v4347_v15  ;;  %v4363_v19 = vld [vmem:[#allocation11 + $0x140] sm:$0xff]  ;;  %v8981_v21 = vcombine.low %v4331_v14, %v4347_v15 }
 0x7cc   :  { %v8269_v34 = vcombine.low %v7721_v22, %v7723_v25  ;;  %v9014_v22 = vcombine.high %v4363_v19, %v4379_v20  ;;  %v4395_v23 = vld [vmem:[#allocation11 + $0x240] sm:$0xff]  ;;  %v9013_v27 = vcombine.low %v4363_v19, %v4379_v20 }
 0x7cd   :  { %v4411_v25 = vld [vmem:[#allocation11 + $0x2c0] sm:$0xff] }
 0x7ce   :  { %v8283_v36 = vrot.slane %v8269_v34, %v10706_v16  ;;  %7863 = vmatpush1.bf16.msra.mxu1 %v9171_v29  ;;  %v9046_v29 = vcombine.high %v4395_v23, %v4411_v25  ;;  %v4427_v31 = vld [vmem:[#allocation11 + $0x340] sm:$0xff]  ;;  %v9045_v34 = vcombine.low %v4395_v23, %v4411_v25 }
 0x7cf   :  { %7864 = vmatprep.subr.bf16.mxu1 %v9204_v33  ;;  %v4443_v33 = vld [vmem:[#allocation11 + $0x3c0] sm:$0xff] }
 0x7d0   :  { %v8284_v41 = vcombine.low %v8276_v30, %v8283_v36  ;;  %v9078_v24 = vcombine.high %v4427_v31, %v4443_v33  ;;  %v4475_v30 = vld [vmem:[#allocation11 + $0x4c0] sm:$0xff]  ;;  %v9077_v36 = vcombine.low %v4427_v31, %v4443_v33 }
 0x7d1   :  { %v9109_v42 = vcombine.low %v4459_v35, %v4475_v30  ;;  %v4619_v4 = vld [vmem:[#allocation11 + $0x940] sm:$0xff] }
 0x7d2   :  { %8396 = vst [vmem:[#allocation14 + $0x8] sm:$0xff] %v8284_v41  ;;  %7865 = vmatpush1.bf16.msra.mxu1 %v9203_v38  ;;  %v9110_v38 = vcombine.high %v4459_v35, %v4475_v30  ;;  %v4507_v41 = vld [vmem:[#allocation11 + $0x5c0] sm:$0xff] }
 0x7d3   :  { %7866 = vmatprep.subr.bf16.mxu1 %v9236_v40  ;;  %v4491_v40 = vld [vmem:[#allocation11 + $0x540] sm:$0xff] }
 0x7d4   :  { %v4635_v5 = vld [vmem:[#allocation11 + $0x9c0] sm:$0xff] }
 0x7d5   :  { %v4651_v14 = vld [vmem:[#allocation11 + $0xa40] sm:$0xff] }
 0x7d6   :  { %7867 = vmatpush1.bf16.msra.mxu1 %v9235_v9  ;;  %v9142_v9 = vcombine.high %v4491_v40, %v4507_v41  ;;  %v4667_v15 = vld [vmem:[#allocation11 + $0xac0] sm:$0xff] }
 0x7d7   :  { %7868 = vmatprep.subr.bf16.mxu1 %v9268_v45  ;;  %v4523_v45 = vld [vmem:[#allocation11 + $0x640] sm:$0xff] }
 0x7d8   :  { %v9174_v50 = vcombine.high %v4523_v45, %v4539_v55  ;;  %v9173_v58 = vcombine.low %v4523_v45, %v4539_v55  ;;  %v4683_v19 = vld [vmem:[#allocation11 + $0xb40] sm:$0xff]  ;;  %v4332_v45 = vld [vmem:[#allocation11 + $0x48] sm:$0xff] }
 0x7d9   :  { %v4699_v20 = vld [vmem:[#allocation11 + $0xbc0] sm:$0xff]  ;;  %v4348_v55 = vld [vmem:[#allocation11 + $0xc8] sm:$0xff] }
 0x7da   :  { %7869 = vmatpush1.bf16.msra.mxu1 %v9267_v44  ;;  %v4882_v44 = vrot.slane %v10959_v43, %v10861_v11  ;;  %v4715_v23 = vld [vmem:[#allocation11 + $0xc40] sm:$0xff] }
 0x7db   :  { %7870 = vmatprep.subr.bf16.mxu1 %v9300_v47  ;;  %v9141_v47 = vcombine.low %v4491_v40, %v4507_v41  ;;  %v4731_v25 = vld [vmem:[#allocation11 + $0xcc0] sm:$0xff] }
 0x7dc   :  { %v4747_v31 = vld [vmem:[#allocation11 + $0xd40] sm:$0xff] }
 0x7dd   :  { %v4763_v33 = vld [vmem:[#allocation11 + $0xdc0] sm:$0xff] }
 0x7de   :  { %7871 = vmatpush1.bf16.msra.mxu1 %v9299_v26  ;;  %v4555_v26 = vld [vmem:[#allocation11 + $0x740] sm:$0xff] }
 0x7df   :  { %7872 = vmatprep.subr.bf16.mxu1 %v9332_v13  ;;  %v4571_v13 = vld [vmem:[#allocation11 + $0x7c0] sm:$0xff] }
 0x7e0   :  { %v4779_v35 = vld [vmem:[#allocation11 + $0xe40] sm:$0xff] }
 0x7e1   :  { %v4795_v30 = vld [vmem:[#allocation11 + $0xec0] sm:$0xff] }
 0x7e2   :  { %7873 = vmatpush1.bf16.msra.mxu1 %v9331_v53  ;;  %v4811_v40 = vld [vmem:[#allocation11 + $0xf40] sm:$0xff] }
 0x7e3   :  { %7874 = vmatprep.subr.bf16.mxu1 %v9364_v54  ;;  %v4827_v41 = vld [vmem:[#allocation11 + $0xfc0] sm:$0xff] }
 0x7e6   :  { %7875 = vmatpush1.bf16.msra.mxu1 %v9363_v60  ;;  %v9206_v60 = vcombine.high %v4555_v26, %v4571_v13 }
 0x7e7   :  { %7876 = vmatprep.subr.bf16.mxu1 %v9396_v61 }
 0x7ea   :  { %7877 = vmatpush1.bf16.msra.mxu1 %v9395_v2  ;;  %v9205_v2 = vcombine.low %v4555_v26, %v4571_v13  ;;  %v4396_v13 = vld [vmem:[#allocation11 + $0x248] sm:$0xff] }
 0x7eb   :  { %7878 = vmatprep.subr.bf16.mxu1 %v9428_v3  ;;  %v9238_v3 = vcombine.high %v4587_v63, %v4603_v1 }
 0x7ee   :  { %7879 = vmatpush1.bf16.msra.mxu1 %v9427_v7  ;;  %v9237_v7 = vcombine.low %v4587_v63, %v4603_v1 }
 0x7ef   :  { %7880 = vmatprep.subr.bf16.mxu1 %v9460_v12  ;;  %v9270_v12 = vcombine.high %v4619_v4, %v4635_v5 }
 0x7f2   :  { %7881 = vmatpush1.bf16.msra.mxu1 %v9459_v17  ;;  %v9269_v17 = vcombine.low %v4619_v4, %v4635_v5 }
 0x7f3   :  { %7891 = vmatprep.subr.bf16.mxu1 %v8982_v18  ;;  %v9302_v18 = vcombine.high %v4651_v14, %v4667_v15 }
 0x7f5   :  { %7883 = vmatmul.mubr.bf16.vlgmr.msra.gmra.mrb[32].mxu1 %v10872_v49 }
 0x7f6   :  { %7892 = vmatpush1.bf16.msra.mxu1 %v8981_v21  ;;  %7923 = vmatprep.mubr.bf16.mxu1 %v10870_v48  ;;  %v9301_v21 = vcombine.low %v4651_v14, %v4667_v15 }
 0x7f7   :  { %7893 = vmatprep.subr.bf16.mxu1 %v9014_v22  ;;  %v9334_v22 = vcombine.high %v4683_v19, %v4699_v20 }
 0x7fa   :  { %7894 = vmatpush1.bf16.msra.mxu1 %v9013_v27  ;;  %v9333_v27 = vcombine.low %v4683_v19, %v4699_v20  ;;  %v4886_v19 = vrot.slane %v10959_v43, %v10914_v62  ;;  %v4890_v20 = vrot.slane %v10959_v43, %v10917_v0 }
 0x7fb   :  { %7895 = vmatprep.subr.bf16.mxu1 %v9046_v29  ;;  %v9366_v29 = vcombine.high %v4715_v23, %v4731_v25 }
 0x7fe   :  { %7896 = vmatpush1.bf16.msra.mxu1 %v9045_v34  ;;  %v9365_v34 = vcombine.low %v4715_v23, %v4731_v25  ;;  %v4556_v25 = vld [vmem:[#allocation11 + $0x748] sm:$0xff] }
 0x7ff   :  { %7897 = vmatprep.subr.bf16.mxu1 %v9078_v24  ;;  %v9398_v24 = vcombine.high %v4747_v31, %v4763_v33 }
 0x802   :  { %7898 = vmatpush1.bf16.msra.mxu1 %v9077_v36  ;;  %v9397_v36 = vcombine.low %v4747_v31, %v4763_v33 }
 0x803   :  { %7899 = vmatprep.subr.bf16.mxu1 %v9110_v38  ;;  %v9430_v38 = vcombine.high %v4779_v35, %v4795_v30 }
 0x806   :  { %7900 = vmatpush1.bf16.msra.mxu1 %v9109_v42  ;;  %v9429_v42 = vcombine.low %v4779_v35, %v4795_v30 }
 0x807   :  { %7901 = vmatprep.subr.bf16.mxu1 %v9142_v9  ;;  %v9462_v9 = vcombine.high %v4811_v40, %v4827_v41 }
 0x808   :  { %v7761_v57 = vpop.f32.mrb[20].mxu1 }
 0x809   :  { %v10965_v51 = vadd.f32 %v7761_v57, %v4878_v8  ;;  %v7763_v52 = vpop.f32.mrb[21].mxu1  ;;  %v9461_v8 = vcombine.low %v4811_v40, %v4827_v41  ;;  %v8983_v57 = vcombine.low %v4332_v45, %v4348_v55  ;;  %v4604_v40 = vld [vmem:[#allocation11 + $0x8c8] sm:$0xff] }
 0x80a   :  { %v10967_v53 = vadd.f32 %v7763_v52, %v4882_v44  ;;  %v7765_v54 = vpop.f32.mrb[22].mxu1  ;;  %7902 = vmatpush1.bf16.msra.mxu1 %v9141_v47  ;;  %v8984_v44 = vcombine.high %v4332_v45, %v4348_v55  ;;  %v4364_v47 = vld [vmem:[#allocation11 + $0x148] sm:$0xff] }
 0x80b   :  { %v7766_v59 = vpop.f32.mrb[23].mxu1  ;;  %7903 = vmatprep.subr.bf16.mxu1 %v9174_v50  ;;  %v4380_v50 = vld [vmem:[#allocation11 + $0x1c8] sm:$0xff] }
 0x80c   :  { %v8285_v61 = vcombine.low %v10965_v51, %v10967_v53  ;;  %v9016_v26 = vcombine.high %v4364_v47, %v4380_v50  ;;  %v4412_v52 = vld [vmem:[#allocation11 + $0x2c8] sm:$0xff]  ;;  %v9015_v54 = vcombine.low %v4364_v47, %v4380_v50 }
 0x80d   :  { %v4428_v59 = vld [vmem:[#allocation11 + $0x348] sm:$0xff]  ;;  %v9047_v63 = vcombine.low %v4396_v13, %v4412_v52 }
 0x80e   :  { %7904 = vmatpush1.bf16.msra.mxu1 %v9173_v58  ;;  %v9048_v58 = vcombine.high %v4396_v13, %v4412_v52  ;;  %v8293_v41 = vrot.slane %v8285_v61, %v10706_v16  ;;  %v4684_v53 = vld [vmem:[#allocation11 + $0xb48] sm:$0xff] }
 0x80f   :  { %7905 = vmatprep.subr.bf16.mxu1 %v9206_v60  ;;  %v4444_v60 = vld [vmem:[#allocation11 + $0x3c8] sm:$0xff] }
 0x810   :  { %v9080_v1 = vcombine.high %v4428_v59, %v4444_v60  ;;  %v9079_v4 = vcombine.low %v4428_v59, %v4444_v60  ;;  %v4700_v61 = vld [vmem:[#allocation11 + $0xbc8] sm:$0xff] }
 0x811   :  { %v4732_v59 = vld [vmem:[#allocation11 + $0xcc8] sm:$0xff]  ;;  %v9335_v60 = vcombine.low %v4684_v53, %v4700_v61 }
 0x812   :  { %7906 = vmatpush1.bf16.msra.mxu1 %v9205_v2  ;;  %v4460_v2 = vld [vmem:[#allocation11 + $0x448] sm:$0xff] }
 0x813   :  { %7907 = vmatprep.subr.bf16.mxu1 %v9238_v3  ;;  %v4476_v3 = vld [vmem:[#allocation11 + $0x4c8] sm:$0xff] }
 0x814   :  { %v9112_v5 = vcombine.high %v4460_v2, %v4476_v3  ;;  %v9111_v14 = vcombine.low %v4460_v2, %v4476_v3  ;;  %v4764_v2 = vld [vmem:[#allocation11 + $0xdc8] sm:$0xff] }
 0x816   :  { %7908 = vmatpush1.bf16.msra.mxu1 %v9237_v7  ;;  %v4492_v7 = vld [vmem:[#allocation11 + $0x548] sm:$0xff] }
 0x817   :  { %7909 = vmatprep.subr.bf16.mxu1 %v9270_v12  ;;  %v4508_v12 = vld [vmem:[#allocation11 + $0x5c8] sm:$0xff] }
 0x818   :  { %v9144_v15 = vcombine.high %v4492_v7, %v4508_v12 }
 0x81a   :  { %7910 = vmatpush1.bf16.msra.mxu1 %v9269_v17  ;;  %v4524_v17 = vld [vmem:[#allocation11 + $0x648] sm:$0xff] }
 0x81b   :  { %7911 = vmatprep.subr.bf16.mxu1 %v9302_v18  ;;  %v4540_v18 = vld [vmem:[#allocation11 + $0x6c8] sm:$0xff] }
 0x81e   :  { %7912 = vmatpush1.bf16.msra.mxu1 %v9301_v21  ;;  %v9143_v21 = vcombine.low %v4492_v7, %v4508_v12  ;;  %v4796_v7 = vld [vmem:[#allocation11 + $0xec8] sm:$0xff] }
 0x81f   :  { %7913 = vmatprep.subr.bf16.mxu1 %v9334_v22  ;;  %v9176_v22 = vcombine.high %v4524_v17, %v4540_v18 }
 0x822   :  { %7914 = vmatpush1.bf16.msra.mxu1 %v9333_v27  ;;  %v4572_v27 = vld [vmem:[#allocation11 + $0x7c8] sm:$0xff] }
 0x823   :  { %7915 = vmatprep.subr.bf16.mxu1 %v9366_v29  ;;  %v9208_v30 = vcombine.high %v4556_v25, %v4572_v27 }
 0x826   :  { %7916 = vmatpush1.bf16.msra.mxu1 %v9365_v34 }
 0x827   :  { %7917 = vmatprep.subr.bf16.mxu1 %v9398_v24  ;;  %v9175_v24 = vcombine.low %v4524_v17, %v4540_v18  ;;  %v4828_v17 = vld [vmem:[#allocation11 + $0xfc8] sm:$0xff] }
 0x82a   :  { %7918 = vmatpush1.bf16.msra.mxu1 %v9397_v36 }
 0x82b   :  { %7919 = vmatprep.subr.bf16.mxu1 %v9430_v38  ;;  %v4588_v38 = vld [vmem:[#allocation11 + $0x848] sm:$0xff] }
 0x82c   :  { %v9240_v45 = vcombine.high %v4588_v38, %v4604_v40  ;;  %v9239_v47 = vcombine.low %v4588_v38, %v4604_v40 }
 0x82e   :  { %7920 = vmatpush1.bf16.msra.mxu1 %v9429_v42 }
 0x82f   :  { %7921 = vmatprep.subr.bf16.mxu1 %v9462_v9  ;;  %v9207_v9 = vcombine.low %v4556_v25, %v4572_v27  ;;  %v4365_v25 = vld [vmem:[#allocation11 + $0x150] sm:$0xff] }
 0x830   :  { %v4381_v27 = vld [vmem:[#allocation11 + $0x1d0] sm:$0xff] }
 0x832   :  { %7922 = vmatpush1.bf16.msra.mxu1 %v9461_v8  ;;  %v4620_v8 = vld [vmem:[#allocation11 + $0x948] sm:$0xff] }
 0x833   :  { %7932 = vmatprep.subr.bf16.mxu1 %v8984_v44  ;;  %v4636_v44 = vld [vmem:[#allocation11 + $0x9c8] sm:$0xff] }
 0x834   :  { %v9272_v50 = vcombine.high %v4620_v8, %v4636_v44  ;;  %v9271_v13 = vcombine.low %v4620_v8, %v4636_v44  ;;  %v4509_v8 = vld [vmem:[#allocation11 + $0x5d0] sm:$0xff] }
 0x835   :  { %7924 = vmatmul.mubr.bf16.vlgmr.msra.gmra.mrb[36].mxu1 %v10872_v49 }
 0x836   :  { %7933 = vmatpush1.bf16.msra.mxu1 %v8983_v57  ;;  %7964 = vmatprep.mubr.bf16.mxu1 %v10870_v48  ;;  %v4652_v57 = vld [vmem:[#allocation11 + $0xa48] sm:$0xff] }
 0x837   :  { %7934 = vmatprep.subr.bf16.mxu1 %v9016_v26  ;;  %v4668_v26 = vld [vmem:[#allocation11 + $0xac8] sm:$0xff] }
 0x838   :  { %v9304_v51 = vcombine.high %v4652_v57, %v4668_v26  ;;  %v9303_v52 = vcombine.low %v4652_v57, %v4668_v26  ;;  %v4541_v57 = vld [vmem:[#allocation11 + $0x6d0] sm:$0xff]  ;;  %v4894_v26 = vrot.slane %v10959_v43, %v10931_v37 }
 0x83a   :  { %7935 = vmatpush1.bf16.msra.mxu1 %v9015_v54  ;;  %v9336_v54 = vcombine.high %v4684_v53, %v4700_v61 }
 0x83b   :  { %7936 = vmatprep.subr.bf16.mxu1 %v9048_v58  ;;  %v4716_v58 = vld [vmem:[#allocation11 + $0xc48] sm:$0xff] }
 0x83c   :  { %v9367_v3 = vcombine.low %v4716_v58, %v4732_v59 }
 0x83e   :  { %7937 = vmatpush1.bf16.msra.mxu1 %v9047_v63  ;;  %v9368_v63 = vcombine.high %v4716_v58, %v4732_v59 }
 0x83f   :  { %7938 = vmatprep.subr.bf16.mxu1 %v9080_v1  ;;  %v4748_v1 = vld [vmem:[#allocation11 + $0xd48] sm:$0xff] }
 0x840   :  { %v9399_v12 = vcombine.low %v4748_v1, %v4764_v2 }
 0x842   :  { %7939 = vmatpush1.bf16.msra.mxu1 %v9079_v4  ;;  %v9400_v4 = vcombine.high %v4748_v1, %v4764_v2 }
 0x843   :  { %7940 = vmatprep.subr.bf16.mxu1 %v9112_v5  ;;  %v4780_v5 = vld [vmem:[#allocation11 + $0xe48] sm:$0xff] }
 0x844   :  { %v9431_v18 = vcombine.low %v4780_v5, %v4796_v7 }
 0x846   :  { %7941 = vmatpush1.bf16.msra.mxu1 %v9111_v14  ;;  %v9432_v14 = vcombine.high %v4780_v5, %v4796_v7  ;;  %v4589_v5 = vld [vmem:[#allocation11 + $0x850] sm:$0xff] }
 0x847   :  { %7942 = vmatprep.subr.bf16.mxu1 %v9144_v15  ;;  %v4812_v15 = vld [vmem:[#allocation11 + $0xf48] sm:$0xff]  ;;  %v4605_v7 = vld [vmem:[#allocation11 + $0x8d0] sm:$0xff] }
 0x848   :  { %v7802_v23 = vpop.f32.mrb[24].mxu1 }
 0x849   :  { %v7803_v29 = vadd.f32 %v7802_v23, %v4886_v19  ;;  %v7804_v31 = vpop.f32.mrb[25].mxu1  ;;  %v9464_v19 = vcombine.high %v4812_v15, %v4828_v17 }
 0x84a   :  { %v7805_v33 = vadd.f32 %v7804_v31, %v4890_v20  ;;  %v7806_v34 = vpop.f32.mrb[26].mxu1  ;;  %7943 = vmatpush1.bf16.msra.mxu1 %v9143_v21  ;;  %v4333_v20 = vld [vmem:[#allocation11 + $0x50] sm:$0xff]  ;;  %v9018_v31 = vcombine.high %v4365_v25, %v4381_v27 }
 0x84b   :  { %v7807_v35 = vpop.f32.mrb[27].mxu1  ;;  %7944 = vmatprep.subr.bf16.mxu1 %v9176_v22  ;;  %v4349_v21 = vld [vmem:[#allocation11 + $0xd0] sm:$0xff]  ;;  %v9463_v22 = vcombine.low %v4812_v15, %v4828_v17 }
 0x84c   :  { %v8286_v36 = vcombine.low %v7803_v29, %v7805_v33  ;;  %v8986_v23 = vcombine.high %v4333_v20, %v4349_v21  ;;  %v8985_v29 = vcombine.low %v4333_v20, %v4349_v21  ;;  %v4397_v33 = vld [vmem:[#allocation11 + $0x250] sm:$0xff] }
 0x84d   :  { %v4413_v34 = vld [vmem:[#allocation11 + $0x2d0] sm:$0xff] }
 0x84e   :  { %v8300_v42 = vrot.slane %v8286_v36, %v10706_v16  ;;  %7945 = vmatpush1.bf16.msra.mxu1 %v9175_v24  ;;  %v9017_v24 = vcombine.low %v4365_v25, %v4381_v27  ;;  %v9050_v35 = vcombine.high %v4397_v33, %v4413_v34  ;;  %v4445_v36 = vld [vmem:[#allocation11 + $0x3d0] sm:$0xff]  ;;  %v9049_v38 = vcombine.low %v4397_v33, %v4413_v34 }
 0x84f   :  { %7946 = vmatprep.subr.bf16.mxu1 %v9208_v30  ;;  %v4429_v30 = vld [vmem:[#allocation11 + $0x350] sm:$0xff] }
 0x850   :  { %v8301_v55 = vcombine.low %v8293_v41, %v8300_v42  ;;  %v9082_v40 = vcombine.high %v4429_v30, %v4445_v36  ;;  %v4461_v41 = vld [vmem:[#allocation11 + $0x450] sm:$0xff] }
 0x851   :  { %v4477_v42 = vld [vmem:[#allocation11 + $0x4d0] sm:$0xff] }
 0x852   :  { %8397 = vst [vmem:[#allocation14 + $0x10] sm:$0xff] %v8301_v55  ;;  %7947 = vmatpush1.bf16.msra.mxu1 %v9207_v9  ;;  %v9081_v9 = vcombine.low %v4429_v30, %v4445_v36  ;;  %v4493_v55 = vld [vmem:[#allocation11 + $0x550] sm:$0xff]  ;;  %v9113_v44 = vcombine.low %v4461_v41, %v4477_v42 }
 0x853   :  { %7948 = vmatprep.subr.bf16.mxu1 %v9240_v45  ;;  %v9114_v45 = vcombine.high %v4461_v41, %v4477_v42  ;;  %v4621_v15 = vld [vmem:[#allocation11 + $0x950] sm:$0xff] }
 0x854   :  { %v4637_v17 = vld [vmem:[#allocation11 + $0x9d0] sm:$0xff] }
 0x855   :  { %v4653_v20 = vld [vmem:[#allocation11 + $0xa50] sm:$0xff] }
 0x856   :  { %7949 = vmatpush1.bf16.msra.mxu1 %v9239_v47  ;;  %v9146_v47 = vcombine.high %v4493_v55, %v4509_v8  ;;  %v4669_v21 = vld [vmem:[#allocation11 + $0xad0] sm:$0xff] }
 0x857   :  { %7950 = vmatprep.subr.bf16.mxu1 %v9272_v50  ;;  %v4525_v50 = vld [vmem:[#allocation11 + $0x650] sm:$0xff] }
 0x858   :  { %v9178_v53 = vcombine.high %v4525_v50, %v4541_v57  ;;  %v9177_v1 = vcombine.low %v4525_v50, %v4541_v57  ;;  %v4685_v25 = vld [vmem:[#allocation11 + $0xb50] sm:$0xff]  ;;  %v4334_v50 = vld [vmem:[#allocation11 + $0x58] sm:$0xff] }
 0x859   :  { %v4701_v27 = vld [vmem:[#allocation11 + $0xbd0] sm:$0xff]  ;;  %v4350_v57 = vld [vmem:[#allocation11 + $0xd8] sm:$0xff] }
 0x85a   :  { %7951 = vmatpush1.bf16.msra.mxu1 %v9271_v13  ;;  %v4898_v13 = vrot.slane %v10959_v43, %v10934_v39  ;;  %v4717_v33 = vld [vmem:[#allocation11 + $0xc50] sm:$0xff] }
 0x85b   :  { %7952 = vmatprep.subr.bf16.mxu1 %v9304_v51  ;;  %v9145_v51 = vcombine.low %v4493_v55, %v4509_v8  ;;  %v4733_v34 = vld [vmem:[#allocation11 + $0xcd0] sm:$0xff] }
 0x85c   :  { %v4749_v30 = vld [vmem:[#allocation11 + $0xd50] sm:$0xff] }
 0x85d   :  { %v4765_v36 = vld [vmem:[#allocation11 + $0xdd0] sm:$0xff] }
 0x85e   :  { %7953 = vmatpush1.bf16.msra.mxu1 %v9303_v52  ;;  %v4557_v52 = vld [vmem:[#allocation11 + $0x750] sm:$0xff] }
 0x85f   :  { %7954 = vmatprep.subr.bf16.mxu1 %v9336_v54  ;;  %v4573_v54 = vld [vmem:[#allocation11 + $0x7d0] sm:$0xff] }
 0x860   :  { %v4781_v41 = vld [vmem:[#allocation11 + $0xe50] sm:$0xff] }
 0x861   :  { %v4797_v42 = vld [vmem:[#allocation11 + $0xed0] sm:$0xff] }
 0x862   :  { %7955 = vmatpush1.bf16.msra.mxu1 %v9335_v60  ;;  %v4813_v55 = vld [vmem:[#allocation11 + $0xf50] sm:$0xff] }
 0x863   :  { %7956 = vmatprep.subr.bf16.mxu1 %v9368_v63  ;;  %v4829_v8 = vld [vmem:[#allocation11 + $0xfd0] sm:$0xff] }
 0x866   :  { %7957 = vmatpush1.bf16.msra.mxu1 %v9367_v3  ;;  %v9210_v3 = vcombine.high %v4557_v52, %v4573_v54 }
 0x867   :  { %7958 = vmatprep.subr.bf16.mxu1 %v9400_v4 }
 0x86a   :  { %7959 = vmatpush1.bf16.msra.mxu1 %v9399_v12  ;;  %v9209_v12 = vcombine.low %v4557_v52, %v4573_v54  ;;  %v4398_v54 = vld [vmem:[#allocation11 + $0x258] sm:$0xff] }
 0x86b   :  { %7960 = vmatprep.subr.bf16.mxu1 %v9432_v14  ;;  %v9242_v14 = vcombine.high %v4589_v5, %v4605_v7 }
 0x86e   :  { %7961 = vmatpush1.bf16.msra.mxu1 %v9431_v18  ;;  %v9241_v18 = vcombine.low %v4589_v5, %v4605_v7 }
 0x86f   :  { %7962 = vmatprep.subr.bf16.mxu1 %v9464_v19  ;;  %v9274_v19 = vcombine.high %v4621_v15, %v4637_v17 }
 0x872   :  { %7963 = vmatpush1.bf16.msra.mxu1 %v9463_v22  ;;  %v9273_v22 = vcombine.low %v4621_v15, %v4637_v17 }
 0x873   :  { %7973 = vmatprep.subr.bf16.mxu1 %v8986_v23  ;;  %v9306_v23 = vcombine.high %v4653_v20, %v4669_v21 }
 0x875   :  { %7965 = vmatmul.mubr.bf16.vlgmr.msra.gmra.mrb[40].mxu1 %v10872_v49 }
 0x876   :  { %7974 = vmatpush1.bf16.msra.mxu1 %v8985_v29  ;;  %8005 = vmatprep.mubr.bf16.mxu1 %v10870_v48  ;;  %v9305_v29 = vcombine.low %v4653_v20, %v4669_v21 }
 0x877   :  { %7975 = vmatprep.subr.bf16.mxu1 %v9018_v31  ;;  %v9338_v31 = vcombine.high %v4685_v25, %v4701_v27 }
 0x87a   :  { %7976 = vmatpush1.bf16.msra.mxu1 %v9017_v24  ;;  %v9337_v24 = vcombine.low %v4685_v25, %v4701_v27  ;;  %v4902_v25 = vrot.slane %v10959_v43, %v10886_v28  ;;  %v4906_v27 = vrot.slane %v10959_v43, %v10891_v32 }
 0x87b   :  { %7977 = vmatprep.subr.bf16.mxu1 %v9050_v35  ;;  %v9370_v35 = vcombine.high %v4717_v33, %v4733_v34 }
 0x87e   :  { %7978 = vmatpush1.bf16.msra.mxu1 %v9049_v38  ;;  %v9369_v38 = vcombine.low %v4717_v33, %v4733_v34  ;;  %v4558_v34 = vld [vmem:[#allocation11 + $0x758] sm:$0xff] }
 0x87f   :  { %7979 = vmatprep.subr.bf16.mxu1 %v9082_v40  ;;  %v9402_v40 = vcombine.high %v4749_v30, %v4765_v36 }
 0x882   :  { %7980 = vmatpush1.bf16.msra.mxu1 %v9081_v9  ;;  %v9401_v9 = vcombine.low %v4749_v30, %v4765_v36 }
 0x883   :  { %7981 = vmatprep.subr.bf16.mxu1 %v9114_v45  ;;  %v9434_v45 = vcombine.high %v4781_v41, %v4797_v42 }
 0x886   :  { %7982 = vmatpush1.bf16.msra.mxu1 %v9113_v44  ;;  %v9433_v44 = vcombine.low %v4781_v41, %v4797_v42 }
 0x887   :  { %7983 = vmatprep.subr.bf16.mxu1 %v9146_v47  ;;  %v9466_v47 = vcombine.high %v4813_v55, %v4829_v8 }
 0x888   :  { %v7843_v61 = vpop.f32.mrb[28].mxu1 }
 0x889   :  { %v10988_v58 = vadd.f32 %v7843_v61, %v4894_v26  ;;  %v7845_v59 = vpop.f32.mrb[29].mxu1  ;;  %v9465_v26 = vcombine.low %v4813_v55, %v4829_v8  ;;  %v8987_v61 = vcombine.low %v4334_v50, %v4350_v57  ;;  %v4606_v55 = vld [vmem:[#allocation11 + $0x8d8] sm:$0xff] }
 0x88a   :  { %v10990_v60 = vadd.f32 %v7845_v59, %v4898_v13  ;;  %v7847_v63 = vpop.f32.mrb[30].mxu1  ;;  %7984 = vmatpush1.bf16.msra.mxu1 %v9145_v51  ;;  %v8988_v13 = vcombine.high %v4334_v50, %v4350_v57  ;;  %v4366_v51 = vld [vmem:[#allocation11 + $0x158] sm:$0xff] }
 0x88b   :  { %v7848_v2 = vpop.f32.mrb[31].mxu1  ;;  %7985 = vmatprep.subr.bf16.mxu1 %v9178_v53  ;;  %v4382_v53 = vld [vmem:[#allocation11 + $0x1d8] sm:$0xff] }
 0x88c   :  { %v8302_v4 = vcombine.low %v10988_v58, %v10990_v60  ;;  %v9020_v52 = vcombine.high %v4366_v51, %v4382_v53  ;;  %v4414_v59 = vld [vmem:[#allocation11 + $0x2d8] sm:$0xff]  ;;  %v9019_v63 = vcombine.low %v4366_v51, %v4382_v53 }
 0x88d   :  { %v4430_v2 = vld [vmem:[#allocation11 + $0x358] sm:$0xff]  ;;  %v9051_v5 = vcombine.low %v4398_v54, %v4414_v59 }
 0x88e   :  { %7986 = vmatpush1.bf16.msra.mxu1 %v9177_v1  ;;  %v9052_v1 = vcombine.high %v4398_v54, %v4414_v59  ;;  %v8310_v43 = vrot.slane %v8302_v4, %v10706_v16  ;;  %v4622_v57 = vld [vmem:[#allocation11 + $0x958] sm:$0xff] }
 0x88f   :  { %7987 = vmatprep.subr.bf16.mxu1 %v9210_v3  ;;  %v4446_v3 = vld [vmem:[#allocation11 + $0x3d8] sm:$0xff] }
 0x890   :  { %v9084_v7 = vcombine.high %v4430_v2, %v4446_v3  ;;  %v9083_v15 = vcombine.low %v4430_v2, %v4446_v3  ;;  %v4654_v53 = vld [vmem:[#allocation11 + $0xa58] sm:$0xff] }
 0x891   :  { %v4686_v60 = vld [vmem:[#allocation11 + $0xb58] sm:$0xff] }
 0x892   :  { %7988 = vmatpush1.bf16.msra.mxu1 %v9209_v12  ;;  %v4462_v12 = vld [vmem:[#allocation11 + $0x458] sm:$0xff] }
 0x893   :  { %7989 = vmatprep.subr.bf16.mxu1 %v9242_v14  ;;  %v4478_v14 = vld [vmem:[#allocation11 + $0x4d8] sm:$0xff] }
 0x894   :  { %v9116_v17 = vcombine.high %v4462_v12, %v4478_v14  ;;  %v9115_v20 = vcombine.low %v4462_v12, %v4478_v14  ;;  %v4702_v4 = vld [vmem:[#allocation11 + $0xbd8] sm:$0xff] }
 0x895   :  { %v9340_v59 = vcombine.high %v4686_v60, %v4702_v4  ;;  %v9339_v2 = vcombine.low %v4686_v60, %v4702_v4 }
 0x896   :  { %7990 = vmatpush1.bf16.msra.mxu1 %v9241_v18  ;;  %v4494_v18 = vld [vmem:[#allocation11 + $0x558] sm:$0xff] }
 0x897   :  { %7991 = vmatprep.subr.bf16.mxu1 %v9274_v19  ;;  %v4510_v19 = vld [vmem:[#allocation11 + $0x5d8] sm:$0xff] }
 0x898   :  { %v9148_v21 = vcombine.high %v4494_v18, %v4510_v19 }
 0x89a   :  { %7992 = vmatpush1.bf16.msra.mxu1 %v9273_v22  ;;  %v4526_v22 = vld [vmem:[#allocation11 + $0x658] sm:$0xff] }
 0x89b   :  { %7993 = vmatprep.subr.bf16.mxu1 %v9306_v23  ;;  %v4542_v23 = vld [vmem:[#allocation11 + $0x6d8] sm:$0xff] }
 0x89e   :  { %7994 = vmatpush1.bf16.msra.mxu1 %v9305_v29  ;;  %v9147_v29 = vcombine.low %v4494_v18, %v4510_v19 }
 0x89f   :  { %7995 = vmatprep.subr.bf16.mxu1 %v9338_v31  ;;  %v9180_v31 = vcombine.high %v4526_v22, %v4542_v23 }
 0x8a2   :  { %7996 = vmatpush1.bf16.msra.mxu1 %v9337_v24  ;;  %v4574_v24 = vld [vmem:[#allocation11 + $0x7d8] sm:$0xff] }
 0x8a3   :  { %7997 = vmatprep.subr.bf16.mxu1 %v9370_v35  ;;  %v9212_v42 = vcombine.high %v4558_v34, %v4574_v24 }
 0x8a6   :  { %7998 = vmatpush1.bf16.msra.mxu1 %v9369_v38 }
 0x8a7   :  { %7999 = vmatprep.subr.bf16.mxu1 %v9402_v40  ;;  %v9179_v40 = vcombine.low %v4526_v22, %v4542_v23 }
 0x8aa   :  { %8000 = vmatpush1.bf16.msra.mxu1 %v9401_v9 }
 0x8ab   :  { %8001 = vmatprep.subr.bf16.mxu1 %v9434_v45  ;;  %v4590_v45 = vld [vmem:[#allocation11 + $0x858] sm:$0xff] }
 0x8ae   :  { %8002 = vmatpush1.bf16.msra.mxu1 %v9433_v44  ;;  %v9211_v44 = vcombine.low %v4558_v34, %v4574_v24  ;;  %v4383_v34 = vld [vmem:[#allocation11 + $0x1e0] sm:$0xff] }
 0x8af   :  { %8003 = vmatprep.subr.bf16.mxu1 %v9466_v47  ;;  %v9244_v47 = vcombine.high %v4590_v45, %v4606_v55 }
 0x8b2   :  { %8004 = vmatpush1.bf16.msra.mxu1 %v9465_v26  ;;  %v4638_v26 = vld [vmem:[#allocation11 + $0x9d8] sm:$0xff] }
 0x8b3   :  { %8014 = vmatprep.subr.bf16.mxu1 %v8988_v13  ;;  %v9243_v13 = vcombine.low %v4590_v45, %v4606_v55  ;;  %v9276_v51 = vcombine.high %v4622_v57, %v4638_v26  ;;  %v4463_v55 = vld [vmem:[#allocation11 + $0x460] sm:$0xff] }
 0x8b5   :  { %8006 = vmatmul.mubr.bf16.vlgmr.msra.gmra.mrb[44].mxu1 %v10872_v49 }
 0x8b6   :  { %8015 = vmatpush1.bf16.msra.mxu1 %v8987_v61  ;;  %8046 = vmatprep.mubr.bf16.mxu1 %v10870_v48  ;;  %v4670_v61 = vld [vmem:[#allocation11 + $0xad8] sm:$0xff] }
 0x8b7   :  { %8016 = vmatprep.subr.bf16.mxu1 %v9020_v52  ;;  %v9275_v52 = vcombine.low %v4622_v57, %v4638_v26  ;;  %v9308_v58 = vcombine.high %v4654_v53, %v4670_v61  ;;  %v9307_v54 = vcombine.low %v4654_v53, %v4670_v61  ;;  %v11007_v26 = vld [vmem:[#allocation13 + $0x10] sm:$0xff]  ;;  %v4543_v53 = vld [vmem:[#allocation11 + $0x6e0] sm:$0xff] }
 0x8b8   :  { %v4910_v61 = vrot.slane %v11007_v26, %v10858_v6 }
 0x8ba   :  { %8017 = vmatpush1.bf16.msra.mxu1 %v9019_v63  ;;  %v4718_v63 = vld [vmem:[#allocation11 + $0xc58] sm:$0xff] }
 0x8bb   :  { %8018 = vmatprep.subr.bf16.mxu1 %v9052_v1  ;;  %v4734_v1 = vld [vmem:[#allocation11 + $0xcd8] sm:$0xff] }
 0x8bc   :  { %v9372_v3 = vcombine.high %v4718_v63, %v4734_v1  ;;  %v9371_v12 = vcombine.low %v4718_v63, %v4734_v1 }
 0x8be   :  { %8019 = vmatpush1.bf16.msra.mxu1 %v9051_v5  ;;  %v4750_v5 = vld [vmem:[#allocation11 + $0xd58] sm:$0xff] }
 0x8bf   :  { %8020 = vmatprep.subr.bf16.mxu1 %v9084_v7  ;;  %v4766_v7 = vld [vmem:[#allocation11 + $0xdd8] sm:$0xff] }
 0x8c0   :  { %v9404_v14 = vcombine.high %v4750_v5, %v4766_v7  ;;  %v9403_v18 = vcombine.low %v4750_v5, %v4766_v7 }
 0x8c2   :  { %8021 = vmatpush1.bf16.msra.mxu1 %v9083_v15  ;;  %v4782_v15 = vld [vmem:[#allocation11 + $0xe58] sm:$0xff] }
 0x8c3   :  { %8022 = vmatprep.subr.bf16.mxu1 %v9116_v17  ;;  %v4798_v17 = vld [vmem:[#allocation11 + $0xed8] sm:$0xff] }
 0x8c4   :  { %v9436_v19 = vcombine.high %v4782_v15, %v4798_v17  ;;  %v9435_v22 = vcombine.low %v4782_v15, %v4798_v17  ;;  %v4591_v15 = vld [vmem:[#allocation11 + $0x860] sm:$0xff] }
 0x8c5   :  { %v4607_v17 = vld [vmem:[#allocation11 + $0x8e0] sm:$0xff] }
 0x8c6   :  { %8023 = vmatpush1.bf16.msra.mxu1 %v9115_v20  ;;  %v4814_v20 = vld [vmem:[#allocation11 + $0xf58] sm:$0xff] }
 0x8c7   :  { %8024 = vmatprep.subr.bf16.mxu1 %v9148_v21  ;;  %v4830_v21 = vld [vmem:[#allocation11 + $0xfd8] sm:$0xff] }
 0x8c8   :  { %v7884_v33 = vpop.f32.mrb[32].mxu1  ;;  %v9468_v23 = vcombine.high %v4814_v20, %v4830_v21 }
 0x8c9   :  { %v7885_v35 = vadd.f32 %v7884_v33, %v4902_v25  ;;  %v7886_v30 = vpop.f32.mrb[33].mxu1  ;;  %v4335_v25 = vld [vmem:[#allocation11 + $0x60] sm:$0xff] }
 0x8ca   :  { %v7887_v36 = vadd.f32 %v7886_v30, %v4906_v27  ;;  %v7888_v38 = vpop.f32.mrb[34].mxu1  ;;  %8025 = vmatpush1.bf16.msra.mxu1 %v9147_v29  ;;  %v4351_v27 = vld [vmem:[#allocation11 + $0xe0] sm:$0xff]  ;;  %v9467_v29 = vcombine.low %v4814_v20, %v4830_v21 }
 0x8cb   :  { %v7889_v41 = vpop.f32.mrb[35].mxu1  ;;  %8026 = vmatprep.subr.bf16.mxu1 %v9180_v31  ;;  %v8990_v31 = vcombine.high %v4335_v25, %v4351_v27  ;;  %v4367_v33 = vld [vmem:[#allocation11 + $0x160] sm:$0xff]  ;;  %v8989_v24 = vcombine.low %v4335_v25, %v4351_v27 }
 0x8cc   :  { %v8303_v9 = vcombine.low %v7885_v35, %v7887_v36  ;;  %v9022_v35 = vcombine.high %v4367_v33, %v4383_v34  ;;  %v4399_v30 = vld [vmem:[#allocation11 + $0x260] sm:$0xff]  ;;  %v9021_v38 = vcombine.low %v4367_v33, %v4383_v34 }
 0x8cd   :  { %v4415_v36 = vld [vmem:[#allocation11 + $0x2e0] sm:$0xff] }
 0x8ce   :  { %v8317_v8 = vrot.slane %v8303_v9, %v10706_v16  ;;  %8027 = vmatpush1.bf16.msra.mxu1 %v9179_v40  ;;  %v9054_v40 = vcombine.high %v4399_v30, %v4415_v36  ;;  %v4431_v41 = vld [vmem:[#allocation11 + $0x360] sm:$0xff]  ;;  %v9053_v9 = vcombine.low %v4399_v30, %v4415_v36 }
 0x8cf   :  { %8028 = vmatprep.subr.bf16.mxu1 %v9212_v42  ;;  %v4447_v42 = vld [vmem:[#allocation11 + $0x3e0] sm:$0xff] }
 0x8d0   :  { %v8318_v50 = vcombine.low %v8310_v43, %v8317_v8  ;;  %v9086_v45 = vcombine.high %v4431_v41, %v4447_v42  ;;  %v4479_v43 = vld [vmem:[#allocation11 + $0x4e0] sm:$0xff]  ;;  %v9085_v8 = vcombine.low %v4431_v41, %v4447_v42 }
 0x8d1   :  { %v9117_v57 = vcombine.low %v4463_v55, %v4479_v43  ;;  %v4623_v20 = vld [vmem:[#allocation11 + $0x960] sm:$0xff] }
 0x8d2   :  { %8398 = vst [vmem:[#allocation14 + $0x18] sm:$0xff] %v8318_v50  ;;  %8029 = vmatpush1.bf16.msra.mxu1 %v9211_v44  ;;  %v9118_v44 = vcombine.high %v4463_v55, %v4479_v43  ;;  %v4511_v50 = vld [vmem:[#allocation11 + $0x5e0] sm:$0xff] }
 0x8d3   :  { %8030 = vmatprep.subr.bf16.mxu1 %v9244_v47  ;;  %v4495_v47 = vld [vmem:[#allocation11 + $0x560] sm:$0xff] }
 0x8d4   :  { %v4639_v21 = vld [vmem:[#allocation11 + $0x9e0] sm:$0xff] }
 0x8d5   :  { %v4655_v25 = vld [vmem:[#allocation11 + $0xa60] sm:$0xff] }
 0x8d6   :  { %8031 = vmatpush1.bf16.msra.mxu1 %v9243_v13  ;;  %v9150_v13 = vcombine.high %v4495_v47, %v4511_v50  ;;  %v4671_v27 = vld [vmem:[#allocation11 + $0xae0] sm:$0xff] }
 0x8d7   :  { %8032 = vmatprep.subr.bf16.mxu1 %v9276_v51  ;;  %v4527_v51 = vld [vmem:[#allocation11 + $0x660] sm:$0xff] }
 0x8d8   :  { %v9182_v60 = vcombine.high %v4527_v51, %v4543_v53  ;;  %v9181_v5 = vcombine.low %v4527_v51, %v4543_v53  ;;  %v4687_v33 = vld [vmem:[#allocation11 + $0xb60] sm:$0xff]  ;;  %v4336_v51 = vld [vmem:[#allocation11 + $0x68] sm:$0xff] }
 0x8d9   :  { %v4703_v34 = vld [vmem:[#allocation11 + $0xbe0] sm:$0xff]  ;;  %v4352_v53 = vld [vmem:[#allocation11 + $0xe8] sm:$0xff] }
 0x8da   :  { %8033 = vmatpush1.bf16.msra.mxu1 %v9275_v52  ;;  %v4914_v52 = vrot.slane %v11007_v26, %v10861_v11  ;;  %v4719_v30 = vld [vmem:[#allocation11 + $0xc60] sm:$0xff] }
 0x8db   :  { %8034 = vmatprep.subr.bf16.mxu1 %v9308_v58  ;;  %v9149_v58 = vcombine.low %v4495_v47, %v4511_v50  ;;  %v4735_v36 = vld [vmem:[#allocation11 + $0xce0] sm:$0xff] }
 0x8dc   :  { %v4751_v41 = vld [vmem:[#allocation11 + $0xd60] sm:$0xff] }
 0x8dd   :  { %v4767_v42 = vld [vmem:[#allocation11 + $0xde0] sm:$0xff] }
 0x8de   :  { %8035 = vmatpush1.bf16.msra.mxu1 %v9307_v54  ;;  %v4559_v54 = vld [vmem:[#allocation11 + $0x760] sm:$0xff] }
 0x8df   :  { %8036 = vmatprep.subr.bf16.mxu1 %v9340_v59  ;;  %v4575_v59 = vld [vmem:[#allocation11 + $0x7e0] sm:$0xff] }
 0x8e0   :  { %v4783_v55 = vld [vmem:[#allocation11 + $0xe60] sm:$0xff] }
 0x8e1   :  { %v4799_v43 = vld [vmem:[#allocation11 + $0xee0] sm:$0xff] }
 0x8e2   :  { %8037 = vmatpush1.bf16.msra.mxu1 %v9339_v2  ;;  %v4815_v47 = vld [vmem:[#allocation11 + $0xf60] sm:$0xff] }
 0x8e3   :  { %8038 = vmatprep.subr.bf16.mxu1 %v9372_v3  ;;  %v4831_v50 = vld [vmem:[#allocation11 + $0xfe0] sm:$0xff] }
 0x8e6   :  { %8039 = vmatpush1.bf16.msra.mxu1 %v9371_v12  ;;  %v9214_v12 = vcombine.high %v4559_v54, %v4575_v59 }
 0x8e7   :  { %8040 = vmatprep.subr.bf16.mxu1 %v9404_v14 }
 0x8ea   :  { %8041 = vmatpush1.bf16.msra.mxu1 %v9403_v18  ;;  %v9213_v18 = vcombine.low %v4559_v54, %v4575_v59  ;;  %v4400_v59 = vld [vmem:[#allocation11 + $0x268] sm:$0xff] }
 0x8eb   :  { %8042 = vmatprep.subr.bf16.mxu1 %v9436_v19  ;;  %v9246_v19 = vcombine.high %v4591_v15, %v4607_v17 }
 0x8ee   :  { %8043 = vmatpush1.bf16.msra.mxu1 %v9435_v22  ;;  %v9245_v22 = vcombine.low %v4591_v15, %v4607_v17 }
 0x8ef   :  { %8044 = vmatprep.subr.bf16.mxu1 %v9468_v23  ;;  %v9278_v23 = vcombine.high %v4623_v20, %v4639_v21 }
 0x8f2   :  { %8045 = vmatpush1.bf16.msra.mxu1 %v9467_v29  ;;  %v9277_v29 = vcombine.low %v4623_v20, %v4639_v21 }
 0x8f3   :  { %8055 = vmatprep.subr.bf16.mxu1 %v8990_v31  ;;  %v9310_v31 = vcombine.high %v4655_v25, %v4671_v27 }
 0x8f5   :  { %8047 = vmatmul.mubr.bf16.vlgmr.msra.gmra.mrb[48].mxu1 %v10872_v49 }
 0x8f6   :  { %8056 = vmatpush1.bf16.msra.mxu1 %v8989_v24  ;;  %8087 = vmatprep.mubr.bf16.mxu1 %v10870_v48  ;;  %v9309_v24 = vcombine.low %v4655_v25, %v4671_v27 }
 0x8f7   :  { %8057 = vmatprep.subr.bf16.mxu1 %v9022_v35  ;;  %v9342_v35 = vcombine.high %v4687_v33, %v4703_v34 }
 0x8fa   :  { %8058 = vmatpush1.bf16.msra.mxu1 %v9021_v38  ;;  %v9341_v38 = vcombine.low %v4687_v33, %v4703_v34  ;;  %v4918_v33 = vrot.slane %v11007_v26, %v10914_v62  ;;  %v4922_v34 = vrot.slane %v11007_v26, %v10917_v0 }
 0x8fb   :  { %8059 = vmatprep.subr.bf16.mxu1 %v9054_v40  ;;  %v9374_v40 = vcombine.high %v4719_v30, %v4735_v36 }
 0x8fe   :  { %8060 = vmatpush1.bf16.msra.mxu1 %v9053_v9  ;;  %v9373_v9 = vcombine.low %v4719_v30, %v4735_v36  ;;  %v4560_v36 = vld [vmem:[#allocation11 + $0x768] sm:$0xff] }
 0x8ff   :  { %8061 = vmatprep.subr.bf16.mxu1 %v9086_v45  ;;  %v9406_v45 = vcombine.high %v4751_v41, %v4767_v42 }
 0x902   :  { %8062 = vmatpush1.bf16.msra.mxu1 %v9085_v8  ;;  %v9405_v8 = vcombine.low %v4751_v41, %v4767_v42 }
 0x903   :  { %8063 = vmatprep.subr.bf16.mxu1 %v9118_v44  ;;  %v9438_v44 = vcombine.high %v4783_v55, %v4799_v43 }
 0x906   :  { %8064 = vmatpush1.bf16.msra.mxu1 %v9117_v57  ;;  %v9437_v57 = vcombine.low %v4783_v55, %v4799_v43 }
 0x907   :  { %8065 = vmatprep.subr.bf16.mxu1 %v9150_v13  ;;  %v9470_v13 = vcombine.high %v4815_v47, %v4831_v50 }
 0x908   :  { %v7925_v4 = vpop.f32.mrb[36].mxu1 }
 0x909   :  { %v11013_v63 = vadd.f32 %v7925_v4, %v4910_v61  ;;  %v7927_v1 = vpop.f32.mrb[37].mxu1  ;;  %v9469_v61 = vcombine.low %v4815_v47, %v4831_v50  ;;  %v8991_v4 = vcombine.low %v4336_v51, %v4352_v53  ;;  %v4608_v47 = vld [vmem:[#allocation11 + $0x8e8] sm:$0xff] }
 0x90a   :  { %v11015_v2 = vadd.f32 %v7927_v1, %v4914_v52  ;;  %v7929_v3 = vpop.f32.mrb[38].mxu1  ;;  %8066 = vmatpush1.bf16.msra.mxu1 %v9149_v58  ;;  %v8992_v52 = vcombine.high %v4336_v51, %v4352_v53  ;;  %v4368_v58 = vld [vmem:[#allocation11 + $0x168] sm:$0xff] }
 0x90b   :  { %v7930_v7 = vpop.f32.mrb[39].mxu1  ;;  %8067 = vmatprep.subr.bf16.mxu1 %v9182_v60  ;;  %v4384_v60 = vld [vmem:[#allocation11 + $0x1e8] sm:$0xff] }
 0x90c   :  { %v8319_v14 = vcombine.low %v11013_v63, %v11015_v2  ;;  %v9024_v54 = vcombine.high %v4368_v58, %v4384_v60  ;;  %v4416_v1 = vld [vmem:[#allocation11 + $0x2e8] sm:$0xff]  ;;  %v9023_v3 = vcombine.low %v4368_v58, %v4384_v60 }
 0x90d   :  { %v4432_v7 = vld [vmem:[#allocation11 + $0x368] sm:$0xff]  ;;  %v9055_v15 = vcombine.low %v4400_v59, %v4416_v1 }
 0x90e   :  { %8068 = vmatpush1.bf16.msra.mxu1 %v9181_v5  ;;  %v9056_v5 = vcombine.high %v4400_v59, %v4416_v1  ;;  %v8327_v50 = vrot.slane %v8319_v14, %v10706_v16  ;;  %v4688_v2 = vld [vmem:[#allocation11 + $0xb68] sm:$0xff] }
 0x90f   :  { %8069 = vmatprep.subr.bf16.mxu1 %v9214_v12  ;;  %v4448_v12 = vld [vmem:[#allocation11 + $0x3e8] sm:$0xff] }
 0x910   :  { %v9088_v17 = vcombine.high %v4432_v7, %v4448_v12  ;;  %v9087_v20 = vcombine.low %v4432_v7, %v4448_v12  ;;  %v4704_v14 = vld [vmem:[#allocation11 + $0xbe8] sm:$0xff] }
 0x911   :  { %v4736_v7 = vld [vmem:[#allocation11 + $0xce8] sm:$0xff]  ;;  %v9343_v12 = vcombine.low %v4688_v2, %v4704_v14 }
 0x912   :  { %8070 = vmatpush1.bf16.msra.mxu1 %v9213_v18  ;;  %v4464_v18 = vld [vmem:[#allocation11 + $0x468] sm:$0xff] }
 0x913   :  { %8071 = vmatprep.subr.bf16.mxu1 %v9246_v19  ;;  %v4480_v19 = vld [vmem:[#allocation11 + $0x4e8] sm:$0xff] }
 0x914   :  { %v9120_v21 = vcombine.high %v4464_v18, %v4480_v19  ;;  %v9119_v25 = vcombine.low %v4464_v18, %v4480_v19  ;;  %v4768_v18 = vld [vmem:[#allocation11 + $0xde8] sm:$0xff] }
 0x916   :  { %8072 = vmatpush1.bf16.msra.mxu1 %v9245_v22  ;;  %v4496_v22 = vld [vmem:[#allocation11 + $0x568] sm:$0xff] }
 0x917   :  { %8073 = vmatprep.subr.bf16.mxu1 %v9278_v23  ;;  %v4512_v23 = vld [vmem:[#allocation11 + $0x5e8] sm:$0xff] }
 0x918   :  { %v9152_v27 = vcombine.high %v4496_v22, %v4512_v23 }
 0x91a   :  { %8074 = vmatpush1.bf16.msra.mxu1 %v9277_v29  ;;  %v4528_v29 = vld [vmem:[#allocation11 + $0x668] sm:$0xff] }
 0x91b   :  { %8075 = vmatprep.subr.bf16.mxu1 %v9310_v31  ;;  %v4544_v31 = vld [vmem:[#allocation11 + $0x6e8] sm:$0xff] }
 0x91e   :  { %8076 = vmatpush1.bf16.msra.mxu1 %v9309_v24  ;;  %v9151_v24 = vcombine.low %v4496_v22, %v4512_v23  ;;  %v4800_v22 = vld [vmem:[#allocation11 + $0xee8] sm:$0xff] }
 0x91f   :  { %8077 = vmatprep.subr.bf16.mxu1 %v9342_v35  ;;  %v9184_v35 = vcombine.high %v4528_v29, %v4544_v31 }
 0x922   :  { %8078 = vmatpush1.bf16.msra.mxu1 %v9341_v38  ;;  %v4576_v38 = vld [vmem:[#allocation11 + $0x7e8] sm:$0xff] }
 0x923   :  { %8079 = vmatprep.subr.bf16.mxu1 %v9374_v40  ;;  %v9216_v43 = vcombine.high %v4560_v36, %v4576_v38 }
 0x926   :  { %8080 = vmatpush1.bf16.msra.mxu1 %v9373_v9 }
 0x927   :  { %8081 = vmatprep.subr.bf16.mxu1 %v9406_v45  ;;  %v9183_v45 = vcombine.low %v4528_v29, %v4544_v31  ;;  %v4832_v29 = vld [vmem:[#allocation11 + $0xfe8] sm:$0xff] }
 0x92a   :  { %8082 = vmatpush1.bf16.msra.mxu1 %v9405_v8 }
 0x92b   :  { %8083 = vmatprep.subr.bf16.mxu1 %v9438_v44  ;;  %v4592_v44 = vld [vmem:[#allocation11 + $0x868] sm:$0xff] }
 0x92c   :  { %v9248_v51 = vcombine.high %v4592_v44, %v4608_v47  ;;  %v9247_v58 = vcombine.low %v4592_v44, %v4608_v47 }
 0x92e   :  { %8084 = vmatpush1.bf16.msra.mxu1 %v9437_v57 }
 0x92f   :  { %8085 = vmatprep.subr.bf16.mxu1 %v9470_v13  ;;  %v9215_v13 = vcombine.low %v4560_v36, %v4576_v38  ;;  %v4369_v36 = vld [vmem:[#allocation11 + $0x170] sm:$0xff] }
 0x930   :  { %v4385_v38 = vld [vmem:[#allocation11 + $0x1f0] sm:$0xff] }
 0x932   :  { %8086 = vmatpush1.bf16.msra.mxu1 %v9469_v61  ;;  %v4624_v61 = vld [vmem:[#allocation11 + $0x968] sm:$0xff] }
 0x933   :  { %8096 = vmatprep.subr.bf16.mxu1 %v8992_v52  ;;  %v4640_v52 = vld [vmem:[#allocation11 + $0x9e8] sm:$0xff] }
 0x934   :  { %v9280_v60 = vcombine.high %v4624_v61, %v4640_v52  ;;  %v9279_v59 = vcombine.low %v4624_v61, %v4640_v52  ;;  %v4513_v61 = vld [vmem:[#allocation11 + $0x5f0] sm:$0xff] }
 0x935   :  { %8088 = vmatmul.mubr.bf16.vlgmr.msra.gmra.mrb[52].mxu1 %v10872_v49 }
 0x936   :  { %8097 = vmatpush1.bf16.msra.mxu1 %v8991_v4  ;;  %8128 = vmatprep.mubr.bf16.mxu1 %v10870_v48  ;;  %v4656_v4 = vld [vmem:[#allocation11 + $0xa68] sm:$0xff] }
 0x937   :  { %8098 = vmatprep.subr.bf16.mxu1 %v9024_v54  ;;  %v4672_v54 = vld [vmem:[#allocation11 + $0xae8] sm:$0xff] }
 0x938   :  { %v9312_v63 = vcombine.high %v4656_v4, %v4672_v54  ;;  %v9311_v1 = vcombine.low %v4656_v4, %v4672_v54  ;;  %v4926_v4 = vrot.slane %v11007_v26, %v10931_v37  ;;  %v4930_v54 = vrot.slane %v11007_v26, %v10934_v39 }
 0x93a   :  { %8099 = vmatpush1.bf16.msra.mxu1 %v9023_v3  ;;  %v9344_v3 = vcombine.high %v4688_v2, %v4704_v14  ;;  %v4561_v14 = vld [vmem:[#allocation11 + $0x770] sm:$0xff] }
 0x93b   :  { %8100 = vmatprep.subr.bf16.mxu1 %v9056_v5  ;;  %v4720_v5 = vld [vmem:[#allocation11 + $0xc68] sm:$0xff] }
 0x93c   :  { %v9375_v19 = vcombine.low %v4720_v5, %v4736_v7 }
 0x93e   :  { %8101 = vmatpush1.bf16.msra.mxu1 %v9055_v15  ;;  %v9376_v15 = vcombine.high %v4720_v5, %v4736_v7 }
 0x93f   :  { %8102 = vmatprep.subr.bf16.mxu1 %v9088_v17  ;;  %v4752_v17 = vld [vmem:[#allocation11 + $0xd68] sm:$0xff] }
 0x940   :  { %v9407_v23 = vcombine.low %v4752_v17, %v4768_v18 }
 0x942   :  { %8103 = vmatpush1.bf16.msra.mxu1 %v9087_v20  ;;  %v9408_v20 = vcombine.high %v4752_v17, %v4768_v18 }
 0x943   :  { %8104 = vmatprep.subr.bf16.mxu1 %v9120_v21  ;;  %v4784_v21 = vld [vmem:[#allocation11 + $0xe68] sm:$0xff] }
 0x944   :  { %v9439_v31 = vcombine.low %v4784_v21, %v4800_v22 }
 0x946   :  { %8105 = vmatpush1.bf16.msra.mxu1 %v9119_v25  ;;  %v9440_v25 = vcombine.high %v4784_v21, %v4800_v22  ;;  %v4609_v21 = vld [vmem:[#allocation11 + $0x8f0] sm:$0xff] }
 0x947   :  { %8106 = vmatprep.subr.bf16.mxu1 %v9152_v27  ;;  %v4816_v27 = vld [vmem:[#allocation11 + $0xf68] sm:$0xff] }
 0x948   :  { %v7966_v30 = vpop.f32.mrb[40].mxu1 }
 0x949   :  { %v7967_v40 = vadd.f32 %v7966_v30, %v4918_v33  ;;  %v7968_v41 = vpop.f32.mrb[41].mxu1  ;;  %v9472_v33 = vcombine.high %v4816_v27, %v4832_v29 }
 0x94a   :  { %v7969_v42 = vadd.f32 %v7968_v41, %v4922_v34  ;;  %v7970_v9 = vpop.f32.mrb[42].mxu1  ;;  %8107 = vmatpush1.bf16.msra.mxu1 %v9151_v24  ;;  %v4337_v34 = vld [vmem:[#allocation11 + $0x70] sm:$0xff]  ;;  %v9026_v41 = vcombine.high %v4369_v36, %v4385_v38 }
 0x94b   :  { %v7971_v55 = vpop.f32.mrb[43].mxu1  ;;  %8108 = vmatprep.subr.bf16.mxu1 %v9184_v35  ;;  %v4353_v24 = vld [vmem:[#allocation11 + $0xf0] sm:$0xff]  ;;  %v9471_v35 = vcombine.low %v4816_v27, %v4832_v29 }
 0x94c   :  { %v8320_v8 = vcombine.low %v7967_v40, %v7969_v42  ;;  %v8994_v30 = vcombine.high %v4337_v34, %v4353_v24  ;;  %v8993_v40 = vcombine.low %v4337_v34, %v4353_v24  ;;  %v4401_v42 = vld [vmem:[#allocation11 + $0x270] sm:$0xff] }
 0x94d   :  { %v4417_v9 = vld [vmem:[#allocation11 + $0x2f0] sm:$0xff] }
 0x94e   :  { %v8334_v57 = vrot.slane %v8320_v8, %v10706_v16  ;;  %8109 = vmatpush1.bf16.msra.mxu1 %v9183_v45  ;;  %v9025_v45 = vcombine.low %v4369_v36, %v4385_v38  ;;  %v9058_v55 = vcombine.high %v4401_v42, %v4417_v9  ;;  %v4449_v8 = vld [vmem:[#allocation11 + $0x3f0] sm:$0xff]  ;;  %v9057_v44 = vcombine.low %v4401_v42, %v4417_v9 }
 0x94f   :  { %8110 = vmatprep.subr.bf16.mxu1 %v9216_v43  ;;  %v4433_v43 = vld [vmem:[#allocation11 + $0x370] sm:$0xff] }
 0x950   :  { %v8335_v53 = vcombine.low %v8327_v50, %v8334_v57  ;;  %v9090_v47 = vcombine.high %v4433_v43, %v4449_v8  ;;  %v4465_v50 = vld [vmem:[#allocation11 + $0x470] sm:$0xff] }
 0x951   :  { %v4481_v57 = vld [vmem:[#allocation11 + $0x4f0] sm:$0xff] }
 0x952   :  { %8399 = vst [vmem:[#allocation14 + $0x20] sm:$0xff] %v8335_v53  ;;  %8111 = vmatpush1.bf16.msra.mxu1 %v9215_v13  ;;  %v9089_v13 = vcombine.low %v4433_v43, %v4449_v8  ;;  %v4497_v53 = vld [vmem:[#allocation11 + $0x570] sm:$0xff]  ;;  %v9121_v52 = vcombine.low %v4465_v50, %v4481_v57 }
 0x953   :  { %8112 = vmatprep.subr.bf16.mxu1 %v9248_v51  ;;  %v9122_v51 = vcombine.high %v4465_v50, %v4481_v57  ;;  %v4641_v27 = vld [vmem:[#allocation11 + $0x9f0] sm:$0xff] }
 0x954   :  { %v4673_v34 = vld [vmem:[#allocation11 + $0xaf0] sm:$0xff] }
 0x955   :  { %v4705_v36 = vld [vmem:[#allocation11 + $0xbf0] sm:$0xff] }
 0x956   :  { %8113 = vmatpush1.bf16.msra.mxu1 %v9247_v58  ;;  %v4529_v58 = vld [vmem:[#allocation11 + $0x670] sm:$0xff] }
 0x957   :  { %8114 = vmatprep.subr.bf16.mxu1 %v9280_v60  ;;  %v4545_v60 = vld [vmem:[#allocation11 + $0x6f0] sm:$0xff] }
 0x958   :  { %v4737_v42 = vld [vmem:[#allocation11 + $0xcf0] sm:$0xff] }
 0x959   :  { %v4769_v43 = vld [vmem:[#allocation11 + $0xdf0] sm:$0xff] }
 0x95a   :  { %8115 = vmatpush1.bf16.msra.mxu1 %v9279_v59  ;;  %v9153_v59 = vcombine.low %v4497_v53, %v4513_v61  ;;  %v4801_v50 = vld [vmem:[#allocation11 + $0xef0] sm:$0xff] }
 0x95b   :  { %8116 = vmatprep.subr.bf16.mxu1 %v9312_v63  ;;  %v9186_v63 = vcombine.high %v4529_v58, %v4545_v60 }
 0x95e   :  { %8117 = vmatpush1.bf16.msra.mxu1 %v9311_v1  ;;  %v4577_v1 = vld [vmem:[#allocation11 + $0x7f0] sm:$0xff] }
 0x95f   :  { %8118 = vmatprep.subr.bf16.mxu1 %v9344_v3  ;;  %v9218_v18 = vcombine.high %v4561_v14, %v4577_v1  ;;  %v9217_v22 = vcombine.low %v4561_v14, %v4577_v1 }
 0x962   :  { %8119 = vmatpush1.bf16.msra.mxu1 %v9343_v12 }
 0x963   :  { %8120 = vmatprep.subr.bf16.mxu1 %v9376_v15  ;;  %v9185_v15 = vcombine.low %v4529_v58, %v4545_v60  ;;  %v4934_v58 = vrot.slane %v11007_v26, %v10886_v28  ;;  %v4938_v60 = vrot.slane %v11007_v26, %v10891_v32  ;;  %v10375_v28 = vld [vmem:[#allocation13 + $0x18] sm:$0xff] }
 0x964   :  { %v4946_v32 = vrot.slane %v10375_v28, %v10861_v11 }
 0x966   :  { %8121 = vmatpush1.bf16.msra.mxu1 %v9375_v19 }
 0x967   :  { %8122 = vmatprep.subr.bf16.mxu1 %v9408_v20  ;;  %v4593_v20 = vld [vmem:[#allocation11 + $0x870] sm:$0xff] }
 0x968   :  { %v9249_v29 = vcombine.low %v4593_v20, %v4609_v21 }
 0x96a   :  { %8123 = vmatpush1.bf16.msra.mxu1 %v9407_v23  ;;  %v9250_v23 = vcombine.high %v4593_v20, %v4609_v21 }
 0x96b   :  { %8124 = vmatprep.subr.bf16.mxu1 %v9440_v25  ;;  %v4625_v25 = vld [vmem:[#allocation11 + $0x970] sm:$0xff] }
 0x96c   :  { %v9281_v24 = vcombine.low %v4625_v25, %v4641_v27 }
 0x96e   :  { %8125 = vmatpush1.bf16.msra.mxu1 %v9439_v31  ;;  %v9282_v31 = vcombine.high %v4625_v25, %v4641_v27  ;;  %v4950_v25 = vrot.slane %v10375_v28, %v10914_v62 }
 0x96f   :  { %8126 = vmatprep.subr.bf16.mxu1 %v9472_v33  ;;  %v4657_v33 = vld [vmem:[#allocation11 + $0xa70] sm:$0xff] }
 0x970   :  { %v9313_v38 = vcombine.low %v4657_v33, %v4673_v34 }
 0x972   :  { %8127 = vmatpush1.bf16.msra.mxu1 %v9471_v35  ;;  %v9314_v35 = vcombine.high %v4657_v33, %v4673_v34 }
 0x973   :  { %8137 = vmatprep.subr.bf16.mxu1 %v8994_v30  ;;  %v4689_v30 = vld [vmem:[#allocation11 + $0xb70] sm:$0xff] }
 0x974   :  { %v9345_v9 = vcombine.low %v4689_v30, %v4705_v36 }
 0x975   :  { %8129 = vmatmul.mubr.bf16.vlgmr.msra.gmra.mrb[56].mxu1 %v10872_v49 }
 0x976   :  { %8138 = vmatpush1.bf16.msra.mxu1 %v8993_v40  ;;  %8169 = vmatprep.mubr.bf16.mxu1 %v10870_v48  ;;  %v9154_v48 = vcombine.high %v4497_v53, %v4513_v61  ;;  %v9346_v40 = vcombine.high %v4689_v30, %v4705_v36  ;;  %v4833_v53 = vld [vmem:[#allocation11 + $0xff0] sm:$0xff]  ;;  %v4962_v30 = vrot.slane %v10375_v28, %v10934_v39 }
 0x977   :  { %8139 = vmatprep.subr.bf16.mxu1 %v9026_v41  ;;  %v4721_v41 = vld [vmem:[#allocation11 + $0xc70] sm:$0xff] }
 0x978   :  { %v9377_v8 = vcombine.low %v4721_v41, %v4737_v42 }
 0x97a   :  { %8140 = vmatpush1.bf16.msra.mxu1 %v9025_v45  ;;  %v9378_v45 = vcombine.high %v4721_v41, %v4737_v42 }
 0x97b   :  { %8141 = vmatprep.subr.bf16.mxu1 %v9058_v55  ;;  %v4753_v55 = vld [vmem:[#allocation11 + $0xd70] sm:$0xff] }
 0x97c   :  { %v9409_v57 = vcombine.low %v4753_v55, %v4769_v43 }
 0x97e   :  { %8142 = vmatpush1.bf16.msra.mxu1 %v9057_v44  ;;  %v9410_v44 = vcombine.high %v4753_v55, %v4769_v43 }
 0x97f   :  { %8143 = vmatprep.subr.bf16.mxu1 %v9090_v47  ;;  %v4785_v47 = vld [vmem:[#allocation11 + $0xe70] sm:$0xff] }
 0x980   :  { %v9441_v61 = vcombine.low %v4785_v47, %v4801_v50 }
 0x982   :  { %8144 = vmatpush1.bf16.msra.mxu1 %v9089_v13  ;;  %v9442_v13 = vcombine.high %v4785_v47, %v4801_v50 }
 0x983   :  { %8145 = vmatprep.subr.bf16.mxu1 %v9122_v51  ;;  %v4817_v51 = vld [vmem:[#allocation11 + $0xf70] sm:$0xff] }
 0x986   :  { %8146 = vmatpush1.bf16.msra.mxu1 %v9121_v52  ;;  %v9474_v52 = vcombine.high %v4817_v51, %v4833_v53 }
 0x987   :  { %8147 = vmatprep.subr.bf16.mxu1 %v9154_v48  ;;  %v9473_v48 = vcombine.low %v4817_v51, %v4833_v53 }
 0x988   :  { %v8007_v2 = vpop.f32.mrb[44].mxu1 }
 0x989   :  { %v11036_v3 = vadd.f32 %v8007_v2, %v4926_v4  ;;  %v8009_v5 = vpop.f32.mrb[45].mxu1 }
 0x98a   :  { %v11038_v7 = vadd.f32 %v8009_v5, %v4930_v54  ;;  %v8011_v12 = vpop.f32.mrb[46].mxu1  ;;  %8148 = vmatpush1.bf16.msra.mxu1 %v9153_v59 }
 0x98b   :  { %v8012_v17 = vpop.f32.mrb[47].mxu1  ;;  %8149 = vmatprep.subr.bf16.mxu1 %v9186_v63 }
 0x98c   :  { %v8336_v19 = vcombine.low %v11036_v3, %v11038_v7  ;;  %v4954_v3 = vrot.slane %v10375_v28, %v10917_v0 }
 0x98e   :  { %8150 = vmatpush1.bf16.msra.mxu1 %v9185_v15  ;;  %v8344_v5 = vrot.slane %v8336_v19, %v10706_v16  ;;  %v4942_v15 = vrot.slane %v10375_v28, %v10858_v6 }
 0x98f   :  { %8151 = vmatprep.subr.bf16.mxu1 %v9218_v18 }
 0x992   :  { %8152 = vmatpush1.bf16.msra.mxu1 %v9217_v22 }
 0x993   :  { %8153 = vmatprep.subr.bf16.mxu1 %v9250_v23 }
 0x996   :  { %8154 = vmatpush1.bf16.msra.mxu1 %v9249_v29 }
 0x997   :  { %8155 = vmatprep.subr.bf16.mxu1 %v9282_v31 }
 0x99a   :  { %8156 = vmatpush1.bf16.msra.mxu1 %v9281_v24 }
 0x99b   :  { %8157 = vmatprep.subr.bf16.mxu1 %v9314_v35  ;;  %v4958_v35 = vrot.slane %v10375_v28, %v10931_v37 }
 0x99e   :  { %8158 = vmatpush1.bf16.msra.mxu1 %v9313_v38 }
 0x99f   :  { %8159 = vmatprep.subr.bf16.mxu1 %v9346_v40 }
 0x9a2   :  { %8160 = vmatpush1.bf16.msra.mxu1 %v9345_v9  ;;  %v8385_v9 = vrot.slane %v8371_v56, %v10706_v16 }
 0x9a3   :  { %8161 = vmatprep.subr.bf16.mxu1 %v9378_v45 }
 0x9a6   :  { %8162 = vmatpush1.bf16.msra.mxu1 %v9377_v8 }
 0x9a7   :  { %8163 = vmatprep.subr.bf16.mxu1 %v9410_v44 }
 0x9aa   :  { %8164 = vmatpush1.bf16.msra.mxu1 %v9409_v57 }
 0x9ab   :  { %8165 = vmatprep.subr.bf16.mxu1 %v9442_v13 }
 0x9ae   :  { %8166 = vmatpush1.bf16.msra.mxu1 %v9441_v61 }
 0x9af   :  { %8167 = vmatprep.subr.bf16.mxu1 %v9474_v52 }
 0x9b2   :  { %8168 = vmatpush1.bf16.msra.mxu1 %v9473_v48 }
 0x9b5   :  { %8170 = vmatmul.mubr.bf16.vlgmr.msra.gmra.mrb[60].mxu1 %v10872_v49 }
 0x9c8   :  { %v8048_v4 = vpop.f32.mrb[48].mxu1 }
 0x9c9   :  { %v8049_v54 = vadd.f32 %v8048_v4, %v4934_v58  ;;  %v8050_v59 = vpop.f32.mrb[49].mxu1 }
 0x9ca   :  { %v8051_v63 = vadd.f32 %v8050_v59, %v4938_v60  ;;  %v8052_v2 = vpop.f32.mrb[50].mxu1 }
 0x9cb   :  { %v8053_v14 = vpop.f32.mrb[51].mxu1 }
 0x9cc   :  { %v8337_v1 = vcombine.low %v8049_v54, %v8051_v63 }
 0x9ce   :  { %v8351_v49 = vrot.slane %v8337_v1, %v10706_v16 }
 0x9d0   :  { %v8352_v12 = vcombine.low %v8344_v5, %v8351_v49 }
 0x9d2   :  { %8400 = vst [vmem:[#allocation14 + $0x28] sm:$0xff] %v8352_v12 }
 0xa08   :  { %v8089_v26 = vpop.f32.mrb[52].mxu1 }
 0xa09   :  { %v8090_v17 = vadd.f32 %v8089_v26, %v4942_v15  ;;  %v8091_v18 = vpop.f32.mrb[53].mxu1 }
 0xa0a   :  { %v8092_v20 = vadd.f32 %v8091_v18, %v4946_v32  ;;  %v8093_v21 = vpop.f32.mrb[54].mxu1 }
 0xa0b   :  { %v8094_v22 = vpop.f32.mrb[55].mxu1 }
 0xa0c   :  { %v8353_v23 = vcombine.low %v8090_v17, %v8092_v20 }
 0xa0e   :  { %v8361_v11 = vrot.slane %v8353_v23, %v10706_v16 }
 0xa48   :  { %v8130_v7 = vpop.f32.mrb[56].mxu1 }
 0xa49   :  { %v8131_v19 = vadd.f32 %v8130_v7, %v4950_v25  ;;  %v8132_v27 = vpop.f32.mrb[57].mxu1 }
 0xa4a   :  { %v8133_v29 = vadd.f32 %v8132_v27, %v4954_v3  ;;  %v8134_v31 = vpop.f32.mrb[58].mxu1 }
 0xa4b   :  { %v8135_v33 = vpop.f32.mrb[59].mxu1 }
 0xa4c   :  { %v8354_v6 = vcombine.low %v8131_v19, %v8133_v29 }
 0xa4e   :  { %v8368_v34 = vrot.slane %v8354_v6, %v10706_v16 }
 0xa50   :  { %v8369_v24 = vcombine.low %v8361_v11, %v8368_v34 }
 0xa52   :  { %8401 = vst [vmem:[#allocation14 + $0x30] sm:$0xff] %v8369_v24 }
 0xa88   :  { %v8171_v62 = vpop.f32.mrb[60].mxu1 }
 0xa89   :  { %v8172_v36 = vadd.f32 %v8171_v62, %v4958_v35  ;;  %v8173_v0 = vpop.f32.mrb[61].mxu1 }
 0xa8a   :  { %v8174_v38 = vadd.f32 %v8173_v0, %v4962_v30  ;;  %v8175_v40 = vpop.f32.mrb[62].mxu1 }
 0xa8b   :  { %v8176_v41 = vpop.f32.mrb[63].mxu1 }
 0xa8c   :  { %v8370_v42 = vcombine.low %v8172_v36, %v8174_v38 }
 0xa8e   :  { %v8378_v45 = vrot.slane %v8370_v42, %v10706_v16 }
 0xa90   :  { %v8386_v55 = vcombine.low %v8378_v45, %v8385_v9 }
 0xa92   :  { %8402 = vst [vmem:[#allocation14 + $0x38] sm:$0xff] %v8386_v55 }
 0xa93   :  { %10541 = shalt.err (!%p10538_p4)
}
 0xa94   :  { %s10542_s14 = scalar_lea.hbm %s11084_s7, 1024 }
 0xa95   :  { %p10543_p5 = scmp.ne.s32.totalorder %s11084_s7, %s10542_s14  ;;  %p10546_p6 = scmp.lt.u32.totalorder %s10542_s14, %s11084_s7 }
 0xa97   :  { %p10548_p7 = pnand %p10546_p6, %p10543_p5 }
 0xa99   :  { %10551 = shalt.err (!%p10548_p7)
}
 0xa9a   :  { %8412 = dma.vmem_to_hbm [thread:$0]  %s8410_s9, 1024, %s11084_s7, [#allocation4]  }
 0xa9b   :  { %10560 = dma.done.wait [#allocation4], 1024  }
 0xa9c   :  { %10561 = vsyncadd [#allocation4], 4294966272 }
 0xa9d   :  { %8416 = vsyncpa [#allocation3], 1 }
 0xa9e   :  { %8417 = vsyncpa [#allocation6], 1 }
 0xa9f   :  { %8418 = vsyncpa [#allocation9], 1 }
 0xaa0   :  { %8419 = vsyncpa [#allocation12], 1 }
 0xaa1   :  { %8420 = vsyncpa [#allocation4], 1 }

// kernel: tpu_custom_call.1
= control target key start
LH: loop header
LB: loop body
LE: loop exit
PB: predicated region body
PF: predicated region fallthrough
CT: control target
= control target key end

     0   :  { %12 = vsyncpa [#allocation3], 0  ;;  %s11077_s0 = inlined_call_operand.hbm [shape: f32[2,4096], index: 0, kind: input, shape index: {}]   ;;  %s11078_s1 = inlined_call_operand.hbm [shape: bf16[4096,256], index: 1, kind: input, shape index: {}]   ;;  %s11079_s2 = inlined_call_operand.hbm [shape: f32[1,256], index: 2, kind: input, shape index: {}]   ;;  %s11080_s3 = inlined_call_operand.hbm [shape: bf16[256,256], index: 3, kind: input, shape index: {}]   ;;  %s11081_s4 = inlined_call_operand.hbm [shape: f32[1,256], index: 4, kind: input, shape index: {}]   ;;  %s11082_s5 = inlined_call_operand.hbm [shape: bf16[256,4096], index: 5, kind: input, shape index: {}]   ;;  %s11083_s6 = inlined_call_operand.hbm [shape: f32[1,4096], index: 6, kind: input, shape index: {}]   ;;  %s11084_s7 = inlined_call_operand.hbm [shape: f32[2,4096], index: 7, kind: output, shape index: {}]  }
   0x1   :  { %13 = vsyncpa [#allocation6], 0 }
   0x2   :  { %14 = vsyncpa [#allocation9], 0 }
   0x3   :  { %15 = vsyncpa [#allocation12], 0 }
   0x4   :  { %16 = vsyncpa [#allocation4], 0  ;;  %s10562_s24 = smov [#allocation5]   ;;  %s10376_s28 = scalar_lea.hbm %s11078_s1, 65536 }
   0x5   :  { %s32_s25 = sshll.u32 %s10562_s24, 4  ;;  %p10377_p0 = scmp.ne.s32.totalorder %s11078_s1, %s10376_s28  ;;  %s33_s25 = int_to_ptr.vmem [resolvable:$true] %s32_s25 }
   0x6   :  { %p10380_p1 = scmp.lt.u32.totalorder %s10376_s28, %s11078_s1 }
   0x8   :  { %p10382_p2 = pnand %p10380_p1, %p10377_p0 }
   0xa   :  { %10385 = shalt.err (!%p10382_p2)
}
   0xb   :  { %s10386_s10 = scalar_lea.vmem %s33_s25, 65536  ;;  %p10391_p4 = scmp.lt.s32.totalorder %s33_s25, %s33_s25 }
   0xc   :  { %p10387_p3 = scmp.ne.s32.totalorder %s33_s25, %s10386_s10  ;;  %p10392_p5 = scmp.lt.s32.totalorder %s10386_s10, %s10386_s10 }
   0xe   :  { %p10393_p6 = por %p10392_p5, %p10391_p4 }
  0x10   :  { %p10394_p7 = pnand %p10393_p6, %p10387_p3 }
  0x12   :  { %10397 = shalt.err (!%p10394_p7)
}
  0x13   :  { %s10563_s11 = smov 128   ;;  %s10564_s12 = smov 8  }
  0x14   :  { %38 = dma.hbm_to_vmem [thread:$0]  %s11078_s1, 65536, %s33_s25, [#allocation6], %s10563_s11, %s10563_s11, %s10564_s12  }
  0x15   :  { %s10565_s15 = smov [#allocation8]   ;;  %s10566_s17 = smov [#allocation11]  }
  0x16   :  { %s54_s16 = sshll.u32 %s10565_s15, 4  ;;  %s76_s18 = sshll.u32 %s10566_s17, 4  ;;  %s55_s16 = int_to_ptr.vmem [resolvable:$true] %s54_s16  ;;  %s77_s18 = int_to_ptr.vmem [resolvable:$true] %s76_s18 }
  0x17   :  { %s10398_s21 = scalar_lea.hbm %s11080_s3, 4096 }
  0x18   :  { %p10399_p8 = scmp.ne.s32.totalorder %s11080_s3, %s10398_s21  ;;  %p10402_p9 = scmp.lt.u32.totalorder %s10398_s21, %s11080_s3 }
  0x1a   :  { %p10404_p10 = pnand %p10402_p9, %p10399_p8 }
  0x1c   :  { %10407 = shalt.err (!%p10404_p10)
}
  0x1d   :  { %s10408_s1 = scalar_lea.vmem %s55_s16, 4096  ;;  %p10413_p12 = scmp.lt.s32.totalorder %s55_s16, %s55_s16 }
  0x1e   :  { %p10409_p11 = scmp.ne.s32.totalorder %s55_s16, %s10408_s1  ;;  %p10414_p13 = scmp.lt.s32.totalorder %s10408_s1, %s10408_s1 }
  0x20   :  { %p10415_p0 = por %p10414_p13, %p10413_p12 }
  0x22   :  { %p10416_p1 = pnand %p10415_p0, %p10409_p11 }
  0x24   :  { %10419 = shalt.err (!%p10416_p1)
}
  0x25   :  { %60 = dma.hbm_to_vmem [thread:$0]  %s11080_s3, 4096, %s55_s16, [#allocation9], %s10563_s11, %s10563_s11, %s10564_s12  }
  0x26   :  { %s10420_s30 = scalar_lea.hbm %s11082_s5, 65536 }
  0x27   :  { %p10421_p2 = scmp.ne.s32.totalorder %s11082_s5, %s10420_s30  ;;  %p10424_p3 = scmp.lt.u32.totalorder %s10420_s30, %s11082_s5 }
  0x29   :  { %p10426_p4 = pnand %p10424_p3, %p10421_p2 }
  0x2b   :  { %10429 = shalt.err (!%p10426_p4)
}
  0x2c   :  { %s10430_s14 = scalar_lea.vmem %s77_s18, 65536  ;;  %p10435_p6 = scmp.lt.s32.totalorder %s77_s18, %s77_s18 }
  0x2d   :  { %p10431_p5 = scmp.ne.s32.totalorder %s77_s18, %s10430_s14  ;;  %p10436_p7 = scmp.lt.s32.totalorder %s10430_s14, %s10430_s14 }
  0x2f   :  { %p10437_p8 = por %p10436_p7, %p10435_p6 }
  0x31   :  { %p10438_p9 = pnand %p10437_p8, %p10431_p5 }
  0x33   :  { %10441 = shalt.err (!%p10438_p9)
}
  0x34   :  { %s10567_s3 = smov 2048   ;;  %s10568_s16 = smov [#allocation2]  }
  0x35   :  { %82 = dma.hbm_to_vmem [thread:$0]  %s11082_s5, 65536, %s77_s18, [#allocation12], %s10567_s3, %s10567_s3, %s10563_s11  }
  0x36   :  { %s23_s17 = sshll.u32 %s10568_s16, 4  ;;  %s10569_s19 = smov [#allocation7]   ;;  %s24_s17 = int_to_ptr.vmem [resolvable:$true] %s23_s17 }
  0x37   :  { %s45_s20 = sshll.u32 %s10569_s19, 4  ;;  %s10442_s23 = scalar_lea.hbm %s11077_s0, 1024  ;;  %s46_s20 = int_to_ptr.vmem [resolvable:$true] %s45_s20 }
  0x38   :  { %p10443_p10 = scmp.ne.s32.totalorder %s11077_s0, %s10442_s23  ;;  %p10446_p11 = scmp.lt.u32.totalorder %s10442_s23, %s11077_s0 }
  0x3a   :  { %p10448_p12 = pnand %p10446_p11, %p10443_p10 }
  0x3c   :  { %10451 = shalt.err (!%p10448_p12)
}
  0x3d   :  { %s10452_s5 = scalar_lea.vmem %s24_s17, 1024  ;;  %p10457_p0 = scmp.lt.s32.totalorder %s24_s17, %s24_s17 }
  0x3e   :  { %p10453_p13 = scmp.ne.s32.totalorder %s24_s17, %s10452_s5  ;;  %p10458_p1 = scmp.lt.s32.totalorder %s10452_s5, %s10452_s5 }
  0x40   :  { %p10459_p2 = por %p10458_p1, %p10457_p0 }
  0x42   :  { %p10460_p3 = pnand %p10459_p2, %p10453_p13 }
  0x44   :  { %10463 = shalt.err (!%p10460_p3)
}
  0x45   :  { %26 = dma.hbm_to_vmem [thread:$0]  %s11077_s0, 1024, %s24_s17, [#allocation3]  }
  0x46   :  { %s10464_s29 = scalar_lea.hbm %s11079_s2, 32 }
  0x47   :  { %p10465_p4 = scmp.ne.s32.totalorder %s11079_s2, %s10464_s29  ;;  %p10468_p5 = scmp.lt.u32.totalorder %s10464_s29, %s11079_s2 }
  0x49   :  { %p10470_p6 = pnand %p10468_p5, %p10465_p4 }
  0x4b   :  { %10473 = shalt.err (!%p10470_p6)
}
  0x4c   :  { %s10474_s13 = scalar_lea.vmem %s46_s20, 32  ;;  %p10479_p8 = scmp.lt.s32.totalorder %s46_s20, %s46_s20 }
  0x4d   :  { %p10475_p7 = scmp.ne.s32.totalorder %s46_s20, %s10474_s13  ;;  %p10480_p9 = scmp.lt.s32.totalorder %s10474_s13, %s10474_s13 }
  0x4f   :  { %p10481_p10 = por %p10480_p9, %p10479_p8 }
  0x51   :  { %p10482_p11 = pnand %p10481_p10, %p10475_p7 }
  0x53   :  { %10485 = shalt.err (!%p10482_p11)
}
  0x54   :  { %48 = dma.hbm_to_vmem [thread:$0]  %s11079_s2, 32, %s46_s20, [#allocation6]  }
  0x55   :  { %s10570_s3 = smov [#allocation10]   ;;  %s10571_s15 = smov [#allocation13]  }
  0x56   :  { %s67_s12 = sshll.u32 %s10570_s3, 4  ;;  %s89_s16 = sshll.u32 %s10571_s15, 4  ;;  %s68_s12 = int_to_ptr.vmem [resolvable:$true] %s67_s12  ;;  %s90_s16 = int_to_ptr.vmem [resolvable:$true] %s89_s16 }
  0x57   :  { %s10486_s21 = scalar_lea.hbm %s11081_s4, 32 }
  0x58   :  { %p10487_p12 = scmp.ne.s32.totalorder %s11081_s4, %s10486_s21  ;;  %p10490_p13 = scmp.lt.u32.totalorder %s10486_s21, %s11081_s4 }
  0x5a   :  { %p10492_p0 = pnand %p10490_p13, %p10487_p12 }
  0x5c   :  { %10495 = shalt.err (!%p10492_p0)
}
  0x5d   :  { %s10496_s2 = scalar_lea.vmem %s68_s12, 32  ;;  %p10501_p2 = scmp.lt.s32.totalorder %s68_s12, %s68_s12 }
  0x5e   :  { %p10497_p1 = scmp.ne.s32.totalorder %s68_s12, %s10496_s2  ;;  %p10502_p3 = scmp.lt.s32.totalorder %s10496_s2, %s10496_s2 }
  0x60   :  { %p10503_p4 = por %p10502_p3, %p10501_p2 }
  0x62   :  { %p10504_p5 = pnand %p10503_p4, %p10497_p1 }
  0x64   :  { %10507 = shalt.err (!%p10504_p5)
}
  0x65   :  { %70 = dma.hbm_to_vmem [thread:$0]  %s11081_s4, 32, %s68_s12, [#allocation9]  }
  0x66   :  { %s10508_s11 = scalar_lea.hbm %s11083_s6, 512 }
  0x67   :  { %p10509_p6 = scmp.ne.s32.totalorder %s11083_s6, %s10508_s11  ;;  %p10512_p7 = scmp.lt.u32.totalorder %s10508_s11, %s11083_s6 }
  0x69   :  { %p10514_p8 = pnand %p10512_p7, %p10509_p6 }
  0x6b   :  { %10517 = shalt.err (!%p10514_p8)
}
  0x6c   :  { %s10518_s30 = scalar_lea.vmem %s90_s16, 512  ;;  %p10523_p10 = scmp.lt.s32.totalorder %s90_s16, %s90_s16 }
  0x6d   :  { %p10519_p9 = scmp.ne.s32.totalorder %s90_s16, %s10518_s30  ;;  %p10524_p11 = scmp.lt.s32.totalorder %s10518_s30, %s10518_s30 }
  0x6f   :  { %p10525_p12 = por %p10524_p11, %p10523_p10 }
  0x71   :  { %p10526_p13 = pnand %p10525_p12, %p10519_p9 }
  0x73   :  { %10529 = shalt.err (!%p10526_p13)
}
  0x74   :  { %92 = dma.hbm_to_vmem [thread:$0]  %s11083_s6, 512, %s90_s16, [#allocation12]  }
  0x75   :  { %10552 = dma.done.wait [#allocation3], 1024  }
  0x76   :  { %10553 = vsyncadd [#allocation3], 4294966272 }
  0x77   :  { %10554 = dma.done.wait [#allocation6], 65568  }
  0x78   :  { %10555 = vsyncadd [#allocation6], 4294901728 }
  0x79   :  { %10556 = dma.done.wait [#allocation9], 4128  }
  0x7a   :  { %10557 = vsyncadd [#allocation9], 4294963168 }
  0x7b   :  { %10558 = dma.done.wait [#allocation12], 66048  }
  0x7c   :  { %10559 = vsyncadd [#allocation12], 4294901248  ;;  %v9551_v0 = vld [vmem:[#allocation5 + $0x4] ss:$8 sps:$4 sm:$0xff]   ;;  %v9553_v1 = vld [vmem:[#allocation5] ss:$8 sps:$4 sm:$0xff]   ;;  %v134_v9 = vlaneseq }
  0x7d   :  { %3414 = vmatprep.subr.bf16.mxu0 %v9551_v0  ;;  %v9554_v2 = vld [vmem:[#allocation5 + $0x14] ss:$8 sps:$4 sm:$0xff]   ;;  %v9556_v3 = vld [vmem:[#allocation5 + $0x10] ss:$8 sps:$4 sm:$0xff]   ;;  %v9557_v4 = vld [vmem:[#allocation5 + $0x24] ss:$8 sps:$4 sm:$0xff]  }
  0x7e   :  { %3415 = vmatpush1.bf16.msra.mxu0 %v9553_v1  ;;  %v9559_v5 = vld [vmem:[#allocation5 + $0x20] ss:$8 sps:$4 sm:$0xff]   ;;  %v9560_v6 = vld [vmem:[#allocation5 + $0x34] ss:$8 sps:$4 sm:$0xff]   ;;  %v10572_v7 = vmov 1983009808  }
  0x7f   :  { %3416 = vmatprep.subr.bf16.mxu0 %v9554_v2  ;;  %v132_v8 = vunpack.c.l.s4 %v10572_v7  ;;  %v9562_v10 = vld [vmem:[#allocation5 + $0x30] ss:$8 sps:$4 sm:$0xff]   ;;  %v9563_v11 = vld [vmem:[#allocation5 + $0x44] ss:$8 sps:$4 sm:$0xff]   ;;  %v10703_v13 = vshrl.u32 %v134_v9, 7  ;;  %s10573_s6 = smov [#allocation14]  }
  0x80   :  { %v9565_v14 = vld [vmem:[#allocation5 + $0x40] ss:$8 sps:$4 sm:$0xff]   ;;  %v9566_v15 = vld [vmem:[#allocation5 + $0x54] ss:$8 sps:$4 sm:$0xff]   ;;  %v9568_v17 = vld [vmem:[#allocation5 + $0x50] ss:$8 sps:$4 sm:$0xff]  }
  0x81   :  { %v133_v12 = vunpack.c.0.s8 %v132_v8  ;;  %v9569_v18 = vld [vmem:[#allocation5 + $0x64] ss:$8 sps:$4 sm:$0xff]   ;;  %v9571_v21 = vld [vmem:[#allocation5 + $0x60] ss:$8 sps:$4 sm:$0xff]   ;;  %v9572_v22 = vld [vmem:[#allocation5 + $0x74] ss:$8 sps:$4 sm:$0xff]  }
  0x82   :  { %3417 = vmatpush1.bf16.msra.mxu0 %v9556_v3  ;;  %v114_v19 = vld [vmem:[#allocation2] sm:$0xff]  ;;  %v9574_v25 = vld [vmem:[#allocation5 + $0x70] ss:$8 sps:$4 sm:$0xff]   ;;  %v9578_v28 = vld [vmem:[#allocation5 + $0x94] ss:$8 sps:$4 sm:$0xff]   ;;  %s8409_s9 = sshll.u32 %s10573_s6, 4  ;;  %s8410_s9 = int_to_ptr.vmem [resolvable:$true] %s8409_s9 }
  0x83   :  { %3418 = vmatprep.subr.bf16.mxu0 %v9557_v4  ;;  %v10706_v16 = vsub.s32 %v133_v12, %v10703_v13  ;;  %v9575_v26 = vld [vmem:[#allocation5 + $0x84] ss:$8 sps:$4 sm:$0xff]   ;;  %v9577_v27 = vld [vmem:[#allocation5 + $0x80] ss:$8 sps:$4 sm:$0xff]   ;;  %v9580_v29 = vld [vmem:[#allocation5 + $0x90] ss:$8 sps:$4 sm:$0xff]   ;;  %v130_v38 = vcombine.high %v114_v19, %v114_v19  ;;  %p10535_p1 = scmp.lt.s32.totalorder %s8410_s9, %s8410_s9 }
  0x84   :  { %v9581_v30 = vld [vmem:[#allocation5 + $0xa4] ss:$8 sps:$4 sm:$0xff]   ;;  %v9583_v31 = vld [vmem:[#allocation5 + $0xa0] ss:$8 sps:$4 sm:$0xff]   ;;  %v9584_v32 = vld [vmem:[#allocation5 + $0xb4] ss:$8 sps:$4 sm:$0xff]  }
  0x85   :  { %v137_v20 = vrot.slane %v114_v19, %v10706_v16  ;;  %v9586_v33 = vld [vmem:[#allocation5 + $0xb0] ss:$8 sps:$4 sm:$0xff]   ;;  %v9587_v34 = vld [vmem:[#allocation5 + $0xc4] ss:$8 sps:$4 sm:$0xff]   ;;  %v9589_v35 = vld [vmem:[#allocation5 + $0xc0] ss:$8 sps:$4 sm:$0xff]   ;;  %v10710_v41 = vrot.slane %v130_v38, %v10706_v16 }
  0x86   :  { %3419 = vmatpush1.bf16.msra.mxu0 %v9559_v5  ;;  %v9590_v36 = vld [vmem:[#allocation5 + $0xd4] ss:$8 sps:$4 sm:$0xff]   ;;  %v9592_v37 = vld [vmem:[#allocation5 + $0xd0] ss:$8 sps:$4 sm:$0xff]   ;;  %v9593_v39 = vld [vmem:[#allocation5 + $0xe4] ss:$8 sps:$4 sm:$0xff]  }
  0x87   :  { %3420 = vmatprep.subr.bf16.mxu0 %v9560_v6  ;;  %v145_v23 = vcombine.high %v137_v20, %v137_v20  ;;  %v9595_v40 = vld [vmem:[#allocation5 + $0xe0] ss:$8 sps:$4 sm:$0xff]   ;;  %v9596_v42 = vld [vmem:[#allocation5 + $0xf4] ss:$8 sps:$4 sm:$0xff]   ;;  %v9598_v43 = vld [vmem:[#allocation5 + $0xf0] ss:$8 sps:$4 sm:$0xff]   ;;  %v146_v44 = vcombine.high %v10710_v41, %v10710_v41  ;;  %v298_v46 = vpack.c.bf16 %v137_v20, %v137_v20 }
  0x88   :  { %v9602_v45 = vld [vmem:[#allocation5 + $0x104] ss:$8 sps:$4 sm:$0xff]   ;;  %v9600_v47 = vld [vmem:[#allocation5 + $0x100] ss:$8 sps:$4 sm:$0xff]   ;;  %v9605_v49 = vld [vmem:[#allocation5 + $0x114] ss:$8 sps:$4 sm:$0xff]  }
  0x89   :  { %v299_v24 = vpack.c.bf16 %v145_v23, %v145_v23  ;;  %v301_v48 = vpack.c.bf16 %v146_v44, %v146_v44  ;;  %v9603_v50 = vld [vmem:[#allocation5 + $0x110] ss:$8 sps:$4 sm:$0xff]   ;;  %v9608_v51 = vld [vmem:[#allocation5 + $0x124] ss:$8 sps:$4 sm:$0xff]   ;;  %v9606_v52 = vld [vmem:[#allocation5 + $0x120] ss:$8 sps:$4 sm:$0xff]  }
  0x8a   :  { %3421 = vmatpush1.bf16.msra.mxu0 %v9562_v10  ;;  %v9611_v53 = vld [vmem:[#allocation5 + $0x134] ss:$8 sps:$4 sm:$0xff]   ;;  %v9609_v54 = vld [vmem:[#allocation5 + $0x130] ss:$8 sps:$4 sm:$0xff]   ;;  %v9614_v55 = vld [vmem:[#allocation5 + $0x144] ss:$8 sps:$4 sm:$0xff]  }
  0x8b   :  { %3422 = vmatprep.subr.bf16.mxu0 %v9563_v11  ;;  %3446 = vmatprep.mubr.bf16.mxu0 %v299_v24  ;;  %v9612_v56 = vld [vmem:[#allocation5 + $0x140] ss:$8 sps:$4 sm:$0xff]   ;;  %v9617_v57 = vld [vmem:[#allocation5 + $0x154] ss:$8 sps:$4 sm:$0xff]   ;;  %v9615_v58 = vld [vmem:[#allocation5 + $0x150] ss:$8 sps:$4 sm:$0xff]  }
  0x8c   :  { %v9620_v59 = vld [vmem:[#allocation5 + $0x164] ss:$8 sps:$4 sm:$0xff]   ;;  %v9618_v60 = vld [vmem:[#allocation5 + $0x160] ss:$8 sps:$4 sm:$0xff]   ;;  %v9623_v61 = vld [vmem:[#allocation5 + $0x174] ss:$8 sps:$4 sm:$0xff]  }
  0x8d   :  { %v9621_v62 = vld [vmem:[#allocation5 + $0x170] ss:$8 sps:$4 sm:$0xff]   ;;  %v9626_v63 = vld [vmem:[#allocation5 + $0x184] ss:$8 sps:$4 sm:$0xff]   ;;  %v9624_v0 = vld [vmem:[#allocation5 + $0x180] ss:$8 sps:$4 sm:$0xff]  }
  0x8e   :  { %3423 = vmatpush1.bf16.msra.mxu0 %v9565_v14  ;;  %v9629_v1 = vld [vmem:[#allocation5 + $0x194] ss:$8 sps:$4 sm:$0xff]   ;;  %v9627_v2 = vld [vmem:[#allocation5 + $0x190] ss:$8 sps:$4 sm:$0xff]   ;;  %v9632_v3 = vld [vmem:[#allocation5 + $0x1a4] ss:$8 sps:$4 sm:$0xff]  }
  0x8f   :  { %3424 = vmatprep.subr.bf16.mxu0 %v9566_v15  ;;  %v9630_v4 = vld [vmem:[#allocation5 + $0x1a0] ss:$8 sps:$4 sm:$0xff]   ;;  %v9635_v5 = vld [vmem:[#allocation5 + $0x1b4] ss:$8 sps:$4 sm:$0xff]   ;;  %v9633_v6 = vld [vmem:[#allocation5 + $0x1b0] ss:$8 sps:$4 sm:$0xff]  }
  0x90   :  { %v9638_v7 = vld [vmem:[#allocation5 + $0x1c4] ss:$8 sps:$4 sm:$0xff]   ;;  %v9636_v8 = vld [vmem:[#allocation5 + $0x1c0] ss:$8 sps:$4 sm:$0xff]   ;;  %v9641_v9 = vld [vmem:[#allocation5 + $0x1d4] ss:$8 sps:$4 sm:$0xff]  }
  0x91   :  { %v9639_v10 = vld [vmem:[#allocation5 + $0x1d0] ss:$8 sps:$4 sm:$0xff]   ;;  %v9644_v11 = vld [vmem:[#allocation5 + $0x1e4] ss:$8 sps:$4 sm:$0xff]   ;;  %v9642_v14 = vld [vmem:[#allocation5 + $0x1e0] ss:$8 sps:$4 sm:$0xff]  }
  0x92   :  { %3425 = vmatpush1.bf16.msra.mxu0 %v9568_v17  ;;  %v10714_v12 = vld [vmem:[#allocation2 + $0x8] sm:$0xff]  ;;  %v9647_v15 = vld [vmem:[#allocation5 + $0x1f4] ss:$8 sps:$4 sm:$0xff]   ;;  %s10530_s10 = scalar_lea.vmem %s8410_s9, 1024 }
  0x93   :  { %3426 = vmatprep.subr.bf16.mxu0 %v9569_v18  ;;  %v10718_v17 = vrot.slane %v10714_v12, %v10706_v16  ;;  %v9645_v18 = vld [vmem:[#allocation5 + $0x1f0] ss:$8 sps:$4 sm:$0xff]   ;;  %v9650_v19 = vld [vmem:[#allocation5 + $0x204] ss:$8 sps:$4 sm:$0xff]   ;;  %v9653_v23 = vld [vmem:[#allocation5 + $0x214] ss:$8 sps:$4 sm:$0xff]   ;;  %p10531_p0 = scmp.ne.s32.totalorder %s8410_s9, %s10530_s10  ;;  %p10536_p2 = scmp.lt.s32.totalorder %s10530_s10, %s10530_s10 }
  0x94   :  { %v9674_v38 = vld [vmem:[#allocation5 + $0x284] ss:$8 sps:$4 sm:$0xff]   ;;  %v9683_v44 = vld [vmem:[#allocation5 + $0x2b4] ss:$8 sps:$4 sm:$0xff]  }
  0x95   :  { %v162_v20 = vcombine.high %v10718_v17, %v10718_v17  ;;  %p10537_p3 = por %p10536_p2, %p10535_p1 }
  0x96   :  { %3427 = vmatpush1.bf16.msra.mxu0 %v9571_v21  ;;  %v300_v21 = vpack.c.bf16 %v10710_v41, %v10710_v41  ;;  %v9675_v41 = vld [vmem:[#allocation5 + $0x290] ss:$8 sps:$4 sm:$0xff]  }
  0x97   :  { %3428 = vmatprep.subr.bf16.mxu0 %v9572_v22  ;;  %v9648_v22 = vld [vmem:[#allocation5 + $0x200] ss:$8 sps:$4 sm:$0xff]   ;;  %v303_v24 = vpack.c.bf16 %v162_v20, %v162_v20  ;;  %v9729_v20 = vld [vmem:[#allocation5 + $0x3b0] ss:$8 sps:$4 sm:$0xff]   ;;  %p10538_p4 = pnand %p10537_p3, %p10531_p0 }
  0x9a   :  { %3429 = vmatpush1.bf16.msra.mxu0 %v9574_v25  ;;  %v9651_v25 = vld [vmem:[#allocation5 + $0x210] ss:$8 sps:$4 sm:$0xff]  }
  0x9b   :  { %3430 = vmatprep.subr.bf16.mxu0 %v9575_v26  ;;  %v9656_v26 = vld [vmem:[#allocation5 + $0x224] ss:$8 sps:$4 sm:$0xff]  }
  0x9e   :  { %3431 = vmatpush1.bf16.msra.mxu0 %v9577_v27  ;;  %v9654_v27 = vld [vmem:[#allocation5 + $0x220] ss:$8 sps:$4 sm:$0xff]  }
  0x9f   :  { %3432 = vmatprep.subr.bf16.mxu0 %v9578_v28  ;;  %v9659_v28 = vld [vmem:[#allocation5 + $0x234] ss:$8 sps:$4 sm:$0xff]  }
  0xa2   :  { %3433 = vmatpush1.bf16.msra.mxu0 %v9580_v29  ;;  %v9657_v29 = vld [vmem:[#allocation5 + $0x230] ss:$8 sps:$4 sm:$0xff]  }
  0xa3   :  { %3434 = vmatprep.subr.bf16.mxu0 %v9581_v30  ;;  %v9662_v30 = vld [vmem:[#allocation5 + $0x244] ss:$8 sps:$4 sm:$0xff]  }
  0xa6   :  { %3435 = vmatpush1.bf16.msra.mxu0 %v9583_v31  ;;  %v9660_v31 = vld [vmem:[#allocation5 + $0x240] ss:$8 sps:$4 sm:$0xff]  }
  0xa7   :  { %3436 = vmatprep.subr.bf16.mxu0 %v9584_v32  ;;  %v9665_v32 = vld [vmem:[#allocation5 + $0x254] ss:$8 sps:$4 sm:$0xff]  }
  0xaa   :  { %3437 = vmatpush1.bf16.msra.mxu0 %v9586_v33  ;;  %v9663_v33 = vld [vmem:[#allocation5 + $0x250] ss:$8 sps:$4 sm:$0xff]  }
  0xab   :  { %3438 = vmatprep.subr.bf16.mxu0 %v9587_v34  ;;  %v9668_v34 = vld [vmem:[#allocation5 + $0x264] ss:$8 sps:$4 sm:$0xff]  }
  0xae   :  { %3439 = vmatpush1.bf16.msra.mxu0 %v9589_v35  ;;  %v9666_v35 = vld [vmem:[#allocation5 + $0x260] ss:$8 sps:$4 sm:$0xff]  }
  0xaf   :  { %3440 = vmatprep.subr.bf16.mxu0 %v9590_v36  ;;  %v9671_v36 = vld [vmem:[#allocation5 + $0x274] ss:$8 sps:$4 sm:$0xff]  }
  0xb2   :  { %3441 = vmatpush1.bf16.msra.mxu0 %v9592_v37  ;;  %v9669_v37 = vld [vmem:[#allocation5 + $0x270] ss:$8 sps:$4 sm:$0xff]  }
  0xb3   :  { %3442 = vmatprep.subr.bf16.mxu0 %v9593_v39  ;;  %v9672_v39 = vld [vmem:[#allocation5 + $0x280] ss:$8 sps:$4 sm:$0xff]  }
  0xb6   :  { %3443 = vmatpush1.bf16.msra.mxu0 %v9595_v40  ;;  %v9677_v40 = vld [vmem:[#allocation5 + $0x294] ss:$8 sps:$4 sm:$0xff]  }
  0xb7   :  { %3444 = vmatprep.subr.bf16.mxu0 %v9596_v42  ;;  %v9680_v42 = vld [vmem:[#allocation5 + $0x2a4] ss:$8 sps:$4 sm:$0xff]  }
  0xba   :  { %3445 = vmatpush1.bf16.msra.mxu0 %v9598_v43  ;;  %v9678_v43 = vld [vmem:[#allocation5 + $0x2a0] ss:$8 sps:$4 sm:$0xff]  }
  0xbb   :  { %3455 = vmatprep.subr.bf16.mxu0 %v9602_v45  ;;  %v9681_v45 = vld [vmem:[#allocation5 + $0x2b0] ss:$8 sps:$4 sm:$0xff]  }
  0xbd   :  { %3447 = vmatmul.mubr.bf16.vlgmr.msra.gmra.mrb[0].mxu0 %v298_v46  ;;  %v9686_v46 = vld [vmem:[#allocation5 + $0x2c4] ss:$8 sps:$4 sm:$0xff]  }
  0xbe   :  { %3456 = vmatpush1.bf16.msra.mxu0 %v9600_v47  ;;  %3487 = vmatprep.mubr.bf16.mxu0 %v301_v48  ;;  %v9684_v47 = vld [vmem:[#allocation5 + $0x2c0] ss:$8 sps:$4 sm:$0xff]   ;;  %v9689_v48 = vld [vmem:[#allocation5 + $0x2d4] ss:$8 sps:$4 sm:$0xff]  }
  0xbf   :  { %3457 = vmatprep.subr.bf16.mxu0 %v9605_v49  ;;  %v9687_v49 = vld [vmem:[#allocation5 + $0x2d0] ss:$8 sps:$4 sm:$0xff]  }
  0xc2   :  { %3458 = vmatpush1.bf16.msra.mxu0 %v9603_v50  ;;  %v9692_v50 = vld [vmem:[#allocation5 + $0x2e4] ss:$8 sps:$4 sm:$0xff]  }
  0xc3   :  { %3459 = vmatprep.subr.bf16.mxu0 %v9608_v51  ;;  %v147_v51 = vcombine.high %v10714_v12, %v10714_v12  ;;  %v9720_v12 = vld [vmem:[#allocation5 + $0x380] ss:$8 sps:$4 sm:$0xff]  }
  0xc6   :  { %3460 = vmatpush1.bf16.msra.mxu0 %v9606_v52  ;;  %v9690_v52 = vld [vmem:[#allocation5 + $0x2e0] ss:$8 sps:$4 sm:$0xff]  }
  0xc7   :  { %3461 = vmatprep.subr.bf16.mxu0 %v9611_v53  ;;  %v9695_v53 = vld [vmem:[#allocation5 + $0x2f4] ss:$8 sps:$4 sm:$0xff]  }
  0xca   :  { %3462 = vmatpush1.bf16.msra.mxu0 %v9609_v54  ;;  %v10727_v54 = vrot.slane %v147_v51, %v10706_v16  ;;  %v9769_v51 = vld [vmem:[#allocation5 + $0x480] ss:$8 sps:$4 sm:$0xff]  }
  0xcb   :  { %3463 = vmatprep.subr.bf16.mxu0 %v9614_v55  ;;  %v9693_v55 = vld [vmem:[#allocation5 + $0x2f0] ss:$8 sps:$4 sm:$0xff]  }
  0xce   :  { %3464 = vmatpush1.bf16.msra.mxu0 %v9612_v56  ;;  %v9698_v56 = vld [vmem:[#allocation5 + $0x304] ss:$8 sps:$4 sm:$0xff]  }
  0xcf   :  { %3465 = vmatprep.subr.bf16.mxu0 %v9617_v57  ;;  %v163_v57 = vcombine.high %v10727_v54, %v10727_v54 }
  0xd2   :  { %3466 = vmatpush1.bf16.msra.mxu0 %v9615_v58  ;;  %v302_v58 = vpack.c.bf16 %v10718_v17, %v10718_v17  ;;  %v9728_v17 = vld [vmem:[#allocation5 + $0x3a4] ss:$8 sps:$4 sm:$0xff]  }
  0xd3   :  { %3467 = vmatprep.subr.bf16.mxu0 %v9620_v59  ;;  %v9696_v59 = vld [vmem:[#allocation5 + $0x300] ss:$8 sps:$4 sm:$0xff]  }
  0xd6   :  { %3468 = vmatpush1.bf16.msra.mxu0 %v9618_v60  ;;  %v9701_v60 = vld [vmem:[#allocation5 + $0x314] ss:$8 sps:$4 sm:$0xff]  }
  0xd7   :  { %3469 = vmatprep.subr.bf16.mxu0 %v9623_v61  ;;  %v305_v61 = vpack.c.bf16 %v163_v57, %v163_v57  ;;  %v9778_v57 = vld [vmem:[#allocation5 + $0x4b0] ss:$8 sps:$4 sm:$0xff]  }
  0xda   :  { %3470 = vmatpush1.bf16.msra.mxu0 %v9621_v62  ;;  %v9699_v62 = vld [vmem:[#allocation5 + $0x310] ss:$8 sps:$4 sm:$0xff]  }
  0xdb   :  { %3471 = vmatprep.subr.bf16.mxu0 %v9626_v63  ;;  %v9704_v63 = vld [vmem:[#allocation5 + $0x324] ss:$8 sps:$4 sm:$0xff]  }
  0xde   :  { %3472 = vmatpush1.bf16.msra.mxu0 %v9624_v0  ;;  %v9702_v0 = vld [vmem:[#allocation5 + $0x320] ss:$8 sps:$4 sm:$0xff]  }
  0xdf   :  { %3473 = vmatprep.subr.bf16.mxu0 %v9629_v1  ;;  %v9707_v1 = vld [vmem:[#allocation5 + $0x334] ss:$8 sps:$4 sm:$0xff]  }
  0xe2   :  { %3474 = vmatpush1.bf16.msra.mxu0 %v9627_v2  ;;  %v9705_v2 = vld [vmem:[#allocation5 + $0x330] ss:$8 sps:$4 sm:$0xff]  }
  0xe3   :  { %3475 = vmatprep.subr.bf16.mxu0 %v9632_v3  ;;  %v9710_v3 = vld [vmem:[#allocation5 + $0x344] ss:$8 sps:$4 sm:$0xff]  }
  0xe6   :  { %3476 = vmatpush1.bf16.msra.mxu0 %v9630_v4  ;;  %v9708_v4 = vld [vmem:[#allocation5 + $0x340] ss:$8 sps:$4 sm:$0xff]  }
  0xe7   :  { %3477 = vmatprep.subr.bf16.mxu0 %v9635_v5  ;;  %v9713_v5 = vld [vmem:[#allocation5 + $0x354] ss:$8 sps:$4 sm:$0xff]  }
  0xea   :  { %3478 = vmatpush1.bf16.msra.mxu0 %v9633_v6  ;;  %v9711_v6 = vld [vmem:[#allocation5 + $0x350] ss:$8 sps:$4 sm:$0xff]  }
  0xeb   :  { %3479 = vmatprep.subr.bf16.mxu0 %v9638_v7  ;;  %v9716_v7 = vld [vmem:[#allocation5 + $0x364] ss:$8 sps:$4 sm:$0xff]  }
  0xee   :  { %3480 = vmatpush1.bf16.msra.mxu0 %v9636_v8  ;;  %v9714_v8 = vld [vmem:[#allocation5 + $0x360] ss:$8 sps:$4 sm:$0xff]  }
  0xef   :  { %3481 = vmatprep.subr.bf16.mxu0 %v9641_v9  ;;  %v9719_v9 = vld [vmem:[#allocation5 + $0x374] ss:$8 sps:$4 sm:$0xff]  }
  0xf2   :  { %3482 = vmatpush1.bf16.msra.mxu0 %v9639_v10  ;;  %v9717_v10 = vld [vmem:[#allocation5 + $0x370] ss:$8 sps:$4 sm:$0xff]  }
  0xf3   :  { %3483 = vmatprep.subr.bf16.mxu0 %v9644_v11  ;;  %v9722_v11 = vld [vmem:[#allocation5 + $0x384] ss:$8 sps:$4 sm:$0xff]  }
  0xf6   :  { %3484 = vmatpush1.bf16.msra.mxu0 %v9642_v14  ;;  %v9725_v14 = vld [vmem:[#allocation5 + $0x394] ss:$8 sps:$4 sm:$0xff]  }
  0xf7   :  { %3485 = vmatprep.subr.bf16.mxu0 %v9647_v15  ;;  %v9723_v15 = vld [vmem:[#allocation5 + $0x390] ss:$8 sps:$4 sm:$0xff]  }
  0xfa   :  { %3486 = vmatpush1.bf16.msra.mxu0 %v9645_v18  ;;  %v9726_v18 = vld [vmem:[#allocation5 + $0x3a0] ss:$8 sps:$4 sm:$0xff]  }
  0xfb   :  { %3496 = vmatprep.subr.bf16.mxu0 %v9650_v19  ;;  %v9731_v19 = vld [vmem:[#allocation5 + $0x3b4] ss:$8 sps:$4 sm:$0xff]  }
  0xfd   :  { %3488 = vmatmul.mubr.bf16.vlgmr.msra.gmra.mrb[0].mxu0 %v300_v21  ;;  %v9734_v21 = vld [vmem:[#allocation5 + $0x3c4] ss:$8 sps:$4 sm:$0xff]  }
  0xfe   :  { %3497 = vmatpush1.bf16.msra.mxu0 %v9648_v22  ;;  %3528 = vmatprep.mubr.bf16.mxu0 %v303_v24  ;;  %v9732_v22 = vld [vmem:[#allocation5 + $0x3c0] ss:$8 sps:$4 sm:$0xff]   ;;  %v9735_v24 = vld [vmem:[#allocation5 + $0x3d0] ss:$8 sps:$4 sm:$0xff]  }
  0xff   :  { %3498 = vmatprep.subr.bf16.mxu0 %v9653_v23  ;;  %v9737_v23 = vld [vmem:[#allocation5 + $0x3d4] ss:$8 sps:$4 sm:$0xff]  }
 0x102   :  { %3499 = vmatpush1.bf16.msra.mxu0 %v9651_v25  ;;  %v9740_v25 = vld [vmem:[#allocation5 + $0x3e4] ss:$8 sps:$4 sm:$0xff]  }
 0x103   :  { %3500 = vmatprep.subr.bf16.mxu0 %v9656_v26  ;;  %v10733_v26 = vld [vmem:[#allocation2 + $0x10] sm:$0xff] }
 0x106   :  { %3501 = vmatpush1.bf16.msra.mxu0 %v9654_v27  ;;  %v9738_v27 = vld [vmem:[#allocation5 + $0x3e0] ss:$8 sps:$4 sm:$0xff]  }
 0x107   :  { %3502 = vmatprep.subr.bf16.mxu0 %v9659_v28  ;;  %v10737_v28 = vrot.slane %v10733_v26, %v10706_v16 }
 0x10a   :  { %3503 = vmatpush1.bf16.msra.mxu0 %v9657_v29  ;;  %v9743_v29 = vld [vmem:[#allocation5 + $0x3f4] ss:$8 sps:$4 sm:$0xff]  }
 0x10b   :  { %3504 = vmatprep.subr.bf16.mxu0 %v9662_v30  ;;  %v9741_v30 = vld [vmem:[#allocation5 + $0x3f0] ss:$8 sps:$4 sm:$0xff]  }
 0x10e   :  { %3505 = vmatpush1.bf16.msra.mxu0 %v9660_v31  ;;  %v179_v31 = vcombine.high %v10737_v28, %v10737_v28 }
 0x10f   :  { %3506 = vmatprep.subr.bf16.mxu0 %v9665_v32  ;;  %v9747_v32 = vld [vmem:[#allocation5 + $0x404] ss:$8 sps:$4 sm:$0xff]  }
 0x112   :  { %3507 = vmatpush1.bf16.msra.mxu0 %v9663_v33  ;;  %v304_v33 = vpack.c.bf16 %v10727_v54, %v10727_v54  ;;  %v9777_v54 = vld [vmem:[#allocation5 + $0x4a4] ss:$8 sps:$4 sm:$0xff]  }
 0x113   :  { %3508 = vmatprep.subr.bf16.mxu0 %v9668_v34  ;;  %v9745_v34 = vld [vmem:[#allocation5 + $0x400] ss:$8 sps:$4 sm:$0xff]  }
 0x116   :  { %3509 = vmatpush1.bf16.msra.mxu0 %v9666_v35  ;;  %v307_v35 = vpack.c.bf16 %v179_v31, %v179_v31  ;;  %v9828_v31 = vld [vmem:[#allocation5 + $0x5b4] ss:$8 sps:$4 sm:$0xff]  }
 0x117   :  { %3510 = vmatprep.subr.bf16.mxu0 %v9671_v36  ;;  %v9750_v36 = vld [vmem:[#allocation5 + $0x414] ss:$8 sps:$4 sm:$0xff]  }
 0x11a   :  { %3511 = vmatpush1.bf16.msra.mxu0 %v9669_v37  ;;  %v9748_v37 = vld [vmem:[#allocation5 + $0x410] ss:$8 sps:$4 sm:$0xff]  }
 0x11b   :  { %3512 = vmatprep.subr.bf16.mxu0 %v9674_v38  ;;  %v9753_v38 = vld [vmem:[#allocation5 + $0x424] ss:$8 sps:$4 sm:$0xff]  }
 0x11e   :  { %3513 = vmatpush1.bf16.msra.mxu0 %v9672_v39  ;;  %v9751_v39 = vld [vmem:[#allocation5 + $0x420] ss:$8 sps:$4 sm:$0xff]  }
 0x11f   :  { %3514 = vmatprep.subr.bf16.mxu0 %v9677_v40  ;;  %v9756_v40 = vld [vmem:[#allocation5 + $0x434] ss:$8 sps:$4 sm:$0xff]  }
 0x122   :  { %3515 = vmatpush1.bf16.msra.mxu0 %v9675_v41  ;;  %v9754_v41 = vld [vmem:[#allocation5 + $0x430] ss:$8 sps:$4 sm:$0xff]  }
 0x123   :  { %3516 = vmatprep.subr.bf16.mxu0 %v9680_v42  ;;  %v9759_v42 = vld [vmem:[#allocation5 + $0x444] ss:$8 sps:$4 sm:$0xff]  }
 0x126   :  { %3517 = vmatpush1.bf16.msra.mxu0 %v9678_v43  ;;  %v9757_v43 = vld [vmem:[#allocation5 + $0x440] ss:$8 sps:$4 sm:$0xff]  }
 0x127   :  { %3518 = vmatprep.subr.bf16.mxu0 %v9683_v44  ;;  %v9762_v44 = vld [vmem:[#allocation5 + $0x454] ss:$8 sps:$4 sm:$0xff]  }
 0x12a   :  { %3519 = vmatpush1.bf16.msra.mxu0 %v9681_v45  ;;  %v9760_v45 = vld [vmem:[#allocation5 + $0x450] ss:$8 sps:$4 sm:$0xff]  }
 0x12b   :  { %3520 = vmatprep.subr.bf16.mxu0 %v9686_v46  ;;  %v9765_v46 = vld [vmem:[#allocation5 + $0x464] ss:$8 sps:$4 sm:$0xff]  }
 0x12e   :  { %3521 = vmatpush1.bf16.msra.mxu0 %v9684_v47  ;;  %v9763_v47 = vld [vmem:[#allocation5 + $0x460] ss:$8 sps:$4 sm:$0xff]  }
 0x12f   :  { %3522 = vmatprep.subr.bf16.mxu0 %v9689_v48  ;;  %v9768_v48 = vld [vmem:[#allocation5 + $0x474] ss:$8 sps:$4 sm:$0xff]  }
 0x132   :  { %3523 = vmatpush1.bf16.msra.mxu0 %v9687_v49  ;;  %v9766_v49 = vld [vmem:[#allocation5 + $0x470] ss:$8 sps:$4 sm:$0xff]  }
 0x133   :  { %3524 = vmatprep.subr.bf16.mxu0 %v9692_v50  ;;  %v9771_v50 = vld [vmem:[#allocation5 + $0x484] ss:$8 sps:$4 sm:$0xff]  }
 0x136   :  { %3525 = vmatpush1.bf16.msra.mxu0 %v9690_v52  ;;  %v9774_v52 = vld [vmem:[#allocation5 + $0x494] ss:$8 sps:$4 sm:$0xff]  }
 0x137   :  { %3526 = vmatprep.subr.bf16.mxu0 %v9695_v53  ;;  %v9772_v53 = vld [vmem:[#allocation5 + $0x490] ss:$8 sps:$4 sm:$0xff]  }
 0x13a   :  { %3527 = vmatpush1.bf16.msra.mxu0 %v9693_v55  ;;  %v9775_v55 = vld [vmem:[#allocation5 + $0x4a0] ss:$8 sps:$4 sm:$0xff]  }
 0x13b   :  { %3537 = vmatprep.subr.bf16.mxu0 %v9698_v56  ;;  %v9780_v56 = vld [vmem:[#allocation5 + $0x4b4] ss:$8 sps:$4 sm:$0xff]  }
 0x13d   :  { %3529 = vmatmul.mubr.bf16.vlgmr.msra.gmra.mrb[0].mxu0 %v302_v58  ;;  %v9783_v58 = vld [vmem:[#allocation5 + $0x4c4] ss:$8 sps:$4 sm:$0xff]  }
 0x13e   :  { %3538 = vmatpush1.bf16.msra.mxu0 %v9696_v59  ;;  %3569 = vmatprep.mubr.bf16.mxu0 %v305_v61  ;;  %v9781_v59 = vld [vmem:[#allocation5 + $0x4c0] ss:$8 sps:$4 sm:$0xff]   ;;  %v9784_v61 = vld [vmem:[#allocation5 + $0x4d0] ss:$8 sps:$4 sm:$0xff]  }
 0x13f   :  { %3539 = vmatprep.subr.bf16.mxu0 %v9701_v60  ;;  %v9786_v60 = vld [vmem:[#allocation5 + $0x4d4] ss:$8 sps:$4 sm:$0xff]  }
 0x142   :  { %3540 = vmatpush1.bf16.msra.mxu0 %v9699_v62  ;;  %v164_v62 = vcombine.high %v10733_v26, %v10733_v26  ;;  %v9817_v26 = vld [vmem:[#allocation5 + $0x580] ss:$8 sps:$4 sm:$0xff]  }
 0x143   :  { %3541 = vmatprep.subr.bf16.mxu0 %v9704_v63  ;;  %v9789_v63 = vld [vmem:[#allocation5 + $0x4e4] ss:$8 sps:$4 sm:$0xff]  }
 0x146   :  { %3542 = vmatpush1.bf16.msra.mxu0 %v9702_v0  ;;  %v9787_v0 = vld [vmem:[#allocation5 + $0x4e0] ss:$8 sps:$4 sm:$0xff]  }
 0x147   :  { %3543 = vmatprep.subr.bf16.mxu0 %v9707_v1  ;;  %v10746_v1 = vrot.slane %v164_v62, %v10706_v16  ;;  %v9868_v62 = vld [vmem:[#allocation5 + $0x684] ss:$8 sps:$4 sm:$0xff]  }
 0x14a   :  { %3544 = vmatpush1.bf16.msra.mxu0 %v9705_v2  ;;  %v9792_v2 = vld [vmem:[#allocation5 + $0x4f4] ss:$8 sps:$4 sm:$0xff]  }
 0x14b   :  { %3545 = vmatprep.subr.bf16.mxu0 %v9710_v3  ;;  %v9790_v3 = vld [vmem:[#allocation5 + $0x4f0] ss:$8 sps:$4 sm:$0xff]  }
 0x14e   :  { %3546 = vmatpush1.bf16.msra.mxu0 %v9708_v4  ;;  %v180_v4 = vcombine.high %v10746_v1, %v10746_v1 }
 0x14f   :  { %3547 = vmatprep.subr.bf16.mxu0 %v9713_v5  ;;  %v9795_v5 = vld [vmem:[#allocation5 + $0x504] ss:$8 sps:$4 sm:$0xff]  }
 0x152   :  { %3548 = vmatpush1.bf16.msra.mxu0 %v9711_v6  ;;  %v306_v6 = vpack.c.bf16 %v10737_v28, %v10737_v28  ;;  %v9820_v28 = vld [vmem:[#allocation5 + $0x590] ss:$8 sps:$4 sm:$0xff]  }
 0x153   :  { %3549 = vmatprep.subr.bf16.mxu0 %v9716_v7  ;;  %v9793_v7 = vld [vmem:[#allocation5 + $0x500] ss:$8 sps:$4 sm:$0xff]  }
 0x156   :  { %3550 = vmatpush1.bf16.msra.mxu0 %v9714_v8  ;;  %v309_v8 = vpack.c.bf16 %v180_v4, %v180_v4  ;;  %v9877_v4 = vld [vmem:[#allocation5 + $0x6b4] ss:$8 sps:$4 sm:$0xff]  }
 0x157   :  { %3551 = vmatprep.subr.bf16.mxu0 %v9719_v9  ;;  %v9798_v9 = vld [vmem:[#allocation5 + $0x514] ss:$8 sps:$4 sm:$0xff]  }
 0x15a   :  { %3552 = vmatpush1.bf16.msra.mxu0 %v9717_v10  ;;  %v9796_v10 = vld [vmem:[#allocation5 + $0x510] ss:$8 sps:$4 sm:$0xff]  }
 0x15b   :  { %3553 = vmatprep.subr.bf16.mxu0 %v9722_v11  ;;  %v9801_v11 = vld [vmem:[#allocation5 + $0x524] ss:$8 sps:$4 sm:$0xff]  }
 0x15e   :  { %3554 = vmatpush1.bf16.msra.mxu0 %v9720_v12  ;;  %v9799_v12 = vld [vmem:[#allocation5 + $0x520] ss:$8 sps:$4 sm:$0xff]  }
 0x15f   :  { %3555 = vmatprep.subr.bf16.mxu0 %v9725_v14  ;;  %v9804_v14 = vld [vmem:[#allocation5 + $0x534] ss:$8 sps:$4 sm:$0xff]  }
 0x162   :  { %3556 = vmatpush1.bf16.msra.mxu0 %v9723_v15  ;;  %v9802_v15 = vld [vmem:[#allocation5 + $0x530] ss:$8 sps:$4 sm:$0xff]  }
 0x163   :  { %3557 = vmatprep.subr.bf16.mxu0 %v9728_v17  ;;  %v9807_v17 = vld [vmem:[#allocation5 + $0x544] ss:$8 sps:$4 sm:$0xff]  }
 0x166   :  { %3558 = vmatpush1.bf16.msra.mxu0 %v9726_v18  ;;  %v9805_v18 = vld [vmem:[#allocation5 + $0x540] ss:$8 sps:$4 sm:$0xff]  }
 0x167   :  { %3559 = vmatprep.subr.bf16.mxu0 %v9731_v19  ;;  %v9810_v19 = vld [vmem:[#allocation5 + $0x554] ss:$8 sps:$4 sm:$0xff]  }
 0x16a   :  { %3560 = vmatpush1.bf16.msra.mxu0 %v9729_v20  ;;  %v9808_v20 = vld [vmem:[#allocation5 + $0x550] ss:$8 sps:$4 sm:$0xff]  }
 0x16b   :  { %3561 = vmatprep.subr.bf16.mxu0 %v9734_v21  ;;  %v9813_v21 = vld [vmem:[#allocation5 + $0x564] ss:$8 sps:$4 sm:$0xff]  }
 0x16e   :  { %3562 = vmatpush1.bf16.msra.mxu0 %v9732_v22  ;;  %v9811_v22 = vld [vmem:[#allocation5 + $0x560] ss:$8 sps:$4 sm:$0xff]  }
 0x16f   :  { %3563 = vmatprep.subr.bf16.mxu0 %v9737_v23  ;;  %v9816_v23 = vld [vmem:[#allocation5 + $0x574] ss:$8 sps:$4 sm:$0xff]  }
 0x172   :  { %3564 = vmatpush1.bf16.msra.mxu0 %v9735_v24  ;;  %v9814_v24 = vld [vmem:[#allocation5 + $0x570] ss:$8 sps:$4 sm:$0xff]  }
 0x173   :  { %3565 = vmatprep.subr.bf16.mxu0 %v9740_v25  ;;  %v9819_v25 = vld [vmem:[#allocation5 + $0x584] ss:$8 sps:$4 sm:$0xff]  }
 0x176   :  { %3566 = vmatpush1.bf16.msra.mxu0 %v9738_v27  ;;  %v9822_v27 = vld [vmem:[#allocation5 + $0x594] ss:$8 sps:$4 sm:$0xff]  }
 0x177   :  { %3567 = vmatprep.subr.bf16.mxu0 %v9743_v29  ;;  %v9825_v29 = vld [vmem:[#allocation5 + $0x5a4] ss:$8 sps:$4 sm:$0xff]  }
 0x17a   :  { %3568 = vmatpush1.bf16.msra.mxu0 %v9741_v30  ;;  %v9823_v30 = vld [vmem:[#allocation5 + $0x5a0] ss:$8 sps:$4 sm:$0xff]  }
 0x17b   :  { %3578 = vmatprep.subr.bf16.mxu0 %v9747_v32  ;;  %v9826_v32 = vld [vmem:[#allocation5 + $0x5b0] ss:$8 sps:$4 sm:$0xff]  }
 0x17d   :  { %3570 = vmatmul.mubr.bf16.vlgmr.msra.gmra.mrb[0].mxu0 %v304_v33  ;;  %v9831_v33 = vld [vmem:[#allocation5 + $0x5c4] ss:$8 sps:$4 sm:$0xff]  }
 0x17e   :  { %3579 = vmatpush1.bf16.msra.mxu0 %v9745_v34  ;;  %3610 = vmatprep.mubr.bf16.mxu0 %v307_v35  ;;  %v9829_v34 = vld [vmem:[#allocation5 + $0x5c0] ss:$8 sps:$4 sm:$0xff]   ;;  %v9834_v35 = vld [vmem:[#allocation5 + $0x5d4] ss:$8 sps:$4 sm:$0xff]  }
 0x17f   :  { %3580 = vmatprep.subr.bf16.mxu0 %v9750_v36  ;;  %v9832_v36 = vld [vmem:[#allocation5 + $0x5d0] ss:$8 sps:$4 sm:$0xff]  }
 0x182   :  { %3581 = vmatpush1.bf16.msra.mxu0 %v9748_v37  ;;  %v9837_v37 = vld [vmem:[#allocation5 + $0x5e4] ss:$8 sps:$4 sm:$0xff]  }
 0x183   :  { %3582 = vmatprep.subr.bf16.mxu0 %v9753_v38  ;;  %v10752_v38 = vld [vmem:[#allocation2 + $0x18] sm:$0xff] }
 0x186   :  { %3583 = vmatpush1.bf16.msra.mxu0 %v9751_v39  ;;  %v9835_v39 = vld [vmem:[#allocation5 + $0x5e0] ss:$8 sps:$4 sm:$0xff]  }
 0x187   :  { %3584 = vmatprep.subr.bf16.mxu0 %v9756_v40  ;;  %v10756_v40 = vrot.slane %v10752_v38, %v10706_v16 }
 0x18a   :  { %3585 = vmatpush1.bf16.msra.mxu0 %v9754_v41  ;;  %v9840_v41 = vld [vmem:[#allocation5 + $0x5f4] ss:$8 sps:$4 sm:$0xff]  }
 0x18b   :  { %3586 = vmatprep.subr.bf16.mxu0 %v9759_v42  ;;  %v9838_v42 = vld [vmem:[#allocation5 + $0x5f0] ss:$8 sps:$4 sm:$0xff]  }
 0x18e   :  { %3587 = vmatpush1.bf16.msra.mxu0 %v9757_v43  ;;  %v196_v43 = vcombine.high %v10756_v40, %v10756_v40 }
 0x18f   :  { %3588 = vmatprep.subr.bf16.mxu0 %v9762_v44  ;;  %v9844_v44 = vld [vmem:[#allocation5 + $0x604] ss:$8 sps:$4 sm:$0xff]  }
 0x192   :  { %3589 = vmatpush1.bf16.msra.mxu0 %v9760_v45  ;;  %v308_v45 = vpack.c.bf16 %v10746_v1, %v10746_v1  ;;  %v9869_v1 = vld [vmem:[#allocation5 + $0x690] ss:$8 sps:$4 sm:$0xff]  }
 0x193   :  { %3590 = vmatprep.subr.bf16.mxu0 %v9765_v46  ;;  %v9842_v46 = vld [vmem:[#allocation5 + $0x600] ss:$8 sps:$4 sm:$0xff]  }
 0x196   :  { %3591 = vmatpush1.bf16.msra.mxu0 %v9763_v47  ;;  %v311_v47 = vpack.c.bf16 %v196_v43, %v196_v43  ;;  %v9925_v43 = vld [vmem:[#allocation5 + $0x7b4] ss:$8 sps:$4 sm:$0xff]  }
 0x197   :  { %3592 = vmatprep.subr.bf16.mxu0 %v9768_v48  ;;  %v9847_v48 = vld [vmem:[#allocation5 + $0x614] ss:$8 sps:$4 sm:$0xff]  }
 0x19a   :  { %3593 = vmatpush1.bf16.msra.mxu0 %v9766_v49  ;;  %v9845_v49 = vld [vmem:[#allocation5 + $0x610] ss:$8 sps:$4 sm:$0xff]  }
 0x19b   :  { %3594 = vmatprep.subr.bf16.mxu0 %v9771_v50  ;;  %v9850_v50 = vld [vmem:[#allocation5 + $0x624] ss:$8 sps:$4 sm:$0xff]  }
 0x19e   :  { %3595 = vmatpush1.bf16.msra.mxu0 %v9769_v51  ;;  %v9848_v51 = vld [vmem:[#allocation5 + $0x620] ss:$8 sps:$4 sm:$0xff]  }
 0x19f   :  { %3596 = vmatprep.subr.bf16.mxu0 %v9774_v52  ;;  %v9853_v52 = vld [vmem:[#allocation5 + $0x634] ss:$8 sps:$4 sm:$0xff]  }
 0x1a2   :  { %3597 = vmatpush1.bf16.msra.mxu0 %v9772_v53  ;;  %v9851_v53 = vld [vmem:[#allocation5 + $0x630] ss:$8 sps:$4 sm:$0xff]  }
 0x1a3   :  { %3598 = vmatprep.subr.bf16.mxu0 %v9777_v54  ;;  %v9856_v54 = vld [vmem:[#allocation5 + $0x644] ss:$8 sps:$4 sm:$0xff]  }
 0x1a6   :  { %3599 = vmatpush1.bf16.msra.mxu0 %v9775_v55  ;;  %v9854_v55 = vld [vmem:[#allocation5 + $0x640] ss:$8 sps:$4 sm:$0xff]  }
 0x1a7   :  { %3600 = vmatprep.subr.bf16.mxu0 %v9780_v56  ;;  %v9859_v56 = vld [vmem:[#allocation5 + $0x654] ss:$8 sps:$4 sm:$0xff]  }
 0x1aa   :  { %3601 = vmatpush1.bf16.msra.mxu0 %v9778_v57  ;;  %v9857_v57 = vld [vmem:[#allocation5 + $0x650] ss:$8 sps:$4 sm:$0xff]  }
 0x1ab   :  { %3602 = vmatprep.subr.bf16.mxu0 %v9783_v58  ;;  %v9862_v58 = vld [vmem:[#allocation5 + $0x664] ss:$8 sps:$4 sm:$0xff]  }
 0x1ae   :  { %3603 = vmatpush1.bf16.msra.mxu0 %v9781_v59  ;;  %v9860_v59 = vld [vmem:[#allocation5 + $0x660] ss:$8 sps:$4 sm:$0xff]  }
 0x1af   :  { %3604 = vmatprep.subr.bf16.mxu0 %v9786_v60  ;;  %v9865_v60 = vld [vmem:[#allocation5 + $0x674] ss:$8 sps:$4 sm:$0xff]  }
 0x1b2   :  { %3605 = vmatpush1.bf16.msra.mxu0 %v9784_v61  ;;  %v9863_v61 = vld [vmem:[#allocation5 + $0x670] ss:$8 sps:$4 sm:$0xff]  }
 0x1b3   :  { %3606 = vmatprep.subr.bf16.mxu0 %v9789_v63  ;;  %v9866_v63 = vld [vmem:[#allocation5 + $0x680] ss:$8 sps:$4 sm:$0xff]  }
 0x1b6   :  { %3607 = vmatpush1.bf16.msra.mxu0 %v9787_v0  ;;  %v9871_v0 = vld [vmem:[#allocation5 + $0x694] ss:$8 sps:$4 sm:$0xff]  }
 0x1b7   :  { %3608 = vmatprep.subr.bf16.mxu0 %v9792_v2  ;;  %v9874_v2 = vld [vmem:[#allocation5 + $0x6a4] ss:$8 sps:$4 sm:$0xff]  }
 0x1ba   :  { %3609 = vmatpush1.bf16.msra.mxu0 %v9790_v3  ;;  %v9872_v3 = vld [vmem:[#allocation5 + $0x6a0] ss:$8 sps:$4 sm:$0xff]  }
 0x1bb   :  { %3619 = vmatprep.subr.bf16.mxu0 %v9795_v5  ;;  %v9875_v5 = vld [vmem:[#allocation5 + $0x6b0] ss:$8 sps:$4 sm:$0xff]  }
 0x1bd   :  { %3611 = vmatmul.mubr.bf16.vlgmr.msra.gmra.mrb[0].mxu0 %v306_v6  ;;  %v9880_v6 = vld [vmem:[#allocation5 + $0x6c4] ss:$8 sps:$4 sm:$0xff]  }
 0x1be   :  { %3620 = vmatpush1.bf16.msra.mxu0 %v9793_v7  ;;  %3651 = vmatprep.mubr.bf16.mxu0 %v309_v8  ;;  %v9878_v7 = vld [vmem:[#allocation5 + $0x6c0] ss:$8 sps:$4 sm:$0xff]   ;;  %v9883_v8 = vld [vmem:[#allocation5 + $0x6d4] ss:$8 sps:$4 sm:$0xff]  }
 0x1bf   :  { %3621 = vmatprep.subr.bf16.mxu0 %v9798_v9  ;;  %v9881_v9 = vld [vmem:[#allocation5 + $0x6d0] ss:$8 sps:$4 sm:$0xff]  }
 0x1c2   :  { %3622 = vmatpush1.bf16.msra.mxu0 %v9796_v10  ;;  %v181_v10 = vcombine.high %v10752_v38, %v10752_v38  ;;  %v9914_v38 = vld [vmem:[#allocation5 + $0x780] ss:$8 sps:$4 sm:$0xff]  }
 0x1c3   :  { %3623 = vmatprep.subr.bf16.mxu0 %v9801_v11  ;;  %v9886_v11 = vld [vmem:[#allocation5 + $0x6e4] ss:$8 sps:$4 sm:$0xff]  }
 0x1c6   :  { %3624 = vmatpush1.bf16.msra.mxu0 %v9799_v12  ;;  %v9884_v12 = vld [vmem:[#allocation5 + $0x6e0] ss:$8 sps:$4 sm:$0xff]  }
 0x1c7   :  { %3625 = vmatprep.subr.bf16.mxu0 %v9804_v14  ;;  %v10765_v14 = vrot.slane %v181_v10, %v10706_v16  ;;  %v9965_v10 = vld [vmem:[#allocation5 + $0x884] ss:$8 sps:$4 sm:$0xff]  }
 0x1ca   :  { %3626 = vmatpush1.bf16.msra.mxu0 %v9802_v15  ;;  %v9889_v15 = vld [vmem:[#allocation5 + $0x6f4] ss:$8 sps:$4 sm:$0xff]  }
 0x1cb   :  { %3627 = vmatprep.subr.bf16.mxu0 %v9807_v17  ;;  %v9887_v17 = vld [vmem:[#allocation5 + $0x6f0] ss:$8 sps:$4 sm:$0xff]  }
 0x1ce   :  { %3628 = vmatpush1.bf16.msra.mxu0 %v9805_v18  ;;  %v197_v18 = vcombine.high %v10765_v14, %v10765_v14 }
 0x1cf   :  { %3629 = vmatprep.subr.bf16.mxu0 %v9810_v19  ;;  %v9892_v19 = vld [vmem:[#allocation5 + $0x704] ss:$8 sps:$4 sm:$0xff]  }
 0x1d2   :  { %3630 = vmatpush1.bf16.msra.mxu0 %v9808_v20  ;;  %v310_v20 = vpack.c.bf16 %v10756_v40, %v10756_v40  ;;  %v9917_v40 = vld [vmem:[#allocation5 + $0x790] ss:$8 sps:$4 sm:$0xff]  }
 0x1d3   :  { %3631 = vmatprep.subr.bf16.mxu0 %v9813_v21  ;;  %v9890_v21 = vld [vmem:[#allocation5 + $0x700] ss:$8 sps:$4 sm:$0xff]  }
 0x1d6   :  { %3632 = vmatpush1.bf16.msra.mxu0 %v9811_v22  ;;  %v313_v22 = vpack.c.bf16 %v197_v18, %v197_v18  ;;  %v9974_v18 = vld [vmem:[#allocation5 + $0x8b4] ss:$8 sps:$4 sm:$0xff]  }
 0x1d7   :  { %3633 = vmatprep.subr.bf16.mxu0 %v9816_v23  ;;  %v9895_v23 = vld [vmem:[#allocation5 + $0x714] ss:$8 sps:$4 sm:$0xff]  }
 0x1da   :  { %3634 = vmatpush1.bf16.msra.mxu0 %v9814_v24  ;;  %v9893_v24 = vld [vmem:[#allocation5 + $0x710] ss:$8 sps:$4 sm:$0xff]  }
 0x1db   :  { %3635 = vmatprep.subr.bf16.mxu0 %v9819_v25  ;;  %v9898_v25 = vld [vmem:[#allocation5 + $0x724] ss:$8 sps:$4 sm:$0xff]  }
 0x1de   :  { %3636 = vmatpush1.bf16.msra.mxu0 %v9817_v26  ;;  %v9896_v26 = vld [vmem:[#allocation5 + $0x720] ss:$8 sps:$4 sm:$0xff]  }
 0x1df   :  { %3637 = vmatprep.subr.bf16.mxu0 %v9822_v27  ;;  %v9901_v27 = vld [vmem:[#allocation5 + $0x734] ss:$8 sps:$4 sm:$0xff]  }
 0x1e2   :  { %3638 = vmatpush1.bf16.msra.mxu0 %v9820_v28  ;;  %v9899_v28 = vld [vmem:[#allocation5 + $0x730] ss:$8 sps:$4 sm:$0xff]  }
 0x1e3   :  { %3639 = vmatprep.subr.bf16.mxu0 %v9825_v29  ;;  %v9904_v29 = vld [vmem:[#allocation5 + $0x744] ss:$8 sps:$4 sm:$0xff]  }
 0x1e6   :  { %3640 = vmatpush1.bf16.msra.mxu0 %v9823_v30  ;;  %v9902_v30 = vld [vmem:[#allocation5 + $0x740] ss:$8 sps:$4 sm:$0xff]  }
 0x1e7   :  { %3641 = vmatprep.subr.bf16.mxu0 %v9828_v31  ;;  %v9907_v31 = vld [vmem:[#allocation5 + $0x754] ss:$8 sps:$4 sm:$0xff]  }
 0x1ea   :  { %3642 = vmatpush1.bf16.msra.mxu0 %v9826_v32  ;;  %v9905_v32 = vld [vmem:[#allocation5 + $0x750] ss:$8 sps:$4 sm:$0xff]  }
 0x1eb   :  { %3643 = vmatprep.subr.bf16.mxu0 %v9831_v33  ;;  %v9910_v33 = vld [vmem:[#allocation5 + $0x764] ss:$8 sps:$4 sm:$0xff]  }
 0x1ee   :  { %3644 = vmatpush1.bf16.msra.mxu0 %v9829_v34  ;;  %v9908_v34 = vld [vmem:[#allocation5 + $0x760] ss:$8 sps:$4 sm:$0xff]  }
 0x1ef   :  { %3645 = vmatprep.subr.bf16.mxu0 %v9834_v35  ;;  %v9913_v35 = vld [vmem:[#allocation5 + $0x774] ss:$8 sps:$4 sm:$0xff]  }
 0x1f2   :  { %3646 = vmatpush1.bf16.msra.mxu0 %v9832_v36  ;;  %v9911_v36 = vld [vmem:[#allocation5 + $0x770] ss:$8 sps:$4 sm:$0xff]  }
 0x1f3   :  { %3647 = vmatprep.subr.bf16.mxu0 %v9837_v37  ;;  %v9916_v37 = vld [vmem:[#allocation5 + $0x784] ss:$8 sps:$4 sm:$0xff]  }
 0x1f6   :  { %3648 = vmatpush1.bf16.msra.mxu0 %v9835_v39  ;;  %v9919_v39 = vld [vmem:[#allocation5 + $0x794] ss:$8 sps:$4 sm:$0xff]  }
 0x1f7   :  { %3649 = vmatprep.subr.bf16.mxu0 %v9840_v41  ;;  %v9922_v41 = vld [vmem:[#allocation5 + $0x7a4] ss:$8 sps:$4 sm:$0xff]  }
 0x1fa   :  { %3650 = vmatpush1.bf16.msra.mxu0 %v9838_v42  ;;  %v9920_v42 = vld [vmem:[#allocation5 + $0x7a0] ss:$8 sps:$4 sm:$0xff]  }
 0x1fb   :  { %3660 = vmatprep.subr.bf16.mxu0 %v9844_v44  ;;  %v9923_v44 = vld [vmem:[#allocation5 + $0x7b0] ss:$8 sps:$4 sm:$0xff]  }
 0x1fd   :  { %3652 = vmatmul.mubr.bf16.vlgmr.msra.gmra.mrb[0].mxu0 %v308_v45  ;;  %v9928_v45 = vld [vmem:[#allocation5 + $0x7c4] ss:$8 sps:$4 sm:$0xff]  }
 0x1fe   :  { %3661 = vmatpush1.bf16.msra.mxu0 %v9842_v46  ;;  %3692 = vmatprep.mubr.bf16.mxu0 %v311_v47  ;;  %v9926_v46 = vld [vmem:[#allocation5 + $0x7c0] ss:$8 sps:$4 sm:$0xff]   ;;  %v9931_v47 = vld [vmem:[#allocation5 + $0x7d4] ss:$8 sps:$4 sm:$0xff]  }
 0x1ff   :  { %3662 = vmatprep.subr.bf16.mxu0 %v9847_v48  ;;  %v9929_v48 = vld [vmem:[#allocation5 + $0x7d0] ss:$8 sps:$4 sm:$0xff]  }
 0x202   :  { %3663 = vmatpush1.bf16.msra.mxu0 %v9845_v49  ;;  %v9934_v49 = vld [vmem:[#allocation5 + $0x7e4] ss:$8 sps:$4 sm:$0xff]  }
 0x203   :  { %3664 = vmatprep.subr.bf16.mxu0 %v9850_v50  ;;  %v10771_v50 = vld [vmem:[#allocation2 + $0x20] sm:$0xff] }
 0x206   :  { %3665 = vmatpush1.bf16.msra.mxu0 %v9848_v51  ;;  %v9932_v51 = vld [vmem:[#allocation5 + $0x7e0] ss:$8 sps:$4 sm:$0xff]  }
 0x207   :  { %3666 = vmatprep.subr.bf16.mxu0 %v9853_v52  ;;  %v10775_v52 = vrot.slane %v10771_v50, %v10706_v16 }
 0x20a   :  { %3667 = vmatpush1.bf16.msra.mxu0 %v9851_v53  ;;  %v9937_v53 = vld [vmem:[#allocation5 + $0x7f4] ss:$8 sps:$4 sm:$0xff]  }
 0x20b   :  { %3668 = vmatprep.subr.bf16.mxu0 %v9856_v54  ;;  %v9935_v54 = vld [vmem:[#allocation5 + $0x7f0] ss:$8 sps:$4 sm:$0xff]  }
 0x20e   :  { %3669 = vmatpush1.bf16.msra.mxu0 %v9854_v55  ;;  %v213_v55 = vcombine.high %v10775_v52, %v10775_v52 }
 0x20f   :  { %3670 = vmatprep.subr.bf16.mxu0 %v9859_v56  ;;  %v9941_v56 = vld [vmem:[#allocation5 + $0x804] ss:$8 sps:$4 sm:$0xff]  }
 0x212   :  { %3671 = vmatpush1.bf16.msra.mxu0 %v9857_v57  ;;  %v312_v57 = vpack.c.bf16 %v10765_v14, %v10765_v14  ;;  %v9966_v14 = vld [vmem:[#allocation5 + $0x890] ss:$8 sps:$4 sm:$0xff]  }
 0x213   :  { %3672 = vmatprep.subr.bf16.mxu0 %v9862_v58  ;;  %v9939_v58 = vld [vmem:[#allocation5 + $0x800] ss:$8 sps:$4 sm:$0xff]  }
 0x216   :  { %3673 = vmatpush1.bf16.msra.mxu0 %v9860_v59  ;;  %v315_v59 = vpack.c.bf16 %v213_v55, %v213_v55  ;;  %v10022_v55 = vld [vmem:[#allocation5 + $0x9b4] ss:$8 sps:$4 sm:$0xff]  }
 0x217   :  { %3674 = vmatprep.subr.bf16.mxu0 %v9865_v60  ;;  %v9944_v60 = vld [vmem:[#allocation5 + $0x814] ss:$8 sps:$4 sm:$0xff]  }
 0x21a   :  { %3675 = vmatpush1.bf16.msra.mxu0 %v9863_v61  ;;  %v9942_v61 = vld [vmem:[#allocation5 + $0x810] ss:$8 sps:$4 sm:$0xff]  }
 0x21b   :  { %3676 = vmatprep.subr.bf16.mxu0 %v9868_v62  ;;  %v9947_v62 = vld [vmem:[#allocation5 + $0x824] ss:$8 sps:$4 sm:$0xff]  }
 0x21e   :  { %3677 = vmatpush1.bf16.msra.mxu0 %v9866_v63  ;;  %v9945_v63 = vld [vmem:[#allocation5 + $0x820] ss:$8 sps:$4 sm:$0xff]  }
 0x21f   :  { %3678 = vmatprep.subr.bf16.mxu0 %v9871_v0  ;;  %v9950_v0 = vld [vmem:[#allocation5 + $0x834] ss:$8 sps:$4 sm:$0xff]  }
 0x222   :  { %3679 = vmatpush1.bf16.msra.mxu0 %v9869_v1  ;;  %v9948_v1 = vld [vmem:[#allocation5 + $0x830] ss:$8 sps:$4 sm:$0xff]  }
 0x223   :  { %3680 = vmatprep.subr.bf16.mxu0 %v9874_v2  ;;  %v9953_v2 = vld [vmem:[#allocation5 + $0x844] ss:$8 sps:$4 sm:$0xff]  }
 0x226   :  { %3681 = vmatpush1.bf16.msra.mxu0 %v9872_v3  ;;  %v9951_v3 = vld [vmem:[#allocation5 + $0x840] ss:$8 sps:$4 sm:$0xff]  }
 0x227   :  { %3682 = vmatprep.subr.bf16.mxu0 %v9877_v4  ;;  %v9956_v4 = vld [vmem:[#allocation5 + $0x854] ss:$8 sps:$4 sm:$0xff]  }
 0x22a   :  { %3683 = vmatpush1.bf16.msra.mxu0 %v9875_v5  ;;  %v9954_v5 = vld [vmem:[#allocation5 + $0x850] ss:$8 sps:$4 sm:$0xff]  }
 0x22b   :  { %3684 = vmatprep.subr.bf16.mxu0 %v9880_v6  ;;  %v9959_v6 = vld [vmem:[#allocation5 + $0x864] ss:$8 sps:$4 sm:$0xff]  }
 0x22e   :  { %3685 = vmatpush1.bf16.msra.mxu0 %v9878_v7  ;;  %v9957_v7 = vld [vmem:[#allocation5 + $0x860] ss:$8 sps:$4 sm:$0xff]  }
 0x22f   :  { %3686 = vmatprep.subr.bf16.mxu0 %v9883_v8  ;;  %v9962_v8 = vld [vmem:[#allocation5 + $0x874] ss:$8 sps:$4 sm:$0xff]  }
 0x232   :  { %3687 = vmatpush1.bf16.msra.mxu0 %v9881_v9  ;;  %v9960_v9 = vld [vmem:[#allocation5 + $0x870] ss:$8 sps:$4 sm:$0xff]  }
 0x233   :  { %3688 = vmatprep.subr.bf16.mxu0 %v9886_v11  ;;  %v9963_v11 = vld [vmem:[#allocation5 + $0x880] ss:$8 sps:$4 sm:$0xff]  }
 0x236   :  { %3689 = vmatpush1.bf16.msra.mxu0 %v9884_v12  ;;  %v9968_v12 = vld [vmem:[#allocation5 + $0x894] ss:$8 sps:$4 sm:$0xff]  }
 0x237   :  { %3690 = vmatprep.subr.bf16.mxu0 %v9889_v15  ;;  %v9971_v15 = vld [vmem:[#allocation5 + $0x8a4] ss:$8 sps:$4 sm:$0xff]  }
 0x23a   :  { %3691 = vmatpush1.bf16.msra.mxu0 %v9887_v17  ;;  %v9969_v17 = vld [vmem:[#allocation5 + $0x8a0] ss:$8 sps:$4 sm:$0xff]  }
 0x23b   :  { %3701 = vmatprep.subr.bf16.mxu0 %v9892_v19  ;;  %v9972_v19 = vld [vmem:[#allocation5 + $0x8b0] ss:$8 sps:$4 sm:$0xff]  }
 0x23d   :  { %3693 = vmatmul.mubr.bf16.vlgmr.msra.gmra.mrb[0].mxu0 %v310_v20  ;;  %v9977_v20 = vld [vmem:[#allocation5 + $0x8c4] ss:$8 sps:$4 sm:$0xff]  }
 0x23e   :  { %3702 = vmatpush1.bf16.msra.mxu0 %v9890_v21  ;;  %3733 = vmatprep.mubr.bf16.mxu0 %v313_v22  ;;  %v9975_v21 = vld [vmem:[#allocation5 + $0x8c0] ss:$8 sps:$4 sm:$0xff]   ;;  %v9980_v22 = vld [vmem:[#allocation5 + $0x8d4] ss:$8 sps:$4 sm:$0xff]  }
 0x23f   :  { %3703 = vmatprep.subr.bf16.mxu0 %v9895_v23  ;;  %v9978_v23 = vld [vmem:[#allocation5 + $0x8d0] ss:$8 sps:$4 sm:$0xff]  }
 0x242   :  { %3704 = vmatpush1.bf16.msra.mxu0 %v9893_v24  ;;  %v198_v24 = vcombine.high %v10771_v50, %v10771_v50  ;;  %v10011_v50 = vld [vmem:[#allocation5 + $0x980] ss:$8 sps:$4 sm:$0xff]  }
 0x243   :  { %3705 = vmatprep.subr.bf16.mxu0 %v9898_v25  ;;  %v9983_v25 = vld [vmem:[#allocation5 + $0x8e4] ss:$8 sps:$4 sm:$0xff]  }
 0x246   :  { %3706 = vmatpush1.bf16.msra.mxu0 %v9896_v26  ;;  %v9981_v26 = vld [vmem:[#allocation5 + $0x8e0] ss:$8 sps:$4 sm:$0xff]  }
 0x247   :  { %3707 = vmatprep.subr.bf16.mxu0 %v9901_v27  ;;  %v10784_v27 = vrot.slane %v198_v24, %v10706_v16  ;;  %v10062_v24 = vld [vmem:[#allocation5 + $0xa84] ss:$8 sps:$4 sm:$0xff]  }
 0x24a   :  { %3708 = vmatpush1.bf16.msra.mxu0 %v9899_v28  ;;  %v9986_v28 = vld [vmem:[#allocation5 + $0x8f4] ss:$8 sps:$4 sm:$0xff]  }
 0x24b   :  { %3709 = vmatprep.subr.bf16.mxu0 %v9904_v29  ;;  %v9984_v29 = vld [vmem:[#allocation5 + $0x8f0] ss:$8 sps:$4 sm:$0xff]  }
 0x24e   :  { %3710 = vmatpush1.bf16.msra.mxu0 %v9902_v30  ;;  %v214_v30 = vcombine.high %v10784_v27, %v10784_v27 }
 0x24f   :  { %3711 = vmatprep.subr.bf16.mxu0 %v9907_v31  ;;  %v9989_v31 = vld [vmem:[#allocation5 + $0x904] ss:$8 sps:$4 sm:$0xff]  }
 0x252   :  { %3712 = vmatpush1.bf16.msra.mxu0 %v9905_v32  ;;  %v314_v32 = vpack.c.bf16 %v10775_v52, %v10775_v52  ;;  %v10014_v52 = vld [vmem:[#allocation5 + $0x990] ss:$8 sps:$4 sm:$0xff]  }
 0x253   :  { %3713 = vmatprep.subr.bf16.mxu0 %v9910_v33  ;;  %v9987_v33 = vld [vmem:[#allocation5 + $0x900] ss:$8 sps:$4 sm:$0xff]  }
 0x256   :  { %3714 = vmatpush1.bf16.msra.mxu0 %v9908_v34  ;;  %v317_v34 = vpack.c.bf16 %v214_v30, %v214_v30  ;;  %v10071_v30 = vld [vmem:[#allocation5 + $0xab4] ss:$8 sps:$4 sm:$0xff]  }
 0x257   :  { %3715 = vmatprep.subr.bf16.mxu0 %v9913_v35  ;;  %v9992_v35 = vld [vmem:[#allocation5 + $0x914] ss:$8 sps:$4 sm:$0xff]  }
 0x25a   :  { %3716 = vmatpush1.bf16.msra.mxu0 %v9911_v36  ;;  %v9990_v36 = vld [vmem:[#allocation5 + $0x910] ss:$8 sps:$4 sm:$0xff]  }
 0x25b   :  { %3717 = vmatprep.subr.bf16.mxu0 %v9916_v37  ;;  %v9995_v37 = vld [vmem:[#allocation5 + $0x924] ss:$8 sps:$4 sm:$0xff]  }
 0x25e   :  { %3718 = vmatpush1.bf16.msra.mxu0 %v9914_v38  ;;  %v9993_v38 = vld [vmem:[#allocation5 + $0x920] ss:$8 sps:$4 sm:$0xff]  }
 0x25f   :  { %3719 = vmatprep.subr.bf16.mxu0 %v9919_v39  ;;  %v9998_v39 = vld [vmem:[#allocation5 + $0x934] ss:$8 sps:$4 sm:$0xff]  }
 0x262   :  { %3720 = vmatpush1.bf16.msra.mxu0 %v9917_v40  ;;  %v9996_v40 = vld [vmem:[#allocation5 + $0x930] ss:$8 sps:$4 sm:$0xff]  }
 0x263   :  { %3721 = vmatprep.subr.bf16.mxu0 %v9922_v41  ;;  %v10001_v41 = vld [vmem:[#allocation5 + $0x944] ss:$8 sps:$4 sm:$0xff]  }
 0x266   :  { %3722 = vmatpush1.bf16.msra.mxu0 %v9920_v42  ;;  %v9999_v42 = vld [vmem:[#allocation5 + $0x940] ss:$8 sps:$4 sm:$0xff]  }
 0x267   :  { %3723 = vmatprep.subr.bf16.mxu0 %v9925_v43  ;;  %v10004_v43 = vld [vmem:[#allocation5 + $0x954] ss:$8 sps:$4 sm:$0xff]  }
 0x26a   :  { %3724 = vmatpush1.bf16.msra.mxu0 %v9923_v44  ;;  %v10002_v44 = vld [vmem:[#allocation5 + $0x950] ss:$8 sps:$4 sm:$0xff]  }
 0x26b   :  { %3725 = vmatprep.subr.bf16.mxu0 %v9928_v45  ;;  %v10007_v45 = vld [vmem:[#allocation5 + $0x964] ss:$8 sps:$4 sm:$0xff]  }
 0x26e   :  { %3726 = vmatpush1.bf16.msra.mxu0 %v9926_v46  ;;  %v10005_v46 = vld [vmem:[#allocation5 + $0x960] ss:$8 sps:$4 sm:$0xff]  }
 0x26f   :  { %3727 = vmatprep.subr.bf16.mxu0 %v9931_v47  ;;  %v10010_v47 = vld [vmem:[#allocation5 + $0x974] ss:$8 sps:$4 sm:$0xff]  }
 0x272   :  { %3728 = vmatpush1.bf16.msra.mxu0 %v9929_v48  ;;  %v10008_v48 = vld [vmem:[#allocation5 + $0x970] ss:$8 sps:$4 sm:$0xff]  }
 0x273   :  { %3729 = vmatprep.subr.bf16.mxu0 %v9934_v49  ;;  %v10013_v49 = vld [vmem:[#allocation5 + $0x984] ss:$8 sps:$4 sm:$0xff]  }
 0x276   :  { %3730 = vmatpush1.bf16.msra.mxu0 %v9932_v51  ;;  %v10016_v51 = vld [vmem:[#allocation5 + $0x994] ss:$8 sps:$4 sm:$0xff]  }
 0x277   :  { %3731 = vmatprep.subr.bf16.mxu0 %v9937_v53  ;;  %v10019_v53 = vld [vmem:[#allocation5 + $0x9a4] ss:$8 sps:$4 sm:$0xff]  }
 0x27a   :  { %3732 = vmatpush1.bf16.msra.mxu0 %v9935_v54  ;;  %v10017_v54 = vld [vmem:[#allocation5 + $0x9a0] ss:$8 sps:$4 sm:$0xff]  }
 0x27b   :  { %3742 = vmatprep.subr.bf16.mxu0 %v9941_v56  ;;  %v10020_v56 = vld [vmem:[#allocation5 + $0x9b0] ss:$8 sps:$4 sm:$0xff]  }
 0x27d   :  { %3734 = vmatmul.mubr.bf16.vlgmr.msra.gmra.mrb[0].mxu0 %v312_v57  ;;  %v10025_v57 = vld [vmem:[#allocation5 + $0x9c4] ss:$8 sps:$4 sm:$0xff]  }
 0x27e   :  { %3743 = vmatpush1.bf16.msra.mxu0 %v9939_v58  ;;  %3774 = vmatprep.mubr.bf16.mxu0 %v315_v59  ;;  %v10023_v58 = vld [vmem:[#allocation5 + $0x9c0] ss:$8 sps:$4 sm:$0xff]   ;;  %v10028_v59 = vld [vmem:[#allocation5 + $0x9d4] ss:$8 sps:$4 sm:$0xff]  }
 0x27f   :  { %3744 = vmatprep.subr.bf16.mxu0 %v9944_v60  ;;  %v10026_v60 = vld [vmem:[#allocation5 + $0x9d0] ss:$8 sps:$4 sm:$0xff]  }
 0x282   :  { %3745 = vmatpush1.bf16.msra.mxu0 %v9942_v61  ;;  %v10031_v61 = vld [vmem:[#allocation5 + $0x9e4] ss:$8 sps:$4 sm:$0xff]  }
 0x283   :  { %3746 = vmatprep.subr.bf16.mxu0 %v9947_v62  ;;  %v10790_v62 = vld [vmem:[#allocation2 + $0x28] sm:$0xff] }
 0x286   :  { %3747 = vmatpush1.bf16.msra.mxu0 %v9945_v63  ;;  %v10029_v63 = vld [vmem:[#allocation5 + $0x9e0] ss:$8 sps:$4 sm:$0xff]  }
 0x287   :  { %3748 = vmatprep.subr.bf16.mxu0 %v9950_v0  ;;  %v10794_v0 = vrot.slane %v10790_v62, %v10706_v16 }
 0x28a   :  { %3749 = vmatpush1.bf16.msra.mxu0 %v9948_v1  ;;  %v10034_v1 = vld [vmem:[#allocation5 + $0x9f4] ss:$8 sps:$4 sm:$0xff]  }
 0x28b   :  { %3750 = vmatprep.subr.bf16.mxu0 %v9953_v2  ;;  %v10032_v2 = vld [vmem:[#allocation5 + $0x9f0] ss:$8 sps:$4 sm:$0xff]  }
 0x28e   :  { %3751 = vmatpush1.bf16.msra.mxu0 %v9951_v3  ;;  %v230_v3 = vcombine.high %v10794_v0, %v10794_v0 }
 0x28f   :  { %3752 = vmatprep.subr.bf16.mxu0 %v9956_v4  ;;  %v10038_v4 = vld [vmem:[#allocation5 + $0xa04] ss:$8 sps:$4 sm:$0xff]  }
 0x292   :  { %3753 = vmatpush1.bf16.msra.mxu0 %v9954_v5  ;;  %v316_v5 = vpack.c.bf16 %v10784_v27, %v10784_v27  ;;  %v10063_v27 = vld [vmem:[#allocation5 + $0xa90] ss:$8 sps:$4 sm:$0xff]  }
 0x293   :  { %3754 = vmatprep.subr.bf16.mxu0 %v9959_v6  ;;  %v10036_v6 = vld [vmem:[#allocation5 + $0xa00] ss:$8 sps:$4 sm:$0xff]  }
 0x296   :  { %3755 = vmatpush1.bf16.msra.mxu0 %v9957_v7  ;;  %v319_v7 = vpack.c.bf16 %v230_v3, %v230_v3  ;;  %v10119_v3 = vld [vmem:[#allocation5 + $0xbb4] ss:$8 sps:$4 sm:$0xff]  }
 0x297   :  { %3756 = vmatprep.subr.bf16.mxu0 %v9962_v8  ;;  %v10041_v8 = vld [vmem:[#allocation5 + $0xa14] ss:$8 sps:$4 sm:$0xff]  }
 0x29a   :  { %3757 = vmatpush1.bf16.msra.mxu0 %v9960_v9  ;;  %v10039_v9 = vld [vmem:[#allocation5 + $0xa10] ss:$8 sps:$4 sm:$0xff]  }
 0x29b   :  { %3758 = vmatprep.subr.bf16.mxu0 %v9965_v10  ;;  %v10044_v10 = vld [vmem:[#allocation5 + $0xa24] ss:$8 sps:$4 sm:$0xff]  }
 0x29e   :  { %3759 = vmatpush1.bf16.msra.mxu0 %v9963_v11  ;;  %v10042_v11 = vld [vmem:[#allocation5 + $0xa20] ss:$8 sps:$4 sm:$0xff]  }
 0x29f   :  { %3760 = vmatprep.subr.bf16.mxu0 %v9968_v12  ;;  %v10047_v12 = vld [vmem:[#allocation5 + $0xa34] ss:$8 sps:$4 sm:$0xff]  }
 0x2a2   :  { %3761 = vmatpush1.bf16.msra.mxu0 %v9966_v14  ;;  %v10045_v14 = vld [vmem:[#allocation5 + $0xa30] ss:$8 sps:$4 sm:$0xff]  }
 0x2a3   :  { %3762 = vmatprep.subr.bf16.mxu0 %v9971_v15  ;;  %v10050_v15 = vld [vmem:[#allocation5 + $0xa44] ss:$8 sps:$4 sm:$0xff]  }
 0x2a6   :  { %3763 = vmatpush1.bf16.msra.mxu0 %v9969_v17  ;;  %v10048_v17 = vld [vmem:[#allocation5 + $0xa40] ss:$8 sps:$4 sm:$0xff]  }
 0x2a7   :  { %3764 = vmatprep.subr.bf16.mxu0 %v9974_v18  ;;  %v10053_v18 = vld [vmem:[#allocation5 + $0xa54] ss:$8 sps:$4 sm:$0xff]  }
 0x2aa   :  { %3765 = vmatpush1.bf16.msra.mxu0 %v9972_v19  ;;  %v10051_v19 = vld [vmem:[#allocation5 + $0xa50] ss:$8 sps:$4 sm:$0xff]  }
 0x2ab   :  { %3766 = vmatprep.subr.bf16.mxu0 %v9977_v20  ;;  %v10056_v20 = vld [vmem:[#allocation5 + $0xa64] ss:$8 sps:$4 sm:$0xff]  }
 0x2ae   :  { %3767 = vmatpush1.bf16.msra.mxu0 %v9975_v21  ;;  %v10054_v21 = vld [vmem:[#allocation5 + $0xa60] ss:$8 sps:$4 sm:$0xff]  }
 0x2af   :  { %3768 = vmatprep.subr.bf16.mxu0 %v9980_v22  ;;  %v10059_v22 = vld [vmem:[#allocation5 + $0xa74] ss:$8 sps:$4 sm:$0xff]  }
 0x2b2   :  { %3769 = vmatpush1.bf16.msra.mxu0 %v9978_v23  ;;  %v10057_v23 = vld [vmem:[#allocation5 + $0xa70] ss:$8 sps:$4 sm:$0xff]  }
 0x2b3   :  { %3770 = vmatprep.subr.bf16.mxu0 %v9983_v25  ;;  %v10060_v25 = vld [vmem:[#allocation5 + $0xa80] ss:$8 sps:$4 sm:$0xff]  }
 0x2b6   :  { %3771 = vmatpush1.bf16.msra.mxu0 %v9981_v26  ;;  %v10065_v26 = vld [vmem:[#allocation5 + $0xa94] ss:$8 sps:$4 sm:$0xff]  }
 0x2b7   :  { %3772 = vmatprep.subr.bf16.mxu0 %v9986_v28  ;;  %v10068_v28 = vld [vmem:[#allocation5 + $0xaa4] ss:$8 sps:$4 sm:$0xff]  }
 0x2ba   :  { %3773 = vmatpush1.bf16.msra.mxu0 %v9984_v29  ;;  %v10066_v29 = vld [vmem:[#allocation5 + $0xaa0] ss:$8 sps:$4 sm:$0xff]  }
 0x2bb   :  { %3783 = vmatprep.subr.bf16.mxu0 %v9989_v31  ;;  %v10069_v31 = vld [vmem:[#allocation5 + $0xab0] ss:$8 sps:$4 sm:$0xff]  }
 0x2bd   :  { %3775 = vmatmul.mubr.bf16.vlgmr.msra.gmra.mrb[0].mxu0 %v314_v32  ;;  %v10074_v32 = vld [vmem:[#allocation5 + $0xac4] ss:$8 sps:$4 sm:$0xff]  }
 0x2be   :  { %3784 = vmatpush1.bf16.msra.mxu0 %v9987_v33  ;;  %3815 = vmatprep.mubr.bf16.mxu0 %v317_v34  ;;  %v10072_v33 = vld [vmem:[#allocation5 + $0xac0] ss:$8 sps:$4 sm:$0xff]   ;;  %v10077_v34 = vld [vmem:[#allocation5 + $0xad4] ss:$8 sps:$4 sm:$0xff]  }
 0x2bf   :  { %3785 = vmatprep.subr.bf16.mxu0 %v9992_v35  ;;  %v10075_v35 = vld [vmem:[#allocation5 + $0xad0] ss:$8 sps:$4 sm:$0xff]  }
 0x2c2   :  { %3786 = vmatpush1.bf16.msra.mxu0 %v9990_v36  ;;  %v215_v36 = vcombine.high %v10790_v62, %v10790_v62  ;;  %v10108_v62 = vld [vmem:[#allocation5 + $0xb80] ss:$8 sps:$4 sm:$0xff]  }
 0x2c3   :  { %3787 = vmatprep.subr.bf16.mxu0 %v9995_v37  ;;  %v10080_v37 = vld [vmem:[#allocation5 + $0xae4] ss:$8 sps:$4 sm:$0xff]  }
 0x2c6   :  { %3788 = vmatpush1.bf16.msra.mxu0 %v9993_v38  ;;  %v10078_v38 = vld [vmem:[#allocation5 + $0xae0] ss:$8 sps:$4 sm:$0xff]  }
 0x2c7   :  { %3789 = vmatprep.subr.bf16.mxu0 %v9998_v39  ;;  %v10803_v39 = vrot.slane %v215_v36, %v10706_v16  ;;  %v10159_v36 = vld [vmem:[#allocation5 + $0xc84] ss:$8 sps:$4 sm:$0xff]  }
 0x2ca   :  { %3790 = vmatpush1.bf16.msra.mxu0 %v9996_v40  ;;  %v10083_v40 = vld [vmem:[#allocation5 + $0xaf4] ss:$8 sps:$4 sm:$0xff]  }
 0x2cb   :  { %3791 = vmatprep.subr.bf16.mxu0 %v10001_v41  ;;  %v10081_v41 = vld [vmem:[#allocation5 + $0xaf0] ss:$8 sps:$4 sm:$0xff]  }
 0x2ce   :  { %3792 = vmatpush1.bf16.msra.mxu0 %v9999_v42  ;;  %v231_v42 = vcombine.high %v10803_v39, %v10803_v39 }
 0x2cf   :  { %3793 = vmatprep.subr.bf16.mxu0 %v10004_v43  ;;  %v10086_v43 = vld [vmem:[#allocation5 + $0xb04] ss:$8 sps:$4 sm:$0xff]  }
 0x2d2   :  { %3794 = vmatpush1.bf16.msra.mxu0 %v10002_v44  ;;  %v318_v44 = vpack.c.bf16 %v10794_v0, %v10794_v0  ;;  %v10111_v0 = vld [vmem:[#allocation5 + $0xb90] ss:$8 sps:$4 sm:$0xff]  }
 0x2d3   :  { %3795 = vmatprep.subr.bf16.mxu0 %v10007_v45  ;;  %v10084_v45 = vld [vmem:[#allocation5 + $0xb00] ss:$8 sps:$4 sm:$0xff]  }
 0x2d6   :  { %3796 = vmatpush1.bf16.msra.mxu0 %v10005_v46  ;;  %v321_v46 = vpack.c.bf16 %v231_v42, %v231_v42  ;;  %v10168_v42 = vld [vmem:[#allocation5 + $0xcb4] ss:$8 sps:$4 sm:$0xff]  }
 0x2d7   :  { %3797 = vmatprep.subr.bf16.mxu0 %v10010_v47  ;;  %v10089_v47 = vld [vmem:[#allocation5 + $0xb14] ss:$8 sps:$4 sm:$0xff]  }
 0x2da   :  { %3798 = vmatpush1.bf16.msra.mxu0 %v10008_v48  ;;  %v10087_v48 = vld [vmem:[#allocation5 + $0xb10] ss:$8 sps:$4 sm:$0xff]  }
 0x2db   :  { %3799 = vmatprep.subr.bf16.mxu0 %v10013_v49  ;;  %v10092_v49 = vld [vmem:[#allocation5 + $0xb24] ss:$8 sps:$4 sm:$0xff]  }
 0x2de   :  { %3800 = vmatpush1.bf16.msra.mxu0 %v10011_v50  ;;  %v10090_v50 = vld [vmem:[#allocation5 + $0xb20] ss:$8 sps:$4 sm:$0xff]  }
 0x2df   :  { %3801 = vmatprep.subr.bf16.mxu0 %v10016_v51  ;;  %v10095_v51 = vld [vmem:[#allocation5 + $0xb34] ss:$8 sps:$4 sm:$0xff]  }
 0x2e2   :  { %3802 = vmatpush1.bf16.msra.mxu0 %v10014_v52  ;;  %v10093_v52 = vld [vmem:[#allocation5 + $0xb30] ss:$8 sps:$4 sm:$0xff]  }
 0x2e3   :  { %3803 = vmatprep.subr.bf16.mxu0 %v10019_v53  ;;  %v10098_v53 = vld [vmem:[#allocation5 + $0xb44] ss:$8 sps:$4 sm:$0xff]  }
 0x2e6   :  { %3804 = vmatpush1.bf16.msra.mxu0 %v10017_v54  ;;  %v10096_v54 = vld [vmem:[#allocation5 + $0xb40] ss:$8 sps:$4 sm:$0xff]  }
 0x2e7   :  { %3805 = vmatprep.subr.bf16.mxu0 %v10022_v55  ;;  %v10101_v55 = vld [vmem:[#allocation5 + $0xb54] ss:$8 sps:$4 sm:$0xff]  }
 0x2ea   :  { %3806 = vmatpush1.bf16.msra.mxu0 %v10020_v56  ;;  %v10099_v56 = vld [vmem:[#allocation5 + $0xb50] ss:$8 sps:$4 sm:$0xff]  }
 0x2eb   :  { %3807 = vmatprep.subr.bf16.mxu0 %v10025_v57  ;;  %v10104_v57 = vld [vmem:[#allocation5 + $0xb64] ss:$8 sps:$4 sm:$0xff]  }
 0x2ee   :  { %3808 = vmatpush1.bf16.msra.mxu0 %v10023_v58  ;;  %v10102_v58 = vld [vmem:[#allocation5 + $0xb60] ss:$8 sps:$4 sm:$0xff]  }
 0x2ef   :  { %3809 = vmatprep.subr.bf16.mxu0 %v10028_v59  ;;  %v10107_v59 = vld [vmem:[#allocation5 + $0xb74] ss:$8 sps:$4 sm:$0xff]  }
 0x2f2   :  { %3810 = vmatpush1.bf16.msra.mxu0 %v10026_v60  ;;  %v10105_v60 = vld [vmem:[#allocation5 + $0xb70] ss:$8 sps:$4 sm:$0xff]  }
 0x2f3   :  { %3811 = vmatprep.subr.bf16.mxu0 %v10031_v61  ;;  %v10110_v61 = vld [vmem:[#allocation5 + $0xb84] ss:$8 sps:$4 sm:$0xff]  }
 0x2f6   :  { %3812 = vmatpush1.bf16.msra.mxu0 %v10029_v63  ;;  %v10113_v63 = vld [vmem:[#allocation5 + $0xb94] ss:$8 sps:$4 sm:$0xff]  }
 0x2f7   :  { %3813 = vmatprep.subr.bf16.mxu0 %v10034_v1  ;;  %v10116_v1 = vld [vmem:[#allocation5 + $0xba4] ss:$8 sps:$4 sm:$0xff]  }
 0x2fa   :  { %3814 = vmatpush1.bf16.msra.mxu0 %v10032_v2  ;;  %v10114_v2 = vld [vmem:[#allocation5 + $0xba0] ss:$8 sps:$4 sm:$0xff]  }
 0x2fb   :  { %3824 = vmatprep.subr.bf16.mxu0 %v10038_v4  ;;  %v10117_v4 = vld [vmem:[#allocation5 + $0xbb0] ss:$8 sps:$4 sm:$0xff]  }
 0x2fd   :  { %3816 = vmatmul.mubr.bf16.vlgmr.msra.gmra.mrb[0].mxu0 %v316_v5  ;;  %v10122_v5 = vld [vmem:[#allocation5 + $0xbc4] ss:$8 sps:$4 sm:$0xff]  }
 0x2fe   :  { %3825 = vmatpush1.bf16.msra.mxu0 %v10036_v6  ;;  %3856 = vmatprep.mubr.bf16.mxu0 %v319_v7  ;;  %v10120_v6 = vld [vmem:[#allocation5 + $0xbc0] ss:$8 sps:$4 sm:$0xff]   ;;  %v10125_v7 = vld [vmem:[#allocation5 + $0xbd4] ss:$8 sps:$4 sm:$0xff]  }
 0x2ff   :  { %3826 = vmatprep.subr.bf16.mxu0 %v10041_v8  ;;  %v10123_v8 = vld [vmem:[#allocation5 + $0xbd0] ss:$8 sps:$4 sm:$0xff]  }
 0x302   :  { %3827 = vmatpush1.bf16.msra.mxu0 %v10039_v9  ;;  %v10128_v9 = vld [vmem:[#allocation5 + $0xbe4] ss:$8 sps:$4 sm:$0xff]  }
 0x303   :  { %3828 = vmatprep.subr.bf16.mxu0 %v10044_v10  ;;  %v10809_v10 = vld [vmem:[#allocation2 + $0x30] sm:$0xff] }
 0x306   :  { %3829 = vmatpush1.bf16.msra.mxu0 %v10042_v11  ;;  %v10126_v11 = vld [vmem:[#allocation5 + $0xbe0] ss:$8 sps:$4 sm:$0xff]  }
 0x307   :  { %3830 = vmatprep.subr.bf16.mxu0 %v10047_v12  ;;  %v10813_v12 = vrot.slane %v10809_v10, %v10706_v16 }
 0x30a   :  { %3831 = vmatpush1.bf16.msra.mxu0 %v10045_v14  ;;  %v10131_v14 = vld [vmem:[#allocation5 + $0xbf4] ss:$8 sps:$4 sm:$0xff]  }
 0x30b   :  { %3832 = vmatprep.subr.bf16.mxu0 %v10050_v15  ;;  %v10129_v15 = vld [vmem:[#allocation5 + $0xbf0] ss:$8 sps:$4 sm:$0xff]  }
 0x30e   :  { %3833 = vmatpush1.bf16.msra.mxu0 %v10048_v17  ;;  %v247_v17 = vcombine.high %v10813_v12, %v10813_v12 }
 0x30f   :  { %3834 = vmatprep.subr.bf16.mxu0 %v10053_v18  ;;  %v10135_v18 = vld [vmem:[#allocation5 + $0xc04] ss:$8 sps:$4 sm:$0xff]  }
 0x312   :  { %3835 = vmatpush1.bf16.msra.mxu0 %v10051_v19  ;;  %v320_v19 = vpack.c.bf16 %v10803_v39, %v10803_v39  ;;  %v10160_v39 = vld [vmem:[#allocation5 + $0xc90] ss:$8 sps:$4 sm:$0xff]  }
 0x313   :  { %3836 = vmatprep.subr.bf16.mxu0 %v10056_v20  ;;  %v10133_v20 = vld [vmem:[#allocation5 + $0xc00] ss:$8 sps:$4 sm:$0xff]  }
 0x316   :  { %3837 = vmatpush1.bf16.msra.mxu0 %v10054_v21  ;;  %v323_v21 = vpack.c.bf16 %v247_v17, %v247_v17  ;;  %v10216_v17 = vld [vmem:[#allocation5 + $0xdb4] ss:$8 sps:$4 sm:$0xff]  }
 0x317   :  { %3838 = vmatprep.subr.bf16.mxu0 %v10059_v22  ;;  %v10138_v22 = vld [vmem:[#allocation5 + $0xc14] ss:$8 sps:$4 sm:$0xff]  }
 0x31a   :  { %3839 = vmatpush1.bf16.msra.mxu0 %v10057_v23  ;;  %v10136_v23 = vld [vmem:[#allocation5 + $0xc10] ss:$8 sps:$4 sm:$0xff]  }
 0x31b   :  { %3840 = vmatprep.subr.bf16.mxu0 %v10062_v24  ;;  %v10141_v24 = vld [vmem:[#allocation5 + $0xc24] ss:$8 sps:$4 sm:$0xff]  }
 0x31e   :  { %3841 = vmatpush1.bf16.msra.mxu0 %v10060_v25  ;;  %v10139_v25 = vld [vmem:[#allocation5 + $0xc20] ss:$8 sps:$4 sm:$0xff]  }
 0x31f   :  { %3842 = vmatprep.subr.bf16.mxu0 %v10065_v26  ;;  %v10144_v26 = vld [vmem:[#allocation5 + $0xc34] ss:$8 sps:$4 sm:$0xff]  }
 0x322   :  { %3843 = vmatpush1.bf16.msra.mxu0 %v10063_v27  ;;  %v10142_v27 = vld [vmem:[#allocation5 + $0xc30] ss:$8 sps:$4 sm:$0xff]  }
 0x323   :  { %3844 = vmatprep.subr.bf16.mxu0 %v10068_v28  ;;  %v10147_v28 = vld [vmem:[#allocation5 + $0xc44] ss:$8 sps:$4 sm:$0xff]  }
 0x326   :  { %3845 = vmatpush1.bf16.msra.mxu0 %v10066_v29  ;;  %v10145_v29 = vld [vmem:[#allocation5 + $0xc40] ss:$8 sps:$4 sm:$0xff]  }
 0x327   :  { %3846 = vmatprep.subr.bf16.mxu0 %v10071_v30  ;;  %v10150_v30 = vld [vmem:[#allocation5 + $0xc54] ss:$8 sps:$4 sm:$0xff]  }
 0x32a   :  { %3847 = vmatpush1.bf16.msra.mxu0 %v10069_v31  ;;  %v10148_v31 = vld [vmem:[#allocation5 + $0xc50] ss:$8 sps:$4 sm:$0xff]  }
 0x32b   :  { %3848 = vmatprep.subr.bf16.mxu0 %v10074_v32  ;;  %v10153_v32 = vld [vmem:[#allocation5 + $0xc64] ss:$8 sps:$4 sm:$0xff]  }
 0x32e   :  { %3849 = vmatpush1.bf16.msra.mxu0 %v10072_v33  ;;  %v10151_v33 = vld [vmem:[#allocation5 + $0xc60] ss:$8 sps:$4 sm:$0xff]  }
 0x32f   :  { %3850 = vmatprep.subr.bf16.mxu0 %v10077_v34  ;;  %v10156_v34 = vld [vmem:[#allocation5 + $0xc74] ss:$8 sps:$4 sm:$0xff]  }
 0x332   :  { %3851 = vmatpush1.bf16.msra.mxu0 %v10075_v35  ;;  %v10154_v35 = vld [vmem:[#allocation5 + $0xc70] ss:$8 sps:$4 sm:$0xff]  }
 0x333   :  { %3852 = vmatprep.subr.bf16.mxu0 %v10080_v37  ;;  %v10157_v37 = vld [vmem:[#allocation5 + $0xc80] ss:$8 sps:$4 sm:$0xff]  }
 0x336   :  { %3853 = vmatpush1.bf16.msra.mxu0 %v10078_v38  ;;  %v10162_v38 = vld [vmem:[#allocation5 + $0xc94] ss:$8 sps:$4 sm:$0xff]  }
 0x337   :  { %3854 = vmatprep.subr.bf16.mxu0 %v10083_v40  ;;  %v10165_v40 = vld [vmem:[#allocation5 + $0xca4] ss:$8 sps:$4 sm:$0xff]  }
 0x33a   :  { %3855 = vmatpush1.bf16.msra.mxu0 %v10081_v41  ;;  %v10163_v41 = vld [vmem:[#allocation5 + $0xca0] ss:$8 sps:$4 sm:$0xff]  }
 0x33b   :  { %3865 = vmatprep.subr.bf16.mxu0 %v10086_v43  ;;  %v10166_v43 = vld [vmem:[#allocation5 + $0xcb0] ss:$8 sps:$4 sm:$0xff]  }
 0x33d   :  { %3857 = vmatmul.mubr.bf16.vlgmr.msra.gmra.mrb[0].mxu0 %v318_v44  ;;  %v10171_v44 = vld [vmem:[#allocation5 + $0xcc4] ss:$8 sps:$4 sm:$0xff]  }
 0x33e   :  { %3866 = vmatpush1.bf16.msra.mxu0 %v10084_v45  ;;  %3897 = vmatprep.mubr.bf16.mxu0 %v321_v46  ;;  %v10169_v45 = vld [vmem:[#allocation5 + $0xcc0] ss:$8 sps:$4 sm:$0xff]   ;;  %v10174_v46 = vld [vmem:[#allocation5 + $0xcd4] ss:$8 sps:$4 sm:$0xff]  }
 0x33f   :  { %3867 = vmatprep.subr.bf16.mxu0 %v10089_v47  ;;  %v10172_v47 = vld [vmem:[#allocation5 + $0xcd0] ss:$8 sps:$4 sm:$0xff]  }
 0x342   :  { %3868 = vmatpush1.bf16.msra.mxu0 %v10087_v48  ;;  %v232_v48 = vcombine.high %v10809_v10, %v10809_v10  ;;  %v10205_v10 = vld [vmem:[#allocation5 + $0xd80] ss:$8 sps:$4 sm:$0xff]  }
 0x343   :  { %3869 = vmatprep.subr.bf16.mxu0 %v10092_v49  ;;  %v10177_v49 = vld [vmem:[#allocation5 + $0xce4] ss:$8 sps:$4 sm:$0xff]  }
 0x346   :  { %3870 = vmatpush1.bf16.msra.mxu0 %v10090_v50  ;;  %v10175_v50 = vld [vmem:[#allocation5 + $0xce0] ss:$8 sps:$4 sm:$0xff]  }
 0x347   :  { %3871 = vmatprep.subr.bf16.mxu0 %v10095_v51  ;;  %v10822_v51 = vrot.slane %v232_v48, %v10706_v16  ;;  %v10338_v48 = vld [vmem:[#allocation8 + $0x30] ss:$8 sps:$4 sm:$0xff]  }
 0x34a   :  { %3872 = vmatpush1.bf16.msra.mxu0 %v10093_v52  ;;  %v10180_v52 = vld [vmem:[#allocation5 + $0xcf4] ss:$8 sps:$4 sm:$0xff]  }
 0x34b   :  { %3873 = vmatprep.subr.bf16.mxu0 %v10098_v53  ;;  %v10178_v53 = vld [vmem:[#allocation5 + $0xcf0] ss:$8 sps:$4 sm:$0xff]  }
 0x34e   :  { %3874 = vmatpush1.bf16.msra.mxu0 %v10096_v54  ;;  %v248_v54 = vcombine.high %v10822_v51, %v10822_v51 }
 0x34f   :  { %3875 = vmatprep.subr.bf16.mxu0 %v10101_v55  ;;  %v10183_v55 = vld [vmem:[#allocation5 + $0xd04] ss:$8 sps:$4 sm:$0xff]  }
 0x352   :  { %3876 = vmatpush1.bf16.msra.mxu0 %v10099_v56  ;;  %v322_v56 = vpack.c.bf16 %v10813_v12, %v10813_v12  ;;  %v10208_v12 = vld [vmem:[#allocation5 + $0xd90] ss:$8 sps:$4 sm:$0xff]  }
 0x353   :  { %3877 = vmatprep.subr.bf16.mxu0 %v10104_v57  ;;  %v10181_v57 = vld [vmem:[#allocation5 + $0xd00] ss:$8 sps:$4 sm:$0xff]  }
 0x356   :  { %3878 = vmatpush1.bf16.msra.mxu0 %v10102_v58  ;;  %v325_v58 = vpack.c.bf16 %v248_v54, %v248_v54  ;;  %v10245_v54 = vld [vmem:[#allocation5 + $0xe50] ss:$8 sps:$4 sm:$0xff]  }
 0x357   :  { %3879 = vmatprep.subr.bf16.mxu0 %v10107_v59  ;;  %v10186_v59 = vld [vmem:[#allocation5 + $0xd14] ss:$8 sps:$4 sm:$0xff]  }
 0x35a   :  { %3880 = vmatpush1.bf16.msra.mxu0 %v10105_v60  ;;  %v10184_v60 = vld [vmem:[#allocation5 + $0xd10] ss:$8 sps:$4 sm:$0xff]  }
 0x35b   :  { %3881 = vmatprep.subr.bf16.mxu0 %v10110_v61  ;;  %v10189_v61 = vld [vmem:[#allocation5 + $0xd24] ss:$8 sps:$4 sm:$0xff]  }
 0x35e   :  { %3882 = vmatpush1.bf16.msra.mxu0 %v10108_v62  ;;  %v10187_v62 = vld [vmem:[#allocation5 + $0xd20] ss:$8 sps:$4 sm:$0xff]  }
 0x35f   :  { %3883 = vmatprep.subr.bf16.mxu0 %v10113_v63  ;;  %v10192_v63 = vld [vmem:[#allocation5 + $0xd34] ss:$8 sps:$4 sm:$0xff]  }
 0x362   :  { %3884 = vmatpush1.bf16.msra.mxu0 %v10111_v0  ;;  %v10190_v0 = vld [vmem:[#allocation5 + $0xd30] ss:$8 sps:$4 sm:$0xff]  }
 0x363   :  { %3885 = vmatprep.subr.bf16.mxu0 %v10116_v1  ;;  %v10195_v1 = vld [vmem:[#allocation5 + $0xd44] ss:$8 sps:$4 sm:$0xff]  }
 0x366   :  { %3886 = vmatpush1.bf16.msra.mxu0 %v10114_v2  ;;  %v10193_v2 = vld [vmem:[#allocation5 + $0xd40] ss:$8 sps:$4 sm:$0xff]  }
 0x367   :  { %3887 = vmatprep.subr.bf16.mxu0 %v10119_v3  ;;  %v10198_v3 = vld [vmem:[#allocation5 + $0xd54] ss:$8 sps:$4 sm:$0xff]  }
 0x36a   :  { %3888 = vmatpush1.bf16.msra.mxu0 %v10117_v4  ;;  %v10196_v4 = vld [vmem:[#allocation5 + $0xd50] ss:$8 sps:$4 sm:$0xff]  }
 0x36b   :  { %3889 = vmatprep.subr.bf16.mxu0 %v10122_v5  ;;  %v10201_v5 = vld [vmem:[#allocation5 + $0xd64] ss:$8 sps:$4 sm:$0xff]  }
 0x36e   :  { %3890 = vmatpush1.bf16.msra.mxu0 %v10120_v6  ;;  %v10199_v6 = vld [vmem:[#allocation5 + $0xd60] ss:$8 sps:$4 sm:$0xff]  }
 0x36f   :  { %3891 = vmatprep.subr.bf16.mxu0 %v10125_v7  ;;  %v10204_v7 = vld [vmem:[#allocation5 + $0xd74] ss:$8 sps:$4 sm:$0xff]  }
 0x372   :  { %3892 = vmatpush1.bf16.msra.mxu0 %v10123_v8  ;;  %v10202_v8 = vld [vmem:[#allocation5 + $0xd70] ss:$8 sps:$4 sm:$0xff]  }
 0x373   :  { %3893 = vmatprep.subr.bf16.mxu0 %v10128_v9  ;;  %v10207_v9 = vld [vmem:[#allocation5 + $0xd84] ss:$8 sps:$4 sm:$0xff]  }
 0x376   :  { %3894 = vmatpush1.bf16.msra.mxu0 %v10126_v11  ;;  %v10210_v11 = vld [vmem:[#allocation5 + $0xd94] ss:$8 sps:$4 sm:$0xff]  }
 0x377   :  { %3895 = vmatprep.subr.bf16.mxu0 %v10131_v14  ;;  %v10213_v14 = vld [vmem:[#allocation5 + $0xda4] ss:$8 sps:$4 sm:$0xff]  }
 0x37a   :  { %3896 = vmatpush1.bf16.msra.mxu0 %v10129_v15  ;;  %v10211_v15 = vld [vmem:[#allocation5 + $0xda0] ss:$8 sps:$4 sm:$0xff]  }
 0x37b   :  { %3906 = vmatprep.subr.bf16.mxu0 %v10135_v18  ;;  %v10214_v18 = vld [vmem:[#allocation5 + $0xdb0] ss:$8 sps:$4 sm:$0xff]  }
 0x37d   :  { %3898 = vmatmul.mubr.bf16.vlgmr.msra.gmra.mrb[0].mxu0 %v320_v19  ;;  %v10219_v19 = vld [vmem:[#allocation5 + $0xdc4] ss:$8 sps:$4 sm:$0xff]  }
 0x37e   :  { %3907 = vmatpush1.bf16.msra.mxu0 %v10133_v20  ;;  %3938 = vmatprep.mubr.bf16.mxu0 %v323_v21  ;;  %v10217_v20 = vld [vmem:[#allocation5 + $0xdc0] ss:$8 sps:$4 sm:$0xff]   ;;  %v10222_v21 = vld [vmem:[#allocation5 + $0xdd4] ss:$8 sps:$4 sm:$0xff]  }
 0x37f   :  { %3908 = vmatprep.subr.bf16.mxu0 %v10138_v22  ;;  %v10220_v22 = vld [vmem:[#allocation5 + $0xdd0] ss:$8 sps:$4 sm:$0xff]  }
 0x382   :  { %3909 = vmatpush1.bf16.msra.mxu0 %v10136_v23  ;;  %v10225_v23 = vld [vmem:[#allocation5 + $0xde4] ss:$8 sps:$4 sm:$0xff]  }
 0x383   :  { %3910 = vmatprep.subr.bf16.mxu0 %v10141_v24  ;;  %v10828_v24 = vld [vmem:[#allocation2 + $0x38] sm:$0xff] }
 0x386   :  { %3911 = vmatpush1.bf16.msra.mxu0 %v10139_v25  ;;  %v10223_v25 = vld [vmem:[#allocation5 + $0xde0] ss:$8 sps:$4 sm:$0xff]  }
 0x387   :  { %3912 = vmatprep.subr.bf16.mxu0 %v10144_v26  ;;  %v10832_v26 = vrot.slane %v10828_v24, %v10706_v16 }
 0x38a   :  { %3913 = vmatpush1.bf16.msra.mxu0 %v10142_v27  ;;  %v10228_v27 = vld [vmem:[#allocation5 + $0xdf4] ss:$8 sps:$4 sm:$0xff]  }
 0x38b   :  { %3914 = vmatprep.subr.bf16.mxu0 %v10147_v28  ;;  %v10226_v28 = vld [vmem:[#allocation5 + $0xdf0] ss:$8 sps:$4 sm:$0xff]  }
 0x38e   :  { %3915 = vmatpush1.bf16.msra.mxu0 %v10145_v29  ;;  %v264_v29 = vcombine.high %v10832_v26, %v10832_v26 }
 0x38f   :  { %3916 = vmatprep.subr.bf16.mxu0 %v10150_v30  ;;  %v10232_v30 = vld [vmem:[#allocation5 + $0xe04] ss:$8 sps:$4 sm:$0xff]  }
 0x392   :  { %3917 = vmatpush1.bf16.msra.mxu0 %v10148_v31  ;;  %v324_v31 = vpack.c.bf16 %v10822_v51, %v10822_v51  ;;  %v10247_v51 = vld [vmem:[#allocation5 + $0xe54] ss:$8 sps:$4 sm:$0xff]  }
 0x393   :  { %3918 = vmatprep.subr.bf16.mxu0 %v10153_v32  ;;  %v10230_v32 = vld [vmem:[#allocation5 + $0xe00] ss:$8 sps:$4 sm:$0xff]  }
 0x396   :  { %3919 = vmatpush1.bf16.msra.mxu0 %v10151_v33  ;;  %v327_v33 = vpack.c.bf16 %v264_v29, %v264_v29  ;;  %v10368_v29 = vld [vmem:[#allocation8 + $0xd0] ss:$8 sps:$4 sm:$0xff]  }
 0x397   :  { %3920 = vmatprep.subr.bf16.mxu0 %v10156_v34  ;;  %v10235_v34 = vld [vmem:[#allocation5 + $0xe14] ss:$8 sps:$4 sm:$0xff]  }
 0x39a   :  { %3921 = vmatpush1.bf16.msra.mxu0 %v10154_v35  ;;  %v10327_v35 = vld [vmem:[#allocation8 + $0x4] ss:$8 sps:$4 sm:$0xff]  }
 0x39b   :  { %3922 = vmatprep.subr.bf16.mxu0 %v10159_v36  ;;  %v10329_v36 = vld [vmem:[#allocation8] ss:$8 sps:$4 sm:$0xff]   ;;  %4278 = vmatprep.subr.bf16.mxu1 %v10327_v35  ;;  %v326_v35 = vpack.c.bf16 %v10832_v26, %v10832_v26 }
 0x39c   :  { %4279 = vmatpush1.bf16.msra.mxu1 %v10329_v36  ;;  %v10278_v36 = vld [vmem:[#allocation5 + $0xf00] ss:$8 sps:$4 sm:$0xff]  }
 0x39d   :  { %v10290_v26 = vld [vmem:[#allocation5 + $0xf40] ss:$8 sps:$4 sm:$0xff]  }
 0x39e   :  { %3923 = vmatpush1.bf16.msra.mxu0 %v10157_v37  ;;  %v10330_v37 = vld [vmem:[#allocation8 + $0x14] ss:$8 sps:$4 sm:$0xff]  }
 0x39f   :  { %3924 = vmatprep.subr.bf16.mxu0 %v10162_v38  ;;  %v10233_v38 = vld [vmem:[#allocation5 + $0xe10] ss:$8 sps:$4 sm:$0xff]   ;;  %4280 = vmatprep.subr.bf16.mxu1 %v10330_v37 }
 0x3a2   :  { %3925 = vmatpush1.bf16.msra.mxu0 %v10160_v39  ;;  %v10238_v39 = vld [vmem:[#allocation5 + $0xe24] ss:$8 sps:$4 sm:$0xff]  }
 0x3a3   :  { %3926 = vmatprep.subr.bf16.mxu0 %v10165_v40  ;;  %v10332_v40 = vld [vmem:[#allocation8 + $0x10] ss:$8 sps:$4 sm:$0xff]  }
 0x3a4   :  { %4281 = vmatpush1.bf16.msra.mxu1 %v10332_v40  ;;  %v10286_v40 = vld [vmem:[#allocation5 + $0xf24] ss:$8 sps:$4 sm:$0xff]  }
 0x3a6   :  { %3927 = vmatpush1.bf16.msra.mxu0 %v10163_v41  ;;  %v10333_v41 = vld [vmem:[#allocation8 + $0x24] ss:$8 sps:$4 sm:$0xff]  }
 0x3a7   :  { %3928 = vmatprep.subr.bf16.mxu0 %v10168_v42  ;;  %v10236_v42 = vld [vmem:[#allocation5 + $0xe20] ss:$8 sps:$4 sm:$0xff]   ;;  %4282 = vmatprep.subr.bf16.mxu1 %v10333_v41 }
 0x3a8   :  { %v10284_v41 = vld [vmem:[#allocation5 + $0xf20] ss:$8 sps:$4 sm:$0xff]  }
 0x3aa   :  { %3929 = vmatpush1.bf16.msra.mxu0 %v10166_v43  ;;  %v10241_v43 = vld [vmem:[#allocation5 + $0xe34] ss:$8 sps:$4 sm:$0xff]  }
 0x3ab   :  { %3930 = vmatprep.subr.bf16.mxu0 %v10171_v44  ;;  %v10335_v44 = vld [vmem:[#allocation8 + $0x20] ss:$8 sps:$4 sm:$0xff]  }
 0x3ac   :  { %4283 = vmatpush1.bf16.msra.mxu1 %v10335_v44  ;;  %v10292_v44 = vld [vmem:[#allocation5 + $0xf44] ss:$8 sps:$4 sm:$0xff]  }
 0x3ae   :  { %3931 = vmatpush1.bf16.msra.mxu0 %v10169_v45  ;;  %v10336_v45 = vld [vmem:[#allocation8 + $0x34] ss:$8 sps:$4 sm:$0xff]  }
 0x3af   :  { %3932 = vmatprep.subr.bf16.mxu0 %v10174_v46  ;;  %v10239_v46 = vld [vmem:[#allocation5 + $0xe30] ss:$8 sps:$4 sm:$0xff]   ;;  %4284 = vmatprep.subr.bf16.mxu1 %v10336_v45  ;;  %v10295_v45 = vld [vmem:[#allocation5 + $0xf54] ss:$8 sps:$4 sm:$0xff]  }
 0x3b0   :  { %4285 = vmatpush1.bf16.msra.mxu1 %v10338_v48  ;;  %v10296_v48 = vld [vmem:[#allocation5 + $0xf60] ss:$8 sps:$4 sm:$0xff]  }
 0x3b2   :  { %3933 = vmatpush1.bf16.msra.mxu0 %v10172_v47  ;;  %v10244_v47 = vld [vmem:[#allocation5 + $0xe44] ss:$8 sps:$4 sm:$0xff]  }
 0x3b3   :  { %3934 = vmatprep.subr.bf16.mxu0 %v10177_v49  ;;  %v10339_v49 = vld [vmem:[#allocation8 + $0x44] ss:$8 sps:$4 sm:$0xff]  }
 0x3b4   :  { %4286 = vmatprep.subr.bf16.mxu1 %v10339_v49  ;;  %v10301_v49 = vld [vmem:[#allocation5 + $0xf74] ss:$8 sps:$4 sm:$0xff]  }
 0x3b6   :  { %3935 = vmatpush1.bf16.msra.mxu0 %v10175_v50  ;;  %v10242_v50 = vld [vmem:[#allocation5 + $0xe40] ss:$8 sps:$4 sm:$0xff]  }
 0x3b7   :  { %3936 = vmatprep.subr.bf16.mxu0 %v10180_v52  ;;  %v10341_v52 = vld [vmem:[#allocation8 + $0x40] ss:$8 sps:$4 sm:$0xff]  }
 0x3b8   :  { %4287 = vmatpush1.bf16.msra.mxu1 %v10341_v52  ;;  %v10302_v52 = vld [vmem:[#allocation5 + $0xf80] ss:$8 sps:$4 sm:$0xff]  }
 0x3ba   :  { %3937 = vmatpush1.bf16.msra.mxu0 %v10178_v53  ;;  %v10342_v53 = vld [vmem:[#allocation8 + $0x54] ss:$8 sps:$4 sm:$0xff]  }
 0x3bb   :  { %3947 = vmatprep.subr.bf16.mxu0 %v10183_v55  ;;  %v10250_v55 = vld [vmem:[#allocation5 + $0xe64] ss:$8 sps:$4 sm:$0xff]   ;;  %4288 = vmatprep.subr.bf16.mxu1 %v10342_v53  ;;  %v10307_v53 = vld [vmem:[#allocation5 + $0xf94] ss:$8 sps:$4 sm:$0xff]  }
 0x3bd   :  { %3939 = vmatmul.mubr.bf16.vlgmr.msra.gmra.mrb[0].mxu0 %v322_v56  ;;  %v10344_v56 = vld [vmem:[#allocation8 + $0x50] ss:$8 sps:$4 sm:$0xff]  }
 0x3be   :  { %3948 = vmatpush1.bf16.msra.mxu0 %v10181_v57  ;;  %3979 = vmatprep.mubr.bf16.mxu0 %v325_v58  ;;  %v10345_v57 = vld [vmem:[#allocation8 + $0x64] ss:$8 sps:$4 sm:$0xff]  }
 0x3bf   :  { %3949 = vmatprep.subr.bf16.mxu0 %v10186_v59  ;;  %v10248_v58 = vld [vmem:[#allocation5 + $0xe60] ss:$8 sps:$4 sm:$0xff]   ;;  %v10253_v59 = vld [vmem:[#allocation5 + $0xe74] ss:$8 sps:$4 sm:$0xff]   ;;  %4289 = vmatpush1.bf16.msra.mxu1 %v10344_v56 }
 0x3c0   :  { %4290 = vmatprep.subr.bf16.mxu1 %v10345_v57  ;;  %v10308_v56 = vld [vmem:[#allocation5 + $0xfa0] ss:$8 sps:$4 sm:$0xff]   ;;  %v10313_v57 = vld [vmem:[#allocation5 + $0xfb4] ss:$8 sps:$4 sm:$0xff]  }
 0x3c2   :  { %3950 = vmatpush1.bf16.msra.mxu0 %v10184_v60  ;;  %v10347_v60 = vld [vmem:[#allocation8 + $0x60] ss:$8 sps:$4 sm:$0xff]  }
 0x3c3   :  { %3951 = vmatprep.subr.bf16.mxu0 %v10189_v61  ;;  %v10348_v61 = vld [vmem:[#allocation8 + $0x74] ss:$8 sps:$4 sm:$0xff]   ;;  %4291 = vmatpush1.bf16.msra.mxu1 %v10347_v60 }
 0x3c4   :  { %4292 = vmatprep.subr.bf16.mxu1 %v10348_v61  ;;  %v10314_v60 = vld [vmem:[#allocation5 + $0xfc0] ss:$8 sps:$4 sm:$0xff]   ;;  %v10319_v61 = vld [vmem:[#allocation5 + $0xfd4] ss:$8 sps:$4 sm:$0xff]  }
 0x3c6   :  { %3952 = vmatpush1.bf16.msra.mxu0 %v10187_v62  ;;  %v10251_v62 = vld [vmem:[#allocation5 + $0xe70] ss:$8 sps:$4 sm:$0xff]  }
 0x3c7   :  { %3953 = vmatprep.subr.bf16.mxu0 %v10192_v63  ;;  %v10256_v63 = vld [vmem:[#allocation5 + $0xe84] ss:$8 sps:$4 sm:$0xff]  }
 0x3ca   :  { %3954 = vmatpush1.bf16.msra.mxu0 %v10190_v0  ;;  %v10350_v0 = vld [vmem:[#allocation8 + $0x70] ss:$8 sps:$4 sm:$0xff]  }
 0x3cb   :  { %3955 = vmatprep.subr.bf16.mxu0 %v10195_v1  ;;  %v10351_v1 = vld [vmem:[#allocation8 + $0x84] ss:$8 sps:$4 sm:$0xff]   ;;  %4293 = vmatpush1.bf16.msra.mxu1 %v10350_v0 }
 0x3cc   :  { %4294 = vmatprep.subr.bf16.mxu1 %v10351_v1  ;;  %v10320_v0 = vld [vmem:[#allocation5 + $0xfe0] ss:$8 sps:$4 sm:$0xff]   ;;  %v10325_v1 = vld [vmem:[#allocation5 + $0xff4] ss:$8 sps:$4 sm:$0xff]  }
 0x3ce   :  { %3956 = vmatpush1.bf16.msra.mxu0 %v10193_v2  ;;  %v10254_v2 = vld [vmem:[#allocation5 + $0xe80] ss:$8 sps:$4 sm:$0xff]  }
 0x3cf   :  { %3957 = vmatprep.subr.bf16.mxu0 %v10198_v3  ;;  %v10259_v3 = vld [vmem:[#allocation5 + $0xe94] ss:$8 sps:$4 sm:$0xff]  }
 0x3d2   :  { %3958 = vmatpush1.bf16.msra.mxu0 %v10196_v4  ;;  %v10353_v4 = vld [vmem:[#allocation8 + $0x80] ss:$8 sps:$4 sm:$0xff]  }
 0x3d3   :  { %3959 = vmatprep.subr.bf16.mxu0 %v10201_v5  ;;  %v10354_v5 = vld [vmem:[#allocation8 + $0x94] ss:$8 sps:$4 sm:$0xff]   ;;  %4295 = vmatpush1.bf16.msra.mxu1 %v10353_v4  ;;  %v10369_v4 = vld [vmem:[#allocation8 + $0xe4] ss:$8 sps:$4 sm:$0xff]  }
 0x3d4   :  { %4296 = vmatprep.subr.bf16.mxu1 %v10354_v5  ;;  %v10371_v5 = vld [vmem:[#allocation8 + $0xe0] ss:$8 sps:$4 sm:$0xff]  }
 0x3d6   :  { %3960 = vmatpush1.bf16.msra.mxu0 %v10199_v6  ;;  %v10257_v6 = vld [vmem:[#allocation5 + $0xe90] ss:$8 sps:$4 sm:$0xff]  }
 0x3d7   :  { %3961 = vmatprep.subr.bf16.mxu0 %v10204_v7  ;;  %v10262_v7 = vld [vmem:[#allocation5 + $0xea4] ss:$8 sps:$4 sm:$0xff]  }
 0x3da   :  { %3962 = vmatpush1.bf16.msra.mxu0 %v10202_v8  ;;  %v10356_v8 = vld [vmem:[#allocation8 + $0x90] ss:$8 sps:$4 sm:$0xff]  }
 0x3db   :  { %3963 = vmatprep.subr.bf16.mxu0 %v10207_v9  ;;  %v10357_v9 = vld [vmem:[#allocation8 + $0xa4] ss:$8 sps:$4 sm:$0xff]   ;;  %4297 = vmatpush1.bf16.msra.mxu1 %v10356_v8 }
 0x3dc   :  { %4298 = vmatprep.subr.bf16.mxu1 %v10357_v9  ;;  %v10849_v8 = vld [vmem:[#allocation11] sm:$0xff] }
 0x3dd   :  { %v10851_v9 = vld [vmem:[#allocation11 + $0x80] sm:$0xff] }
 0x3de   :  { %3964 = vmatpush1.bf16.msra.mxu0 %v10205_v10  ;;  %v10260_v10 = vld [vmem:[#allocation5 + $0xea0] ss:$8 sps:$4 sm:$0xff]  }
 0x3df   :  { %3965 = vmatprep.subr.bf16.mxu0 %v10210_v11  ;;  %v10265_v11 = vld [vmem:[#allocation5 + $0xeb4] ss:$8 sps:$4 sm:$0xff]  }
 0x3e2   :  { %3966 = vmatpush1.bf16.msra.mxu0 %v10208_v12  ;;  %v10359_v12 = vld [vmem:[#allocation8 + $0xa0] ss:$8 sps:$4 sm:$0xff]  }
 0x3e3   :  { %3967 = vmatprep.subr.bf16.mxu0 %v10213_v14  ;;  %v10360_v14 = vld [vmem:[#allocation8 + $0xb4] ss:$8 sps:$4 sm:$0xff]   ;;  %4299 = vmatpush1.bf16.msra.mxu1 %v10359_v12 }
 0x3e4   :  { %4300 = vmatprep.subr.bf16.mxu1 %v10360_v14  ;;  %v4338_v12 = vld [vmem:[#allocation11 + $0x78] sm:$0xff] }
 0x3e5   :  { %v4354_v14 = vld [vmem:[#allocation11 + $0xf8] sm:$0xff] }
 0x3e6   :  { %3968 = vmatpush1.bf16.msra.mxu0 %v10211_v15  ;;  %v10263_v15 = vld [vmem:[#allocation5 + $0xeb0] ss:$8 sps:$4 sm:$0xff]  }
 0x3e7   :  { %3969 = vmatprep.subr.bf16.mxu0 %v10216_v17  ;;  %v10268_v17 = vld [vmem:[#allocation5 + $0xec4] ss:$8 sps:$4 sm:$0xff]  }
 0x3ea   :  { %3970 = vmatpush1.bf16.msra.mxu0 %v10214_v18  ;;  %v10362_v18 = vld [vmem:[#allocation8 + $0xb0] ss:$8 sps:$4 sm:$0xff]  }
 0x3eb   :  { %3971 = vmatprep.subr.bf16.mxu0 %v10219_v19  ;;  %v10363_v19 = vld [vmem:[#allocation8 + $0xc4] ss:$8 sps:$4 sm:$0xff]   ;;  %4301 = vmatpush1.bf16.msra.mxu1 %v10362_v18  ;;  %v4370_v18 = vld [vmem:[#allocation11 + $0x178] sm:$0xff] }
 0x3ec   :  { %4302 = vmatprep.subr.bf16.mxu1 %v10363_v19  ;;  %v4386_v19 = vld [vmem:[#allocation11 + $0x1f8] sm:$0xff] }
 0x3ee   :  { %3972 = vmatpush1.bf16.msra.mxu0 %v10217_v20  ;;  %v10266_v20 = vld [vmem:[#allocation5 + $0xec0] ss:$8 sps:$4 sm:$0xff]  }
 0x3ef   :  { %3973 = vmatprep.subr.bf16.mxu0 %v10222_v21  ;;  %v10271_v21 = vld [vmem:[#allocation5 + $0xed4] ss:$8 sps:$4 sm:$0xff]  }
 0x3f2   :  { %3974 = vmatpush1.bf16.msra.mxu0 %v10220_v22  ;;  %v10365_v22 = vld [vmem:[#allocation8 + $0xc0] ss:$8 sps:$4 sm:$0xff]  }
 0x3f3   :  { %3975 = vmatprep.subr.bf16.mxu0 %v10225_v23  ;;  %v10366_v23 = vld [vmem:[#allocation8 + $0xd4] ss:$8 sps:$4 sm:$0xff]   ;;  %4303 = vmatpush1.bf16.msra.mxu1 %v10365_v22 }
 0x3f4   :  { %4304 = vmatprep.subr.bf16.mxu1 %v10366_v23  ;;  %v4402_v22 = vld [vmem:[#allocation11 + $0x278] sm:$0xff] }
 0x3f5   :  { %v4418_v23 = vld [vmem:[#allocation11 + $0x2f8] sm:$0xff] }
 0x3f6   :  { %3976 = vmatpush1.bf16.msra.mxu0 %v10223_v25  ;;  %v10269_v25 = vld [vmem:[#allocation5 + $0xed0] ss:$8 sps:$4 sm:$0xff]  }
 0x3f7   :  { %3977 = vmatprep.subr.bf16.mxu0 %v10228_v27  ;;  %v249_v27 = vcombine.high %v10828_v24, %v10828_v24  ;;  %4305 = vmatpush1.bf16.msra.mxu1 %v10368_v29  ;;  %v10280_v24 = vld [vmem:[#allocation5 + $0xf04] ss:$8 sps:$4 sm:$0xff]   ;;  %v4450_v29 = vld [vmem:[#allocation11 + $0x3f8] sm:$0xff] }
 0x3f8   :  { %4306 = vmatprep.subr.bf16.mxu1 %v10369_v4 }
 0x3fa   :  { %3978 = vmatpush1.bf16.msra.mxu0 %v10226_v28  ;;  %v10274_v28 = vld [vmem:[#allocation5 + $0xee4] ss:$8 sps:$4 sm:$0xff]  }
 0x3fb   :  { %3988 = vmatprep.subr.bf16.mxu0 %v10232_v30  ;;  %v10272_v30 = vld [vmem:[#allocation5 + $0xee0] ss:$8 sps:$4 sm:$0xff]   ;;  %4307 = vmatpush1.bf16.msra.mxu1 %v10371_v5 }
 0x3fd   :  { %3980 = vmatmul.mubr.bf16.vlgmr.msra.gmra.mrb[0].mxu0 %v324_v31  ;;  %v10841_v31 = vrot.slane %v249_v27, %v10706_v16  ;;  %v9060_v27 = vcombine.high %v4402_v22, %v4418_v23 }
 0x3fe   :  { %3989 = vmatpush1.bf16.msra.mxu0 %v10230_v32  ;;  %4020 = vmatprep.mubr.bf16.mxu0 %v327_v33  ;;  %v10277_v32 = vld [vmem:[#allocation5 + $0xef4] ss:$8 sps:$4 sm:$0xff]   ;;  %v10275_v33 = vld [vmem:[#allocation5 + $0xef0] ss:$8 sps:$4 sm:$0xff]  }
 0x3ff   :  { %3990 = vmatprep.subr.bf16.mxu0 %v10235_v34  ;;  %v265_v34 = vcombine.high %v10841_v31, %v10841_v31 }
 0x401   :  { %v329_v37 = vpack.c.bf16 %v265_v34, %v265_v34 }
 0x402   :  { %3991 = vmatpush1.bf16.msra.mxu0 %v10233_v38  ;;  %v10283_v38 = vld [vmem:[#allocation5 + $0xf14] ss:$8 sps:$4 sm:$0xff]  }
 0x403   :  { %3992 = vmatprep.subr.bf16.mxu0 %v10238_v39  ;;  %v10281_v39 = vld [vmem:[#allocation5 + $0xf10] ss:$8 sps:$4 sm:$0xff]  }
 0x406   :  { %3993 = vmatpush1.bf16.msra.mxu0 %v10236_v42  ;;  %v10289_v42 = vld [vmem:[#allocation5 + $0xf34] ss:$8 sps:$4 sm:$0xff]  }
 0x407   :  { %3994 = vmatprep.subr.bf16.mxu0 %v10241_v43  ;;  %v10287_v43 = vld [vmem:[#allocation5 + $0xf30] ss:$8 sps:$4 sm:$0xff]  }
 0x40a   :  { %3995 = vmatpush1.bf16.msra.mxu0 %v10239_v46  ;;  %v10293_v46 = vld [vmem:[#allocation5 + $0xf50] ss:$8 sps:$4 sm:$0xff]  }
 0x40b   :  { %3996 = vmatprep.subr.bf16.mxu0 %v10244_v47  ;;  %v10298_v47 = vld [vmem:[#allocation5 + $0xf64] ss:$8 sps:$4 sm:$0xff]  }
 0x40e   :  { %3997 = vmatpush1.bf16.msra.mxu0 %v10242_v50  ;;  %v10299_v50 = vld [vmem:[#allocation5 + $0xf70] ss:$8 sps:$4 sm:$0xff]  }
 0x40f   :  { %3998 = vmatprep.subr.bf16.mxu0 %v10247_v51  ;;  %v10304_v51 = vld [vmem:[#allocation5 + $0xf84] ss:$8 sps:$4 sm:$0xff]  }
 0x412   :  { %3999 = vmatpush1.bf16.msra.mxu0 %v10245_v54  ;;  %v10305_v54 = vld [vmem:[#allocation5 + $0xf90] ss:$8 sps:$4 sm:$0xff]  }
 0x413   :  { %4000 = vmatprep.subr.bf16.mxu0 %v10250_v55  ;;  %v10310_v55 = vld [vmem:[#allocation5 + $0xfa4] ss:$8 sps:$4 sm:$0xff]  }
 0x416   :  { %4001 = vmatpush1.bf16.msra.mxu0 %v10248_v58  ;;  %v10311_v58 = vld [vmem:[#allocation5 + $0xfb0] ss:$8 sps:$4 sm:$0xff]  }
 0x417   :  { %4002 = vmatprep.subr.bf16.mxu0 %v10253_v59  ;;  %v10316_v59 = vld [vmem:[#allocation5 + $0xfc4] ss:$8 sps:$4 sm:$0xff]  }
 0x41a   :  { %4003 = vmatpush1.bf16.msra.mxu0 %v10251_v62  ;;  %v10317_v62 = vld [vmem:[#allocation5 + $0xfd0] ss:$8 sps:$4 sm:$0xff]  }
 0x41b   :  { %4004 = vmatprep.subr.bf16.mxu0 %v10256_v63  ;;  %v10322_v63 = vld [vmem:[#allocation5 + $0xfe4] ss:$8 sps:$4 sm:$0xff]  }
 0x41e   :  { %4005 = vmatpush1.bf16.msra.mxu0 %v10254_v2  ;;  %v10323_v2 = vld [vmem:[#allocation5 + $0xff0] ss:$8 sps:$4 sm:$0xff]  }
 0x41f   :  { %4006 = vmatprep.subr.bf16.mxu0 %v10259_v3  ;;  %v328_v3 = vpack.c.bf16 %v10841_v31, %v10841_v31 }
 0x422   :  { %4007 = vmatpush1.bf16.msra.mxu0 %v10257_v6  ;;  %v10372_v6 = vld [vmem:[#allocation8 + $0xf4] ss:$8 sps:$4 sm:$0xff]  }
 0x423   :  { %4008 = vmatprep.subr.bf16.mxu0 %v10262_v7  ;;  %v10374_v7 = vld [vmem:[#allocation8 + $0xf0] ss:$8 sps:$4 sm:$0xff]   ;;  %4308 = vmatprep.subr.bf16.mxu1 %v10372_v6  ;;  %v10858_v6 = vsub.s32 0, %v10703_v13 }
 0x424   :  { %4309 = vmatpush1.bf16.msra.mxu1 %v10374_v7  ;;  %v842_v7 = vld [vmem:[#allocation7] sm:$0x3] }
 0x426   :  { %4009 = vmatpush1.bf16.msra.mxu0 %v10260_v10  ;;  %v8965_v10 = vcombine.low %v10849_v8, %v10851_v9 }
 0x427   :  { %4010 = vmatprep.subr.bf16.mxu0 %v10265_v11  ;;  %v8966_v11 = vcombine.high %v10849_v8, %v10851_v9 }
 0x429   :  { %7563 = vmatprep.subr.bf16.mxu1 %v8966_v11  ;;  %v10861_v11 = vsub.s32 1, %v10703_v13 }
 0x42a   :  { %4011 = vmatpush1.bf16.msra.mxu0 %v10263_v15  ;;  %v8995_v15 = vcombine.low %v4338_v12, %v4354_v14 }
 0x42b   :  { %4012 = vmatprep.subr.bf16.mxu0 %v10268_v17  ;;  %v8996_v17 = vcombine.high %v4338_v12, %v4354_v14  ;;  %v847_v12 = vrot.slane %v842_v7, %v10858_v6  ;;  %v851_v14 = vrot.slane %v842_v7, %v10861_v11  ;;  %v4739_v7 = vld [vmem:[#allocation11 + $0xd00] sm:$0xff] }
 0x42e   :  { %4013 = vmatpush1.bf16.msra.mxu0 %v10266_v20  ;;  %v9027_v20 = vcombine.low %v4370_v18, %v4386_v19 }
 0x42f   :  { %4014 = vmatprep.subr.bf16.mxu0 %v10271_v21  ;;  %v9028_v21 = vcombine.high %v4370_v18, %v4386_v19 }
 0x432   :  { %4015 = vmatpush1.bf16.msra.mxu0 %v10269_v25  ;;  %v9059_v25 = vcombine.low %v4402_v22, %v4418_v23 }
 0x433   :  { %4016 = vmatprep.subr.bf16.mxu0 %v10274_v28  ;;  %v4434_v28 = vld [vmem:[#allocation11 + $0x378] sm:$0xff] }
 0x434   :  { %v9092_v31 = vcombine.high %v4434_v28, %v4450_v29 }
 0x436   :  { %4017 = vmatpush1.bf16.msra.mxu0 %v10272_v30  ;;  %v9091_v30 = vcombine.low %v4434_v28, %v4450_v29 }
 0x437   :  { %4018 = vmatprep.subr.bf16.mxu0 %v10277_v32  ;;  %v4466_v32 = vld [vmem:[#allocation11 + $0x478] sm:$0xff] }
 0x43a   :  { %4019 = vmatpush1.bf16.msra.mxu0 %v10275_v33  ;;  %v4482_v33 = vld [vmem:[#allocation11 + $0x4f8] sm:$0xff] }
 0x43b   :  { %4029 = vmatprep.subr.bf16.mxu0 %v10280_v24  ;;  %v9123_v34 = vcombine.low %v4466_v32, %v4482_v33  ;;  %v9124_v24 = vcombine.high %v4466_v32, %v4482_v33  ;;  %v4403_v32 = vld [vmem:[#allocation11 + $0x280] sm:$0xff] }
 0x43d   :  { %4021 = vmatmul.mubr.bf16.vlgmr.msra.gmra.mrb[0].mxu0 %v326_v35  ;;  %v4498_v35 = vld [vmem:[#allocation11 + $0x578] sm:$0xff] }
 0x43e   :  { %4030 = vmatpush1.bf16.msra.mxu0 %v10278_v36  ;;  %4061 = vmatprep.mubr.bf16.mxu0 %v329_v37  ;;  %v4514_v36 = vld [vmem:[#allocation11 + $0x5f8] sm:$0xff] }
 0x43f   :  { %4031 = vmatprep.subr.bf16.mxu0 %v10283_v38  ;;  %v9155_v37 = vcombine.low %v4498_v35, %v4514_v36  ;;  %v9156_v38 = vcombine.high %v4498_v35, %v4514_v36  ;;  %v4435_v35 = vld [vmem:[#allocation11 + $0x380] sm:$0xff] }
 0x442   :  { %4032 = vmatpush1.bf16.msra.mxu0 %v10281_v39  ;;  %v4530_v39 = vld [vmem:[#allocation11 + $0x678] sm:$0xff] }
 0x443   :  { %4033 = vmatprep.subr.bf16.mxu0 %v10286_v40  ;;  %v4546_v40 = vld [vmem:[#allocation11 + $0x6f8] sm:$0xff] }
 0x446   :  { %4034 = vmatpush1.bf16.msra.mxu0 %v10284_v41  ;;  %v9187_v41 = vcombine.low %v4530_v39, %v4546_v40 }
 0x447   :  { %4035 = vmatprep.subr.bf16.mxu0 %v10289_v42  ;;  %v9188_v42 = vcombine.high %v4530_v39, %v4546_v40  ;;  %v4467_v39 = vld [vmem:[#allocation11 + $0x480] sm:$0xff] }
 0x44a   :  { %4036 = vmatpush1.bf16.msra.mxu0 %v10287_v43  ;;  %v4562_v43 = vld [vmem:[#allocation11 + $0x778] sm:$0xff] }
 0x44b   :  { %4037 = vmatprep.subr.bf16.mxu0 %v10292_v44  ;;  %v4578_v44 = vld [vmem:[#allocation11 + $0x7f8] sm:$0xff] }
 0x44e   :  { %4038 = vmatpush1.bf16.msra.mxu0 %v10290_v26  ;;  %v9219_v26 = vcombine.low %v4562_v43, %v4578_v44 }
 0x44f   :  { %4039 = vmatprep.subr.bf16.mxu0 %v10295_v45  ;;  %v9220_v45 = vcombine.high %v4562_v43, %v4578_v44  ;;  %v4499_v43 = vld [vmem:[#allocation11 + $0x580] sm:$0xff] }
 0x450   :  { %v4531_v44 = vld [vmem:[#allocation11 + $0x680] sm:$0xff] }
 0x452   :  { %4040 = vmatpush1.bf16.msra.mxu0 %v10293_v46  ;;  %v4594_v46 = vld [vmem:[#allocation11 + $0x878] sm:$0xff] }
 0x453   :  { %4041 = vmatprep.subr.bf16.mxu0 %v10298_v47  ;;  %v4610_v47 = vld [vmem:[#allocation11 + $0x8f8] sm:$0xff] }
 0x456   :  { %4042 = vmatpush1.bf16.msra.mxu0 %v10296_v48  ;;  %v9251_v48 = vcombine.low %v4594_v46, %v4610_v47 }
 0x457   :  { %4043 = vmatprep.subr.bf16.mxu0 %v10301_v49  ;;  %v9252_v49 = vcombine.high %v4594_v46, %v4610_v47  ;;  %v4547_v46 = vld [vmem:[#allocation11 + $0x700] sm:$0xff] }
 0x458   :  { %v4563_v47 = vld [vmem:[#allocation11 + $0x780] sm:$0xff] }
 0x45a   :  { %4044 = vmatpush1.bf16.msra.mxu0 %v10299_v50  ;;  %v4626_v50 = vld [vmem:[#allocation11 + $0x978] sm:$0xff] }
 0x45b   :  { %4045 = vmatprep.subr.bf16.mxu0 %v10304_v51  ;;  %v4642_v51 = vld [vmem:[#allocation11 + $0x9f8] sm:$0xff] }
 0x45e   :  { %4046 = vmatpush1.bf16.msra.mxu0 %v10302_v52  ;;  %v9283_v52 = vcombine.low %v4626_v50, %v4642_v51 }
 0x45f   :  { %4047 = vmatprep.subr.bf16.mxu0 %v10307_v53  ;;  %v9284_v53 = vcombine.high %v4626_v50, %v4642_v51  ;;  %v4579_v50 = vld [vmem:[#allocation11 + $0x800] sm:$0xff] }
 0x460   :  { %v4595_v51 = vld [vmem:[#allocation11 + $0x880] sm:$0xff] }
 0x462   :  { %4048 = vmatpush1.bf16.msra.mxu0 %v10305_v54  ;;  %v4658_v54 = vld [vmem:[#allocation11 + $0xa78] sm:$0xff] }
 0x463   :  { %4049 = vmatprep.subr.bf16.mxu0 %v10310_v55  ;;  %v4674_v55 = vld [vmem:[#allocation11 + $0xaf8] sm:$0xff] }
 0x466   :  { %4050 = vmatpush1.bf16.msra.mxu0 %v10308_v56  ;;  %v9315_v56 = vcombine.low %v4658_v54, %v4674_v55 }
 0x467   :  { %4051 = vmatprep.subr.bf16.mxu0 %v10313_v57  ;;  %v9316_v57 = vcombine.high %v4658_v54, %v4674_v55  ;;  %v4611_v54 = vld [vmem:[#allocation11 + $0x900] sm:$0xff] }
 0x468   :  { %v4627_v55 = vld [vmem:[#allocation11 + $0x980] sm:$0xff] }
 0x46a   :  { %4052 = vmatpush1.bf16.msra.mxu0 %v10311_v58  ;;  %v4690_v58 = vld [vmem:[#allocation11 + $0xb78] sm:$0xff] }
 0x46b   :  { %4053 = vmatprep.subr.bf16.mxu0 %v10316_v59  ;;  %v4706_v59 = vld [vmem:[#allocation11 + $0xbf8] sm:$0xff] }
 0x46e   :  { %4054 = vmatpush1.bf16.msra.mxu0 %v10314_v60  ;;  %v9347_v60 = vcombine.low %v4690_v58, %v4706_v59 }
 0x46f   :  { %4055 = vmatprep.subr.bf16.mxu0 %v10319_v61  ;;  %v9348_v61 = vcombine.high %v4690_v58, %v4706_v59  ;;  %v4643_v58 = vld [vmem:[#allocation11 + $0xa00] sm:$0xff] }
 0x470   :  { %v4659_v59 = vld [vmem:[#allocation11 + $0xa80] sm:$0xff] }
 0x472   :  { %4056 = vmatpush1.bf16.msra.mxu0 %v10317_v62  ;;  %v4722_v62 = vld [vmem:[#allocation11 + $0xc78] sm:$0xff] }
 0x473   :  { %4057 = vmatprep.subr.bf16.mxu0 %v10322_v63  ;;  %v4738_v63 = vld [vmem:[#allocation11 + $0xcf8] sm:$0xff] }
 0x476   :  { %4058 = vmatpush1.bf16.msra.mxu0 %v10320_v0  ;;  %v9379_v0 = vcombine.low %v4722_v62, %v4738_v63 }
 0x477   :  { %4059 = vmatprep.subr.bf16.mxu0 %v10325_v1  ;;  %v9380_v1 = vcombine.high %v4722_v62, %v4738_v63  ;;  %v4675_v62 = vld [vmem:[#allocation11 + $0xb00] sm:$0xff] }
 0x478   :  { %v4691_v63 = vld [vmem:[#allocation11 + $0xb80] sm:$0xff] }
 0x47a   :  { %4060 = vmatpush1.bf16.msra.mxu0 %v10323_v2  ;;  %v4754_v2 = vld [vmem:[#allocation11 + $0xd78] sm:$0xff] }
 0x47b   :  { %8178 = vmatprep.subr.bf16.mxu0 %v8996_v17 }
 0x47d   :  { %4062 = vmatmul.mubr.bf16.vlgmr.msra.gmra.mrb[0].mxu0 %v328_v3  ;;  %v4770_v3 = vld [vmem:[#allocation11 + $0xdf8] sm:$0xff] }
 0x47e   :  { %8179 = vmatpush1.bf16.msra.mxu0 %v8995_v15  ;;  %v9411_v4 = vcombine.low %v4754_v2, %v4770_v3  ;;  %v9412_v5 = vcombine.high %v4754_v2, %v4770_v3  ;;  %v4707_v2 = vld [vmem:[#allocation11 + $0xc00] sm:$0xff] }
 0x47f   :  { %8180 = vmatprep.subr.bf16.mxu0 %v9028_v21  ;;  %v4723_v3 = vld [vmem:[#allocation11 + $0xc80] sm:$0xff] }
 0x482   :  { %8181 = vmatpush1.bf16.msra.mxu0 %v9027_v20 }
 0x483   :  { %8182 = vmatprep.subr.bf16.mxu0 %v9060_v27  ;;  %v4371_v27 = vld [vmem:[#allocation11 + $0x180] sm:$0xff] }
 0x486   :  { %8183 = vmatpush1.bf16.msra.mxu0 %v9059_v25  ;;  %v4355_v25 = vld [vmem:[#allocation11 + $0x100] sm:$0xff] }
 0x487   :  { %8184 = vmatprep.subr.bf16.mxu0 %v9092_v31  ;;  %v4387_v31 = vld [vmem:[#allocation11 + $0x200] sm:$0xff]  ;;  %v8997_v33 = vcombine.low %v4355_v25, %v4371_v27 }
 0x488   :  { %v9029_v36 = vcombine.low %v4387_v31, %v4403_v32 }
 0x48a   :  { %8185 = vmatpush1.bf16.msra.mxu0 %v9091_v30  ;;  %v8998_v30 = vcombine.high %v4355_v25, %v4371_v27 }
 0x48b   :  { %8186 = vmatprep.subr.bf16.mxu0 %v9124_v24  ;;  %v4419_v24 = vld [vmem:[#allocation11 + $0x300] sm:$0xff] }
 0x48c   :  { %v9061_v40 = vcombine.low %v4419_v24, %v4435_v35 }
 0x48e   :  { %8187 = vmatpush1.bf16.msra.mxu0 %v9123_v34  ;;  %v9030_v34 = vcombine.high %v4387_v31, %v4403_v32  ;;  %v4818_v31 = vld [vmem:[#allocation11 + $0xf78] sm:$0xff] }
 0x48f   :  { %8188 = vmatprep.subr.bf16.mxu0 %v9156_v38  ;;  %v4451_v38 = vld [vmem:[#allocation11 + $0x400] sm:$0xff]  ;;  %v4834_v32 = vld [vmem:[#allocation11 + $0xff8] sm:$0xff] }
 0x490   :  { %v9093_v8 = vcombine.low %v4451_v38, %v4467_v39 }
 0x492   :  { %8189 = vmatpush1.bf16.msra.mxu0 %v9155_v37  ;;  %v9062_v37 = vcombine.high %v4419_v24, %v4435_v35  ;;  %v9475_v24 = vcombine.low %v4818_v31, %v4834_v32  ;;  %v4324_v35 = vld [vmem:[#allocation11 + $0x8] sm:$0xff] }
 0x493   :  { %8190 = vmatprep.subr.bf16.mxu0 %v9188_v42  ;;  %v4483_v42 = vld [vmem:[#allocation11 + $0x500] sm:$0xff] }
 0x494   :  { %v9126_v9 = vcombine.high %v4483_v42, %v4499_v43 }
 0x496   :  { %8191 = vmatpush1.bf16.msra.mxu0 %v9187_v41  ;;  %v9094_v41 = vcombine.high %v4451_v38, %v4467_v39  ;;  %v4106_v39 = vld [vmem:[#allocation10] sm:$0x3] }
 0x497   :  { %8192 = vmatprep.subr.bf16.mxu0 %v9220_v45 }
 0x49a   :  { %8193 = vmatpush1.bf16.msra.mxu0 %v9219_v26  ;;  %v9125_v26 = vcombine.low %v4483_v42, %v4499_v43 }
 0x49b   :  { %8194 = vmatprep.subr.bf16.mxu0 %v9252_v49  ;;  %v9190_v49 = vcombine.high %v4547_v46, %v4563_v47 }
 0x49e   :  { %8195 = vmatpush1.bf16.msra.mxu0 %v9251_v48 }
 0x49f   :  { %8196 = vmatprep.subr.bf16.mxu0 %v9284_v53  ;;  %v9222_v53 = vcombine.high %v4579_v50, %v4595_v51 }
 0x4a2   :  { %8197 = vmatpush1.bf16.msra.mxu0 %v9283_v52  ;;  %v9189_v52 = vcombine.low %v4547_v46, %v4563_v47  ;;  %v4356_v46 = vld [vmem:[#allocation11 + $0x108] sm:$0xff] }
 0x4a3   :  { %8198 = vmatprep.subr.bf16.mxu0 %v9316_v57  ;;  %v9254_v57 = vcombine.high %v4611_v54, %v4627_v55  ;;  %v4372_v47 = vld [vmem:[#allocation11 + $0x188] sm:$0xff] }
 0x4a6   :  { %8199 = vmatpush1.bf16.msra.mxu0 %v9315_v56  ;;  %v9221_v56 = vcombine.low %v4579_v50, %v4595_v51  ;;  %v9000_v50 = vcombine.high %v4356_v46, %v4372_v47  ;;  %v4388_v51 = vld [vmem:[#allocation11 + $0x208] sm:$0xff] }
 0x4a7   :  { %8200 = vmatprep.subr.bf16.mxu0 %v9348_v61  ;;  %v9286_v61 = vcombine.high %v4643_v58, %v4659_v59 }
 0x4aa   :  { %8201 = vmatpush1.bf16.msra.mxu0 %v9347_v60  ;;  %v9253_v60 = vcombine.low %v4611_v54, %v4627_v55  ;;  %v4420_v55 = vld [vmem:[#allocation11 + $0x308] sm:$0xff] }
 0x4ab   :  { %8202 = vmatprep.subr.bf16.mxu0 %v9380_v1  ;;  %v9318_v1 = vcombine.high %v4675_v62, %v4691_v63 }
 0x4ae   :  { %8203 = vmatpush1.bf16.msra.mxu0 %v9379_v0  ;;  %v9285_v0 = vcombine.low %v4643_v58, %v4659_v59  ;;  %v4452_v59 = vld [vmem:[#allocation11 + $0x408] sm:$0xff] }
 0x4af   :  { %8204 = vmatprep.subr.bf16.mxu0 %v9412_v5  ;;  %v9350_v5 = vcombine.high %v4707_v2, %v4723_v3 }
 0x4b2   :  { %8205 = vmatpush1.bf16.msra.mxu0 %v9411_v4  ;;  %v9317_v4 = vcombine.low %v4675_v62, %v4691_v63  ;;  %v4484_v63 = vld [vmem:[#allocation11 + $0x508] sm:$0xff] }
 0x550   :  { %v4063_v15 = vpop.f32.mrb[0].mxu0 }
 0x551   :  { %v9477_v17 = vadd.f32 %v4063_v15, %v847_v12  ;;  %v4065_v18 = vpop.f32.mrb[1].mxu0  ;;  %v4755_v12 = vld [vmem:[#allocation11 + $0xd80] sm:$0xff] }
 0x552   :  { %v9478_v19 = vadd.f32 %v4065_v18, %v851_v14  ;;  %v4067_v20 = vpop.f32.mrb[2].mxu0  ;;  %v9349_v14 = vcombine.low %v4707_v2, %v4723_v3  ;;  %v9382_v15 = vcombine.high %v4739_v7, %v4755_v12  ;;  %v4771_v18 = vld [vmem:[#allocation11 + $0xe00] sm:$0xff]  ;;  %v4516_v3 = vld [vmem:[#allocation11 + $0x608] sm:$0xff] }
 0x553   :  { %v4070_v21 = vmax.f32 %v9477_v17, 0.0  ;;  %v4068_v22 = vpop.f32.mrb[3].mxu0  ;;  %v9381_v17 = vcombine.low %v4739_v7, %v4755_v12  ;;  %v4548_v12 = vld [vmem:[#allocation11 + $0x708] sm:$0xff] }
 0x554   :  { %v4071_v23 = vmax.f32 %v9478_v19, 0.0  ;;  %v4787_v19 = vld [vmem:[#allocation11 + $0xe80] sm:$0xff]  ;;  %v4802_v22 = vld [vmem:[#allocation11 + $0xef8] sm:$0xff] }
 0x555   :  { %v4072_v29 = vpack.c.bf16 %v4070_v21, %v4070_v21  ;;  %v9414_v20 = vcombine.high %v4771_v18, %v4787_v19  ;;  %v4786_v21 = vld [vmem:[#allocation11 + $0xe78] sm:$0xff] }
 0x556   :  { %v4073_v28 = vpack.c.bf16 %v4071_v23, %v4071_v23  ;;  %v9413_v23 = vcombine.low %v4771_v18, %v4787_v19  ;;  %v9444_v25 = vcombine.high %v4786_v21, %v4802_v22  ;;  %v9443_v27 = vcombine.low %v4786_v21, %v4802_v22  ;;  %v4580_v18 = vld [vmem:[#allocation11 + $0x808] sm:$0xff] }
 0x557   :  { %v4596_v19 = vld [vmem:[#allocation11 + $0x888] sm:$0xff] }
 0x558   :  { %4310 = vmatprep.mubr.bf16.mxu1 %v4073_v28  ;;  %8206 = vmatprep.subr.bf16.mxu0 %v9444_v25  ;;  %v4803_v28 = vld [vmem:[#allocation11 + $0xf00] sm:$0xff]  ;;  %v9224_v21 = vcombine.high %v4580_v18, %v4596_v19  ;;  %v4612_v22 = vld [vmem:[#allocation11 + $0x908] sm:$0xff]  ;;  %v9223_v25 = vcombine.low %v4580_v18, %v4596_v19 }
 0x559   :  { %4311 = vmatmul.mubr.bf16.vlgmr.msra.gmra.mrb[0].mxu1 %v4072_v29  ;;  %v4819_v29 = vld [vmem:[#allocation11 + $0xf80] sm:$0xff]  ;;  %8207 = vmatpush1.bf16.msra.mxu0 %v9443_v27 }
 0x55a   :  { %7564 = vmatpush1.bf16.msra.mxu1 %v8965_v10  ;;  %v4515_v10 = vld [vmem:[#allocation11 + $0x600] sm:$0xff] }
 0x55b   :  { %7565 = vmatprep.subr.bf16.mxu1 %v8998_v30  ;;  %v9158_v45 = vcombine.high %v4515_v10, %v4531_v44  ;;  %v9157_v48 = vcombine.low %v4515_v10, %v4531_v44  ;;  %v9446_v30 = vcombine.high %v4803_v28, %v4819_v29 }
 0x55e   :  { %7566 = vmatpush1.bf16.msra.mxu1 %v8997_v33  ;;  %v9445_v33 = vcombine.low %v4803_v28, %v4819_v29  ;;  %v4644_v28 = vld [vmem:[#allocation11 + $0xa08] sm:$0xff] }
 0x55f   :  { %7567 = vmatprep.subr.bf16.mxu1 %v9030_v34  ;;  %v9476_v34 = vcombine.high %v4818_v31, %v4834_v32  ;;  %v4660_v29 = vld [vmem:[#allocation11 + $0xa88] sm:$0xff] }
 0x560   :  { %v9288_v31 = vcombine.high %v4644_v28, %v4660_v29  ;;  %v4676_v32 = vld [vmem:[#allocation11 + $0xb08] sm:$0xff] }
 0x561   :  { %8208 = vmatprep.subr.bf16.mxu0 %v9476_v34  ;;  %v9287_v34 = vcombine.low %v4644_v28, %v4660_v29 }
 0x562   :  { %7568 = vmatpush1.bf16.msra.mxu1 %v9029_v36  ;;  %v4340_v36 = vld [vmem:[#allocation11 + $0x88] sm:$0xff]  ;;  %8209 = vmatpush1.bf16.msra.mxu0 %v9475_v24 }
 0x563   :  { %7569 = vmatprep.subr.bf16.mxu1 %v9062_v37  ;;  %v8968_v37 = vcombine.high %v4324_v35, %v4340_v36  ;;  %v8967_v38 = vcombine.low %v4324_v35, %v4340_v36  ;;  %v4708_v35 = vld [vmem:[#allocation11 + $0xc08] sm:$0xff] }
 0x564   :  { %v4724_v36 = vld [vmem:[#allocation11 + $0xc88] sm:$0xff] }
 0x566   :  { %7570 = vmatpush1.bf16.msra.mxu1 %v9061_v40  ;;  %v4111_v40 = vrot.slane %v4106_v39, %v10858_v6 }
 0x567   :  { %7571 = vmatprep.subr.bf16.mxu1 %v9094_v41  ;;  %v4115_v41 = vrot.slane %v4106_v39, %v10861_v11  ;;  %v4740_v39 = vld [vmem:[#allocation11 + $0xd08] sm:$0xff] }
 0x56a   :  { %7572 = vmatpush1.bf16.msra.mxu1 %v9093_v8 }
 0x56b   :  { %7573 = vmatprep.subr.bf16.mxu1 %v9126_v9 }
 0x56e   :  { %7574 = vmatpush1.bf16.msra.mxu1 %v9125_v26 }
 0x56f   :  { %7575 = vmatprep.subr.bf16.mxu1 %v9158_v45 }
 0x572   :  { %7576 = vmatpush1.bf16.msra.mxu1 %v9157_v48 }
 0x573   :  { %7577 = vmatprep.subr.bf16.mxu1 %v9190_v49 }
 0x576   :  { %7578 = vmatpush1.bf16.msra.mxu1 %v9189_v52  ;;  %v4404_v52 = vld [vmem:[#allocation11 + $0x288] sm:$0xff] }
 0x577   :  { %7579 = vmatprep.subr.bf16.mxu1 %v9222_v53  ;;  %v8999_v53 = vcombine.low %v4356_v46, %v4372_v47  ;;  %v9032_v54 = vcombine.high %v4388_v51, %v4404_v52  ;;  %v4325_v47 = vld [vmem:[#allocation11 + $0x10] sm:$0xff] }
 0x57a   :  { %7580 = vmatpush1.bf16.msra.mxu1 %v9221_v56  ;;  %v4436_v56 = vld [vmem:[#allocation11 + $0x388] sm:$0xff] }
 0x57b   :  { %7581 = vmatprep.subr.bf16.mxu1 %v9254_v57  ;;  %v9031_v57 = vcombine.low %v4388_v51, %v4404_v52  ;;  %v9064_v58 = vcombine.high %v4420_v55, %v4436_v56 }
 0x57e   :  { %7582 = vmatpush1.bf16.msra.mxu1 %v9253_v60  ;;  %v4468_v60 = vld [vmem:[#allocation11 + $0x488] sm:$0xff] }
 0x57f   :  { %7583 = vmatprep.subr.bf16.mxu1 %v9286_v61  ;;  %v9063_v61 = vcombine.low %v4420_v55, %v4436_v56  ;;  %v9096_v62 = vcombine.high %v4452_v59, %v4468_v60 }
 0x582   :  { %7584 = vmatpush1.bf16.msra.mxu1 %v9285_v0  ;;  %v4500_v0 = vld [vmem:[#allocation11 + $0x588] sm:$0xff] }
 0x583   :  { %7585 = vmatprep.subr.bf16.mxu1 %v9318_v1  ;;  %v9095_v1 = vcombine.low %v4452_v59, %v4468_v60  ;;  %v9128_v2 = vcombine.high %v4484_v63, %v4500_v0 }
 0x586   :  { %7586 = vmatpush1.bf16.msra.mxu1 %v9317_v4  ;;  %v4532_v4 = vld [vmem:[#allocation11 + $0x688] sm:$0xff] }
 0x587   :  { %7587 = vmatprep.subr.bf16.mxu1 %v9350_v5  ;;  %v9127_v5 = vcombine.low %v4484_v63, %v4500_v0  ;;  %v9160_v7 = vcombine.high %v4516_v3, %v4532_v4 }
 0x58a   :  { %7588 = vmatpush1.bf16.msra.mxu1 %v9349_v14  ;;  %v4564_v14 = vld [vmem:[#allocation11 + $0x788] sm:$0xff] }
 0x58b   :  { %7589 = vmatprep.subr.bf16.mxu1 %v9382_v15  ;;  %v9159_v15 = vcombine.low %v4516_v3, %v4532_v4 }
 0x58e   :  { %7590 = vmatpush1.bf16.msra.mxu1 %v9381_v17  ;;  %v9192_v17 = vcombine.high %v4548_v12, %v4564_v14 }
 0x58f   :  { %7591 = vmatprep.subr.bf16.mxu1 %v9414_v20  ;;  %v9191_v20 = vcombine.low %v4548_v12, %v4564_v14 }
 0x592   :  { %7592 = vmatpush1.bf16.msra.mxu1 %v9413_v23  ;;  %v4628_v23 = vld [vmem:[#allocation11 + $0x988] sm:$0xff] }
 0x593   :  { %7593 = vmatprep.subr.bf16.mxu1 %v9446_v30  ;;  %v9256_v27 = vcombine.high %v4612_v22, %v4628_v23  ;;  %v9255_v30 = vcombine.low %v4612_v22, %v4628_v23 }
 0x596   :  { %7594 = vmatpush1.bf16.msra.mxu1 %v9445_v33  ;;  %v4692_v33 = vld [vmem:[#allocation11 + $0xb88] sm:$0xff] }
 0x597   :  { %7604 = vmatprep.subr.bf16.mxu1 %v8968_v37  ;;  %v9320_v24 = vcombine.high %v4676_v32, %v4692_v33  ;;  %v9319_v37 = vcombine.low %v4676_v32, %v4692_v33 }
 0x62c   :  { %v4312_v42 = vpop.f32.mrb[0].mxu1 }
 0x62d   :  { %v4313_v43 = vadd.f32 %v4312_v42, %v4111_v40  ;;  %v4314_v8 = vpop.f32.mrb[1].mxu1  ;;  %v4756_v40 = vld [vmem:[#allocation11 + $0xd88] sm:$0xff] }
 0x62e   :  { %v4315_v9 = vadd.f32 %v4314_v8, %v4115_v41  ;;  %v4316_v10 = vpop.f32.mrb[2].mxu1  ;;  %v9351_v41 = vcombine.low %v4708_v35, %v4724_v36  ;;  %v9384_v42 = vcombine.high %v4740_v39, %v4756_v40  ;;  %v4788_v8 = vld [vmem:[#allocation11 + $0xe88] sm:$0xff] }
 0x62f   :  { %v4319_v44 = vmax.f32 %v4313_v43, 0.0  ;;  %v4317_v26 = vpop.f32.mrb[3].mxu1  ;;  %v4772_v43 = vld [vmem:[#allocation11 + $0xe08] sm:$0xff] }
 0x630   :  { %v4320_v45 = vmax.f32 %v4315_v9, 0.0  ;;  %v9383_v9 = vcombine.low %v4740_v39, %v4756_v40  ;;  %v9416_v10 = vcombine.high %v4772_v43, %v4788_v8  ;;  %v4820_v26 = vld [vmem:[#allocation11 + $0xf88] sm:$0xff] }
 0x631   :  { %v10872_v49 = vpack.c.bf16 %v4319_v44, %v4319_v44  ;;  %v4804_v44 = vld [vmem:[#allocation11 + $0xf08] sm:$0xff] }
 0x632   :  { %v10870_v48 = vpack.c.bf16 %v4320_v45, %v4320_v45  ;;  %v9415_v45 = vcombine.low %v4772_v43, %v4788_v8  ;;  %v9448_v46 = vcombine.high %v4804_v44, %v4820_v26  ;;  %v9447_v51 = vcombine.low %v4804_v44, %v4820_v26 }
 0x634   :  { %7595 = vmatprep.mubr.bf16.mxu1 %v10870_v48  ;;  %8210 = vmatprep.mubr.bf16.mxu0 %v10870_v48 }
 0x635   :  { %7596 = vmatmul.mubr.bf16.vlgmr.msra.gmra.mrb[4].mxu1 %v10872_v49  ;;  %8211 = vmatmul.mubr.bf16.vlgmr.msra.gmra.mrb[4].mxu0 %v10872_v49 }
 0x636   :  { %7605 = vmatpush1.bf16.msra.mxu1 %v8967_v38  ;;  %7636 = vmatprep.mubr.bf16.mxu1 %v10870_v48  ;;  %v9352_v38 = vcombine.high %v4708_v35, %v4724_v36 }
 0x637   :  { %7606 = vmatprep.subr.bf16.mxu1 %v9000_v50  ;;  %v4341_v50 = vld [vmem:[#allocation11 + $0x90] sm:$0xff] }
 0x638   :  { %v8970_v52 = vcombine.high %v4325_v47, %v4341_v50  ;;  %v8969_v55 = vcombine.low %v4325_v47, %v4341_v50 }
 0x63a   :  { %7607 = vmatpush1.bf16.msra.mxu1 %v8999_v53  ;;  %v4357_v53 = vld [vmem:[#allocation11 + $0x110] sm:$0xff] }
 0x63b   :  { %7608 = vmatprep.subr.bf16.mxu1 %v9032_v54  ;;  %v4373_v54 = vld [vmem:[#allocation11 + $0x190] sm:$0xff] }
 0x63c   :  { %v9002_v56 = vcombine.high %v4357_v53, %v4373_v54  ;;  %v9001_v59 = vcombine.low %v4357_v53, %v4373_v54 }
 0x63e   :  { %7609 = vmatpush1.bf16.msra.mxu1 %v9031_v57  ;;  %v4389_v57 = vld [vmem:[#allocation11 + $0x210] sm:$0xff] }
 0x63f   :  { %7610 = vmatprep.subr.bf16.mxu1 %v9064_v58  ;;  %v4405_v58 = vld [vmem:[#allocation11 + $0x290] sm:$0xff] }
 0x640   :  { %v9034_v60 = vcombine.high %v4389_v57, %v4405_v58  ;;  %v9033_v63 = vcombine.low %v4389_v57, %v4405_v58 }
 0x642   :  { %7611 = vmatpush1.bf16.msra.mxu1 %v9063_v61  ;;  %v4421_v61 = vld [vmem:[#allocation11 + $0x310] sm:$0xff] }
 0x643   :  { %7612 = vmatprep.subr.bf16.mxu1 %v9096_v62  ;;  %v4437_v62 = vld [vmem:[#allocation11 + $0x390] sm:$0xff] }
 0x644   :  { %v9066_v0 = vcombine.high %v4421_v61, %v4437_v62  ;;  %v9065_v3 = vcombine.low %v4421_v61, %v4437_v62 }
 0x646   :  { %7613 = vmatpush1.bf16.msra.mxu1 %v9095_v1  ;;  %v4453_v1 = vld [vmem:[#allocation11 + $0x410] sm:$0xff] }
 0x647   :  { %7614 = vmatprep.subr.bf16.mxu1 %v9128_v2  ;;  %v4469_v2 = vld [vmem:[#allocation11 + $0x490] sm:$0xff] }
 0x648   :  { %v9098_v4 = vcombine.high %v4453_v1, %v4469_v2  ;;  %v9097_v12 = vcombine.low %v4453_v1, %v4469_v2 }
 0x64a   :  { %7615 = vmatpush1.bf16.msra.mxu1 %v9127_v5  ;;  %v4485_v5 = vld [vmem:[#allocation11 + $0x510] sm:$0xff] }
 0x64b   :  { %7616 = vmatprep.subr.bf16.mxu1 %v9160_v7  ;;  %v4501_v7 = vld [vmem:[#allocation11 + $0x590] sm:$0xff] }
 0x64c   :  { %v9130_v14 = vcombine.high %v4485_v5, %v4501_v7  ;;  %v9129_v18 = vcombine.low %v4485_v5, %v4501_v7 }
 0x64e   :  { %7617 = vmatpush1.bf16.msra.mxu1 %v9159_v15  ;;  %v4517_v15 = vld [vmem:[#allocation11 + $0x610] sm:$0xff] }
 0x64f   :  { %7618 = vmatprep.subr.bf16.mxu1 %v9192_v17  ;;  %v4533_v17 = vld [vmem:[#allocation11 + $0x690] sm:$0xff] }
 0x650   :  { %v9162_v19 = vcombine.high %v4517_v15, %v4533_v17  ;;  %v9161_v22 = vcombine.low %v4517_v15, %v4533_v17 }
 0x652   :  { %7619 = vmatpush1.bf16.msra.mxu1 %v9191_v20  ;;  %v4549_v20 = vld [vmem:[#allocation11 + $0x710] sm:$0xff] }
 0x653   :  { %7620 = vmatprep.subr.bf16.mxu1 %v9224_v21  ;;  %v4565_v21 = vld [vmem:[#allocation11 + $0x790] sm:$0xff] }
 0x654   :  { %v9194_v23 = vcombine.high %v4549_v20, %v4565_v21  ;;  %v9193_v28 = vcombine.low %v4549_v20, %v4565_v21 }
 0x656   :  { %7621 = vmatpush1.bf16.msra.mxu1 %v9223_v25  ;;  %v4581_v25 = vld [vmem:[#allocation11 + $0x810] sm:$0xff] }
 0x657   :  { %7622 = vmatprep.subr.bf16.mxu1 %v9256_v27  ;;  %v4597_v27 = vld [vmem:[#allocation11 + $0x890] sm:$0xff] }
 0x658   :  { %v9226_v29 = vcombine.high %v4581_v25, %v4597_v27  ;;  %v9225_v32 = vcombine.low %v4581_v25, %v4597_v27 }
 0x65a   :  { %7623 = vmatpush1.bf16.msra.mxu1 %v9255_v30  ;;  %v4613_v30 = vld [vmem:[#allocation11 + $0x910] sm:$0xff] }
 0x65b   :  { %7624 = vmatprep.subr.bf16.mxu1 %v9288_v31  ;;  %v4629_v31 = vld [vmem:[#allocation11 + $0x990] sm:$0xff] }
 0x65c   :  { %v9258_v33 = vcombine.high %v4613_v30, %v4629_v31  ;;  %v9257_v35 = vcombine.low %v4613_v30, %v4629_v31 }
 0x65e   :  { %7625 = vmatpush1.bf16.msra.mxu1 %v9287_v34  ;;  %v4645_v34 = vld [vmem:[#allocation11 + $0xa10] sm:$0xff] }
 0x65f   :  { %7626 = vmatprep.subr.bf16.mxu1 %v9320_v24  ;;  %v4661_v24 = vld [vmem:[#allocation11 + $0xa90] sm:$0xff] }
 0x660   :  { %v9290_v36 = vcombine.high %v4645_v34, %v4661_v24  ;;  %v9289_v39 = vcombine.low %v4645_v34, %v4661_v24 }
 0x662   :  { %7627 = vmatpush1.bf16.msra.mxu1 %v9319_v37  ;;  %v4677_v37 = vld [vmem:[#allocation11 + $0xb10] sm:$0xff] }
 0x663   :  { %7628 = vmatprep.subr.bf16.mxu1 %v9352_v38  ;;  %v4693_v38 = vld [vmem:[#allocation11 + $0xb90] sm:$0xff] }
 0x664   :  { %v9322_v40 = vcombine.high %v4677_v37, %v4693_v38  ;;  %v9321_v43 = vcombine.low %v4677_v37, %v4693_v38 }
 0x666   :  { %7629 = vmatpush1.bf16.msra.mxu1 %v9351_v41  ;;  %v4709_v41 = vld [vmem:[#allocation11 + $0xc10] sm:$0xff] }
 0x667   :  { %7630 = vmatprep.subr.bf16.mxu1 %v9384_v42  ;;  %v4725_v42 = vld [vmem:[#allocation11 + $0xc90] sm:$0xff] }
 0x668   :  { %v9354_v8 = vcombine.high %v4709_v41, %v4725_v42  ;;  %v9353_v44 = vcombine.low %v4709_v41, %v4725_v42 }
 0x66a   :  { %7631 = vmatpush1.bf16.msra.mxu1 %v9383_v9  ;;  %v4741_v9 = vld [vmem:[#allocation11 + $0xd10] sm:$0xff] }
 0x66b   :  { %7632 = vmatprep.subr.bf16.mxu1 %v9416_v10  ;;  %v4757_v10 = vld [vmem:[#allocation11 + $0xd90] sm:$0xff] }
 0x66c   :  { %v9386_v26 = vcombine.high %v4741_v9, %v4757_v10  ;;  %v9385_v47 = vcombine.low %v4741_v9, %v4757_v10 }
 0x66e   :  { %7633 = vmatpush1.bf16.msra.mxu1 %v9415_v45  ;;  %v4773_v45 = vld [vmem:[#allocation11 + $0xe10] sm:$0xff] }
 0x66f   :  { %7634 = vmatprep.subr.bf16.mxu1 %v9448_v46  ;;  %v4789_v46 = vld [vmem:[#allocation11 + $0xe90] sm:$0xff] }
 0x670   :  { %v9418_v50 = vcombine.high %v4773_v45, %v4789_v46  ;;  %v9417_v53 = vcombine.low %v4773_v45, %v4789_v46 }
 0x672   :  { %7635 = vmatpush1.bf16.msra.mxu1 %v9447_v51  ;;  %v4805_v51 = vld [vmem:[#allocation11 + $0xf10] sm:$0xff] }
 0x673   :  { %7645 = vmatprep.subr.bf16.mxu1 %v8970_v52  ;;  %v4821_v52 = vld [vmem:[#allocation11 + $0xf90] sm:$0xff] }
 0x674   :  { %v9450_v54 = vcombine.high %v4805_v51, %v4821_v52  ;;  %v9449_v57 = vcombine.low %v4805_v51, %v4821_v52 }
 0x675   :  { %7637 = vmatmul.mubr.bf16.vlgmr.msra.gmra.mrb[8].mxu1 %v10872_v49 }
 0x676   :  { %7646 = vmatpush1.bf16.msra.mxu1 %v8969_v55  ;;  %7677 = vmatprep.mubr.bf16.mxu1 %v10870_v48  ;;  %v4326_v55 = vld [vmem:[#allocation11 + $0x18] sm:$0xff] }
 0x677   :  { %7647 = vmatprep.subr.bf16.mxu1 %v9002_v56  ;;  %v4342_v56 = vld [vmem:[#allocation11 + $0x98] sm:$0xff] }
 0x678   :  { %v8972_v58 = vcombine.high %v4326_v55, %v4342_v56  ;;  %v8971_v61 = vcombine.low %v4326_v55, %v4342_v56 }
 0x67a   :  { %7648 = vmatpush1.bf16.msra.mxu1 %v9001_v59  ;;  %v4358_v59 = vld [vmem:[#allocation11 + $0x118] sm:$0xff] }
 0x67b   :  { %7649 = vmatprep.subr.bf16.mxu1 %v9034_v60  ;;  %v4374_v60 = vld [vmem:[#allocation11 + $0x198] sm:$0xff] }
 0x67c   :  { %v9004_v62 = vcombine.high %v4358_v59, %v4374_v60  ;;  %v9003_v1 = vcombine.low %v4358_v59, %v4374_v60 }
 0x67e   :  { %7650 = vmatpush1.bf16.msra.mxu1 %v9033_v63  ;;  %v4390_v63 = vld [vmem:[#allocation11 + $0x218] sm:$0xff] }
 0x67f   :  { %7651 = vmatprep.subr.bf16.mxu1 %v9066_v0  ;;  %v4406_v0 = vld [vmem:[#allocation11 + $0x298] sm:$0xff] }
 0x680   :  { %v9036_v2 = vcombine.high %v4390_v63, %v4406_v0  ;;  %v9035_v5 = vcombine.low %v4390_v63, %v4406_v0 }
 0x682   :  { %7652 = vmatpush1.bf16.msra.mxu1 %v9065_v3  ;;  %v4422_v3 = vld [vmem:[#allocation11 + $0x318] sm:$0xff] }
 0x683   :  { %7653 = vmatprep.subr.bf16.mxu1 %v9098_v4  ;;  %v4438_v4 = vld [vmem:[#allocation11 + $0x398] sm:$0xff] }
 0x684   :  { %v9068_v7 = vcombine.high %v4422_v3, %v4438_v4  ;;  %v9067_v15 = vcombine.low %v4422_v3, %v4438_v4 }
 0x686   :  { %7654 = vmatpush1.bf16.msra.mxu1 %v9097_v12  ;;  %v4454_v12 = vld [vmem:[#allocation11 + $0x418] sm:$0xff] }
 0x687   :  { %7655 = vmatprep.subr.bf16.mxu1 %v9130_v14  ;;  %v4470_v14 = vld [vmem:[#allocation11 + $0x498] sm:$0xff] }
 0x688   :  { %v9100_v17 = vcombine.high %v4454_v12, %v4470_v14  ;;  %v9099_v20 = vcombine.low %v4454_v12, %v4470_v14 }
 0x68a   :  { %7656 = vmatpush1.bf16.msra.mxu1 %v9129_v18  ;;  %v4486_v18 = vld [vmem:[#allocation11 + $0x518] sm:$0xff] }
 0x68b   :  { %7657 = vmatprep.subr.bf16.mxu1 %v9162_v19  ;;  %v4502_v19 = vld [vmem:[#allocation11 + $0x598] sm:$0xff] }
 0x68c   :  { %v9132_v21 = vcombine.high %v4486_v18, %v4502_v19  ;;  %v9131_v25 = vcombine.low %v4486_v18, %v4502_v19 }
 0x68e   :  { %7658 = vmatpush1.bf16.msra.mxu1 %v9161_v22  ;;  %v4518_v22 = vld [vmem:[#allocation11 + $0x618] sm:$0xff] }
 0x68f   :  { %7659 = vmatprep.subr.bf16.mxu1 %v9194_v23  ;;  %v4534_v23 = vld [vmem:[#allocation11 + $0x698] sm:$0xff] }
 0x690   :  { %v9164_v27 = vcombine.high %v4518_v22, %v4534_v23  ;;  %v9163_v30 = vcombine.low %v4518_v22, %v4534_v23 }
 0x692   :  { %7660 = vmatpush1.bf16.msra.mxu1 %v9193_v28  ;;  %v4550_v28 = vld [vmem:[#allocation11 + $0x718] sm:$0xff] }
 0x693   :  { %7661 = vmatprep.subr.bf16.mxu1 %v9226_v29  ;;  %v4566_v29 = vld [vmem:[#allocation11 + $0x798] sm:$0xff] }
 0x694   :  { %v9196_v31 = vcombine.high %v4550_v28, %v4566_v29  ;;  %v9195_v34 = vcombine.low %v4550_v28, %v4566_v29  ;;  %v10886_v28 = vsub.s32 6, %v10703_v13 }
 0x696   :  { %7662 = vmatpush1.bf16.msra.mxu1 %v9225_v32  ;;  %v4582_v32 = vld [vmem:[#allocation11 + $0x818] sm:$0xff] }
 0x697   :  { %7663 = vmatprep.subr.bf16.mxu1 %v9258_v33  ;;  %v4598_v33 = vld [vmem:[#allocation11 + $0x898] sm:$0xff] }
 0x698   :  { %v9228_v24 = vcombine.high %v4582_v32, %v4598_v33  ;;  %v9227_v37 = vcombine.low %v4582_v32, %v4598_v33  ;;  %v10891_v32 = vsub.s32 7, %v10703_v13 }
 0x69a   :  { %7664 = vmatpush1.bf16.msra.mxu1 %v9257_v35  ;;  %v4614_v35 = vld [vmem:[#allocation11 + $0x918] sm:$0xff] }
 0x69b   :  { %7665 = vmatprep.subr.bf16.mxu1 %v9290_v36  ;;  %v4630_v36 = vld [vmem:[#allocation11 + $0x998] sm:$0xff] }
 0x69c   :  { %v9260_v38 = vcombine.high %v4614_v35, %v4630_v36  ;;  %v9259_v41 = vcombine.low %v4614_v35, %v4630_v36 }
 0x69e   :  { %7666 = vmatpush1.bf16.msra.mxu1 %v9289_v39  ;;  %v4646_v39 = vld [vmem:[#allocation11 + $0xa18] sm:$0xff] }
 0x69f   :  { %7667 = vmatprep.subr.bf16.mxu1 %v9322_v40  ;;  %v4662_v40 = vld [vmem:[#allocation11 + $0xa98] sm:$0xff] }
 0x6a0   :  { %v9292_v42 = vcombine.high %v4646_v39, %v4662_v40  ;;  %v9291_v9 = vcombine.low %v4646_v39, %v4662_v40 }
 0x6a2   :  { %7668 = vmatpush1.bf16.msra.mxu1 %v9321_v43  ;;  %v4678_v43 = vld [vmem:[#allocation11 + $0xb18] sm:$0xff] }
 0x6a3   :  { %7669 = vmatprep.subr.bf16.mxu1 %v9354_v8  ;;  %v4694_v8 = vld [vmem:[#allocation11 + $0xb98] sm:$0xff] }
 0x6a4   :  { %v9324_v10 = vcombine.high %v4678_v43, %v4694_v8  ;;  %v9323_v45 = vcombine.low %v4678_v43, %v4694_v8  ;;  %v4551_v43 = vld [vmem:[#allocation11 + $0x720] sm:$0xff] }
 0x6a5   :  { %v4567_v8 = vld [vmem:[#allocation11 + $0x7a0] sm:$0xff] }
 0x6a6   :  { %7670 = vmatpush1.bf16.msra.mxu1 %v9353_v44  ;;  %v4710_v44 = vld [vmem:[#allocation11 + $0xc18] sm:$0xff] }
 0x6a7   :  { %7671 = vmatprep.subr.bf16.mxu1 %v9386_v26  ;;  %v4726_v26 = vld [vmem:[#allocation11 + $0xc98] sm:$0xff] }
 0x6a8   :  { %v9356_v46 = vcombine.high %v4710_v44, %v4726_v26  ;;  %v9355_v51 = vcombine.low %v4710_v44, %v4726_v26 }
 0x6aa   :  { %7672 = vmatpush1.bf16.msra.mxu1 %v9385_v47  ;;  %v4742_v47 = vld [vmem:[#allocation11 + $0xd18] sm:$0xff] }
 0x6ab   :  { %7673 = vmatprep.subr.bf16.mxu1 %v9418_v50  ;;  %v4758_v50 = vld [vmem:[#allocation11 + $0xd98] sm:$0xff] }
 0x6ac   :  { %v9388_v52 = vcombine.high %v4742_v47, %v4758_v50  ;;  %v9387_v55 = vcombine.low %v4742_v47, %v4758_v50 }
 0x6ae   :  { %7674 = vmatpush1.bf16.msra.mxu1 %v9417_v53  ;;  %v4774_v53 = vld [vmem:[#allocation11 + $0xe18] sm:$0xff] }
 0x6af   :  { %7675 = vmatprep.subr.bf16.mxu1 %v9450_v54  ;;  %v4790_v54 = vld [vmem:[#allocation11 + $0xe98] sm:$0xff] }
 0x6b0   :  { %v9420_v56 = vcombine.high %v4774_v53, %v4790_v54  ;;  %v9419_v59 = vcombine.low %v4774_v53, %v4790_v54  ;;  %v9198_v54 = vcombine.high %v4551_v43, %v4567_v8 }
 0x6b2   :  { %7676 = vmatpush1.bf16.msra.mxu1 %v9449_v57  ;;  %v4806_v57 = vld [vmem:[#allocation11 + $0xf18] sm:$0xff] }
 0x6b3   :  { %7686 = vmatprep.subr.bf16.mxu1 %v8972_v58  ;;  %v4822_v58 = vld [vmem:[#allocation11 + $0xf98] sm:$0xff] }
 0x6b4   :  { %v9452_v60 = vcombine.high %v4806_v57, %v4822_v58  ;;  %v9451_v63 = vcombine.low %v4806_v57, %v4822_v58  ;;  %v4583_v57 = vld [vmem:[#allocation11 + $0x820] sm:$0xff] }
 0x6b5   :  { %7678 = vmatmul.mubr.bf16.vlgmr.msra.gmra.mrb[12].mxu1 %v10872_v49  ;;  %v4599_v58 = vld [vmem:[#allocation11 + $0x8a0] sm:$0xff] }
 0x6b6   :  { %7687 = vmatpush1.bf16.msra.mxu1 %v8971_v61  ;;  %7718 = vmatprep.mubr.bf16.mxu1 %v10870_v48  ;;  %v4327_v61 = vld [vmem:[#allocation11 + $0x20] sm:$0xff] }
 0x6b7   :  { %7688 = vmatprep.subr.bf16.mxu1 %v9004_v62  ;;  %v4343_v62 = vld [vmem:[#allocation11 + $0xa0] sm:$0xff] }
 0x6b8   :  { %v8974_v0 = vcombine.high %v4327_v61, %v4343_v62  ;;  %v8973_v3 = vcombine.low %v4327_v61, %v4343_v62  ;;  %v4615_v61 = vld [vmem:[#allocation11 + $0x920] sm:$0xff] }
 0x6b9   :  { %v4631_v62 = vld [vmem:[#allocation11 + $0x9a0] sm:$0xff] }
 0x6ba   :  { %7689 = vmatpush1.bf16.msra.mxu1 %v9003_v1  ;;  %v4359_v1 = vld [vmem:[#allocation11 + $0x120] sm:$0xff] }
 0x6bb   :  { %7690 = vmatprep.subr.bf16.mxu1 %v9036_v2  ;;  %v4375_v2 = vld [vmem:[#allocation11 + $0x1a0] sm:$0xff] }
 0x6bc   :  { %v9006_v4 = vcombine.high %v4359_v1, %v4375_v2  ;;  %v9005_v12 = vcombine.low %v4359_v1, %v4375_v2  ;;  %v4647_v1 = vld [vmem:[#allocation11 + $0xa20] sm:$0xff] }
 0x6bd   :  { %v4663_v2 = vld [vmem:[#allocation11 + $0xaa0] sm:$0xff] }
 0x6be   :  { %7691 = vmatpush1.bf16.msra.mxu1 %v9035_v5  ;;  %v4391_v5 = vld [vmem:[#allocation11 + $0x220] sm:$0xff] }
 0x6bf   :  { %7692 = vmatprep.subr.bf16.mxu1 %v9068_v7  ;;  %v4407_v7 = vld [vmem:[#allocation11 + $0x2a0] sm:$0xff] }
 0x6c0   :  { %v9038_v14 = vcombine.high %v4391_v5, %v4407_v7  ;;  %v9037_v18 = vcombine.low %v4391_v5, %v4407_v7  ;;  %v4679_v5 = vld [vmem:[#allocation11 + $0xb20] sm:$0xff] }
 0x6c1   :  { %v4695_v7 = vld [vmem:[#allocation11 + $0xba0] sm:$0xff] }
 0x6c2   :  { %7693 = vmatpush1.bf16.msra.mxu1 %v9067_v15  ;;  %v4423_v15 = vld [vmem:[#allocation11 + $0x320] sm:$0xff] }
 0x6c3   :  { %7694 = vmatprep.subr.bf16.mxu1 %v9100_v17  ;;  %v4439_v17 = vld [vmem:[#allocation11 + $0x3a0] sm:$0xff] }
 0x6c4   :  { %v9070_v19 = vcombine.high %v4423_v15, %v4439_v17  ;;  %v9069_v22 = vcombine.low %v4423_v15, %v4439_v17  ;;  %v4711_v15 = vld [vmem:[#allocation11 + $0xc20] sm:$0xff] }
 0x6c5   :  { %v4727_v17 = vld [vmem:[#allocation11 + $0xca0] sm:$0xff] }
 0x6c6   :  { %7695 = vmatpush1.bf16.msra.mxu1 %v9099_v20  ;;  %v4455_v20 = vld [vmem:[#allocation11 + $0x420] sm:$0xff] }
 0x6c7   :  { %7696 = vmatprep.subr.bf16.mxu1 %v9132_v21  ;;  %v4471_v21 = vld [vmem:[#allocation11 + $0x4a0] sm:$0xff] }
 0x6c8   :  { %v9102_v23 = vcombine.high %v4455_v20, %v4471_v21  ;;  %v9101_v29 = vcombine.low %v4455_v20, %v4471_v21  ;;  %v4743_v20 = vld [vmem:[#allocation11 + $0xd20] sm:$0xff] }
 0x6c9   :  { %v4759_v21 = vld [vmem:[#allocation11 + $0xda0] sm:$0xff] }
 0x6ca   :  { %7697 = vmatpush1.bf16.msra.mxu1 %v9131_v25  ;;  %v4487_v25 = vld [vmem:[#allocation11 + $0x520] sm:$0xff] }
 0x6cb   :  { %7698 = vmatprep.subr.bf16.mxu1 %v9164_v27  ;;  %v4503_v27 = vld [vmem:[#allocation11 + $0x5a0] sm:$0xff] }
 0x6cc   :  { %v9134_v33 = vcombine.high %v4487_v25, %v4503_v27 }
 0x6ce   :  { %7699 = vmatpush1.bf16.msra.mxu1 %v9163_v30  ;;  %v10888_v30 = vld [vmem:[#allocation13] sm:$0xff] }
 0x6cf   :  { %7700 = vmatprep.subr.bf16.mxu1 %v9196_v31  ;;  %v4838_v31 = vld [vmem:[#allocation13 + $0x18] sm:$0xff]  ;;  %v4846_v35 = vrot.slane %v10888_v30, %v10858_v6 }
 0x6d0   :  { %v4966_v36 = vrot.slane %v4838_v31, %v10886_v28  ;;  %v4970_v39 = vrot.slane %v4838_v31, %v10891_v32 }
 0x6d2   :  { %7701 = vmatpush1.bf16.msra.mxu1 %v9195_v34  ;;  %v4519_v34 = vld [vmem:[#allocation11 + $0x620] sm:$0xff] }
 0x6d3   :  { %7702 = vmatprep.subr.bf16.mxu1 %v9228_v24  ;;  %v4535_v24 = vld [vmem:[#allocation11 + $0x6a0] sm:$0xff] }
 0x6d4   :  { %v9166_v40 = vcombine.high %v4519_v34, %v4535_v24 }
 0x6d6   :  { %7703 = vmatpush1.bf16.msra.mxu1 %v9227_v37  ;;  %v9133_v37 = vcombine.low %v4487_v25, %v4503_v27  ;;  %v4775_v25 = vld [vmem:[#allocation11 + $0xe20] sm:$0xff] }
 0x6d7   :  { %7704 = vmatprep.subr.bf16.mxu1 %v9260_v38  ;;  %v4850_v38 = vrot.slane %v10888_v30, %v10861_v11  ;;  %v4791_v27 = vld [vmem:[#allocation11 + $0xea0] sm:$0xff] }
 0x6d8   :  { %v9422_v31 = vcombine.high %v4775_v25, %v4791_v27 }
 0x6da   :  { %7705 = vmatpush1.bf16.msra.mxu1 %v9259_v41 }
 0x6db   :  { %7706 = vmatprep.subr.bf16.mxu1 %v9292_v42 }
 0x6de   :  { %7707 = vmatpush1.bf16.msra.mxu1 %v9291_v9 }
 0x6df   :  { %7708 = vmatprep.subr.bf16.mxu1 %v9324_v10 }
 0x6e2   :  { %7709 = vmatpush1.bf16.msra.mxu1 %v9323_v45 }
 0x6e3   :  { %7710 = vmatprep.subr.bf16.mxu1 %v9356_v46 }
 0x6e6   :  { %7711 = vmatpush1.bf16.msra.mxu1 %v9355_v51  ;;  %v9165_v51 = vcombine.low %v4519_v34, %v4535_v24  ;;  %v4823_v34 = vld [vmem:[#allocation11 + $0xfa0] sm:$0xff]  ;;  %v9421_v24 = vcombine.low %v4775_v25, %v4791_v27 }
 0x6e7   :  { %7712 = vmatprep.subr.bf16.mxu1 %v9388_v52 }
 0x6ea   :  { %7713 = vmatpush1.bf16.msra.mxu1 %v9387_v55 }
 0x6eb   :  { %7714 = vmatprep.subr.bf16.mxu1 %v9420_v56 }
 0x6ee   :  { %7715 = vmatpush1.bf16.msra.mxu1 %v9419_v59  ;;  %v9197_v59 = vcombine.low %v4551_v43, %v4567_v8  ;;  %v4392_v8 = vld [vmem:[#allocation11 + $0x228] sm:$0xff] }
 0x6ef   :  { %7716 = vmatprep.subr.bf16.mxu1 %v9452_v60  ;;  %v9230_v60 = vcombine.high %v4583_v57, %v4599_v58 }
 0x6f2   :  { %7717 = vmatpush1.bf16.msra.mxu1 %v9451_v63  ;;  %v9229_v63 = vcombine.low %v4583_v57, %v4599_v58  ;;  %v4472_v57 = vld [vmem:[#allocation11 + $0x4a8] sm:$0xff] }
 0x6f3   :  { %7727 = vmatprep.subr.bf16.mxu1 %v8974_v0  ;;  %v9262_v0 = vcombine.high %v4615_v61, %v4631_v62 }
 0x6f5   :  { %7719 = vmatmul.mubr.bf16.vlgmr.msra.gmra.mrb[16].mxu1 %v10872_v49 }
 0x6f6   :  { %7728 = vmatpush1.bf16.msra.mxu1 %v8973_v3  ;;  %7759 = vmatprep.mubr.bf16.mxu1 %v10870_v48  ;;  %v9261_v3 = vcombine.low %v4615_v61, %v4631_v62  ;;  %v4504_v61 = vld [vmem:[#allocation11 + $0x5a8] sm:$0xff]  ;;  %v10914_v62 = vsub.s32 2, %v10703_v13 }
 0x6f7   :  { %7729 = vmatprep.subr.bf16.mxu1 %v9006_v4  ;;  %v9294_v4 = vcombine.high %v4647_v1, %v4663_v2 }
 0x6fa   :  { %7730 = vmatpush1.bf16.msra.mxu1 %v9005_v12  ;;  %v9293_v12 = vcombine.low %v4647_v1, %v4663_v2  ;;  %v4520_v2 = vld [vmem:[#allocation11 + $0x628] sm:$0xff] }
 0x6fb   :  { %7731 = vmatprep.subr.bf16.mxu1 %v9038_v14  ;;  %v9326_v14 = vcombine.high %v4679_v5, %v4695_v7 }
 0x6fe   :  { %7732 = vmatpush1.bf16.msra.mxu1 %v9037_v18  ;;  %v9325_v18 = vcombine.low %v4679_v5, %v4695_v7 }
 0x6ff   :  { %7733 = vmatprep.subr.bf16.mxu1 %v9070_v19  ;;  %v9358_v19 = vcombine.high %v4711_v15, %v4727_v17 }
 0x702   :  { %7734 = vmatpush1.bf16.msra.mxu1 %v9069_v22  ;;  %v9357_v22 = vcombine.low %v4711_v15, %v4727_v17  ;;  %v4552_v15 = vld [vmem:[#allocation11 + $0x728] sm:$0xff] }
 0x703   :  { %7735 = vmatprep.subr.bf16.mxu1 %v9102_v23  ;;  %v9390_v23 = vcombine.high %v4743_v20, %v4759_v21  ;;  %v4568_v17 = vld [vmem:[#allocation11 + $0x7a8] sm:$0xff] }
 0x704   :  { %v9200_v25 = vcombine.high %v4552_v15, %v4568_v17 }
 0x706   :  { %7736 = vmatpush1.bf16.msra.mxu1 %v9101_v29  ;;  %v9389_v29 = vcombine.low %v4743_v20, %v4759_v21 }
 0x707   :  { %7737 = vmatprep.subr.bf16.mxu1 %v9134_v33  ;;  %v4807_v33 = vld [vmem:[#allocation11 + $0xf20] sm:$0xff] }
 0x708   :  { %v7597_v41 = vpop.f32.mrb[4].mxu1  ;;  %v8212_v42 = vpop.f32.mrb[4].mxu0 }
 0x709   :  { %v10899_v9 = vadd.f32 %v7597_v41, %v4846_v35  ;;  %v10901_v10 = vadd.f32 %v8212_v42, %v4966_v36  ;;  %v7599_v44 = vpop.f32.mrb[5].mxu1  ;;  %v8214_v26 = vpop.f32.mrb[5].mxu0  ;;  %v9454_v35 = vcombine.high %v4807_v33, %v4823_v34  ;;  %v4328_v36 = vld [vmem:[#allocation11 + $0x28] sm:$0xff] }
 0x70a   :  { %v10903_v45 = vadd.f32 %v7599_v44, %v4850_v38  ;;  %7738 = vmatpush1.bf16.msra.mxu1 %v9133_v37  ;;  %v10905_v46 = vadd.f32 %v8214_v26, %v4970_v39  ;;  %v7601_v47 = vpop.f32.mrb[6].mxu1  ;;  %v8216_v50 = vpop.f32.mrb[6].mxu0  ;;  %v4344_v37 = vld [vmem:[#allocation11 + $0xa8] sm:$0xff]  ;;  %v9453_v38 = vcombine.low %v4807_v33, %v4823_v34 }
 0x70b   :  { %v7602_v52 = vpop.f32.mrb[7].mxu1  ;;  %v8217_v53 = vpop.f32.mrb[7].mxu0  ;;  %7739 = vmatprep.subr.bf16.mxu1 %v9166_v40  ;;  %v8976_v39 = vcombine.high %v4328_v36, %v4344_v37  ;;  %v4360_v40 = vld [vmem:[#allocation11 + $0x128] sm:$0xff]  ;;  %v8975_v42 = vcombine.low %v4328_v36, %v4344_v37 }
 0x70c   :  { %v8251_v55 = vcombine.low %v10899_v9, %v10903_v45  ;;  %v8371_v56 = vcombine.low %v10901_v10, %v10905_v46  ;;  %v4376_v41 = vld [vmem:[#allocation11 + $0x1a8] sm:$0xff] }
 0x70d   :  { %v9008_v43 = vcombine.high %v4360_v40, %v4376_v41  ;;  %v4408_v44 = vld [vmem:[#allocation11 + $0x2a8] sm:$0xff]  ;;  %v9007_v26 = vcombine.low %v4360_v40, %v4376_v41 }
 0x70e   :  { %7740 = vmatpush1.bf16.msra.mxu1 %v9165_v51  ;;  %v9040_v47 = vcombine.high %v4392_v8, %v4408_v44  ;;  %v4424_v50 = vld [vmem:[#allocation11 + $0x328] sm:$0xff]  ;;  %v9039_v52 = vcombine.low %v4392_v8, %v4408_v44  ;;  %v8259_v33 = vrot.slane %v8251_v55, %v10706_v16 }
 0x70f   :  { %7741 = vmatprep.subr.bf16.mxu1 %v9198_v54  ;;  %v4440_v51 = vld [vmem:[#allocation11 + $0x3a8] sm:$0xff] }
 0x710   :  { %v9072_v53 = vcombine.high %v4424_v50, %v4440_v51  ;;  %v4456_v54 = vld [vmem:[#allocation11 + $0x428] sm:$0xff]  ;;  %v9071_v58 = vcombine.low %v4424_v50, %v4440_v51 }
 0x711   :  { %v4616_v37 = vld [vmem:[#allocation11 + $0x928] sm:$0xff] }
 0x712   :  { %7742 = vmatpush1.bf16.msra.mxu1 %v9197_v59  ;;  %v9104_v59 = vcombine.high %v4456_v54, %v4472_v57  ;;  %v4648_v41 = vld [vmem:[#allocation11 + $0xa28] sm:$0xff] }
 0x713   :  { %7743 = vmatprep.subr.bf16.mxu1 %v9230_v60  ;;  %v4488_v60 = vld [vmem:[#allocation11 + $0x528] sm:$0xff] }
 0x714   :  { %v9136_v1 = vcombine.high %v4488_v60, %v4504_v61  ;;  %v9135_v7 = vcombine.low %v4488_v60, %v4504_v61  ;;  %v4680_v45 = vld [vmem:[#allocation11 + $0xb28] sm:$0xff] }
 0x715   :  { %v4696_v55 = vld [vmem:[#allocation11 + $0xba8] sm:$0xff] }
 0x716   :  { %7744 = vmatpush1.bf16.msra.mxu1 %v9229_v63  ;;  %v9103_v63 = vcombine.low %v4456_v54, %v4472_v57  ;;  %v9328_v44 = vcombine.high %v4680_v45, %v4696_v55  ;;  %v9327_v50 = vcombine.low %v4680_v45, %v4696_v55 }
 0x717   :  { %7745 = vmatprep.subr.bf16.mxu1 %v9262_v0  ;;  %v10917_v0 = vsub.s32 3, %v10703_v13 }
 0x719   :  { %v4858_v5 = vrot.slane %v10888_v30, %v10917_v0 }
 0x71a   :  { %7746 = vmatpush1.bf16.msra.mxu1 %v9261_v3  ;;  %v4536_v3 = vld [vmem:[#allocation11 + $0x6a8] sm:$0xff] }
 0x71b   :  { %7747 = vmatprep.subr.bf16.mxu1 %v9294_v4  ;;  %v4854_v4 = vrot.slane %v10888_v30, %v10914_v62 }
 0x71e   :  { %7748 = vmatpush1.bf16.msra.mxu1 %v9293_v12  ;;  %v9168_v12 = vcombine.high %v4520_v2, %v4536_v3 }
 0x71f   :  { %7749 = vmatprep.subr.bf16.mxu1 %v9326_v14 }
 0x722   :  { %7750 = vmatpush1.bf16.msra.mxu1 %v9325_v18 }
 0x723   :  { %7751 = vmatprep.subr.bf16.mxu1 %v9358_v19 }
 0x726   :  { %7752 = vmatpush1.bf16.msra.mxu1 %v9357_v22  ;;  %v9167_v22 = vcombine.low %v4520_v2, %v4536_v3 }
 0x727   :  { %7753 = vmatprep.subr.bf16.mxu1 %v9390_v23 }
 0x72a   :  { %7754 = vmatpush1.bf16.msra.mxu1 %v9389_v29  ;;  %v4584_v29 = vld [vmem:[#allocation11 + $0x828] sm:$0xff] }
 0x72b   :  { %7755 = vmatprep.subr.bf16.mxu1 %v9422_v31  ;;  %v4600_v31 = vld [vmem:[#allocation11 + $0x8a8] sm:$0xff] }
 0x72e   :  { %7756 = vmatpush1.bf16.msra.mxu1 %v9421_v24  ;;  %v9199_v24 = vcombine.low %v4552_v15, %v4568_v17  ;;  %v4377_v15 = vld [vmem:[#allocation11 + $0x1b0] sm:$0xff] }
 0x72f   :  { %7757 = vmatprep.subr.bf16.mxu1 %v9454_v35  ;;  %v9232_v35 = vcombine.high %v4584_v29, %v4600_v31 }
 0x732   :  { %7758 = vmatpush1.bf16.msra.mxu1 %v9453_v38  ;;  %v4632_v38 = vld [vmem:[#allocation11 + $0x9a8] sm:$0xff] }
 0x733   :  { %7768 = vmatprep.subr.bf16.mxu1 %v8976_v39  ;;  %v9231_v39 = vcombine.low %v4584_v29, %v4600_v31  ;;  %v9264_v40 = vcombine.high %v4616_v37, %v4632_v38  ;;  %v4457_v31 = vld [vmem:[#allocation11 + $0x430] sm:$0xff] }
 0x735   :  { %7760 = vmatmul.mubr.bf16.vlgmr.msra.gmra.mrb[20].mxu1 %v10872_v49 }
 0x736   :  { %7769 = vmatpush1.bf16.msra.mxu1 %v8975_v42  ;;  %7800 = vmatprep.mubr.bf16.mxu1 %v10870_v48  ;;  %v4664_v42 = vld [vmem:[#allocation11 + $0xaa8] sm:$0xff] }
 0x737   :  { %7770 = vmatprep.subr.bf16.mxu1 %v9008_v43  ;;  %v9263_v43 = vcombine.low %v4616_v37, %v4632_v38  ;;  %v9296_v9 = vcombine.high %v4648_v41, %v4664_v42  ;;  %v9295_v8 = vcombine.low %v4648_v41, %v4664_v42  ;;  %v10931_v37 = vsub.s32 4, %v10703_v13  ;;  %v4521_v41 = vld [vmem:[#allocation11 + $0x630] sm:$0xff] }
 0x738   :  { %v4537_v42 = vld [vmem:[#allocation11 + $0x6b0] sm:$0xff] }
 0x739   :  { %v9170_v55 = vcombine.high %v4521_v41, %v4537_v42 }
 0x73a   :  { %7771 = vmatpush1.bf16.msra.mxu1 %v9007_v26  ;;  %v4712_v26 = vld [vmem:[#allocation11 + $0xc28] sm:$0xff] }
 0x73b   :  { %7772 = vmatprep.subr.bf16.mxu1 %v9040_v47  ;;  %v4728_v47 = vld [vmem:[#allocation11 + $0xca8] sm:$0xff] }
 0x73c   :  { %v9360_v51 = vcombine.high %v4712_v26, %v4728_v47  ;;  %v9359_v54 = vcombine.low %v4712_v26, %v4728_v47  ;;  %v4569_v26 = vld [vmem:[#allocation11 + $0x7b0] sm:$0xff] }
 0x73e   :  { %7773 = vmatpush1.bf16.msra.mxu1 %v9039_v52  ;;  %v4744_v52 = vld [vmem:[#allocation11 + $0xd28] sm:$0xff] }
 0x73f   :  { %7774 = vmatprep.subr.bf16.mxu1 %v9072_v53  ;;  %v4760_v53 = vld [vmem:[#allocation11 + $0xda8] sm:$0xff] }
 0x740   :  { %v9392_v57 = vcombine.high %v4744_v52, %v4760_v53  ;;  %v9391_v60 = vcombine.low %v4744_v52, %v4760_v53  ;;  %v9169_v52 = vcombine.low %v4521_v41, %v4537_v42  ;;  %v4330_v41 = vld [vmem:[#allocation11 + $0x38] sm:$0xff] }
 0x741   :  { %v4346_v42 = vld [vmem:[#allocation11 + $0xb8] sm:$0xff] }
 0x742   :  { %7775 = vmatpush1.bf16.msra.mxu1 %v9071_v58  ;;  %v4776_v58 = vld [vmem:[#allocation11 + $0xe28] sm:$0xff] }
 0x743   :  { %7776 = vmatprep.subr.bf16.mxu1 %v9104_v59  ;;  %v4792_v59 = vld [vmem:[#allocation11 + $0xea8] sm:$0xff] }
 0x744   :  { %v9424_v61 = vcombine.high %v4776_v58, %v4792_v59  ;;  %v9423_v2 = vcombine.low %v4776_v58, %v4792_v59  ;;  %v4585_v58 = vld [vmem:[#allocation11 + $0x830] sm:$0xff] }
 0x745   :  { %v4601_v59 = vld [vmem:[#allocation11 + $0x8b0] sm:$0xff] }
 0x746   :  { %7777 = vmatpush1.bf16.msra.mxu1 %v9103_v63  ;;  %v4808_v63 = vld [vmem:[#allocation11 + $0xf28] sm:$0xff] }
 0x747   :  { %7778 = vmatprep.subr.bf16.mxu1 %v9136_v1  ;;  %v4824_v1 = vld [vmem:[#allocation11 + $0xfa8] sm:$0xff] }
 0x748   :  { %v7638_v14 = vpop.f32.mrb[8].mxu1  ;;  %v9456_v3 = vcombine.high %v4808_v63, %v4824_v1 }
 0x749   :  { %v7639_v18 = vadd.f32 %v7638_v14, %v4854_v4  ;;  %v7640_v19 = vpop.f32.mrb[9].mxu1  ;;  %v4329_v4 = vld [vmem:[#allocation11 + $0x30] sm:$0xff] }
 0x74a   :  { %v7641_v20 = vadd.f32 %v7640_v19, %v4858_v5  ;;  %v7642_v21 = vpop.f32.mrb[10].mxu1  ;;  %7779 = vmatpush1.bf16.msra.mxu1 %v9135_v7  ;;  %v4345_v5 = vld [vmem:[#allocation11 + $0xb0] sm:$0xff]  ;;  %v9455_v7 = vcombine.low %v4808_v63, %v4824_v1 }
 0x74b   :  { %v7643_v23 = vpop.f32.mrb[11].mxu1  ;;  %7780 = vmatprep.subr.bf16.mxu1 %v9168_v12  ;;  %v8978_v12 = vcombine.high %v4329_v4, %v4345_v5  ;;  %v4361_v14 = vld [vmem:[#allocation11 + $0x130] sm:$0xff]  ;;  %v8977_v17 = vcombine.low %v4329_v4, %v4345_v5 }
 0x74c   :  { %v8252_v27 = vcombine.low %v7639_v18, %v7641_v20  ;;  %v9010_v18 = vcombine.high %v4361_v14, %v4377_v15  ;;  %v4393_v19 = vld [vmem:[#allocation11 + $0x230] sm:$0xff]  ;;  %v9009_v21 = vcombine.low %v4361_v14, %v4377_v15 }
 0x74d   :  { %v4409_v20 = vld [vmem:[#allocation11 + $0x2b0] sm:$0xff] }
 0x74e   :  { %v8266_v34 = vrot.slane %v8252_v27, %v10706_v16  ;;  %7781 = vmatpush1.bf16.msra.mxu1 %v9167_v22  ;;  %v9042_v22 = vcombine.high %v4393_v19, %v4409_v20  ;;  %v4425_v23 = vld [vmem:[#allocation11 + $0x330] sm:$0xff]  ;;  %v9041_v27 = vcombine.low %v4393_v19, %v4409_v20 }
 0x74f   :  { %7782 = vmatprep.subr.bf16.mxu1 %v9200_v25  ;;  %v4441_v25 = vld [vmem:[#allocation11 + $0x3b0] sm:$0xff] }
 0x750   :  { %v8267_v36 = vcombine.low %v8259_v33, %v8266_v34  ;;  %v9074_v29 = vcombine.high %v4425_v23, %v4441_v25  ;;  %v4473_v33 = vld [vmem:[#allocation11 + $0x4b0] sm:$0xff]  ;;  %v9073_v34 = vcombine.low %v4425_v23, %v4441_v25 }
 0x751   :  { %v9105_v38 = vcombine.low %v4457_v31, %v4473_v33  ;;  %v4617_v63 = vld [vmem:[#allocation11 + $0x930] sm:$0xff] }
 0x752   :  { %8395 = vst [vmem:[#allocation14] sm:$0xff] %v8267_v36  ;;  %7783 = vmatpush1.bf16.msra.mxu1 %v9199_v24  ;;  %v9106_v24 = vcombine.high %v4457_v31, %v4473_v33  ;;  %v4505_v36 = vld [vmem:[#allocation11 + $0x5b0] sm:$0xff] }
 0x753   :  { %7784 = vmatprep.subr.bf16.mxu1 %v9232_v35  ;;  %v4489_v35 = vld [vmem:[#allocation11 + $0x530] sm:$0xff] }
 0x754   :  { %v9137_v45 = vcombine.low %v4489_v35, %v4505_v36  ;;  %v4633_v1 = vld [vmem:[#allocation11 + $0x9b0] sm:$0xff] }
 0x755   :  { %v4649_v4 = vld [vmem:[#allocation11 + $0xa30] sm:$0xff] }
 0x756   :  { %7785 = vmatpush1.bf16.msra.mxu1 %v9231_v39  ;;  %v10934_v39 = vsub.s32 5, %v10703_v13  ;;  %v4665_v5 = vld [vmem:[#allocation11 + $0xab0] sm:$0xff] }
 0x757   :  { %7786 = vmatprep.subr.bf16.mxu1 %v9264_v40  ;;  %v9138_v40 = vcombine.high %v4489_v35, %v4505_v36  ;;  %v4681_v14 = vld [vmem:[#allocation11 + $0xb30] sm:$0xff] }
 0x758   :  { %v4697_v15 = vld [vmem:[#allocation11 + $0xbb0] sm:$0xff] }
 0x759   :  { %v4713_v19 = vld [vmem:[#allocation11 + $0xc30] sm:$0xff] }
 0x75a   :  { %7787 = vmatpush1.bf16.msra.mxu1 %v9263_v43  ;;  %v4862_v43 = vrot.slane %v10888_v30, %v10931_v37  ;;  %v4729_v20 = vld [vmem:[#allocation11 + $0xcb0] sm:$0xff] }
 0x75b   :  { %7788 = vmatprep.subr.bf16.mxu1 %v9296_v9  ;;  %v4866_v9 = vrot.slane %v10888_v30, %v10934_v39  ;;  %v4745_v23 = vld [vmem:[#allocation11 + $0xd30] sm:$0xff] }
 0x75c   :  { %v4761_v25 = vld [vmem:[#allocation11 + $0xdb0] sm:$0xff] }
 0x75d   :  { %v4777_v31 = vld [vmem:[#allocation11 + $0xe30] sm:$0xff] }
 0x75e   :  { %7789 = vmatpush1.bf16.msra.mxu1 %v9295_v8  ;;  %v4793_v33 = vld [vmem:[#allocation11 + $0xeb0] sm:$0xff] }
 0x75f   :  { %7790 = vmatprep.subr.bf16.mxu1 %v9328_v44  ;;  %v4553_v44 = vld [vmem:[#allocation11 + $0x730] sm:$0xff] }
 0x760   :  { %v4809_v35 = vld [vmem:[#allocation11 + $0xf30] sm:$0xff] }
 0x761   :  { %v4825_v36 = vld [vmem:[#allocation11 + $0xfb0] sm:$0xff] }
 0x762   :  { %7791 = vmatpush1.bf16.msra.mxu1 %v9327_v50 }
 0x763   :  { %7792 = vmatprep.subr.bf16.mxu1 %v9360_v51 }
 0x766   :  { %7793 = vmatpush1.bf16.msra.mxu1 %v9359_v54  ;;  %v9202_v54 = vcombine.high %v4553_v44, %v4569_v26 }
 0x767   :  { %7794 = vmatprep.subr.bf16.mxu1 %v9392_v57 }
 0x76a   :  { %7795 = vmatpush1.bf16.msra.mxu1 %v9391_v60  ;;  %v9201_v60 = vcombine.low %v4553_v44, %v4569_v26  ;;  %v4394_v26 = vld [vmem:[#allocation11 + $0x238] sm:$0xff] }
 0x76b   :  { %7796 = vmatprep.subr.bf16.mxu1 %v9424_v61  ;;  %v9234_v61 = vcombine.high %v4585_v58, %v4601_v59 }
 0x76e   :  { %7797 = vmatpush1.bf16.msra.mxu1 %v9423_v2  ;;  %v9233_v2 = vcombine.low %v4585_v58, %v4601_v59 }
 0x76f   :  { %7798 = vmatprep.subr.bf16.mxu1 %v9456_v3  ;;  %v9266_v3 = vcombine.high %v4617_v63, %v4633_v1 }
 0x772   :  { %7799 = vmatpush1.bf16.msra.mxu1 %v9455_v7  ;;  %v9265_v7 = vcombine.low %v4617_v63, %v4633_v1 }
 0x773   :  { %7809 = vmatprep.subr.bf16.mxu1 %v8978_v12  ;;  %v9298_v12 = vcombine.high %v4649_v4, %v4665_v5 }
 0x775   :  { %7801 = vmatmul.mubr.bf16.vlgmr.msra.gmra.mrb[24].mxu1 %v10872_v49 }
 0x776   :  { %7810 = vmatpush1.bf16.msra.mxu1 %v8977_v17  ;;  %7841 = vmatprep.mubr.bf16.mxu1 %v10870_v48  ;;  %v9297_v17 = vcombine.low %v4649_v4, %v4665_v5 }
 0x777   :  { %7811 = vmatprep.subr.bf16.mxu1 %v9010_v18  ;;  %v9330_v18 = vcombine.high %v4681_v14, %v4697_v15 }
 0x77a   :  { %7812 = vmatpush1.bf16.msra.mxu1 %v9009_v21  ;;  %v9329_v21 = vcombine.low %v4681_v14, %v4697_v15  ;;  %v4870_v14 = vrot.slane %v10888_v30, %v10886_v28  ;;  %v4874_v15 = vrot.slane %v10888_v30, %v10891_v32 }
 0x77b   :  { %7813 = vmatprep.subr.bf16.mxu1 %v9042_v22  ;;  %v9362_v22 = vcombine.high %v4713_v19, %v4729_v20 }
 0x77e   :  { %7814 = vmatpush1.bf16.msra.mxu1 %v9041_v27  ;;  %v9361_v27 = vcombine.low %v4713_v19, %v4729_v20  ;;  %v4554_v20 = vld [vmem:[#allocation11 + $0x738] sm:$0xff] }
 0x77f   :  { %7815 = vmatprep.subr.bf16.mxu1 %v9074_v29  ;;  %v9394_v29 = vcombine.high %v4745_v23, %v4761_v25 }
 0x782   :  { %7816 = vmatpush1.bf16.msra.mxu1 %v9073_v34  ;;  %v9393_v34 = vcombine.low %v4745_v23, %v4761_v25 }
 0x783   :  { %7817 = vmatprep.subr.bf16.mxu1 %v9106_v24  ;;  %v9426_v24 = vcombine.high %v4777_v31, %v4793_v33 }
 0x786   :  { %7818 = vmatpush1.bf16.msra.mxu1 %v9105_v38  ;;  %v9425_v38 = vcombine.low %v4777_v31, %v4793_v33 }
 0x787   :  { %7819 = vmatprep.subr.bf16.mxu1 %v9138_v40  ;;  %v9458_v40 = vcombine.high %v4809_v35, %v4825_v36 }
 0x788   :  { %v7679_v8 = vpop.f32.mrb[12].mxu1 }
 0x789   :  { %v10940_v47 = vadd.f32 %v7679_v8, %v4862_v43  ;;  %v7681_v13 = vpop.f32.mrb[13].mxu1  ;;  %v9457_v43 = vcombine.low %v4809_v35, %v4825_v36  ;;  %v8979_v8 = vcombine.low %v4330_v41, %v4346_v42  ;;  %v4602_v35 = vld [vmem:[#allocation11 + $0x8b8] sm:$0xff] }
 0x78a   :  { %v10942_v50 = vadd.f32 %v7681_v13, %v4866_v9  ;;  %v7683_v51 = vpop.f32.mrb[14].mxu1  ;;  %7820 = vmatpush1.bf16.msra.mxu1 %v9137_v45  ;;  %v8980_v9 = vcombine.high %v4330_v41, %v4346_v42  ;;  %v4362_v45 = vld [vmem:[#allocation11 + $0x138] sm:$0xff] }
 0x78b   :  { %v7684_v53 = vpop.f32.mrb[15].mxu1  ;;  %7821 = vmatprep.subr.bf16.mxu1 %v9170_v55  ;;  %v4378_v55 = vld [vmem:[#allocation11 + $0x1b8] sm:$0xff] }
 0x78c   :  { %v8268_v57 = vcombine.low %v10940_v47, %v10942_v50  ;;  %v9012_v44 = vcombine.high %v4362_v45, %v4378_v55  ;;  %v4410_v13 = vld [vmem:[#allocation11 + $0x2b8] sm:$0xff]  ;;  %v9011_v51 = vcombine.low %v4362_v45, %v4378_v55 }
 0x78d   :  { %v4426_v53 = vld [vmem:[#allocation11 + $0x338] sm:$0xff]  ;;  %v9043_v58 = vcombine.low %v4394_v26, %v4410_v13 }
 0x78e   :  { %7822 = vmatpush1.bf16.msra.mxu1 %v9169_v52  ;;  %v9044_v52 = vcombine.high %v4394_v26, %v4410_v13  ;;  %v8276_v30 = vrot.slane %v8268_v57, %v10706_v16  ;;  %v4618_v42 = vld [vmem:[#allocation11 + $0x938] sm:$0xff] }
 0x78f   :  { %7823 = vmatprep.subr.bf16.mxu1 %v9202_v54  ;;  %v4442_v54 = vld [vmem:[#allocation11 + $0x3b8] sm:$0xff] }
 0x790   :  { %v9076_v59 = vcombine.high %v4426_v53, %v4442_v54  ;;  %v9075_v63 = vcombine.low %v4426_v53, %v4442_v54  ;;  %v4650_v55 = vld [vmem:[#allocation11 + $0xa38] sm:$0xff] }
 0x791   :  { %v4682_v50 = vld [vmem:[#allocation11 + $0xb38] sm:$0xff] }
 0x792   :  { %7824 = vmatpush1.bf16.msra.mxu1 %v9201_v60  ;;  %v4458_v60 = vld [vmem:[#allocation11 + $0x438] sm:$0xff] }
 0x793   :  { %7825 = vmatprep.subr.bf16.mxu1 %v9234_v61  ;;  %v4474_v61 = vld [vmem:[#allocation11 + $0x4b8] sm:$0xff] }
 0x794   :  { %v9108_v1 = vcombine.high %v4458_v60, %v4474_v61  ;;  %v9107_v4 = vcombine.low %v4458_v60, %v4474_v61  ;;  %v4698_v57 = vld [vmem:[#allocation11 + $0xbb8] sm:$0xff] }
 0x795   :  { %v9332_v13 = vcombine.high %v4682_v50, %v4698_v57  ;;  %v9331_v53 = vcombine.low %v4682_v50, %v4698_v57 }
 0x796   :  { %7826 = vmatpush1.bf16.msra.mxu1 %v9233_v2  ;;  %v4490_v2 = vld [vmem:[#allocation11 + $0x538] sm:$0xff] }
 0x797   :  { %7827 = vmatprep.subr.bf16.mxu1 %v9266_v3  ;;  %v4506_v3 = vld [vmem:[#allocation11 + $0x5b8] sm:$0xff] }
 0x798   :  { %v9140_v5 = vcombine.high %v4490_v2, %v4506_v3 }
 0x79a   :  { %7828 = vmatpush1.bf16.msra.mxu1 %v9265_v7  ;;  %v4522_v7 = vld [vmem:[#allocation11 + $0x638] sm:$0xff] }
 0x79b   :  { %7829 = vmatprep.subr.bf16.mxu1 %v9298_v12  ;;  %v4538_v12 = vld [vmem:[#allocation11 + $0x6b8] sm:$0xff] }
 0x79e   :  { %7830 = vmatpush1.bf16.msra.mxu1 %v9297_v17  ;;  %v9139_v17 = vcombine.low %v4490_v2, %v4506_v3 }
 0x79f   :  { %7831 = vmatprep.subr.bf16.mxu1 %v9330_v18  ;;  %v9172_v18 = vcombine.high %v4522_v7, %v4538_v12 }
 0x7a2   :  { %7832 = vmatpush1.bf16.msra.mxu1 %v9329_v21  ;;  %v4570_v21 = vld [vmem:[#allocation11 + $0x7b8] sm:$0xff] }
 0x7a3   :  { %7833 = vmatprep.subr.bf16.mxu1 %v9362_v22  ;;  %v9204_v33 = vcombine.high %v4554_v20, %v4570_v21 }
 0x7a6   :  { %7834 = vmatpush1.bf16.msra.mxu1 %v9361_v27 }
 0x7a7   :  { %7835 = vmatprep.subr.bf16.mxu1 %v9394_v29  ;;  %v9171_v29 = vcombine.low %v4522_v7, %v4538_v12 }
 0x7aa   :  { %7836 = vmatpush1.bf16.msra.mxu1 %v9393_v34 }
 0x7ab   :  { %7837 = vmatprep.subr.bf16.mxu1 %v9426_v24  ;;  %v4586_v24 = vld [vmem:[#allocation11 + $0x838] sm:$0xff] }
 0x7ae   :  { %7838 = vmatpush1.bf16.msra.mxu1 %v9425_v38  ;;  %v9203_v38 = vcombine.low %v4554_v20, %v4570_v21  ;;  %v4379_v20 = vld [vmem:[#allocation11 + $0x1c0] sm:$0xff] }
 0x7af   :  { %7839 = vmatprep.subr.bf16.mxu1 %v9458_v40  ;;  %v9236_v40 = vcombine.high %v4586_v24, %v4602_v35 }
 0x7b2   :  { %7840 = vmatpush1.bf16.msra.mxu1 %v9457_v43  ;;  %v4634_v43 = vld [vmem:[#allocation11 + $0x9b8] sm:$0xff] }
 0x7b3   :  { %7850 = vmatprep.subr.bf16.mxu1 %v8980_v9  ;;  %v9235_v9 = vcombine.low %v4586_v24, %v4602_v35  ;;  %v9268_v45 = vcombine.high %v4618_v42, %v4634_v43  ;;  %v4459_v35 = vld [vmem:[#allocation11 + $0x440] sm:$0xff] }
 0x7b5   :  { %7842 = vmatmul.mubr.bf16.vlgmr.msra.gmra.mrb[28].mxu1 %v10872_v49 }
 0x7b6   :  { %7851 = vmatpush1.bf16.msra.mxu1 %v8979_v8  ;;  %7882 = vmatprep.mubr.bf16.mxu1 %v10870_v48  ;;  %v4666_v8 = vld [vmem:[#allocation11 + $0xab8] sm:$0xff] }
 0x7b7   :  { %7852 = vmatprep.subr.bf16.mxu1 %v9012_v44  ;;  %v9267_v44 = vcombine.low %v4618_v42, %v4634_v43  ;;  %v9300_v47 = vcombine.high %v4650_v55, %v4666_v8  ;;  %v9299_v26 = vcombine.low %v4650_v55, %v4666_v8  ;;  %v10959_v43 = vld [vmem:[#allocation13 + $0x8] sm:$0xff]  ;;  %v4539_v55 = vld [vmem:[#allocation11 + $0x6c0] sm:$0xff] }
 0x7b8   :  { %v4878_v8 = vrot.slane %v10959_v43, %v10858_v6 }
 0x7ba   :  { %7853 = vmatpush1.bf16.msra.mxu1 %v9011_v51  ;;  %v4714_v51 = vld [vmem:[#allocation11 + $0xc38] sm:$0xff] }
 0x7bb   :  { %7854 = vmatprep.subr.bf16.mxu1 %v9044_v52  ;;  %v4730_v52 = vld [vmem:[#allocation11 + $0xcb8] sm:$0xff] }
 0x7bc   :  { %v9364_v54 = vcombine.high %v4714_v51, %v4730_v52  ;;  %v9363_v60 = vcombine.low %v4714_v51, %v4730_v52 }
 0x7be   :  { %7855 = vmatpush1.bf16.msra.mxu1 %v9043_v58  ;;  %v4746_v58 = vld [vmem:[#allocation11 + $0xd38] sm:$0xff] }
 0x7bf   :  { %7856 = vmatprep.subr.bf16.mxu1 %v9076_v59  ;;  %v4762_v59 = vld [vmem:[#allocation11 + $0xdb8] sm:$0xff] }
 0x7c0   :  { %v9396_v61 = vcombine.high %v4746_v58, %v4762_v59  ;;  %v9395_v2 = vcombine.low %v4746_v58, %v4762_v59 }
 0x7c2   :  { %7857 = vmatpush1.bf16.msra.mxu1 %v9075_v63  ;;  %v4778_v63 = vld [vmem:[#allocation11 + $0xe38] sm:$0xff] }
 0x7c3   :  { %7858 = vmatprep.subr.bf16.mxu1 %v9108_v1  ;;  %v4794_v1 = vld [vmem:[#allocation11 + $0xeb8] sm:$0xff] }
 0x7c4   :  { %v9428_v3 = vcombine.high %v4778_v63, %v4794_v1  ;;  %v9427_v7 = vcombine.low %v4778_v63, %v4794_v1  ;;  %v4587_v63 = vld [vmem:[#allocation11 + $0x840] sm:$0xff] }
 0x7c5   :  { %v4603_v1 = vld [vmem:[#allocation11 + $0x8c0] sm:$0xff] }
 0x7c6   :  { %7859 = vmatpush1.bf16.msra.mxu1 %v9107_v4  ;;  %v4810_v4 = vld [vmem:[#allocation11 + $0xf38] sm:$0xff] }
 0x7c7   :  { %7860 = vmatprep.subr.bf16.mxu1 %v9140_v5  ;;  %v4826_v5 = vld [vmem:[#allocation11 + $0xfb8] sm:$0xff] }
 0x7c8   :  { %v7720_v19 = vpop.f32.mrb[16].mxu1  ;;  %v9460_v12 = vcombine.high %v4810_v4, %v4826_v5 }
 0x7c9   :  { %v7721_v22 = vadd.f32 %v7720_v19, %v4870_v14  ;;  %v7722_v23 = vpop.f32.mrb[17].mxu1  ;;  %v4331_v14 = vld [vmem:[#allocation11 + $0x40] sm:$0xff] }
 0x7ca   :  { %v7723_v25 = vadd.f32 %v7722_v23, %v4874_v15  ;;  %v7724_v27 = vpop.f32.mrb[18].mxu1  ;;  %7861 = vmatpush1.bf16.msra.mxu1 %v9139_v17  ;;  %v4347_v15 = vld [vmem:[#allocation11 + $0xc0] sm:$0xff]  ;;  %v9459_v17 = vcombine.low %v4810_v4, %v4826_v5 }
 0x7cb   :  { %v7725_v31 = vpop.f32.mrb[19].mxu1  ;;  %7862 = vmatprep.subr.bf16.mxu1 %v9172_v18  ;;  %v8982_v18 = vcombine.high %v4331_v14, %v4347_v15  ;;  %v4363_v19 = vld [vmem:[#allocation11 + $0x140] sm:$0xff]  ;;  %v8981_v21 = vcombine.low %v4331_v14, %v4347_v15 }
 0x7cc   :  { %v8269_v34 = vcombine.low %v7721_v22, %v7723_v25  ;;  %v9014_v22 = vcombine.high %v4363_v19, %v4379_v20  ;;  %v4395_v23 = vld [vmem:[#allocation11 + $0x240] sm:$0xff]  ;;  %v9013_v27 = vcombine.low %v4363_v19, %v4379_v20 }
 0x7cd   :  { %v4411_v25 = vld [vmem:[#allocation11 + $0x2c0] sm:$0xff] }
 0x7ce   :  { %v8283_v36 = vrot.slane %v8269_v34, %v10706_v16  ;;  %7863 = vmatpush1.bf16.msra.mxu1 %v9171_v29  ;;  %v9046_v29 = vcombine.high %v4395_v23, %v4411_v25  ;;  %v4427_v31 = vld [vmem:[#allocation11 + $0x340] sm:$0xff]  ;;  %v9045_v34 = vcombine.low %v4395_v23, %v4411_v25 }
 0x7cf   :  { %7864 = vmatprep.subr.bf16.mxu1 %v9204_v33  ;;  %v4443_v33 = vld [vmem:[#allocation11 + $0x3c0] sm:$0xff] }
 0x7d0   :  { %v8284_v41 = vcombine.low %v8276_v30, %v8283_v36  ;;  %v9078_v24 = vcombine.high %v4427_v31, %v4443_v33  ;;  %v4475_v30 = vld [vmem:[#allocation11 + $0x4c0] sm:$0xff]  ;;  %v9077_v36 = vcombine.low %v4427_v31, %v4443_v33 }
 0x7d1   :  { %v9109_v42 = vcombine.low %v4459_v35, %v4475_v30  ;;  %v4619_v4 = vld [vmem:[#allocation11 + $0x940] sm:$0xff] }
 0x7d2   :  { %8396 = vst [vmem:[#allocation14 + $0x8] sm:$0xff] %v8284_v41  ;;  %7865 = vmatpush1.bf16.msra.mxu1 %v9203_v38  ;;  %v9110_v38 = vcombine.high %v4459_v35, %v4475_v30  ;;  %v4507_v41 = vld [vmem:[#allocation11 + $0x5c0] sm:$0xff] }
 0x7d3   :  { %7866 = vmatprep.subr.bf16.mxu1 %v9236_v40  ;;  %v4491_v40 = vld [vmem:[#allocation11 + $0x540] sm:$0xff] }
 0x7d4   :  { %v4635_v5 = vld [vmem:[#allocation11 + $0x9c0] sm:$0xff] }
 0x7d5   :  { %v4651_v14 = vld [vmem:[#allocation11 + $0xa40] sm:$0xff] }
 0x7d6   :  { %7867 = vmatpush1.bf16.msra.mxu1 %v9235_v9  ;;  %v9142_v9 = vcombine.high %v4491_v40, %v4507_v41  ;;  %v4667_v15 = vld [vmem:[#allocation11 + $0xac0] sm:$0xff] }
 0x7d7   :  { %7868 = vmatprep.subr.bf16.mxu1 %v9268_v45  ;;  %v4523_v45 = vld [vmem:[#allocation11 + $0x640] sm:$0xff] }
 0x7d8   :  { %v9174_v50 = vcombine.high %v4523_v45, %v4539_v55  ;;  %v9173_v58 = vcombine.low %v4523_v45, %v4539_v55  ;;  %v4683_v19 = vld [vmem:[#allocation11 + $0xb40] sm:$0xff]  ;;  %v4332_v45 = vld [vmem:[#allocation11 + $0x48] sm:$0xff] }
 0x7d9   :  { %v4699_v20 = vld [vmem:[#allocation11 + $0xbc0] sm:$0xff]  ;;  %v4348_v55 = vld [vmem:[#allocation11 + $0xc8] sm:$0xff] }
 0x7da   :  { %7869 = vmatpush1.bf16.msra.mxu1 %v9267_v44  ;;  %v4882_v44 = vrot.slane %v10959_v43, %v10861_v11  ;;  %v4715_v23 = vld [vmem:[#allocation11 + $0xc40] sm:$0xff] }
 0x7db   :  { %7870 = vmatprep.subr.bf16.mxu1 %v9300_v47  ;;  %v9141_v47 = vcombine.low %v4491_v40, %v4507_v41  ;;  %v4731_v25 = vld [vmem:[#allocation11 + $0xcc0] sm:$0xff] }
 0x7dc   :  { %v4747_v31 = vld [vmem:[#allocation11 + $0xd40] sm:$0xff] }
 0x7dd   :  { %v4763_v33 = vld [vmem:[#allocation11 + $0xdc0] sm:$0xff] }
 0x7de   :  { %7871 = vmatpush1.bf16.msra.mxu1 %v9299_v26  ;;  %v4555_v26 = vld [vmem:[#allocation11 + $0x740] sm:$0xff] }
 0x7df   :  { %7872 = vmatprep.subr.bf16.mxu1 %v9332_v13  ;;  %v4571_v13 = vld [vmem:[#allocation11 + $0x7c0] sm:$0xff] }
 0x7e0   :  { %v4779_v35 = vld [vmem:[#allocation11 + $0xe40] sm:$0xff] }
 0x7e1   :  { %v4795_v30 = vld [vmem:[#allocation11 + $0xec0] sm:$0xff] }
 0x7e2   :  { %7873 = vmatpush1.bf16.msra.mxu1 %v9331_v53  ;;  %v4811_v40 = vld [vmem:[#allocation11 + $0xf40] sm:$0xff] }
 0x7e3   :  { %7874 = vmatprep.subr.bf16.mxu1 %v9364_v54  ;;  %v4827_v41 = vld [vmem:[#allocation11 + $0xfc0] sm:$0xff] }
 0x7e6   :  { %7875 = vmatpush1.bf16.msra.mxu1 %v9363_v60  ;;  %v9206_v60 = vcombine.high %v4555_v26, %v4571_v13 }
 0x7e7   :  { %7876 = vmatprep.subr.bf16.mxu1 %v9396_v61 }
 0x7ea   :  { %7877 = vmatpush1.bf16.msra.mxu1 %v9395_v2  ;;  %v9205_v2 = vcombine.low %v4555_v26, %v4571_v13  ;;  %v4396_v13 = vld [vmem:[#allocation11 + $0x248] sm:$0xff] }
 0x7eb   :  { %7878 = vmatprep.subr.bf16.mxu1 %v9428_v3  ;;  %v9238_v3 = vcombine.high %v4587_v63, %v4603_v1 }
 0x7ee   :  { %7879 = vmatpush1.bf16.msra.mxu1 %v9427_v7  ;;  %v9237_v7 = vcombine.low %v4587_v63, %v4603_v1 }
 0x7ef   :  { %7880 = vmatprep.subr.bf16.mxu1 %v9460_v12  ;;  %v9270_v12 = vcombine.high %v4619_v4, %v4635_v5 }
 0x7f2   :  { %7881 = vmatpush1.bf16.msra.mxu1 %v9459_v17  ;;  %v9269_v17 = vcombine.low %v4619_v4, %v4635_v5 }
 0x7f3   :  { %7891 = vmatprep.subr.bf16.mxu1 %v8982_v18  ;;  %v9302_v18 = vcombine.high %v4651_v14, %v4667_v15 }
 0x7f5   :  { %7883 = vmatmul.mubr.bf16.vlgmr.msra.gmra.mrb[32].mxu1 %v10872_v49 }
 0x7f6   :  { %7892 = vmatpush1.bf16.msra.mxu1 %v8981_v21  ;;  %7923 = vmatprep.mubr.bf16.mxu1 %v10870_v48  ;;  %v9301_v21 = vcombine.low %v4651_v14, %v4667_v15 }
 0x7f7   :  { %7893 = vmatprep.subr.bf16.mxu1 %v9014_v22  ;;  %v9334_v22 = vcombine.high %v4683_v19, %v4699_v20 }
 0x7fa   :  { %7894 = vmatpush1.bf16.msra.mxu1 %v9013_v27  ;;  %v9333_v27 = vcombine.low %v4683_v19, %v4699_v20  ;;  %v4886_v19 = vrot.slane %v10959_v43, %v10914_v62  ;;  %v4890_v20 = vrot.slane %v10959_v43, %v10917_v0 }
 0x7fb   :  { %7895 = vmatprep.subr.bf16.mxu1 %v9046_v29  ;;  %v9366_v29 = vcombine.high %v4715_v23, %v4731_v25 }
 0x7fe   :  { %7896 = vmatpush1.bf16.msra.mxu1 %v9045_v34  ;;  %v9365_v34 = vcombine.low %v4715_v23, %v4731_v25  ;;  %v4556_v25 = vld [vmem:[#allocation11 + $0x748] sm:$0xff] }
 0x7ff   :  { %7897 = vmatprep.subr.bf16.mxu1 %v9078_v24  ;;  %v9398_v24 = vcombine.high %v4747_v31, %v4763_v33 }
 0x802   :  { %7898 = vmatpush1.bf16.msra.mxu1 %v9077_v36  ;;  %v9397_v36 = vcombine.low %v4747_v31, %v4763_v33 }
 0x803   :  { %7899 = vmatprep.subr.bf16.mxu1 %v9110_v38  ;;  %v9430_v38 = vcombine.high %v4779_v35, %v4795_v30 }
 0x806   :  { %7900 = vmatpush1.bf16.msra.mxu1 %v9109_v42  ;;  %v9429_v42 = vcombine.low %v4779_v35, %v4795_v30 }
 0x807   :  { %7901 = vmatprep.subr.bf16.mxu1 %v9142_v9  ;;  %v9462_v9 = vcombine.high %v4811_v40, %v4827_v41 }
 0x808   :  { %v7761_v57 = vpop.f32.mrb[20].mxu1 }
 0x809   :  { %v10965_v51 = vadd.f32 %v7761_v57, %v4878_v8  ;;  %v7763_v52 = vpop.f32.mrb[21].mxu1  ;;  %v9461_v8 = vcombine.low %v4811_v40, %v4827_v41  ;;  %v8983_v57 = vcombine.low %v4332_v45, %v4348_v55  ;;  %v4604_v40 = vld [vmem:[#allocation11 + $0x8c8] sm:$0xff] }
 0x80a   :  { %v10967_v53 = vadd.f32 %v7763_v52, %v4882_v44  ;;  %v7765_v54 = vpop.f32.mrb[22].mxu1  ;;  %7902 = vmatpush1.bf16.msra.mxu1 %v9141_v47  ;;  %v8984_v44 = vcombine.high %v4332_v45, %v4348_v55  ;;  %v4364_v47 = vld [vmem:[#allocation11 + $0x148] sm:$0xff] }
 0x80b   :  { %v7766_v59 = vpop.f32.mrb[23].mxu1  ;;  %7903 = vmatprep.subr.bf16.mxu1 %v9174_v50  ;;  %v4380_v50 = vld [vmem:[#allocation11 + $0x1c8] sm:$0xff] }
 0x80c   :  { %v8285_v61 = vcombine.low %v10965_v51, %v10967_v53  ;;  %v9016_v26 = vcombine.high %v4364_v47, %v4380_v50  ;;  %v4412_v52 = vld [vmem:[#allocation11 + $0x2c8] sm:$0xff]  ;;  %v9015_v54 = vcombine.low %v4364_v47, %v4380_v50 }
 0x80d   :  { %v4428_v59 = vld [vmem:[#allocation11 + $0x348] sm:$0xff]  ;;  %v9047_v63 = vcombine.low %v4396_v13, %v4412_v52 }
 0x80e   :  { %7904 = vmatpush1.bf16.msra.mxu1 %v9173_v58  ;;  %v9048_v58 = vcombine.high %v4396_v13, %v4412_v52  ;;  %v8293_v41 = vrot.slane %v8285_v61, %v10706_v16  ;;  %v4684_v53 = vld [vmem:[#allocation11 + $0xb48] sm:$0xff] }
 0x80f   :  { %7905 = vmatprep.subr.bf16.mxu1 %v9206_v60  ;;  %v4444_v60 = vld [vmem:[#allocation11 + $0x3c8] sm:$0xff] }
 0x810   :  { %v9080_v1 = vcombine.high %v4428_v59, %v4444_v60  ;;  %v9079_v4 = vcombine.low %v4428_v59, %v4444_v60  ;;  %v4700_v61 = vld [vmem:[#allocation11 + $0xbc8] sm:$0xff] }
 0x811   :  { %v4732_v59 = vld [vmem:[#allocation11 + $0xcc8] sm:$0xff]  ;;  %v9335_v60 = vcombine.low %v4684_v53, %v4700_v61 }
 0x812   :  { %7906 = vmatpush1.bf16.msra.mxu1 %v9205_v2  ;;  %v4460_v2 = vld [vmem:[#allocation11 + $0x448] sm:$0xff] }
 0x813   :  { %7907 = vmatprep.subr.bf16.mxu1 %v9238_v3  ;;  %v4476_v3 = vld [vmem:[#allocation11 + $0x4c8] sm:$0xff] }
 0x814   :  { %v9112_v5 = vcombine.high %v4460_v2, %v4476_v3  ;;  %v9111_v14 = vcombine.low %v4460_v2, %v4476_v3  ;;  %v4764_v2 = vld [vmem:[#allocation11 + $0xdc8] sm:$0xff] }
 0x816   :  { %7908 = vmatpush1.bf16.msra.mxu1 %v9237_v7  ;;  %v4492_v7 = vld [vmem:[#allocation11 + $0x548] sm:$0xff] }
 0x817   :  { %7909 = vmatprep.subr.bf16.mxu1 %v9270_v12  ;;  %v4508_v12 = vld [vmem:[#allocation11 + $0x5c8] sm:$0xff] }
 0x818   :  { %v9144_v15 = vcombine.high %v4492_v7, %v4508_v12 }
 0x81a   :  { %7910 = vmatpush1.bf16.msra.mxu1 %v9269_v17  ;;  %v4524_v17 = vld [vmem:[#allocation11 + $0x648] sm:$0xff] }
 0x81b   :  { %7911 = vmatprep.subr.bf16.mxu1 %v9302_v18  ;;  %v4540_v18 = vld [vmem:[#allocation11 + $0x6c8] sm:$0xff] }
 0x81e   :  { %7912 = vmatpush1.bf16.msra.mxu1 %v9301_v21  ;;  %v9143_v21 = vcombine.low %v4492_v7, %v4508_v12  ;;  %v4796_v7 = vld [vmem:[#allocation11 + $0xec8] sm:$0xff] }
 0x81f   :  { %7913 = vmatprep.subr.bf16.mxu1 %v9334_v22  ;;  %v9176_v22 = vcombine.high %v4524_v17, %v4540_v18 }
 0x822   :  { %7914 = vmatpush1.bf16.msra.mxu1 %v9333_v27  ;;  %v4572_v27 = vld [vmem:[#allocation11 + $0x7c8] sm:$0xff] }
 0x823   :  { %7915 = vmatprep.subr.bf16.mxu1 %v9366_v29  ;;  %v9208_v30 = vcombine.high %v4556_v25, %v4572_v27 }
 0x826   :  { %7916 = vmatpush1.bf16.msra.mxu1 %v9365_v34 }
 0x827   :  { %7917 = vmatprep.subr.bf16.mxu1 %v9398_v24  ;;  %v9175_v24 = vcombine.low %v4524_v17, %v4540_v18  ;;  %v4828_v17 = vld [vmem:[#allocation11 + $0xfc8] sm:$0xff] }
 0x82a   :  { %7918 = vmatpush1.bf16.msra.mxu1 %v9397_v36 }
 0x82b   :  { %7919 = vmatprep.subr.bf16.mxu1 %v9430_v38  ;;  %v4588_v38 = vld [vmem:[#allocation11 + $0x848] sm:$0xff] }
 0x82c   :  { %v9240_v45 = vcombine.high %v4588_v38, %v4604_v40  ;;  %v9239_v47 = vcombine.low %v4588_v38, %v4604_v40 }
 0x82e   :  { %7920 = vmatpush1.bf16.msra.mxu1 %v9429_v42 }
 0x82f   :  { %7921 = vmatprep.subr.bf16.mxu1 %v9462_v9  ;;  %v9207_v9 = vcombine.low %v4556_v25, %v4572_v27  ;;  %v4365_v25 = vld [vmem:[#allocation11 + $0x150] sm:$0xff] }
 0x830   :  { %v4381_v27 = vld [vmem:[#allocation11 + $0x1d0] sm:$0xff] }
 0x832   :  { %7922 = vmatpush1.bf16.msra.mxu1 %v9461_v8  ;;  %v4620_v8 = vld [vmem:[#allocation11 + $0x948] sm:$0xff] }
 0x833   :  { %7932 = vmatprep.subr.bf16.mxu1 %v8984_v44  ;;  %v4636_v44 = vld [vmem:[#allocation11 + $0x9c8] sm:$0xff] }
 0x834   :  { %v9272_v50 = vcombine.high %v4620_v8, %v4636_v44  ;;  %v9271_v13 = vcombine.low %v4620_v8, %v4636_v44  ;;  %v4509_v8 = vld [vmem:[#allocation11 + $0x5d0] sm:$0xff] }
 0x835   :  { %7924 = vmatmul.mubr.bf16.vlgmr.msra.gmra.mrb[36].mxu1 %v10872_v49 }
 0x836   :  { %7933 = vmatpush1.bf16.msra.mxu1 %v8983_v57  ;;  %7964 = vmatprep.mubr.bf16.mxu1 %v10870_v48  ;;  %v4652_v57 = vld [vmem:[#allocation11 + $0xa48] sm:$0xff] }
 0x837   :  { %7934 = vmatprep.subr.bf16.mxu1 %v9016_v26  ;;  %v4668_v26 = vld [vmem:[#allocation11 + $0xac8] sm:$0xff] }
 0x838   :  { %v9304_v51 = vcombine.high %v4652_v57, %v4668_v26  ;;  %v9303_v52 = vcombine.low %v4652_v57, %v4668_v26  ;;  %v4541_v57 = vld [vmem:[#allocation11 + $0x6d0] sm:$0xff]  ;;  %v4894_v26 = vrot.slane %v10959_v43, %v10931_v37 }
 0x83a   :  { %7935 = vmatpush1.bf16.msra.mxu1 %v9015_v54  ;;  %v9336_v54 = vcombine.high %v4684_v53, %v4700_v61 }
 0x83b   :  { %7936 = vmatprep.subr.bf16.mxu1 %v9048_v58  ;;  %v4716_v58 = vld [vmem:[#allocation11 + $0xc48] sm:$0xff] }
 0x83c   :  { %v9367_v3 = vcombine.low %v4716_v58, %v4732_v59 }
 0x83e   :  { %7937 = vmatpush1.bf16.msra.mxu1 %v9047_v63  ;;  %v9368_v63 = vcombine.high %v4716_v58, %v4732_v59 }
 0x83f   :  { %7938 = vmatprep.subr.bf16.mxu1 %v9080_v1  ;;  %v4748_v1 = vld [vmem:[#allocation11 + $0xd48] sm:$0xff] }
 0x840   :  { %v9399_v12 = vcombine.low %v4748_v1, %v4764_v2 }
 0x842   :  { %7939 = vmatpush1.bf16.msra.mxu1 %v9079_v4  ;;  %v9400_v4 = vcombine.high %v4748_v1, %v4764_v2 }
 0x843   :  { %7940 = vmatprep.subr.bf16.mxu1 %v9112_v5  ;;  %v4780_v5 = vld [vmem:[#allocation11 + $0xe48] sm:$0xff] }
 0x844   :  { %v9431_v18 = vcombine.low %v4780_v5, %v4796_v7 }
 0x846   :  { %7941 = vmatpush1.bf16.msra.mxu1 %v9111_v14  ;;  %v9432_v14 = vcombine.high %v4780_v5, %v4796_v7  ;;  %v4589_v5 = vld [vmem:[#allocation11 + $0x850] sm:$0xff] }
 0x847   :  { %7942 = vmatprep.subr.bf16.mxu1 %v9144_v15  ;;  %v4812_v15 = vld [vmem:[#allocation11 + $0xf48] sm:$0xff]  ;;  %v4605_v7 = vld [vmem:[#allocation11 + $0x8d0] sm:$0xff] }
 0x848   :  { %v7802_v23 = vpop.f32.mrb[24].mxu1 }
 0x849   :  { %v7803_v29 = vadd.f32 %v7802_v23, %v4886_v19  ;;  %v7804_v31 = vpop.f32.mrb[25].mxu1  ;;  %v9464_v19 = vcombine.high %v4812_v15, %v4828_v17 }
 0x84a   :  { %v7805_v33 = vadd.f32 %v7804_v31, %v4890_v20  ;;  %v7806_v34 = vpop.f32.mrb[26].mxu1  ;;  %7943 = vmatpush1.bf16.msra.mxu1 %v9143_v21  ;;  %v4333_v20 = vld [vmem:[#allocation11 + $0x50] sm:$0xff]  ;;  %v9018_v31 = vcombine.high %v4365_v25, %v4381_v27 }
 0x84b   :  { %v7807_v35 = vpop.f32.mrb[27].mxu1  ;;  %7944 = vmatprep.subr.bf16.mxu1 %v9176_v22  ;;  %v4349_v21 = vld [vmem:[#allocation11 + $0xd0] sm:$0xff]  ;;  %v9463_v22 = vcombine.low %v4812_v15, %v4828_v17 }
 0x84c   :  { %v8286_v36 = vcombine.low %v7803_v29, %v7805_v33  ;;  %v8986_v23 = vcombine.high %v4333_v20, %v4349_v21  ;;  %v8985_v29 = vcombine.low %v4333_v20, %v4349_v21  ;;  %v4397_v33 = vld [vmem:[#allocation11 + $0x250] sm:$0xff] }
 0x84d   :  { %v4413_v34 = vld [vmem:[#allocation11 + $0x2d0] sm:$0xff] }
 0x84e   :  { %v8300_v42 = vrot.slane %v8286_v36, %v10706_v16  ;;  %7945 = vmatpush1.bf16.msra.mxu1 %v9175_v24  ;;  %v9017_v24 = vcombine.low %v4365_v25, %v4381_v27  ;;  %v9050_v35 = vcombine.high %v4397_v33, %v4413_v34  ;;  %v4445_v36 = vld [vmem:[#allocation11 + $0x3d0] sm:$0xff]  ;;  %v9049_v38 = vcombine.low %v4397_v33, %v4413_v34 }
 0x84f   :  { %7946 = vmatprep.subr.bf16.mxu1 %v9208_v30  ;;  %v4429_v30 = vld [vmem:[#allocation11 + $0x350] sm:$0xff] }
 0x850   :  { %v8301_v55 = vcombine.low %v8293_v41, %v8300_v42  ;;  %v9082_v40 = vcombine.high %v4429_v30, %v4445_v36  ;;  %v4461_v41 = vld [vmem:[#allocation11 + $0x450] sm:$0xff] }
 0x851   :  { %v4477_v42 = vld [vmem:[#allocation11 + $0x4d0] sm:$0xff] }
 0x852   :  { %8397 = vst [vmem:[#allocation14 + $0x10] sm:$0xff] %v8301_v55  ;;  %7947 = vmatpush1.bf16.msra.mxu1 %v9207_v9  ;;  %v9081_v9 = vcombine.low %v4429_v30, %v4445_v36  ;;  %v4493_v55 = vld [vmem:[#allocation11 + $0x550] sm:$0xff]  ;;  %v9113_v44 = vcombine.low %v4461_v41, %v4477_v42 }
 0x853   :  { %7948 = vmatprep.subr.bf16.mxu1 %v9240_v45  ;;  %v9114_v45 = vcombine.high %v4461_v41, %v4477_v42  ;;  %v4621_v15 = vld [vmem:[#allocation11 + $0x950] sm:$0xff] }
 0x854   :  { %v4637_v17 = vld [vmem:[#allocation11 + $0x9d0] sm:$0xff] }
 0x855   :  { %v4653_v20 = vld [vmem:[#allocation11 + $0xa50] sm:$0xff] }
 0x856   :  { %7949 = vmatpush1.bf16.msra.mxu1 %v9239_v47  ;;  %v9146_v47 = vcombine.high %v4493_v55, %v4509_v8  ;;  %v4669_v21 = vld [vmem:[#allocation11 + $0xad0] sm:$0xff] }
 0x857   :  { %7950 = vmatprep.subr.bf16.mxu1 %v9272_v50  ;;  %v4525_v50 = vld [vmem:[#allocation11 + $0x650] sm:$0xff] }
 0x858   :  { %v9178_v53 = vcombine.high %v4525_v50, %v4541_v57  ;;  %v9177_v1 = vcombine.low %v4525_v50, %v4541_v57  ;;  %v4685_v25 = vld [vmem:[#allocation11 + $0xb50] sm:$0xff]  ;;  %v4334_v50 = vld [vmem:[#allocation11 + $0x58] sm:$0xff] }
 0x859   :  { %v4701_v27 = vld [vmem:[#allocation11 + $0xbd0] sm:$0xff]  ;;  %v4350_v57 = vld [vmem:[#allocation11 + $0xd8] sm:$0xff] }
 0x85a   :  { %7951 = vmatpush1.bf16.msra.mxu1 %v9271_v13  ;;  %v4898_v13 = vrot.slane %v10959_v43, %v10934_v39  ;;  %v4717_v33 = vld [vmem:[#allocation11 + $0xc50] sm:$0xff] }
 0x85b   :  { %7952 = vmatprep.subr.bf16.mxu1 %v9304_v51  ;;  %v9145_v51 = vcombine.low %v4493_v55, %v4509_v8  ;;  %v4733_v34 = vld [vmem:[#allocation11 + $0xcd0] sm:$0xff] }
 0x85c   :  { %v4749_v30 = vld [vmem:[#allocation11 + $0xd50] sm:$0xff] }
 0x85d   :  { %v4765_v36 = vld [vmem:[#allocation11 + $0xdd0] sm:$0xff] }
 0x85e   :  { %7953 = vmatpush1.bf16.msra.mxu1 %v9303_v52  ;;  %v4557_v52 = vld [vmem:[#allocation11 + $0x750] sm:$0xff] }
 0x85f   :  { %7954 = vmatprep.subr.bf16.mxu1 %v9336_v54  ;;  %v4573_v54 = vld [vmem:[#allocation11 + $0x7d0] sm:$0xff] }
 0x860   :  { %v4781_v41 = vld [vmem:[#allocation11 + $0xe50] sm:$0xff] }
 0x861   :  { %v4797_v42 = vld [vmem:[#allocation11 + $0xed0] sm:$0xff] }
 0x862   :  { %7955 = vmatpush1.bf16.msra.mxu1 %v9335_v60  ;;  %v4813_v55 = vld [vmem:[#allocation11 + $0xf50] sm:$0xff] }
 0x863   :  { %7956 = vmatprep.subr.bf16.mxu1 %v9368_v63  ;;  %v4829_v8 = vld [vmem:[#allocation11 + $0xfd0] sm:$0xff] }
 0x866   :  { %7957 = vmatpush1.bf16.msra.mxu1 %v9367_v3  ;;  %v9210_v3 = vcombine.high %v4557_v52, %v4573_v54 }
 0x867   :  { %7958 = vmatprep.subr.bf16.mxu1 %v9400_v4 }
 0x86a   :  { %7959 = vmatpush1.bf16.msra.mxu1 %v9399_v12  ;;  %v9209_v12 = vcombine.low %v4557_v52, %v4573_v54  ;;  %v4398_v54 = vld [vmem:[#allocation11 + $0x258] sm:$0xff] }
 0x86b   :  { %7960 = vmatprep.subr.bf16.mxu1 %v9432_v14  ;;  %v9242_v14 = vcombine.high %v4589_v5, %v4605_v7 }
 0x86e   :  { %7961 = vmatpush1.bf16.msra.mxu1 %v9431_v18  ;;  %v9241_v18 = vcombine.low %v4589_v5, %v4605_v7 }
 0x86f   :  { %7962 = vmatprep.subr.bf16.mxu1 %v9464_v19  ;;  %v9274_v19 = vcombine.high %v4621_v15, %v4637_v17 }
 0x872   :  { %7963 = vmatpush1.bf16.msra.mxu1 %v9463_v22  ;;  %v9273_v22 = vcombine.low %v4621_v15, %v4637_v17 }
 0x873   :  { %7973 = vmatprep.subr.bf16.mxu1 %v8986_v23  ;;  %v9306_v23 = vcombine.high %v4653_v20, %v4669_v21 }
 0x875   :  { %7965 = vmatmul.mubr.bf16.vlgmr.msra.gmra.mrb[40].mxu1 %v10872_v49 }
 0x876   :  { %7974 = vmatpush1.bf16.msra.mxu1 %v8985_v29  ;;  %8005 = vmatprep.mubr.bf16.mxu1 %v10870_v48  ;;  %v9305_v29 = vcombine.low %v4653_v20, %v4669_v21 }
 0x877   :  { %7975 = vmatprep.subr.bf16.mxu1 %v9018_v31  ;;  %v9338_v31 = vcombine.high %v4685_v25, %v4701_v27 }
 0x87a   :  { %7976 = vmatpush1.bf16.msra.mxu1 %v9017_v24  ;;  %v9337_v24 = vcombine.low %v4685_v25, %v4701_v27  ;;  %v4902_v25 = vrot.slane %v10959_v43, %v10886_v28  ;;  %v4906_v27 = vrot.slane %v10959_v43, %v10891_v32 }
 0x87b   :  { %7977 = vmatprep.subr.bf16.mxu1 %v9050_v35  ;;  %v9370_v35 = vcombine.high %v4717_v33, %v4733_v34 }
 0x87e   :  { %7978 = vmatpush1.bf16.msra.mxu1 %v9049_v38  ;;  %v9369_v38 = vcombine.low %v4717_v33, %v4733_v34  ;;  %v4558_v34 = vld [vmem:[#allocation11 + $0x758] sm:$0xff] }
 0x87f   :  { %7979 = vmatprep.subr.bf16.mxu1 %v9082_v40  ;;  %v9402_v40 = vcombine.high %v4749_v30, %v4765_v36 }
 0x882   :  { %7980 = vmatpush1.bf16.msra.mxu1 %v9081_v9  ;;  %v9401_v9 = vcombine.low %v4749_v30, %v4765_v36 }
 0x883   :  { %7981 = vmatprep.subr.bf16.mxu1 %v9114_v45  ;;  %v9434_v45 = vcombine.high %v4781_v41, %v4797_v42 }
 0x886   :  { %7982 = vmatpush1.bf16.msra.mxu1 %v9113_v44  ;;  %v9433_v44 = vcombine.low %v4781_v41, %v4797_v42 }
 0x887   :  { %7983 = vmatprep.subr.bf16.mxu1 %v9146_v47  ;;  %v9466_v47 = vcombine.high %v4813_v55, %v4829_v8 }
 0x888   :  { %v7843_v61 = vpop.f32.mrb[28].mxu1 }
 0x889   :  { %v10988_v58 = vadd.f32 %v7843_v61, %v4894_v26  ;;  %v7845_v59 = vpop.f32.mrb[29].mxu1  ;;  %v9465_v26 = vcombine.low %v4813_v55, %v4829_v8  ;;  %v8987_v61 = vcombine.low %v4334_v50, %v4350_v57  ;;  %v4606_v55 = vld [vmem:[#allocation11 + $0x8d8] sm:$0xff] }
 0x88a   :  { %v10990_v60 = vadd.f32 %v7845_v59, %v4898_v13  ;;  %v7847_v63 = vpop.f32.mrb[30].mxu1  ;;  %7984 = vmatpush1.bf16.msra.mxu1 %v9145_v51  ;;  %v8988_v13 = vcombine.high %v4334_v50, %v4350_v57  ;;  %v4366_v51 = vld [vmem:[#allocation11 + $0x158] sm:$0xff] }
 0x88b   :  { %v7848_v2 = vpop.f32.mrb[31].mxu1  ;;  %7985 = vmatprep.subr.bf16.mxu1 %v9178_v53  ;;  %v4382_v53 = vld [vmem:[#allocation11 + $0x1d8] sm:$0xff] }
 0x88c   :  { %v8302_v4 = vcombine.low %v10988_v58, %v10990_v60  ;;  %v9020_v52 = vcombine.high %v4366_v51, %v4382_v53  ;;  %v4414_v59 = vld [vmem:[#allocation11 + $0x2d8] sm:$0xff]  ;;  %v9019_v63 = vcombine.low %v4366_v51, %v4382_v53 }
 0x88d   :  { %v4430_v2 = vld [vmem:[#allocation11 + $0x358] sm:$0xff]  ;;  %v9051_v5 = vcombine.low %v4398_v54, %v4414_v59 }
 0x88e   :  { %7986 = vmatpush1.bf16.msra.mxu1 %v9177_v1  ;;  %v9052_v1 = vcombine.high %v4398_v54, %v4414_v59  ;;  %v8310_v43 = vrot.slane %v8302_v4, %v10706_v16  ;;  %v4622_v57 = vld [vmem:[#allocation11 + $0x958] sm:$0xff] }
 0x88f   :  { %7987 = vmatprep.subr.bf16.mxu1 %v9210_v3  ;;  %v4446_v3 = vld [vmem:[#allocation11 + $0x3d8] sm:$0xff] }
 0x890   :  { %v9084_v7 = vcombine.high %v4430_v2, %v4446_v3  ;;  %v9083_v15 = vcombine.low %v4430_v2, %v4446_v3  ;;  %v4654_v53 = vld [vmem:[#allocation11 + $0xa58] sm:$0xff] }
 0x891   :  { %v4686_v60 = vld [vmem:[#allocation11 + $0xb58] sm:$0xff] }
 0x892   :  { %7988 = vmatpush1.bf16.msra.mxu1 %v9209_v12  ;;  %v4462_v12 = vld [vmem:[#allocation11 + $0x458] sm:$0xff] }
 0x893   :  { %7989 = vmatprep.subr.bf16.mxu1 %v9242_v14  ;;  %v4478_v14 = vld [vmem:[#allocation11 + $0x4d8] sm:$0xff] }
 0x894   :  { %v9116_v17 = vcombine.high %v4462_v12, %v4478_v14  ;;  %v9115_v20 = vcombine.low %v4462_v12, %v4478_v14  ;;  %v4702_v4 = vld [vmem:[#allocation11 + $0xbd8] sm:$0xff] }
 0x895   :  { %v9340_v59 = vcombine.high %v4686_v60, %v4702_v4  ;;  %v9339_v2 = vcombine.low %v4686_v60, %v4702_v4 }
 0x896   :  { %7990 = vmatpush1.bf16.msra.mxu1 %v9241_v18  ;;  %v4494_v18 = vld [vmem:[#allocation11 + $0x558] sm:$0xff] }
 0x897   :  { %7991 = vmatprep.subr.bf16.mxu1 %v9274_v19  ;;  %v4510_v19 = vld [vmem:[#allocation11 + $0x5d8] sm:$0xff] }
 0x898   :  { %v9148_v21 = vcombine.high %v4494_v18, %v4510_v19 }
 0x89a   :  { %7992 = vmatpush1.bf16.msra.mxu1 %v9273_v22  ;;  %v4526_v22 = vld [vmem:[#allocation11 + $0x658] sm:$0xff] }
 0x89b   :  { %7993 = vmatprep.subr.bf16.mxu1 %v9306_v23  ;;  %v4542_v23 = vld [vmem:[#allocation11 + $0x6d8] sm:$0xff] }
 0x89e   :  { %7994 = vmatpush1.bf16.msra.mxu1 %v9305_v29  ;;  %v9147_v29 = vcombine.low %v4494_v18, %v4510_v19 }
 0x89f   :  { %7995 = vmatprep.subr.bf16.mxu1 %v9338_v31  ;;  %v9180_v31 = vcombine.high %v4526_v22, %v4542_v23 }
 0x8a2   :  { %7996 = vmatpush1.bf16.msra.mxu1 %v9337_v24  ;;  %v4574_v24 = vld [vmem:[#allocation11 + $0x7d8] sm:$0xff] }
 0x8a3   :  { %7997 = vmatprep.subr.bf16.mxu1 %v9370_v35  ;;  %v9212_v42 = vcombine.high %v4558_v34, %v4574_v24 }
 0x8a6   :  { %7998 = vmatpush1.bf16.msra.mxu1 %v9369_v38 }
 0x8a7   :  { %7999 = vmatprep.subr.bf16.mxu1 %v9402_v40  ;;  %v9179_v40 = vcombine.low %v4526_v22, %v4542_v23 }
 0x8aa   :  { %8000 = vmatpush1.bf16.msra.mxu1 %v9401_v9 }
 0x8ab   :  { %8001 = vmatprep.subr.bf16.mxu1 %v9434_v45  ;;  %v4590_v45 = vld [vmem:[#allocation11 + $0x858] sm:$0xff] }
 0x8ae   :  { %8002 = vmatpush1.bf16.msra.mxu1 %v9433_v44  ;;  %v9211_v44 = vcombine.low %v4558_v34, %v4574_v24  ;;  %v4383_v34 = vld [vmem:[#allocation11 + $0x1e0] sm:$0xff] }
 0x8af   :  { %8003 = vmatprep.subr.bf16.mxu1 %v9466_v47  ;;  %v9244_v47 = vcombine.high %v4590_v45, %v4606_v55 }
 0x8b2   :  { %8004 = vmatpush1.bf16.msra.mxu1 %v9465_v26  ;;  %v4638_v26 = vld [vmem:[#allocation11 + $0x9d8] sm:$0xff] }
 0x8b3   :  { %8014 = vmatprep.subr.bf16.mxu1 %v8988_v13  ;;  %v9243_v13 = vcombine.low %v4590_v45, %v4606_v55  ;;  %v9276_v51 = vcombine.high %v4622_v57, %v4638_v26  ;;  %v4463_v55 = vld [vmem:[#allocation11 + $0x460] sm:$0xff] }
 0x8b5   :  { %8006 = vmatmul.mubr.bf16.vlgmr.msra.gmra.mrb[44].mxu1 %v10872_v49 }
 0x8b6   :  { %8015 = vmatpush1.bf16.msra.mxu1 %v8987_v61  ;;  %8046 = vmatprep.mubr.bf16.mxu1 %v10870_v48  ;;  %v4670_v61 = vld [vmem:[#allocation11 + $0xad8] sm:$0xff] }
 0x8b7   :  { %8016 = vmatprep.subr.bf16.mxu1 %v9020_v52  ;;  %v9275_v52 = vcombine.low %v4622_v57, %v4638_v26  ;;  %v9308_v58 = vcombine.high %v4654_v53, %v4670_v61  ;;  %v9307_v54 = vcombine.low %v4654_v53, %v4670_v61  ;;  %v11007_v26 = vld [vmem:[#allocation13 + $0x10] sm:$0xff]  ;;  %v4543_v53 = vld [vmem:[#allocation11 + $0x6e0] sm:$0xff] }
 0x8b8   :  { %v4910_v61 = vrot.slane %v11007_v26, %v10858_v6 }
 0x8ba   :  { %8017 = vmatpush1.bf16.msra.mxu1 %v9019_v63  ;;  %v4718_v63 = vld [vmem:[#allocation11 + $0xc58] sm:$0xff] }
 0x8bb   :  { %8018 = vmatprep.subr.bf16.mxu1 %v9052_v1  ;;  %v4734_v1 = vld [vmem:[#allocation11 + $0xcd8] sm:$0xff] }
 0x8bc   :  { %v9372_v3 = vcombine.high %v4718_v63, %v4734_v1  ;;  %v9371_v12 = vcombine.low %v4718_v63, %v4734_v1 }
 0x8be   :  { %8019 = vmatpush1.bf16.msra.mxu1 %v9051_v5  ;;  %v4750_v5 = vld [vmem:[#allocation11 + $0xd58] sm:$0xff] }
 0x8bf   :  { %8020 = vmatprep.subr.bf16.mxu1 %v9084_v7  ;;  %v4766_v7 = vld [vmem:[#allocation11 + $0xdd8] sm:$0xff] }
 0x8c0   :  { %v9404_v14 = vcombine.high %v4750_v5, %v4766_v7  ;;  %v9403_v18 = vcombine.low %v4750_v5, %v4766_v7 }
 0x8c2   :  { %8021 = vmatpush1.bf16.msra.mxu1 %v9083_v15  ;;  %v4782_v15 = vld [vmem:[#allocation11 + $0xe58] sm:$0xff] }
 0x8c3   :  { %8022 = vmatprep.subr.bf16.mxu1 %v9116_v17  ;;  %v4798_v17 = vld [vmem:[#allocation11 + $0xed8] sm:$0xff] }
 0x8c4   :  { %v9436_v19 = vcombine.high %v4782_v15, %v4798_v17  ;;  %v9435_v22 = vcombine.low %v4782_v15, %v4798_v17  ;;  %v4591_v15 = vld [vmem:[#allocation11 + $0x860] sm:$0xff] }
 0x8c5   :  { %v4607_v17 = vld [vmem:[#allocation11 + $0x8e0] sm:$0xff] }
 0x8c6   :  { %8023 = vmatpush1.bf16.msra.mxu1 %v9115_v20  ;;  %v4814_v20 = vld [vmem:[#allocation11 + $0xf58] sm:$0xff] }
 0x8c7   :  { %8024 = vmatprep.subr.bf16.mxu1 %v9148_v21  ;;  %v4830_v21 = vld [vmem:[#allocation11 + $0xfd8] sm:$0xff] }
 0x8c8   :  { %v7884_v33 = vpop.f32.mrb[32].mxu1  ;;  %v9468_v23 = vcombine.high %v4814_v20, %v4830_v21 }
 0x8c9   :  { %v7885_v35 = vadd.f32 %v7884_v33, %v4902_v25  ;;  %v7886_v30 = vpop.f32.mrb[33].mxu1  ;;  %v4335_v25 = vld [vmem:[#allocation11 + $0x60] sm:$0xff] }
 0x8ca   :  { %v7887_v36 = vadd.f32 %v7886_v30, %v4906_v27  ;;  %v7888_v38 = vpop.f32.mrb[34].mxu1  ;;  %8025 = vmatpush1.bf16.msra.mxu1 %v9147_v29  ;;  %v4351_v27 = vld [vmem:[#allocation11 + $0xe0] sm:$0xff]  ;;  %v9467_v29 = vcombine.low %v4814_v20, %v4830_v21 }
 0x8cb   :  { %v7889_v41 = vpop.f32.mrb[35].mxu1  ;;  %8026 = vmatprep.subr.bf16.mxu1 %v9180_v31  ;;  %v8990_v31 = vcombine.high %v4335_v25, %v4351_v27  ;;  %v4367_v33 = vld [vmem:[#allocation11 + $0x160] sm:$0xff]  ;;  %v8989_v24 = vcombine.low %v4335_v25, %v4351_v27 }
 0x8cc   :  { %v8303_v9 = vcombine.low %v7885_v35, %v7887_v36  ;;  %v9022_v35 = vcombine.high %v4367_v33, %v4383_v34  ;;  %v4399_v30 = vld [vmem:[#allocation11 + $0x260] sm:$0xff]  ;;  %v9021_v38 = vcombine.low %v4367_v33, %v4383_v34 }
 0x8cd   :  { %v4415_v36 = vld [vmem:[#allocation11 + $0x2e0] sm:$0xff] }
 0x8ce   :  { %v8317_v8 = vrot.slane %v8303_v9, %v10706_v16  ;;  %8027 = vmatpush1.bf16.msra.mxu1 %v9179_v40  ;;  %v9054_v40 = vcombine.high %v4399_v30, %v4415_v36  ;;  %v4431_v41 = vld [vmem:[#allocation11 + $0x360] sm:$0xff]  ;;  %v9053_v9 = vcombine.low %v4399_v30, %v4415_v36 }
 0x8cf   :  { %8028 = vmatprep.subr.bf16.mxu1 %v9212_v42  ;;  %v4447_v42 = vld [vmem:[#allocation11 + $0x3e0] sm:$0xff] }
 0x8d0   :  { %v8318_v50 = vcombine.low %v8310_v43, %v8317_v8  ;;  %v9086_v45 = vcombine.high %v4431_v41, %v4447_v42  ;;  %v4479_v43 = vld [vmem:[#allocation11 + $0x4e0] sm:$0xff]  ;;  %v9085_v8 = vcombine.low %v4431_v41, %v4447_v42 }
 0x8d1   :  { %v9117_v57 = vcombine.low %v4463_v55, %v4479_v43  ;;  %v4623_v20 = vld [vmem:[#allocation11 + $0x960] sm:$0xff] }
 0x8d2   :  { %8398 = vst [vmem:[#allocation14 + $0x18] sm:$0xff] %v8318_v50  ;;  %8029 = vmatpush1.bf16.msra.mxu1 %v9211_v44  ;;  %v9118_v44 = vcombine.high %v4463_v55, %v4479_v43  ;;  %v4511_v50 = vld [vmem:[#allocation11 + $0x5e0] sm:$0xff] }
 0x8d3   :  { %8030 = vmatprep.subr.bf16.mxu1 %v9244_v47  ;;  %v4495_v47 = vld [vmem:[#allocation11 + $0x560] sm:$0xff] }
 0x8d4   :  { %v4639_v21 = vld [vmem:[#allocation11 + $0x9e0] sm:$0xff] }
 0x8d5   :  { %v4655_v25 = vld [vmem:[#allocation11 + $0xa60] sm:$0xff] }
 0x8d6   :  { %8031 = vmatpush1.bf16.msra.mxu1 %v9243_v13  ;;  %v9150_v13 = vcombine.high %v4495_v47, %v4511_v50  ;;  %v4671_v27 = vld [vmem:[#allocation11 + $0xae0] sm:$0xff] }
 0x8d7   :  { %8032 = vmatprep.subr.bf16.mxu1 %v9276_v51  ;;  %v4527_v51 = vld [vmem:[#allocation11 + $0x660] sm:$0xff] }
 0x8d8   :  { %v9182_v60 = vcombine.high %v4527_v51, %v4543_v53  ;;  %v9181_v5 = vcombine.low %v4527_v51, %v4543_v53  ;;  %v4687_v33 = vld [vmem:[#allocation11 + $0xb60] sm:$0xff]  ;;  %v4336_v51 = vld [vmem:[#allocation11 + $0x68] sm:$0xff] }
 0x8d9   :  { %v4703_v34 = vld [vmem:[#allocation11 + $0xbe0] sm:$0xff]  ;;  %v4352_v53 = vld [vmem:[#allocation11 + $0xe8] sm:$0xff] }
 0x8da   :  { %8033 = vmatpush1.bf16.msra.mxu1 %v9275_v52  ;;  %v4914_v52 = vrot.slane %v11007_v26, %v10861_v11  ;;  %v4719_v30 = vld [vmem:[#allocation11 + $0xc60] sm:$0xff] }
 0x8db   :  { %8034 = vmatprep.subr.bf16.mxu1 %v9308_v58  ;;  %v9149_v58 = vcombine.low %v4495_v47, %v4511_v50  ;;  %v4735_v36 = vld [vmem:[#allocation11 + $0xce0] sm:$0xff] }
 0x8dc   :  { %v4751_v41 = vld [vmem:[#allocation11 + $0xd60] sm:$0xff] }
 0x8dd   :  { %v4767_v42 = vld [vmem:[#allocation11 + $0xde0] sm:$0xff] }
 0x8de   :  { %8035 = vmatpush1.bf16.msra.mxu1 %v9307_v54  ;;  %v4559_v54 = vld [vmem:[#allocation11 + $0x760] sm:$0xff] }
 0x8df   :  { %8036 = vmatprep.subr.bf16.mxu1 %v9340_v59  ;;  %v4575_v59 = vld [vmem:[#allocation11 + $0x7e0] sm:$0xff] }
 0x8e0   :  { %v4783_v55 = vld [vmem:[#allocation11 + $0xe60] sm:$0xff] }
 0x8e1   :  { %v4799_v43 = vld [vmem:[#allocation11 + $0xee0] sm:$0xff] }
 0x8e2   :  { %8037 = vmatpush1.bf16.msra.mxu1 %v9339_v2  ;;  %v4815_v47 = vld [vmem:[#allocation11 + $0xf60] sm:$0xff] }
 0x8e3   :  { %8038 = vmatprep.subr.bf16.mxu1 %v9372_v3  ;;  %v4831_v50 = vld [vmem:[#allocation11 + $0xfe0] sm:$0xff] }
 0x8e6   :  { %8039 = vmatpush1.bf16.msra.mxu1 %v9371_v12  ;;  %v9214_v12 = vcombine.high %v4559_v54, %v4575_v59 }
 0x8e7   :  { %8040 = vmatprep.subr.bf16.mxu1 %v9404_v14 }
 0x8ea   :  { %8041 = vmatpush1.bf16.msra.mxu1 %v9403_v18  ;;  %v9213_v18 = vcombine.low %v4559_v54, %v4575_v59  ;;  %v4400_v59 = vld [vmem:[#allocation11 + $0x268] sm:$0xff] }
 0x8eb   :  { %8042 = vmatprep.subr.bf16.mxu1 %v9436_v19  ;;  %v9246_v19 = vcombine.high %v4591_v15, %v4607_v17 }
 0x8ee   :  { %8043 = vmatpush1.bf16.msra.mxu1 %v9435_v22  ;;  %v9245_v22 = vcombine.low %v4591_v15, %v4607_v17 }
 0x8ef   :  { %8044 = vmatprep.subr.bf16.mxu1 %v9468_v23  ;;  %v9278_v23 = vcombine.high %v4623_v20, %v4639_v21 }
 0x8f2   :  { %8045 = vmatpush1.bf16.msra.mxu1 %v9467_v29  ;;  %v9277_v29 = vcombine.low %v4623_v20, %v4639_v21 }
 0x8f3   :  { %8055 = vmatprep.subr.bf16.mxu1 %v8990_v31  ;;  %v9310_v31 = vcombine.high %v4655_v25, %v4671_v27 }
 0x8f5   :  { %8047 = vmatmul.mubr.bf16.vlgmr.msra.gmra.mrb[48].mxu1 %v10872_v49 }
 0x8f6   :  { %8056 = vmatpush1.bf16.msra.mxu1 %v8989_v24  ;;  %8087 = vmatprep.mubr.bf16.mxu1 %v10870_v48  ;;  %v9309_v24 = vcombine.low %v4655_v25, %v4671_v27 }
 0x8f7   :  { %8057 = vmatprep.subr.bf16.mxu1 %v9022_v35  ;;  %v9342_v35 = vcombine.high %v4687_v33, %v4703_v34 }
 0x8fa   :  { %8058 = vmatpush1.bf16.msra.mxu1 %v9021_v38  ;;  %v9341_v38 = vcombine.low %v4687_v33, %v4703_v34  ;;  %v4918_v33 = vrot.slane %v11007_v26, %v10914_v62  ;;  %v4922_v34 = vrot.slane %v11007_v26, %v10917_v0 }
 0x8fb   :  { %8059 = vmatprep.subr.bf16.mxu1 %v9054_v40  ;;  %v9374_v40 = vcombine.high %v4719_v30, %v4735_v36 }
 0x8fe   :  { %8060 = vmatpush1.bf16.msra.mxu1 %v9053_v9  ;;  %v9373_v9 = vcombine.low %v4719_v30, %v4735_v36  ;;  %v4560_v36 = vld [vmem:[#allocation11 + $0x768] sm:$0xff] }
 0x8ff   :  { %8061 = vmatprep.subr.bf16.mxu1 %v9086_v45  ;;  %v9406_v45 = vcombine.high %v4751_v41, %v4767_v42 }
 0x902   :  { %8062 = vmatpush1.bf16.msra.mxu1 %v9085_v8  ;;  %v9405_v8 = vcombine.low %v4751_v41, %v4767_v42 }
 0x903   :  { %8063 = vmatprep.subr.bf16.mxu1 %v9118_v44  ;;  %v9438_v44 = vcombine.high %v4783_v55, %v4799_v43 }
 0x906   :  { %8064 = vmatpush1.bf16.msra.mxu1 %v9117_v57  ;;  %v9437_v57 = vcombine.low %v4783_v55, %v4799_v43 }
 0x907   :  { %8065 = vmatprep.subr.bf16.mxu1 %v9150_v13  ;;  %v9470_v13 = vcombine.high %v4815_v47, %v4831_v50 }
 0x908   :  { %v7925_v4 = vpop.f32.mrb[36].mxu1 }
 0x909   :  { %v11013_v63 = vadd.f32 %v7925_v4, %v4910_v61  ;;  %v7927_v1 = vpop.f32.mrb[37].mxu1  ;;  %v9469_v61 = vcombine.low %v4815_v47, %v4831_v50  ;;  %v8991_v4 = vcombine.low %v4336_v51, %v4352_v53  ;;  %v4608_v47 = vld [vmem:[#allocation11 + $0x8e8] sm:$0xff] }
 0x90a   :  { %v11015_v2 = vadd.f32 %v7927_v1, %v4914_v52  ;;  %v7929_v3 = vpop.f32.mrb[38].mxu1  ;;  %8066 = vmatpush1.bf16.msra.mxu1 %v9149_v58  ;;  %v8992_v52 = vcombine.high %v4336_v51, %v4352_v53  ;;  %v4368_v58 = vld [vmem:[#allocation11 + $0x168] sm:$0xff] }
 0x90b   :  { %v7930_v7 = vpop.f32.mrb[39].mxu1  ;;  %8067 = vmatprep.subr.bf16.mxu1 %v9182_v60  ;;  %v4384_v60 = vld [vmem:[#allocation11 + $0x1e8] sm:$0xff] }
 0x90c   :  { %v8319_v14 = vcombine.low %v11013_v63, %v11015_v2  ;;  %v9024_v54 = vcombine.high %v4368_v58, %v4384_v60  ;;  %v4416_v1 = vld [vmem:[#allocation11 + $0x2e8] sm:$0xff]  ;;  %v9023_v3 = vcombine.low %v4368_v58, %v4384_v60 }
 0x90d   :  { %v4432_v7 = vld [vmem:[#allocation11 + $0x368] sm:$0xff]  ;;  %v9055_v15 = vcombine.low %v4400_v59, %v4416_v1 }
 0x90e   :  { %8068 = vmatpush1.bf16.msra.mxu1 %v9181_v5  ;;  %v9056_v5 = vcombine.high %v4400_v59, %v4416_v1  ;;  %v8327_v50 = vrot.slane %v8319_v14, %v10706_v16  ;;  %v4688_v2 = vld [vmem:[#allocation11 + $0xb68] sm:$0xff] }
 0x90f   :  { %8069 = vmatprep.subr.bf16.mxu1 %v9214_v12  ;;  %v4448_v12 = vld [vmem:[#allocation11 + $0x3e8] sm:$0xff] }
 0x910   :  { %v9088_v17 = vcombine.high %v4432_v7, %v4448_v12  ;;  %v9087_v20 = vcombine.low %v4432_v7, %v4448_v12  ;;  %v4704_v14 = vld [vmem:[#allocation11 + $0xbe8] sm:$0xff] }
 0x911   :  { %v4736_v7 = vld [vmem:[#allocation11 + $0xce8] sm:$0xff]  ;;  %v9343_v12 = vcombine.low %v4688_v2, %v4704_v14 }
 0x912   :  { %8070 = vmatpush1.bf16.msra.mxu1 %v9213_v18  ;;  %v4464_v18 = vld [vmem:[#allocation11 + $0x468] sm:$0xff] }
 0x913   :  { %8071 = vmatprep.subr.bf16.mxu1 %v9246_v19  ;;  %v4480_v19 = vld [vmem:[#allocation11 + $0x4e8] sm:$0xff] }
 0x914   :  { %v9120_v21 = vcombine.high %v4464_v18, %v4480_v19  ;;  %v9119_v25 = vcombine.low %v4464_v18, %v4480_v19  ;;  %v4768_v18 = vld [vmem:[#allocation11 + $0xde8] sm:$0xff] }
 0x916   :  { %8072 = vmatpush1.bf16.msra.mxu1 %v9245_v22  ;;  %v4496_v22 = vld [vmem:[#allocation11 + $0x568] sm:$0xff] }
 0x917   :  { %8073 = vmatprep.subr.bf16.mxu1 %v9278_v23  ;;  %v4512_v23 = vld [vmem:[#allocation11 + $0x5e8] sm:$0xff] }
 0x918   :  { %v9152_v27 = vcombine.high %v4496_v22, %v4512_v23 }
 0x91a   :  { %8074 = vmatpush1.bf16.msra.mxu1 %v9277_v29  ;;  %v4528_v29 = vld [vmem:[#allocation11 + $0x668] sm:$0xff] }
 0x91b   :  { %8075 = vmatprep.subr.bf16.mxu1 %v9310_v31  ;;  %v4544_v31 = vld [vmem:[#allocation11 + $0x6e8] sm:$0xff] }
 0x91e   :  { %8076 = vmatpush1.bf16.msra.mxu1 %v9309_v24  ;;  %v9151_v24 = vcombine.low %v4496_v22, %v4512_v23  ;;  %v4800_v22 = vld [vmem:[#allocation11 + $0xee8] sm:$0xff] }
 0x91f   :  { %8077 = vmatprep.subr.bf16.mxu1 %v9342_v35  ;;  %v9184_v35 = vcombine.high %v4528_v29, %v4544_v31 }
 0x922   :  { %8078 = vmatpush1.bf16.msra.mxu1 %v9341_v38  ;;  %v4576_v38 = vld [vmem:[#allocation11 + $0x7e8] sm:$0xff] }
 0x923   :  { %8079 = vmatprep.subr.bf16.mxu1 %v9374_v40  ;;  %v9216_v43 = vcombine.high %v4560_v36, %v4576_v38 }
 0x926   :  { %8080 = vmatpush1.bf16.msra.mxu1 %v9373_v9 }
 0x927   :  { %8081 = vmatprep.subr.bf16.mxu1 %v9406_v45  ;;  %v9183_v45 = vcombine.low %v4528_v29, %v4544_v31  ;;  %v4832_v29 = vld [vmem:[#allocation11 + $0xfe8] sm:$0xff] }
 0x92a   :  { %8082 = vmatpush1.bf16.msra.mxu1 %v9405_v8 }
 0x92b   :  { %8083 = vmatprep.subr.bf16.mxu1 %v9438_v44  ;;  %v4592_v44 = vld [vmem:[#allocation11 + $0x868] sm:$0xff] }
 0x92c   :  { %v9248_v51 = vcombine.high %v4592_v44, %v4608_v47  ;;  %v9247_v58 = vcombine.low %v4592_v44, %v4608_v47 }
 0x92e   :  { %8084 = vmatpush1.bf16.msra.mxu1 %v9437_v57 }
 0x92f   :  { %8085 = vmatprep.subr.bf16.mxu1 %v9470_v13  ;;  %v9215_v13 = vcombine.low %v4560_v36, %v4576_v38  ;;  %v4369_v36 = vld [vmem:[#allocation11 + $0x170] sm:$0xff] }
 0x930   :  { %v4385_v38 = vld [vmem:[#allocation11 + $0x1f0] sm:$0xff] }
 0x932   :  { %8086 = vmatpush1.bf16.msra.mxu1 %v9469_v61  ;;  %v4624_v61 = vld [vmem:[#allocation11 + $0x968] sm:$0xff] }
 0x933   :  { %8096 = vmatprep.subr.bf16.mxu1 %v8992_v52  ;;  %v4640_v52 = vld [vmem:[#allocation11 + $0x9e8] sm:$0xff] }
 0x934   :  { %v9280_v60 = vcombine.high %v4624_v61, %v4640_v52  ;;  %v9279_v59 = vcombine.low %v4624_v61, %v4640_v52  ;;  %v4513_v61 = vld [vmem:[#allocation11 + $0x5f0] sm:$0xff] }
 0x935   :  { %8088 = vmatmul.mubr.bf16.vlgmr.msra.gmra.mrb[52].mxu1 %v10872_v49 }
 0x936   :  { %8097 = vmatpush1.bf16.msra.mxu1 %v8991_v4  ;;  %8128 = vmatprep.mubr.bf16.mxu1 %v10870_v48  ;;  %v4656_v4 = vld [vmem:[#allocation11 + $0xa68] sm:$0xff] }
 0x937   :  { %8098 = vmatprep.subr.bf16.mxu1 %v9024_v54  ;;  %v4672_v54 = vld [vmem:[#allocation11 + $0xae8] sm:$0xff] }
 0x938   :  { %v9312_v63 = vcombine.high %v4656_v4, %v4672_v54  ;;  %v9311_v1 = vcombine.low %v4656_v4, %v4672_v54  ;;  %v4926_v4 = vrot.slane %v11007_v26, %v10931_v37  ;;  %v4930_v54 = vrot.slane %v11007_v26, %v10934_v39 }
 0x93a   :  { %8099 = vmatpush1.bf16.msra.mxu1 %v9023_v3  ;;  %v9344_v3 = vcombine.high %v4688_v2, %v4704_v14  ;;  %v4561_v14 = vld [vmem:[#allocation11 + $0x770] sm:$0xff] }
 0x93b   :  { %8100 = vmatprep.subr.bf16.mxu1 %v9056_v5  ;;  %v4720_v5 = vld [vmem:[#allocation11 + $0xc68] sm:$0xff] }
 0x93c   :  { %v9375_v19 = vcombine.low %v4720_v5, %v4736_v7 }
 0x93e   :  { %8101 = vmatpush1.bf16.msra.mxu1 %v9055_v15  ;;  %v9376_v15 = vcombine.high %v4720_v5, %v4736_v7 }
 0x93f   :  { %8102 = vmatprep.subr.bf16.mxu1 %v9088_v17  ;;  %v4752_v17 = vld [vmem:[#allocation11 + $0xd68] sm:$0xff] }
 0x940   :  { %v9407_v23 = vcombine.low %v4752_v17, %v4768_v18 }
 0x942   :  { %8103 = vmatpush1.bf16.msra.mxu1 %v9087_v20  ;;  %v9408_v20 = vcombine.high %v4752_v17, %v4768_v18 }
 0x943   :  { %8104 = vmatprep.subr.bf16.mxu1 %v9120_v21  ;;  %v4784_v21 = vld [vmem:[#allocation11 + $0xe68] sm:$0xff] }
 0x944   :  { %v9439_v31 = vcombine.low %v4784_v21, %v4800_v22 }
 0x946   :  { %8105 = vmatpush1.bf16.msra.mxu1 %v9119_v25  ;;  %v9440_v25 = vcombine.high %v4784_v21, %v4800_v22  ;;  %v4609_v21 = vld [vmem:[#allocation11 + $0x8f0] sm:$0xff] }
 0x947   :  { %8106 = vmatprep.subr.bf16.mxu1 %v9152_v27  ;;  %v4816_v27 = vld [vmem:[#allocation11 + $0xf68] sm:$0xff] }
 0x948   :  { %v7966_v30 = vpop.f32.mrb[40].mxu1 }
 0x949   :  { %v7967_v40 = vadd.f32 %v7966_v30, %v4918_v33  ;;  %v7968_v41 = vpop.f32.mrb[41].mxu1  ;;  %v9472_v33 = vcombine.high %v4816_v27, %v4832_v29 }
 0x94a   :  { %v7969_v42 = vadd.f32 %v7968_v41, %v4922_v34  ;;  %v7970_v9 = vpop.f32.mrb[42].mxu1  ;;  %8107 = vmatpush1.bf16.msra.mxu1 %v9151_v24  ;;  %v4337_v34 = vld [vmem:[#allocation11 + $0x70] sm:$0xff]  ;;  %v9026_v41 = vcombine.high %v4369_v36, %v4385_v38 }
 0x94b   :  { %v7971_v55 = vpop.f32.mrb[43].mxu1  ;;  %8108 = vmatprep.subr.bf16.mxu1 %v9184_v35  ;;  %v4353_v24 = vld [vmem:[#allocation11 + $0xf0] sm:$0xff]  ;;  %v9471_v35 = vcombine.low %v4816_v27, %v4832_v29 }
 0x94c   :  { %v8320_v8 = vcombine.low %v7967_v40, %v7969_v42  ;;  %v8994_v30 = vcombine.high %v4337_v34, %v4353_v24  ;;  %v8993_v40 = vcombine.low %v4337_v34, %v4353_v24  ;;  %v4401_v42 = vld [vmem:[#allocation11 + $0x270] sm:$0xff] }
 0x94d   :  { %v4417_v9 = vld [vmem:[#allocation11 + $0x2f0] sm:$0xff] }
 0x94e   :  { %v8334_v57 = vrot.slane %v8320_v8, %v10706_v16  ;;  %8109 = vmatpush1.bf16.msra.mxu1 %v9183_v45  ;;  %v9025_v45 = vcombine.low %v4369_v36, %v4385_v38  ;;  %v9058_v55 = vcombine.high %v4401_v42, %v4417_v9  ;;  %v4449_v8 = vld [vmem:[#allocation11 + $0x3f0] sm:$0xff]  ;;  %v9057_v44 = vcombine.low %v4401_v42, %v4417_v9 }
 0x94f   :  { %8110 = vmatprep.subr.bf16.mxu1 %v9216_v43  ;;  %v4433_v43 = vld [vmem:[#allocation11 + $0x370] sm:$0xff] }
 0x950   :  { %v8335_v53 = vcombine.low %v8327_v50, %v8334_v57  ;;  %v9090_v47 = vcombine.high %v4433_v43, %v4449_v8  ;;  %v4465_v50 = vld [vmem:[#allocation11 + $0x470] sm:$0xff] }
 0x951   :  { %v4481_v57 = vld [vmem:[#allocation11 + $0x4f0] sm:$0xff] }
 0x952   :  { %8399 = vst [vmem:[#allocation14 + $0x20] sm:$0xff] %v8335_v53  ;;  %8111 = vmatpush1.bf16.msra.mxu1 %v9215_v13  ;;  %v9089_v13 = vcombine.low %v4433_v43, %v4449_v8  ;;  %v4497_v53 = vld [vmem:[#allocation11 + $0x570] sm:$0xff]  ;;  %v9121_v52 = vcombine.low %v4465_v50, %v4481_v57 }
 0x953   :  { %8112 = vmatprep.subr.bf16.mxu1 %v9248_v51  ;;  %v9122_v51 = vcombine.high %v4465_v50, %v4481_v57  ;;  %v4641_v27 = vld [vmem:[#allocation11 + $0x9f0] sm:$0xff] }
 0x954   :  { %v4673_v34 = vld [vmem:[#allocation11 + $0xaf0] sm:$0xff] }
 0x955   :  { %v4705_v36 = vld [vmem:[#allocation11 + $0xbf0] sm:$0xff] }
 0x956   :  { %8113 = vmatpush1.bf16.msra.mxu1 %v9247_v58  ;;  %v4529_v58 = vld [vmem:[#allocation11 + $0x670] sm:$0xff] }
 0x957   :  { %8114 = vmatprep.subr.bf16.mxu1 %v9280_v60  ;;  %v4545_v60 = vld [vmem:[#allocation11 + $0x6f0] sm:$0xff] }
 0x958   :  { %v4737_v42 = vld [vmem:[#allocation11 + $0xcf0] sm:$0xff] }
 0x959   :  { %v4769_v43 = vld [vmem:[#allocation11 + $0xdf0] sm:$0xff] }
 0x95a   :  { %8115 = vmatpush1.bf16.msra.mxu1 %v9279_v59  ;;  %v9153_v59 = vcombine.low %v4497_v53, %v4513_v61  ;;  %v4801_v50 = vld [vmem:[#allocation11 + $0xef0] sm:$0xff] }
 0x95b   :  { %8116 = vmatprep.subr.bf16.mxu1 %v9312_v63  ;;  %v9186_v63 = vcombine.high %v4529_v58, %v4545_v60 }
 0x95e   :  { %8117 = vmatpush1.bf16.msra.mxu1 %v9311_v1  ;;  %v4577_v1 = vld [vmem:[#allocation11 + $0x7f0] sm:$0xff] }
 0x95f   :  { %8118 = vmatprep.subr.bf16.mxu1 %v9344_v3  ;;  %v9218_v18 = vcombine.high %v4561_v14, %v4577_v1  ;;  %v9217_v22 = vcombine.low %v4561_v14, %v4577_v1 }
 0x962   :  { %8119 = vmatpush1.bf16.msra.mxu1 %v9343_v12 }
 0x963   :  { %8120 = vmatprep.subr.bf16.mxu1 %v9376_v15  ;;  %v9185_v15 = vcombine.low %v4529_v58, %v4545_v60  ;;  %v4934_v58 = vrot.slane %v11007_v26, %v10886_v28  ;;  %v4938_v60 = vrot.slane %v11007_v26, %v10891_v32  ;;  %v10375_v28 = vld [vmem:[#allocation13 + $0x18] sm:$0xff] }
 0x964   :  { %v4946_v32 = vrot.slane %v10375_v28, %v10861_v11 }
 0x966   :  { %8121 = vmatpush1.bf16.msra.mxu1 %v9375_v19 }
 0x967   :  { %8122 = vmatprep.subr.bf16.mxu1 %v9408_v20  ;;  %v4593_v20 = vld [vmem:[#allocation11 + $0x870] sm:$0xff] }
 0x968   :  { %v9249_v29 = vcombine.low %v4593_v20, %v4609_v21 }
 0x96a   :  { %8123 = vmatpush1.bf16.msra.mxu1 %v9407_v23  ;;  %v9250_v23 = vcombine.high %v4593_v20, %v4609_v21 }
 0x96b   :  { %8124 = vmatprep.subr.bf16.mxu1 %v9440_v25  ;;  %v4625_v25 = vld [vmem:[#allocation11 + $0x970] sm:$0xff] }
 0x96c   :  { %v9281_v24 = vcombine.low %v4625_v25, %v4641_v27 }
 0x96e   :  { %8125 = vmatpush1.bf16.msra.mxu1 %v9439_v31  ;;  %v9282_v31 = vcombine.high %v4625_v25, %v4641_v27  ;;  %v4950_v25 = vrot.slane %v10375_v28, %v10914_v62 }
 0x96f   :  { %8126 = vmatprep.subr.bf16.mxu1 %v9472_v33  ;;  %v4657_v33 = vld [vmem:[#allocation11 + $0xa70] sm:$0xff] }
 0x970   :  { %v9313_v38 = vcombine.low %v4657_v33, %v4673_v34 }
 0x972   :  { %8127 = vmatpush1.bf16.msra.mxu1 %v9471_v35  ;;  %v9314_v35 = vcombine.high %v4657_v33, %v4673_v34 }
 0x973   :  { %8137 = vmatprep.subr.bf16.mxu1 %v8994_v30  ;;  %v4689_v30 = vld [vmem:[#allocation11 + $0xb70] sm:$0xff] }
 0x974   :  { %v9345_v9 = vcombine.low %v4689_v30, %v4705_v36 }
 0x975   :  { %8129 = vmatmul.mubr.bf16.vlgmr.msra.gmra.mrb[56].mxu1 %v10872_v49 }
 0x976   :  { %8138 = vmatpush1.bf16.msra.mxu1 %v8993_v40  ;;  %8169 = vmatprep.mubr.bf16.mxu1 %v10870_v48  ;;  %v9154_v48 = vcombine.high %v4497_v53, %v4513_v61  ;;  %v9346_v40 = vcombine.high %v4689_v30, %v4705_v36  ;;  %v4833_v53 = vld [vmem:[#allocation11 + $0xff0] sm:$0xff]  ;;  %v4962_v30 = vrot.slane %v10375_v28, %v10934_v39 }
 0x977   :  { %8139 = vmatprep.subr.bf16.mxu1 %v9026_v41  ;;  %v4721_v41 = vld [vmem:[#allocation11 + $0xc70] sm:$0xff] }
 0x978   :  { %v9377_v8 = vcombine.low %v4721_v41, %v4737_v42 }
 0x97a   :  { %8140 = vmatpush1.bf16.msra.mxu1 %v9025_v45  ;;  %v9378_v45 = vcombine.high %v4721_v41, %v4737_v42 }
 0x97b   :  { %8141 = vmatprep.subr.bf16.mxu1 %v9058_v55  ;;  %v4753_v55 = vld [vmem:[#allocation11 + $0xd70] sm:$0xff] }
 0x97c   :  { %v9409_v57 = vcombine.low %v4753_v55, %v4769_v43 }
 0x97e   :  { %8142 = vmatpush1.bf16.msra.mxu1 %v9057_v44  ;;  %v9410_v44 = vcombine.high %v4753_v55, %v4769_v43 }
 0x97f   :  { %8143 = vmatprep.subr.bf16.mxu1 %v9090_v47  ;;  %v4785_v47 = vld [vmem:[#allocation11 + $0xe70] sm:$0xff] }
 0x980   :  { %v9441_v61 = vcombine.low %v4785_v47, %v4801_v50 }
 0x982   :  { %8144 = vmatpush1.bf16.msra.mxu1 %v9089_v13  ;;  %v9442_v13 = vcombine.high %v4785_v47, %v4801_v50 }
 0x983   :  { %8145 = vmatprep.subr.bf16.mxu1 %v9122_v51  ;;  %v4817_v51 = vld [vmem:[#allocation11 + $0xf70] sm:$0xff] }
 0x986   :  { %8146 = vmatpush1.bf16.msra.mxu1 %v9121_v52  ;;  %v9474_v52 = vcombine.high %v4817_v51, %v4833_v53 }
 0x987   :  { %8147 = vmatprep.subr.bf16.mxu1 %v9154_v48  ;;  %v9473_v48 = vcombine.low %v4817_v51, %v4833_v53 }
 0x988   :  { %v8007_v2 = vpop.f32.mrb[44].mxu1 }
 0x989   :  { %v11036_v3 = vadd.f32 %v8007_v2, %v4926_v4  ;;  %v8009_v5 = vpop.f32.mrb[45].mxu1 }
 0x98a   :  { %v11038_v7 = vadd.f32 %v8009_v5, %v4930_v54  ;;  %v8011_v12 = vpop.f32.mrb[46].mxu1  ;;  %8148 = vmatpush1.bf16.msra.mxu1 %v9153_v59 }
 0x98b   :  { %v8012_v17 = vpop.f32.mrb[47].mxu1  ;;  %8149 = vmatprep.subr.bf16.mxu1 %v9186_v63 }
 0x98c   :  { %v8336_v19 = vcombine.low %v11036_v3, %v11038_v7  ;;  %v4954_v3 = vrot.slane %v10375_v28, %v10917_v0 }
 0x98e   :  { %8150 = vmatpush1.bf16.msra.mxu1 %v9185_v15  ;;  %v8344_v5 = vrot.slane %v8336_v19, %v10706_v16  ;;  %v4942_v15 = vrot.slane %v10375_v28, %v10858_v6 }
 0x98f   :  { %8151 = vmatprep.subr.bf16.mxu1 %v9218_v18 }
 0x992   :  { %8152 = vmatpush1.bf16.msra.mxu1 %v9217_v22 }
 0x993   :  { %8153 = vmatprep.subr.bf16.mxu1 %v9250_v23 }
 0x996   :  { %8154 = vmatpush1.bf16.msra.mxu1 %v9249_v29 }
 0x997   :  { %8155 = vmatprep.subr.bf16.mxu1 %v9282_v31 }
 0x99a   :  { %8156 = vmatpush1.bf16.msra.mxu1 %v9281_v24 }
 0x99b   :  { %8157 = vmatprep.subr.bf16.mxu1 %v9314_v35  ;;  %v4958_v35 = vrot.slane %v10375_v28, %v10931_v37 }
 0x99e   :  { %8158 = vmatpush1.bf16.msra.mxu1 %v9313_v38 }
 0x99f   :  { %8159 = vmatprep.subr.bf16.mxu1 %v9346_v40 }
 0x9a2   :  { %8160 = vmatpush1.bf16.msra.mxu1 %v9345_v9  ;;  %v8385_v9 = vrot.slane %v8371_v56, %v10706_v16 }
 0x9a3   :  { %8161 = vmatprep.subr.bf16.mxu1 %v9378_v45 }
 0x9a6   :  { %8162 = vmatpush1.bf16.msra.mxu1 %v9377_v8 }
 0x9a7   :  { %8163 = vmatprep.subr.bf16.mxu1 %v9410_v44 }
 0x9aa   :  { %8164 = vmatpush1.bf16.msra.mxu1 %v9409_v57 }
 0x9ab   :  { %8165 = vmatprep.subr.bf16.mxu1 %v9442_v13 }
 0x9ae   :  { %8166 = vmatpush1.bf16.msra.mxu1 %v9441_v61 }
 0x9af   :  { %8167 = vmatprep.subr.bf16.mxu1 %v9474_v52 }
 0x9b2   :  { %8168 = vmatpush1.bf16.msra.mxu1 %v9473_v48 }
 0x9b5   :  { %8170 = vmatmul.mubr.bf16.vlgmr.msra.gmra.mrb[60].mxu1 %v10872_v49 }
 0x9c8   :  { %v8048_v4 = vpop.f32.mrb[48].mxu1 }
 0x9c9   :  { %v8049_v54 = vadd.f32 %v8048_v4, %v4934_v58  ;;  %v8050_v59 = vpop.f32.mrb[49].mxu1 }
 0x9ca   :  { %v8051_v63 = vadd.f32 %v8050_v59, %v4938_v60  ;;  %v8052_v2 = vpop.f32.mrb[50].mxu1 }
 0x9cb   :  { %v8053_v14 = vpop.f32.mrb[51].mxu1 }
 0x9cc   :  { %v8337_v1 = vcombine.low %v8049_v54, %v8051_v63 }
 0x9ce   :  { %v8351_v49 = vrot.slane %v8337_v1, %v10706_v16 }
 0x9d0   :  { %v8352_v12 = vcombine.low %v8344_v5, %v8351_v49 }
 0x9d2   :  { %8400 = vst [vmem:[#allocation14 + $0x28] sm:$0xff] %v8352_v12 }
 0xa08   :  { %v8089_v26 = vpop.f32.mrb[52].mxu1 }
 0xa09   :  { %v8090_v17 = vadd.f32 %v8089_v26, %v4942_v15  ;;  %v8091_v18 = vpop.f32.mrb[53].mxu1 }
 0xa0a   :  { %v8092_v20 = vadd.f32 %v8091_v18, %v4946_v32  ;;  %v8093_v21 = vpop.f32.mrb[54].mxu1 }
 0xa0b   :  { %v8094_v22 = vpop.f32.mrb[55].mxu1 }
 0xa0c   :  { %v8353_v23 = vcombine.low %v8090_v17, %v8092_v20 }
 0xa0e   :  { %v8361_v11 = vrot.slane %v8353_v23, %v10706_v16 }
 0xa48   :  { %v8130_v7 = vpop.f32.mrb[56].mxu1 }
 0xa49   :  { %v8131_v19 = vadd.f32 %v8130_v7, %v4950_v25  ;;  %v8132_v27 = vpop.f32.mrb[57].mxu1 }
 0xa4a   :  { %v8133_v29 = vadd.f32 %v8132_v27, %v4954_v3  ;;  %v8134_v31 = vpop.f32.mrb[58].mxu1 }
 0xa4b   :  { %v8135_v33 = vpop.f32.mrb[59].mxu1 }
 0xa4c   :  { %v8354_v6 = vcombine.low %v8131_v19, %v8133_v29 }
 0xa4e   :  { %v8368_v34 = vrot.slane %v8354_v6, %v10706_v16 }
 0xa50   :  { %v8369_v24 = vcombine.low %v8361_v11, %v8368_v34 }
 0xa52   :  { %8401 = vst [vmem:[#allocation14 + $0x30] sm:$0xff] %v8369_v24 }
 0xa88   :  { %v8171_v62 = vpop.f32.mrb[60].mxu1 }
 0xa89   :  { %v8172_v36 = vadd.f32 %v8171_v62, %v4958_v35  ;;  %v8173_v0 = vpop.f32.mrb[61].mxu1 }
 0xa8a   :  { %v8174_v38 = vadd.f32 %v8173_v0, %v4962_v30  ;;  %v8175_v40 = vpop.f32.mrb[62].mxu1 }
 0xa8b   :  { %v8176_v41 = vpop.f32.mrb[63].mxu1 }
 0xa8c   :  { %v8370_v42 = vcombine.low %v8172_v36, %v8174_v38 }
 0xa8e   :  { %v8378_v45 = vrot.slane %v8370_v42, %v10706_v16 }
 0xa90   :  { %v8386_v55 = vcombine.low %v8378_v45, %v8385_v9 }
 0xa92   :  { %8402 = vst [vmem:[#allocation14 + $0x38] sm:$0xff] %v8386_v55 }
 0xa93   :  { %10541 = shalt.err (!%p10538_p4)
}
 0xa94   :  { %s10542_s14 = scalar_lea.hbm %s11084_s7, 1024 }
 0xa95   :  { %p10543_p5 = scmp.ne.s32.totalorder %s11084_s7, %s10542_s14  ;;  %p10546_p6 = scmp.lt.u32.totalorder %s10542_s14, %s11084_s7 }
 0xa97   :  { %p10548_p7 = pnand %p10546_p6, %p10543_p5 }
 0xa99   :  { %10551 = shalt.err (!%p10548_p7)
}
 0xa9a   :  { %8412 = dma.vmem_to_hbm [thread:$0]  %s8410_s9, 1024, %s11084_s7, [#allocation4]  }
 0xa9b   :  { %10560 = dma.done.wait [#allocation4], 1024  }
 0xa9c   :  { %10561 = vsyncadd [#allocation4], 4294966272 }
 0xa9d   :  { %8416 = vsyncpa [#allocation3], 1 }
 0xa9e   :  { %8417 = vsyncpa [#allocation6], 1 }
 0xa9f   :  { %8418 = vsyncpa [#allocation9], 1 }
 0xaa0   :  { %8419 = vsyncpa [#allocation12], 1 }
 0xaa1   :  { %8420 = vsyncpa [#allocation4], 1 }

</bundles_post_ra>
